<compile_context>
chip_gen: v5e
topology: v5e:2x2
jax: 0.10.0
libtpu: 0.0.40
codegen_flags: <defaults>
</compile_context>

<pallas_src>
import functools

import numpy as np

import jax
import jax.numpy as jnp
from jax import lax
from jax.experimental import pallas as pl
from jax.experimental.pallas import tpu as pltpu


def _nca_fused_kernel(x_ref, wband_ref, w0_ref, b0_ref, gamma_ref, beta_ref,
                      pproj_ref, w1_ref, mask_ref,
                      o_ref,
                      xp_ref,
                      *, D, H, WB, C, K, pad, n_cells):
    """One grid step == one NCA update step.

    Layouts (lane order is (w, b, c), i.e. batch folded into the lane axis):
      x_ref    : (D, H, WB*C)        initial cell state
      xp_ref   : (D+2p, H+2p, WB*C)  persistent padded state (VMEM scratch)
      mask_ref : (1, D*H, WB*C)      this step's per-cell fire mask (channel-expanded)
      o_ref    : (D, H, WB*C)        final state (written on the last step)
    """
    step = pl.program_id(0)
    DH = D * H
    WBC = WB * C
    inv_n = 1.0 / float(n_cells)

    # ---- step 0: place the initial state in the interior of the padded scratch
    @pl.when(step == 0)
    def _():
        xp_ref[pad:pad + D, pad:pad + H, :] = x_ref[...]

    # ---- refresh reflect halos (H rows, then whole D planes).  The reflect
    # along W is folded into the banded conv matrices, so the lane axis needs
    # no halo and all lane accesses stay 128-wide and unmasked.
    for i in range(pad):
        xp_ref[pad:pad + D, i:i + 1, :] = \
            xp_ref[pad:pad + D, 2 * pad - i:2 * pad - i + 1, :]
        xp_ref[pad:pad + D, pad + H + i:pad + H + i + 1, :] = \
            xp_ref[pad:pad + D, pad + H - 2 - i:pad + H - 1 - i, :]
    for i in range(pad):
        xp_ref[i:i + 1, :, :] = xp_ref[2 * pad - i:2 * pad - i + 1, :, :]
        xp_ref[pad + D + i:pad + D + i + 1, :, :] = \
            xp_ref[pad + D - 2 - i:pad + D - 1 - i, :, :]

    # ---- current state (interior of the padded buffer) ----------------------
    x2 = xp_ref[pad:pad + D, pad:pad + H, :].reshape(DH, WBC)

    # ---- depthwise KxKxK conv as K*K banded MXU matmuls (fully unrolled) ----
    acc = jnp.zeros((DH, WBC), jnp.float32)
    for kd in range(K):
        for kh in range(K):
            patch = xp_ref[kd:kd + D, kh:kh + H, :].reshape(DH, WBC)
            acc = acc + jnp.dot(patch, wband_ref[kd * K + kh],
                                preferred_element_type=jnp.float32)

    # ---- perceive -> fc0 ([x | conv] fused) -> BN(batch stats) -> ReLU -> fc1
    z = jnp.dot(jnp.concatenate([x2, acc], axis=-1), w0_ref[...],
                preferred_element_type=jnp.float32) + b0_ref[...]   # (DH, WB*HID)

    # Global per-hidden-feature statistics over ALL B*D*H*W cells: pool the WB
    # lane groups with the block projector (MXU), then reduce over rows (XLU).
    mean_f = jnp.sum(jnp.dot(z, pproj_ref[...],
                             preferred_element_type=jnp.float32),
                     axis=0, keepdims=True) * inv_n                 # (1, WB*HID)
    diff = z - mean_f
    var_f = jnp.sum(jnp.dot(diff * diff, pproj_ref[...],
                            preferred_element_type=jnp.float32),
                    axis=0, keepdims=True) * inv_n                  # biased variance
    hid = jnp.maximum(diff * (gamma_ref[...] * lax.rsqrt(var_f + 1e-5))
                      + beta_ref[...], 0.0)
    dx = jnp.dot(hid, w1_ref[...], preferred_element_type=jnp.float32)  # (DH, WBC)

    # ---- stochastic per-cell fire mask + residual update ---------------------
    # ("keep the first input_channels unchanged" is folded into w1 -> dx == 0 there)
    new_x = x2 + dx * mask_ref[0]
    xp_ref[pad:pad + D, pad:pad + H, :] = new_x.reshape(D, H, WBC)

    @pl.when(step == pl.num_programs(0) - 1)
    def _():
        o_ref[...] = new_x.reshape(D, H, WBC)


def _const_spec(shape):
    nd = len(shape)
    return pl.BlockSpec(shape, lambda *_: (0,) * nd)


@functools.partial(jax.jit, static_argnames=("ksize",))
def nca_forward(x, packed, fire_mask, *, ksize):
    """x: (B, D, H, W, C) float32, channel-last (the module's input layout).

    fire_mask: (steps, D*H, W*B*C) float32 -- per-cell {0,1} fire mask for
    every step, already broadcast over channels, lane order (w, b, c).
    """
    (wband, w0, b0t, gamma_t, beta_t, pproj, w1bd) = packed
    B, D, H, W, C = x.shape
    WB = W * B
    WBC = WB * C
    K = ksize
    pad = (K - 1) // 2
    steps = fire_mask.shape[0]
    DH = D * H

    # lane-dense packing: (B, D, H, W, C) -> (D, H, (w, b, c))
    x_packed = jnp.transpose(x, (1, 2, 3, 0, 4)).reshape(D, H, WBC)

    kernel = functools.partial(
        _nca_fused_kernel, D=D, H=H, WB=WB, C=C, K=K, pad=pad,
        n_cells=B * D * H * W)

    grid_spec = pltpu.PrefetchScalarGridSpec(
        num_scalar_prefetch=0,
        grid=(steps,),
        in_specs=[
            _const_spec((D, H, WBC)),          # initial state
            _const_spec(wband.shape),          # banded depthwise conv (K*K, WBC, WBC)
            _const_spec(w0.shape),             # fused fc0             (2*WBC, WB*HID)
            _const_spec(b0t.shape),            # fc0 bias (+conv bias) (1, WB*HID)
            _const_spec(gamma_t.shape),        # BN gamma (tiled)      (1, WB*HID)
            _const_spec(beta_t.shape),         # BN beta  (tiled)      (1, WB*HID)
            _const_spec(pproj.shape),          # BN group projector    (WB*HID, WB*HID)
            _const_spec(w1bd.shape),           # fc1 (keep-gated)      (WB*HID, WBC)
            pl.BlockSpec((1, DH, WBC), lambda s: (s, 0, 0)),   # per-step fire mask
        ],
        out_specs=_const_spec((D, H, WBC)),
        scratch_shapes=[
            pltpu.VMEM((D + 2 * pad, H + 2 * pad, WBC), jnp.float32),  # padded state
        ],
    )

    out_packed = pl.pallas_call(
        kernel,
        out_shape=jax.ShapeDtypeStruct((D, H, WBC), jnp.float32),
        grid_spec=grid_spec,
        compiler_params=pltpu.CompilerParams(
            dimension_semantics=("arbitrary",),          # steps are sequential
            vmem_limit_bytes=32 * 1024 * 1024),
    )(x_packed, wband, w0, b0t, gamma_t, beta_t, pproj, w1bd, fire_mask)

    return jnp.transpose(out_packed.reshape(D, H, W, B, C), (3, 0, 1, 2, 4))


def init_params(key, channel_n, hidden_size, ksize):
    """Synthetic parameters with the PyTorch module's tensor shapes.

    conv_w is indexed [c, kD, kH, kW] (depthwise Conv3d weight, groups=channel_n).
    NOTE: the module zero-inits fc1 ('standard' init), which would make the
    forward an identity on non-input channels; small random values are used
    here so the demo kernel does real work.
    """
    k1, k2, k3, k4, k5 = jax.random.split(key, 5)
    conv_w = jax.random.normal(k1, (channel_n, ksize, ksize, ksize), jnp.float32) * 0.05
    conv_b = jax.random.normal(k2, (channel_n,), jnp.float32) * 0.05
    fc0_w = jax.random.normal(k3, (hidden_size, 2 * channel_n),
                              jnp.float32) / jnp.sqrt(2.0 * channel_n)
    fc0_b = jax.random.normal(k4, (hidden_size,), jnp.float32) * 0.05
    fc1_w = jax.random.normal(k5, (channel_n, hidden_size), jnp.float32) * 0.05
    gamma = jnp.ones((hidden_size,), jnp.float32)
    beta = jnp.zeros((hidden_size,), jnp.float32)
    return conv_w, conv_b, fc0_w, fc0_b, fc1_w, gamma, beta


def pack_params(raw, *, batch, width, input_channels):
    """Repack module parameters into the kernel's lane-dense (w, b, c) layout."""
    conv_w, conv_b, fc0_w, fc0_b, fc1_w, gamma, beta = [np.asarray(a) for a in raw]
    C, K = conv_w.shape[0], conv_w.shape[1]
    HID = fc0_w.shape[0]
    W, B = width, batch
    WB = W * B
    BC = B * C
    WBC = WB * C
    pad = (K - 1) // 2

    def refl(j):                       # PyTorch 'reflect' padding index
        if j < 0:
            return -j
        if j >= W:
            return 2 * (W - 1) - j
        return j

    # Banded depthwise-conv matrices: one (WBC, WBC) matrix per (kd, kh), with
    # the kw taps and the reflect boundary along W folded in.
    wband = np.zeros((K * K, WBC, WBC), np.float32)
    bc = np.arange(BC)
    for kd in range(K):
        for kh in range(K):
            m = np.zeros((WBC, WBC), np.float32)
            for kw in range(K):
                wvals = np.tile(conv_w[:, kd, kh, kw], B)   # weight per (b, c) lane
                for w_out in range(W):
                    w_in = refl(w_out + kw - pad)
                    m[w_in * BC + bc, w_out * BC + bc] += wvals
            wband[kd * K + kh] = m

    eye_wb = np.eye(WB, dtype=np.float32)
    # fc0 fused over [x | conv(x)] with block-diagonal per-cell weights.
    w0 = np.concatenate([np.kron(eye_wb, fc0_w[:, :C].T),
                         np.kron(eye_wb, fc0_w[:, C:].T)], axis=0)  # (2*WBC, WB*HID)
    # Fold the depthwise-conv bias into fc0's bias (exact).
    b0_eff = fc0_b + conv_b @ fc0_w[:, C:].T
    b0t = np.tile(b0_eff, WB).reshape(1, WB * HID)
    gamma_t = np.tile(gamma, WB).reshape(1, WB * HID)
    beta_t = np.tile(beta, WB).reshape(1, WB * HID)
    # Block projector that sums each hidden feature over the WB lane groups.
    pproj = np.tile(np.eye(HID, dtype=np.float32), (WB, WB))        # (WB*HID, WB*HID)
    # Fold the "keep the first input_channels unchanged" gate into fc1.
    keep = (np.arange(C) >= input_channels).astype(np.float32)[:, None]
    w1bd = np.kron(eye_wb, (fc1_w * keep).T)                        # (WB*HID, WBC)

    return tuple(jnp.asarray(a, jnp.float32)
                 for a in (wband, w0, b0t, gamma_t, beta_t, pproj, w1bd))


if __name__ == "__main__":
    B, D, H, W = 2, 8, 8, 8          # batch, spatial dims  (W*B*C = 128 lanes)
    CHANNEL_N = 8                    # channel_n
    HIDDEN = 32                      # hidden_size
    INPUT_CHANNELS = 1
    KSIZE = 7
    FIRE_RATE = 0.5
    STEPS = 2

    root = jax.random.PRNGKey(0)
    kp, kx, km = jax.random.split(root, 3)
    raw = init_params(kp, CHANNEL_N, HIDDEN, KSIZE)
    packed = pack_params(raw, batch=B, width=W, input_channels=INPUT_CHANNELS)
    x = jax.random.normal(kx, (B, D, H, W, CHANNEL_N), jnp.float32)

    # TODO(synk): per-cell fire mask drawn host-side with jax.random (the TPU
    # in-kernel PRNG has no CPU/interpret lowering); statistically equivalent
    # to torch.rand(...) > fire_rate, not bit-identical.
    u = jax.random.uniform(km, (STEPS, D, H, W, B), jnp.float32)
    cell_mask = (u > FIRE_RATE).astype(jnp.float32)
    fire_mask = jnp.broadcast_to(
        cell_mask[..., None], (STEPS, D, H, W, B, CHANNEL_N)
    ).reshape(STEPS, D * H, W * B * CHANNEL_N)

    out = nca_forward(x, packed, fire_mask, ksize=KSIZE)
    jax.block_until_ready(out)
    assert out.shape == x.shape and out.dtype == jnp.float32
    assert bool(jnp.isfinite(out).all())
    # The module keeps the first `input_channels` channels unchanged.
    assert bool(jnp.allclose(out[..., :INPUT_CHANNELS], x[..., :INPUT_CHANNELS]))
    print("KERNEL_OK")
</pallas_src>

<mosaic_0001>
module attributes {stable_mosaic.version = 11 : i64} {
  func.func @_nca_fused_kernel(%arg0: i32, %arg1: memref<8x8x128xf32, #tpu.memory_space<vmem>>, %arg2: memref<49x128x128xf32, #tpu.memory_space<vmem>>, %arg3: memref<256x512xf32, #tpu.memory_space<vmem>>, %arg4: memref<1x512xf32, #tpu.memory_space<vmem>>, %arg5: memref<1x512xf32, #tpu.memory_space<vmem>>, %arg6: memref<1x512xf32, #tpu.memory_space<vmem>>, %arg7: memref<512x512xf32, #tpu.memory_space<vmem>>, %arg8: memref<512x128xf32, #tpu.memory_space<vmem>>, %arg9: memref<1x64x128xf32, #tpu.memory_space<vmem>>, %arg10: memref<8x8x128xf32, #tpu.memory_space<vmem>>, %arg11: memref<14x14x128xf32, #tpu.memory_space<vmem>>) attributes {dimension_semantics = [#tpu.dimension_semantics<arbitrary>], iteration_bounds = array<i64: 2>, scalar_prefetch = 0 : i64, scratch_operands = 1 : i64, tpu.core_type = #tpu.core_type<tc>, window_params = [{pipeline_mode = #tpu.pipeline_mode<synchronous>, transform_indices = @transform_0, window_bounds = array<i64: 8, 8, 128>}, {pipeline_mode = #tpu.pipeline_mode<synchronous>, transform_indices = @transform_1, window_bounds = array<i64: 49, 128, 128>}, {pipeline_mode = #tpu.pipeline_mode<synchronous>, transform_indices = @transform_2, window_bounds = array<i64: 256, 512>}, {pipeline_mode = #tpu.pipeline_mode<synchronous>, transform_indices = @transform_3, window_bounds = array<i64: 1, 512>}, {pipeline_mode = #tpu.pipeline_mode<synchronous>, transform_indices = @transform_4, window_bounds = array<i64: 1, 512>}, {pipeline_mode = #tpu.pipeline_mode<synchronous>, transform_indices = @transform_5, window_bounds = array<i64: 1, 512>}, {pipeline_mode = #tpu.pipeline_mode<synchronous>, transform_indices = @transform_6, window_bounds = array<i64: 512, 512>}, {pipeline_mode = #tpu.pipeline_mode<synchronous>, transform_indices = @transform_7, window_bounds = array<i64: 512, 128>}, {transform_indices = @transform_8, window_bounds = array<i64: 1, 64, 128>}, {pipeline_mode = #tpu.pipeline_mode<synchronous>, transform_indices = @transform_9, window_bounds = array<i64: 8, 8, 128>}]} {
    %c0_i32 = arith.constant 0 : i32
    %0 = arith.cmpi eq, %arg0, %c0_i32 : i32
    %1 = arith.extui %0 : i1 to i32
    %c0_i32_0 = arith.constant 0 : i32
    %2 = arith.cmpi ne, %1, %c0_i32_0 : i32
    scf.if %2 {
      %c0_401 = arith.constant 0 : index
      %c0_402 = arith.constant 0 : index
      %c0_403 = arith.constant 0 : index
      %368 = vector.load %arg1[%c0_401, %c0_402, %c0_403] : memref<8x8x128xf32, #tpu.memory_space<vmem>>, vector<8x8x128xf32>
      %c3_404 = arith.constant 3 : index
      %c3_405 = arith.constant 3 : index
      %c0_406 = arith.constant 0 : index
      %369 = vector.load %arg11[%c3_404, %c3_405, %c0_406] : memref<14x14x128xf32, #tpu.memory_space<vmem>>, vector<8x8x128xf32>
      tpu.vector_store %arg11[%c3_404, %c3_405, %c0_406], %368 {strides = array<i32>} : memref<14x14x128xf32, #tpu.memory_space<vmem>>, vector<8x8x128xf32>,
    } else {
    }
    %c3 = arith.constant 3 : index
    %c6 = arith.constant 6 : index
    %c0 = arith.constant 0 : index
    %3 = vector.load %arg11[%c3, %c6, %c0] : memref<14x14x128xf32, #tpu.memory_space<vmem>>, vector<8x1x128xf32>
    %c3_1 = arith.constant 3 : index
    %c0_2 = arith.constant 0 : index
    %c0_3 = arith.constant 0 : index
    %4 = vector.load %arg11[%c3_1, %c0_2, %c0_3] : memref<14x14x128xf32, #tpu.memory_space<vmem>>, vector<8x1x128xf32>
    tpu.vector_store %arg11[%c3_1, %c0_2, %c0_3], %3 {strides = array<i32>} : memref<14x14x128xf32, #tpu.memory_space<vmem>>, vector<8x1x128xf32>,
    %c3_4 = arith.constant 3 : index
    %c9 = arith.constant 9 : index
    %c0_5 = arith.constant 0 : index
    %5 = vector.load %arg11[%c3_4, %c9, %c0_5] : memref<14x14x128xf32, #tpu.memory_space<vmem>>, vector<8x1x128xf32>
    %c3_6 = arith.constant 3 : index
    %c11 = arith.constant 11 : index
    %c0_7 = arith.constant 0 : index
    %6 = vector.load %arg11[%c3_6, %c11, %c0_7] : memref<14x14x128xf32, #tpu.memory_space<vmem>>, vector<8x1x128xf32>
    tpu.vector_store %arg11[%c3_6, %c11, %c0_7], %5 {strides = array<i32>} : memref<14x14x128xf32, #tpu.memory_space<vmem>>, vector<8x1x128xf32>,
    %c3_8 = arith.constant 3 : index
    %c5 = arith.constant 5 : index
    %c0_9 = arith.constant 0 : index
    %7 = vector.load %arg11[%c3_8, %c5, %c0_9] : memref<14x14x128xf32, #tpu.memory_space<vmem>>, vector<8x1x128xf32>
    %c3_10 = arith.constant 3 : index
    %c1 = arith.constant 1 : index
    %c0_11 = arith.constant 0 : index
    %8 = vector.load %arg11[%c3_10, %c1, %c0_11] : memref<14x14x128xf32, #tpu.memory_space<vmem>>, vector<8x1x128xf32>
    tpu.vector_store %arg11[%c3_10, %c1, %c0_11], %7 {strides = array<i32>} : memref<14x14x128xf32, #tpu.memory_space<vmem>>, vector<8x1x128xf32>,
    %c3_12 = arith.constant 3 : index
    %c8 = arith.constant 8 : index
    %c0_13 = arith.constant 0 : index
    %9 = vector.load %arg11[%c3_12, %c8, %c0_13] : memref<14x14x128xf32, #tpu.memory_space<vmem>>, vector<8x1x128xf32>
    %c3_14 = arith.constant 3 : index
    %c12 = arith.constant 12 : index
    %c0_15 = arith.constant 0 : index
    %10 = vector.load %arg11[%c3_14, %c12, %c0_15] : memref<14x14x128xf32, #tpu.memory_space<vmem>>, vector<8x1x128xf32>
    tpu.vector_store %arg11[%c3_14, %c12, %c0_15], %9 {strides = array<i32>} : memref<14x14x128xf32, #tpu.memory_space<vmem>>, vector<8x1x128xf32>,
    %c3_16 = arith.constant 3 : index
    %c4 = arith.constant 4 : index
    %c0_17 = arith.constant 0 : index
    %11 = vector.load %arg11[%c3_16, %c4, %c0_17] : memref<14x14x128xf32, #tpu.memory_space<vmem>>, vector<8x1x128xf32>
    %c3_18 = arith.constant 3 : index
    %c2 = arith.constant 2 : index
    %c0_19 = arith.constant 0 : index
    %12 = vector.load %arg11[%c3_18, %c2, %c0_19] : memref<14x14x128xf32, #tpu.memory_space<vmem>>, vector<8x1x128xf32>
    tpu.vector_store %arg11[%c3_18, %c2, %c0_19], %11 {strides = array<i32>} : memref<14x14x128xf32, #tpu.memory_space<vmem>>, vector<8x1x128xf32>,
    %c3_20 = arith.constant 3 : index
    %c7 = arith.constant 7 : index
    %c0_21 = arith.constant 0 : index
    %13 = vector.load %arg11[%c3_20, %c7, %c0_21] : memref<14x14x128xf32, #tpu.memory_space<vmem>>, vector<8x1x128xf32>
    %c3_22 = arith.constant 3 : index
    %c13 = arith.constant 13 : index
    %c0_23 = arith.constant 0 : index
    %14 = vector.load %arg11[%c3_22, %c13, %c0_23] : memref<14x14x128xf32, #tpu.memory_space<vmem>>, vector<8x1x128xf32>
    tpu.vector_store %arg11[%c3_22, %c13, %c0_23], %13 {strides = array<i32>} : memref<14x14x128xf32, #tpu.memory_space<vmem>>, vector<8x1x128xf32>,
    %c6_24 = arith.constant 6 : index
    %c0_25 = arith.constant 0 : index
    %c0_26 = arith.constant 0 : index
    %15 = vector.load %arg11[%c6_24, %c0_25, %c0_26] : memref<14x14x128xf32, #tpu.memory_space<vmem>>, vector<1x14x128xf32>
    %c0_27 = arith.constant 0 : index
    %c0_28 = arith.constant 0 : index
    %c0_29 = arith.constant 0 : index
    %16 = vector.load %arg11[%c0_27, %c0_28, %c0_29] : memref<14x14x128xf32, #tpu.memory_space<vmem>>, vector<1x14x128xf32>
    tpu.vector_store %arg11[%c0_27, %c0_28, %c0_29], %15 {strides = array<i32>} : memref<14x14x128xf32, #tpu.memory_space<vmem>>, vector<1x14x128xf32>,
    %c9_30 = arith.constant 9 : index
    %c0_31 = arith.constant 0 : index
    %c0_32 = arith.constant 0 : index
    %17 = vector.load %arg11[%c9_30, %c0_31, %c0_32] : memref<14x14x128xf32, #tpu.memory_space<vmem>>, vector<1x14x128xf32>
    %c11_33 = arith.constant 11 : index
    %c0_34 = arith.constant 0 : index
    %c0_35 = arith.constant 0 : index
    %18 = vector.load %arg11[%c11_33, %c0_34, %c0_35] : memref<14x14x128xf32, #tpu.memory_space<vmem>>, vector<1x14x128xf32>
    tpu.vector_store %arg11[%c11_33, %c0_34, %c0_35], %17 {strides = array<i32>} : memref<14x14x128xf32, #tpu.memory_space<vmem>>, vector<1x14x128xf32>,
    %c5_36 = arith.constant 5 : index
    %c0_37 = arith.constant 0 : index
    %c0_38 = arith.constant 0 : index
    %19 = vector.load %arg11[%c5_36, %c0_37, %c0_38] : memref<14x14x128xf32, #tpu.memory_space<vmem>>, vector<1x14x128xf32>
    %c1_39 = arith.constant 1 : index
    %c0_40 = arith.constant 0 : index
    %c0_41 = arith.constant 0 : index
    %20 = vector.load %arg11[%c1_39, %c0_40, %c0_41] : memref<14x14x128xf32, #tpu.memory_space<vmem>>, vector<1x14x128xf32>
    tpu.vector_store %arg11[%c1_39, %c0_40, %c0_41], %19 {strides = array<i32>} : memref<14x14x128xf32, #tpu.memory_space<vmem>>, vector<1x14x128xf32>,
    %c8_42 = arith.constant 8 : index
    %c0_43 = arith.constant 0 : index
    %c0_44 = arith.constant 0 : index
    %21 = vector.load %arg11[%c8_42, %c0_43, %c0_44] : memref<14x14x128xf32, #tpu.memory_space<vmem>>, vector<1x14x128xf32>
    %c12_45 = arith.constant 12 : index
    %c0_46 = arith.constant 0 : index
    %c0_47 = arith.constant 0 : index
    %22 = vector.load %arg11[%c12_45, %c0_46, %c0_47] : memref<14x14x128xf32, #tpu.memory_space<vmem>>, vector<1x14x128xf32>
    tpu.vector_store %arg11[%c12_45, %c0_46, %c0_47], %21 {strides = array<i32>} : memref<14x14x128xf32, #tpu.memory_space<vmem>>, vector<1x14x128xf32>,
    %c4_48 = arith.constant 4 : index
    %c0_49 = arith.constant 0 : index
    %c0_50 = arith.constant 0 : index
    %23 = vector.load %arg11[%c4_48, %c0_49, %c0_50] : memref<14x14x128xf32, #tpu.memory_space<vmem>>, vector<1x14x128xf32>
    %c2_51 = arith.constant 2 : index
    %c0_52 = arith.constant 0 : index
    %c0_53 = arith.constant 0 : index
    %24 = vector.load %arg11[%c2_51, %c0_52, %c0_53] : memref<14x14x128xf32, #tpu.memory_space<vmem>>, vector<1x14x128xf32>
    tpu.vector_store %arg11[%c2_51, %c0_52, %c0_53], %23 {strides = array<i32>} : memref<14x14x128xf32, #tpu.memory_space<vmem>>, vector<1x14x128xf32>,
    %c7_54 = arith.constant 7 : index
    %c0_55 = arith.constant 0 : index
    %c0_56 = arith.constant 0 : index
    %25 = vector.load %arg11[%c7_54, %c0_55, %c0_56] : memref<14x14x128xf32, #tpu.memory_space<vmem>>, vector<1x14x128xf32>
    %c13_57 = arith.constant 13 : index
    %c0_58 = arith.constant 0 : index
    %c0_59 = arith.constant 0 : index
    %26 = vector.load %arg11[%c13_57, %c0_58, %c0_59] : memref<14x14x128xf32, #tpu.memory_space<vmem>>, vector<1x14x128xf32>
    tpu.vector_store %arg11[%c13_57, %c0_58, %c0_59], %25 {strides = array<i32>} : memref<14x14x128xf32, #tpu.memory_space<vmem>>, vector<1x14x128xf32>,
    %c3_60 = arith.constant 3 : index
    %c3_61 = arith.constant 3 : index
    %c0_62 = arith.constant 0 : index
    %27 = vector.load %arg11[%c3_60, %c3_61, %c0_62] : memref<14x14x128xf32, #tpu.memory_space<vmem>>, vector<8x8x128xf32>
    %28 = vector.shape_cast %27 : vector<8x8x128xf32> to vector<64x128xf32>
    %cst = arith.constant 0.000000e+00 : f32
    %29 = vector.broadcast %cst : f32 to vector<64x128xf32>
    %c0_63 = arith.constant 0 : index
    %c0_64 = arith.constant 0 : index
    %c0_65 = arith.constant 0 : index
    %30 = vector.load %arg11[%c0_63, %c0_64, %c0_65] : memref<14x14x128xf32, #tpu.memory_space<vmem>>, vector<8x8x128xf32>
    %31 = vector.shape_cast %30 : vector<8x8x128xf32> to vector<64x128xf32>
    %c0_66 = arith.constant 0 : index
    %c0_67 = arith.constant 0 : index
    %c0_68 = arith.constant 0 : index
    %32 = vector.load %arg2[%c0_66, %c0_67, %c0_68] : memref<49x128x128xf32, #tpu.memory_space<vmem>>, vector<1x128x128xf32>
    %33 = vector.shape_cast %32 : vector<1x128x128xf32> to vector<128x128xf32>
    %cst_69 = arith.constant dense<0.000000e+00> : vector<64x128xf32>
    %34 = tpu.matmul %31, %33, %cst_69 {dimension_numbers = #tpu.dot_dimension_numbers<[1], [0], [0], [1], [0, 0, 1, 1], [], []>} : vector<64x128xf32>, vector<128x128xf32>, vector<64x128xf32> -> vector<64x128xf32>
    %35 = arith.addf %29, %34 : vector<64x128xf32>
    %c0_70 = arith.constant 0 : index
    %c1_71 = arith.constant 1 : index
    %c0_72 = arith.constant 0 : index
    %36 = vector.load %arg11[%c0_70, %c1_71, %c0_72] : memref<14x14x128xf32, #tpu.memory_space<vmem>>, vector<8x8x128xf32>
    %37 = vector.shape_cast %36 : vector<8x8x128xf32> to vector<64x128xf32>
    %c1_73 = arith.constant 1 : index
    %c0_74 = arith.constant 0 : index
    %c0_75 = arith.constant 0 : index
    %38 = vector.load %arg2[%c1_73, %c0_74, %c0_75] : memref<49x128x128xf32, #tpu.memory_space<vmem>>, vector<1x128x128xf32>
    %39 = vector.shape_cast %38 : vector<1x128x128xf32> to vector<128x128xf32>
    %cst_76 = arith.constant dense<0.000000e+00> : vector<64x128xf32>
    %40 = tpu.matmul %37, %39, %cst_76 {dimension_numbers = #tpu.dot_dimension_numbers<[1], [0], [0], [1], [0, 0, 1, 1], [], []>} : vector<64x128xf32>, vector<128x128xf32>, vector<64x128xf32> -> vector<64x128xf32>
    %41 = arith.addf %35, %40 : vector<64x128xf32>
    %c0_77 = arith.constant 0 : index
    %c2_78 = arith.constant 2 : index
    %c0_79 = arith.constant 0 : index
    %42 = vector.load %arg11[%c0_77, %c2_78, %c0_79] : memref<14x14x128xf32, #tpu.memory_space<vmem>>, vector<8x8x128xf32>
    %43 = vector.shape_cast %42 : vector<8x8x128xf32> to vector<64x128xf32>
    %c2_80 = arith.constant 2 : index
    %c0_81 = arith.constant 0 : index
    %c0_82 = arith.constant 0 : index
    %44 = vector.load %arg2[%c2_80, %c0_81, %c0_82] : memref<49x128x128xf32, #tpu.memory_space<vmem>>, vector<1x128x128xf32>
    %45 = vector.shape_cast %44 : vector<1x128x128xf32> to vector<128x128xf32>
    %cst_83 = arith.constant dense<0.000000e+00> : vector<64x128xf32>
    %46 = tpu.matmul %43, %45, %cst_83 {dimension_numbers = #tpu.dot_dimension_numbers<[1], [0], [0], [1], [0, 0, 1, 1], [], []>} : vector<64x128xf32>, vector<128x128xf32>, vector<64x128xf32> -> vector<64x128xf32>
    %47 = arith.addf %41, %46 : vector<64x128xf32>
    %c0_84 = arith.constant 0 : index
    %c3_85 = arith.constant 3 : index
    %c0_86 = arith.constant 0 : index
    %48 = vector.load %arg11[%c0_84, %c3_85, %c0_86] : memref<14x14x128xf32, #tpu.memory_space<vmem>>, vector<8x8x128xf32>
    %49 = vector.shape_cast %48 : vector<8x8x128xf32> to vector<64x128xf32>
    %c3_87 = arith.constant 3 : index
    %c0_88 = arith.constant 0 : index
    %c0_89 = arith.constant 0 : index
    %50 = vector.load %arg2[%c3_87, %c0_88, %c0_89] : memref<49x128x128xf32, #tpu.memory_space<vmem>>, vector<1x128x128xf32>
    %51 = vector.shape_cast %50 : vector<1x128x128xf32> to vector<128x128xf32>
    %cst_90 = arith.constant dense<0.000000e+00> : vector<64x128xf32>
    %52 = tpu.matmul %49, %51, %cst_90 {dimension_numbers = #tpu.dot_dimension_numbers<[1], [0], [0], [1], [0, 0, 1, 1], [], []>} : vector<64x128xf32>, vector<128x128xf32>, vector<64x128xf32> -> vector<64x128xf32>
    %53 = arith.addf %47, %52 : vector<64x128xf32>
    %c0_91 = arith.constant 0 : index
    %c4_92 = arith.constant 4 : index
    %c0_93 = arith.constant 0 : index
    %54 = vector.load %arg11[%c0_91, %c4_92, %c0_93] : memref<14x14x128xf32, #tpu.memory_space<vmem>>, vector<8x8x128xf32>
    %55 = vector.shape_cast %54 : vector<8x8x128xf32> to vector<64x128xf32>
    %c4_94 = arith.constant 4 : index
    %c0_95 = arith.constant 0 : index
    %c0_96 = arith.constant 0 : index
    %56 = vector.load %arg2[%c4_94, %c0_95, %c0_96] : memref<49x128x128xf32, #tpu.memory_space<vmem>>, vector<1x128x128xf32>
    %57 = vector.shape_cast %56 : vector<1x128x128xf32> to vector<128x128xf32>
    %cst_97 = arith.constant dense<0.000000e+00> : vector<64x128xf32>
    %58 = tpu.matmul %55, %57, %cst_97 {dimension_numbers = #tpu.dot_dimension_numbers<[1], [0], [0], [1], [0, 0, 1, 1], [], []>} : vector<64x128xf32>, vector<128x128xf32>, vector<64x128xf32> -> vector<64x128xf32>
    %59 = arith.addf %53, %58 : vector<64x128xf32>
    %c0_98 = arith.constant 0 : index
    %c5_99 = arith.constant 5 : index
    %c0_100 = arith.constant 0 : index
    %60 = vector.load %arg11[%c0_98, %c5_99, %c0_100] : memref<14x14x128xf32, #tpu.memory_space<vmem>>, vector<8x8x128xf32>
    %61 = vector.shape_cast %60 : vector<8x8x128xf32> to vector<64x128xf32>
    %c5_101 = arith.constant 5 : index
    %c0_102 = arith.constant 0 : index
    %c0_103 = arith.constant 0 : index
    %62 = vector.load %arg2[%c5_101, %c0_102, %c0_103] : memref<49x128x128xf32, #tpu.memory_space<vmem>>, vector<1x128x128xf32>
    %63 = vector.shape_cast %62 : vector<1x128x128xf32> to vector<128x128xf32>
    %cst_104 = arith.constant dense<0.000000e+00> : vector<64x128xf32>
    %64 = tpu.matmul %61, %63, %cst_104 {dimension_numbers = #tpu.dot_dimension_numbers<[1], [0], [0], [1], [0, 0, 1, 1], [], []>} : vector<64x128xf32>, vector<128x128xf32>, vector<64x128xf32> -> vector<64x128xf32>
    %65 = arith.addf %59, %64 : vector<64x128xf32>
    %c0_105 = arith.constant 0 : index
    %c6_106 = arith.constant 6 : index
    %c0_107 = arith.constant 0 : index
    %66 = vector.load %arg11[%c0_105, %c6_106, %c0_107] : memref<14x14x128xf32, #tpu.memory_space<vmem>>, vector<8x8x128xf32>
    %67 = vector.shape_cast %66 : vector<8x8x128xf32> to vector<64x128xf32>
    %c6_108 = arith.constant 6 : index
    %c0_109 = arith.constant 0 : index
    %c0_110 = arith.constant 0 : index
    %68 = vector.load %arg2[%c6_108, %c0_109, %c0_110] : memref<49x128x128xf32, #tpu.memory_space<vmem>>, vector<1x128x128xf32>
    %69 = vector.shape_cast %68 : vector<1x128x128xf32> to vector<128x128xf32>
    %cst_111 = arith.constant dense<0.000000e+00> : vector<64x128xf32>
    %70 = tpu.matmul %67, %69, %cst_111 {dimension_numbers = #tpu.dot_dimension_numbers<[1], [0], [0], [1], [0, 0, 1, 1], [], []>} : vector<64x128xf32>, vector<128x128xf32>, vector<64x128xf32> -> vector<64x128xf32>
    %71 = arith.addf %65, %70 : vector<64x128xf32>
    %c1_112 = arith.constant 1 : index
    %c0_113 = arith.constant 0 : index
    %c0_114 = arith.constant 0 : index
    %72 = vector.load %arg11[%c1_112, %c0_113, %c0_114] : memref<14x14x128xf32, #tpu.memory_space<vmem>>, vector<8x8x128xf32>
    %73 = vector.shape_cast %72 : vector<8x8x128xf32> to vector<64x128xf32>
    %c7_115 = arith.constant 7 : index
    %c0_116 = arith.constant 0 : index
    %c0_117 = arith.constant 0 : index
    %74 = vector.load %arg2[%c7_115, %c0_116, %c0_117] : memref<49x128x128xf32, #tpu.memory_space<vmem>>, vector<1x128x128xf32>
    %75 = vector.shape_cast %74 : vector<1x128x128xf32> to vector<128x128xf32>
    %cst_118 = arith.constant dense<0.000000e+00> : vector<64x128xf32>
    %76 = tpu.matmul %73, %75, %cst_118 {dimension_numbers = #tpu.dot_dimension_numbers<[1], [0], [0], [1], [0, 0, 1, 1], [], []>} : vector<64x128xf32>, vector<128x128xf32>, vector<64x128xf32> -> vector<64x128xf32>
    %77 = arith.addf %71, %76 : vector<64x128xf32>
    %c1_119 = arith.constant 1 : index
    %c1_120 = arith.constant 1 : index
    %c0_121 = arith.constant 0 : index
    %78 = vector.load %arg11[%c1_119, %c1_120, %c0_121] : memref<14x14x128xf32, #tpu.memory_space<vmem>>, vector<8x8x128xf32>
    %79 = vector.shape_cast %78 : vector<8x8x128xf32> to vector<64x128xf32>
    %c8_122 = arith.constant 8 : index
    %c0_123 = arith.constant 0 : index
    %c0_124 = arith.constant 0 : index
    %80 = vector.load %arg2[%c8_122, %c0_123, %c0_124] : memref<49x128x128xf32, #tpu.memory_space<vmem>>, vector<1x128x128xf32>
    %81 = vector.shape_cast %80 : vector<1x128x128xf32> to vector<128x128xf32>
    %cst_125 = arith.constant dense<0.000000e+00> : vector<64x128xf32>
    %82 = tpu.matmul %79, %81, %cst_125 {dimension_numbers = #tpu.dot_dimension_numbers<[1], [0], [0], [1], [0, 0, 1, 1], [], []>} : vector<64x128xf32>, vector<128x128xf32>, vector<64x128xf32> -> vector<64x128xf32>
    %83 = arith.addf %77, %82 : vector<64x128xf32>
    %c1_126 = arith.constant 1 : index
    %c2_127 = arith.constant 2 : index
    %c0_128 = arith.constant 0 : index
    %84 = vector.load %arg11[%c1_126, %c2_127, %c0_128] : memref<14x14x128xf32, #tpu.memory_space<vmem>>, vector<8x8x128xf32>
    %85 = vector.shape_cast %84 : vector<8x8x128xf32> to vector<64x128xf32>
    %c9_129 = arith.constant 9 : index
    %c0_130 = arith.constant 0 : index
    %c0_131 = arith.constant 0 : index
    %86 = vector.load %arg2[%c9_129, %c0_130, %c0_131] : memref<49x128x128xf32, #tpu.memory_space<vmem>>, vector<1x128x128xf32>
    %87 = vector.shape_cast %86 : vector<1x128x128xf32> to vector<128x128xf32>
    %cst_132 = arith.constant dense<0.000000e+00> : vector<64x128xf32>
    %88 = tpu.matmul %85, %87, %cst_132 {dimension_numbers = #tpu.dot_dimension_numbers<[1], [0], [0], [1], [0, 0, 1, 1], [], []>} : vector<64x128xf32>, vector<128x128xf32>, vector<64x128xf32> -> vector<64x128xf32>
    %89 = arith.addf %83, %88 : vector<64x128xf32>
    %c1_133 = arith.constant 1 : index
    %c3_134 = arith.constant 3 : index
    %c0_135 = arith.constant 0 : index
    %90 = vector.load %arg11[%c1_133, %c3_134, %c0_135] : memref<14x14x128xf32, #tpu.memory_space<vmem>>, vector<8x8x128xf32>
    %91 = vector.shape_cast %90 : vector<8x8x128xf32> to vector<64x128xf32>
    %c10 = arith.constant 10 : index
    %c0_136 = arith.constant 0 : index
    %c0_137 = arith.constant 0 : index
    %92 = vector.load %arg2[%c10, %c0_136, %c0_137] : memref<49x128x128xf32, #tpu.memory_space<vmem>>, vector<1x128x128xf32>
    %93 = vector.shape_cast %92 : vector<1x128x128xf32> to vector<128x128xf32>
    %cst_138 = arith.constant dense<0.000000e+00> : vector<64x128xf32>
    %94 = tpu.matmul %91, %93, %cst_138 {dimension_numbers = #tpu.dot_dimension_numbers<[1], [0], [0], [1], [0, 0, 1, 1], [], []>} : vector<64x128xf32>, vector<128x128xf32>, vector<64x128xf32> -> vector<64x128xf32>
    %95 = arith.addf %89, %94 : vector<64x128xf32>
    %c1_139 = arith.constant 1 : index
    %c4_140 = arith.constant 4 : index
    %c0_141 = arith.constant 0 : index
    %96 = vector.load %arg11[%c1_139, %c4_140, %c0_141] : memref<14x14x128xf32, #tpu.memory_space<vmem>>, vector<8x8x128xf32>
    %97 = vector.shape_cast %96 : vector<8x8x128xf32> to vector<64x128xf32>
    %c11_142 = arith.constant 11 : index
    %c0_143 = arith.constant 0 : index
    %c0_144 = arith.constant 0 : index
    %98 = vector.load %arg2[%c11_142, %c0_143, %c0_144] : memref<49x128x128xf32, #tpu.memory_space<vmem>>, vector<1x128x128xf32>
    %99 = vector.shape_cast %98 : vector<1x128x128xf32> to vector<128x128xf32>
    %cst_145 = arith.constant dense<0.000000e+00> : vector<64x128xf32>
    %100 = tpu.matmul %97, %99, %cst_145 {dimension_numbers = #tpu.dot_dimension_numbers<[1], [0], [0], [1], [0, 0, 1, 1], [], []>} : vector<64x128xf32>, vector<128x128xf32>, vector<64x128xf32> -> vector<64x128xf32>
    %101 = arith.addf %95, %100 : vector<64x128xf32>
    %c1_146 = arith.constant 1 : index
    %c5_147 = arith.constant 5 : index
    %c0_148 = arith.constant 0 : index
    %102 = vector.load %arg11[%c1_146, %c5_147, %c0_148] : memref<14x14x128xf32, #tpu.memory_space<vmem>>, vector<8x8x128xf32>
    %103 = vector.shape_cast %102 : vector<8x8x128xf32> to vector<64x128xf32>
    %c12_149 = arith.constant 12 : index
    %c0_150 = arith.constant 0 : index
    %c0_151 = arith.constant 0 : index
    %104 = vector.load %arg2[%c12_149, %c0_150, %c0_151] : memref<49x128x128xf32, #tpu.memory_space<vmem>>, vector<1x128x128xf32>
    %105 = vector.shape_cast %104 : vector<1x128x128xf32> to vector<128x128xf32>
    %cst_152 = arith.constant dense<0.000000e+00> : vector<64x128xf32>
    %106 = tpu.matmul %103, %105, %cst_152 {dimension_numbers = #tpu.dot_dimension_numbers<[1], [0], [0], [1], [0, 0, 1, 1], [], []>} : vector<64x128xf32>, vector<128x128xf32>, vector<64x128xf32> -> vector<64x128xf32>
    %107 = arith.addf %101, %106 : vector<64x128xf32>
    %c1_153 = arith.constant 1 : index
    %c6_154 = arith.constant 6 : index
    %c0_155 = arith.constant 0 : index
    %108 = vector.load %arg11[%c1_153, %c6_154, %c0_155] : memref<14x14x128xf32, #tpu.memory_space<vmem>>, vector<8x8x128xf32>
    %109 = vector.shape_cast %108 : vector<8x8x128xf32> to vector<64x128xf32>
    %c13_156 = arith.constant 13 : index
    %c0_157 = arith.constant 0 : index
    %c0_158 = arith.constant 0 : index
    %110 = vector.load %arg2[%c13_156, %c0_157, %c0_158] : memref<49x128x128xf32, #tpu.memory_space<vmem>>, vector<1x128x128xf32>
    %111 = vector.shape_cast %110 : vector<1x128x128xf32> to vector<128x128xf32>
    %cst_159 = arith.constant dense<0.000000e+00> : vector<64x128xf32>
    %112 = tpu.matmul %109, %111, %cst_159 {dimension_numbers = #tpu.dot_dimension_numbers<[1], [0], [0], [1], [0, 0, 1, 1], [], []>} : vector<64x128xf32>, vector<128x128xf32>, vector<64x128xf32> -> vector<64x128xf32>
    %113 = arith.addf %107, %112 : vector<64x128xf32>
    %c2_160 = arith.constant 2 : index
    %c0_161 = arith.constant 0 : index
    %c0_162 = arith.constant 0 : index
    %114 = vector.load %arg11[%c2_160, %c0_161, %c0_162] : memref<14x14x128xf32, #tpu.memory_space<vmem>>, vector<8x8x128xf32>
    %115 = vector.shape_cast %114 : vector<8x8x128xf32> to vector<64x128xf32>
    %c14 = arith.constant 14 : index
    %c0_163 = arith.constant 0 : index
    %c0_164 = arith.constant 0 : index
    %116 = vector.load %arg2[%c14, %c0_163, %c0_164] : memref<49x128x128xf32, #tpu.memory_space<vmem>>, vector<1x128x128xf32>
    %117 = vector.shape_cast %116 : vector<1x128x128xf32> to vector<128x128xf32>
    %cst_165 = arith.constant dense<0.000000e+00> : vector<64x128xf32>
    %118 = tpu.matmul %115, %117, %cst_165 {dimension_numbers = #tpu.dot_dimension_numbers<[1], [0], [0], [1], [0, 0, 1, 1], [], []>} : vector<64x128xf32>, vector<128x128xf32>, vector<64x128xf32> -> vector<64x128xf32>
    %119 = arith.addf %113, %118 : vector<64x128xf32>
    %c2_166 = arith.constant 2 : index
    %c1_167 = arith.constant 1 : index
    %c0_168 = arith.constant 0 : index
    %120 = vector.load %arg11[%c2_166, %c1_167, %c0_168] : memref<14x14x128xf32, #tpu.memory_space<vmem>>, vector<8x8x128xf32>
    %121 = vector.shape_cast %120 : vector<8x8x128xf32> to vector<64x128xf32>
    %c15 = arith.constant 15 : index
    %c0_169 = arith.constant 0 : index
    %c0_170 = arith.constant 0 : index
    %122 = vector.load %arg2[%c15, %c0_169, %c0_170] : memref<49x128x128xf32, #tpu.memory_space<vmem>>, vector<1x128x128xf32>
    %123 = vector.shape_cast %122 : vector<1x128x128xf32> to vector<128x128xf32>
    %cst_171 = arith.constant dense<0.000000e+00> : vector<64x128xf32>
    %124 = tpu.matmul %121, %123, %cst_171 {dimension_numbers = #tpu.dot_dimension_numbers<[1], [0], [0], [1], [0, 0, 1, 1], [], []>} : vector<64x128xf32>, vector<128x128xf32>, vector<64x128xf32> -> vector<64x128xf32>
    %125 = arith.addf %119, %124 : vector<64x128xf32>
    %c2_172 = arith.constant 2 : index
    %c2_173 = arith.constant 2 : index
    %c0_174 = arith.constant 0 : index
    %126 = vector.load %arg11[%c2_172, %c2_173, %c0_174] : memref<14x14x128xf32, #tpu.memory_space<vmem>>, vector<8x8x128xf32>
    %127 = vector.shape_cast %126 : vector<8x8x128xf32> to vector<64x128xf32>
    %c16 = arith.constant 16 : index
    %c0_175 = arith.constant 0 : index
    %c0_176 = arith.constant 0 : index
    %128 = vector.load %arg2[%c16, %c0_175, %c0_176] : memref<49x128x128xf32, #tpu.memory_space<vmem>>, vector<1x128x128xf32>
    %129 = vector.shape_cast %128 : vector<1x128x128xf32> to vector<128x128xf32>
    %cst_177 = arith.constant dense<0.000000e+00> : vector<64x128xf32>
    %130 = tpu.matmul %127, %129, %cst_177 {dimension_numbers = #tpu.dot_dimension_numbers<[1], [0], [0], [1], [0, 0, 1, 1], [], []>} : vector<64x128xf32>, vector<128x128xf32>, vector<64x128xf32> -> vector<64x128xf32>
    %131 = arith.addf %125, %130 : vector<64x128xf32>
    %c2_178 = arith.constant 2 : index
    %c3_179 = arith.constant 3 : index
    %c0_180 = arith.constant 0 : index
    %132 = vector.load %arg11[%c2_178, %c3_179, %c0_180] : memref<14x14x128xf32, #tpu.memory_space<vmem>>, vector<8x8x128xf32>
    %133 = vector.shape_cast %132 : vector<8x8x128xf32> to vector<64x128xf32>
    %c17 = arith.constant 17 : index
    %c0_181 = arith.constant 0 : index
    %c0_182 = arith.constant 0 : index
    %134 = vector.load %arg2[%c17, %c0_181, %c0_182] : memref<49x128x128xf32, #tpu.memory_space<vmem>>, vector<1x128x128xf32>
    %135 = vector.shape_cast %134 : vector<1x128x128xf32> to vector<128x128xf32>
    %cst_183 = arith.constant dense<0.000000e+00> : vector<64x128xf32>
    %136 = tpu.matmul %133, %135, %cst_183 {dimension_numbers = #tpu.dot_dimension_numbers<[1], [0], [0], [1], [0, 0, 1, 1], [], []>} : vector<64x128xf32>, vector<128x128xf32>, vector<64x128xf32> -> vector<64x128xf32>
    %137 = arith.addf %131, %136 : vector<64x128xf32>
    %c2_184 = arith.constant 2 : index
    %c4_185 = arith.constant 4 : index
    %c0_186 = arith.constant 0 : index
    %138 = vector.load %arg11[%c2_184, %c4_185, %c0_186] : memref<14x14x128xf32, #tpu.memory_space<vmem>>, vector<8x8x128xf32>
    %139 = vector.shape_cast %138 : vector<8x8x128xf32> to vector<64x128xf32>
    %c18 = arith.constant 18 : index
    %c0_187 = arith.constant 0 : index
    %c0_188 = arith.constant 0 : index
    %140 = vector.load %arg2[%c18, %c0_187, %c0_188] : memref<49x128x128xf32, #tpu.memory_space<vmem>>, vector<1x128x128xf32>
    %141 = vector.shape_cast %140 : vector<1x128x128xf32> to vector<128x128xf32>
    %cst_189 = arith.constant dense<0.000000e+00> : vector<64x128xf32>
    %142 = tpu.matmul %139, %141, %cst_189 {dimension_numbers = #tpu.dot_dimension_numbers<[1], [0], [0], [1], [0, 0, 1, 1], [], []>} : vector<64x128xf32>, vector<128x128xf32>, vector<64x128xf32> -> vector<64x128xf32>
    %143 = arith.addf %137, %142 : vector<64x128xf32>
    %c2_190 = arith.constant 2 : index
    %c5_191 = arith.constant 5 : index
    %c0_192 = arith.constant 0 : index
    %144 = vector.load %arg11[%c2_190, %c5_191, %c0_192] : memref<14x14x128xf32, #tpu.memory_space<vmem>>, vector<8x8x128xf32>
    %145 = vector.shape_cast %144 : vector<8x8x128xf32> to vector<64x128xf32>
    %c19 = arith.constant 19 : index
    %c0_193 = arith.constant 0 : index
    %c0_194 = arith.constant 0 : index
    %146 = vector.load %arg2[%c19, %c0_193, %c0_194] : memref<49x128x128xf32, #tpu.memory_space<vmem>>, vector<1x128x128xf32>
    %147 = vector.shape_cast %146 : vector<1x128x128xf32> to vector<128x128xf32>
    %cst_195 = arith.constant dense<0.000000e+00> : vector<64x128xf32>
    %148 = tpu.matmul %145, %147, %cst_195 {dimension_numbers = #tpu.dot_dimension_numbers<[1], [0], [0], [1], [0, 0, 1, 1], [], []>} : vector<64x128xf32>, vector<128x128xf32>, vector<64x128xf32> -> vector<64x128xf32>
    %149 = arith.addf %143, %148 : vector<64x128xf32>
    %c2_196 = arith.constant 2 : index
    %c6_197 = arith.constant 6 : index
    %c0_198 = arith.constant 0 : index
    %150 = vector.load %arg11[%c2_196, %c6_197, %c0_198] : memref<14x14x128xf32, #tpu.memory_space<vmem>>, vector<8x8x128xf32>
    %151 = vector.shape_cast %150 : vector<8x8x128xf32> to vector<64x128xf32>
    %c20 = arith.constant 20 : index
    %c0_199 = arith.constant 0 : index
    %c0_200 = arith.constant 0 : index
    %152 = vector.load %arg2[%c20, %c0_199, %c0_200] : memref<49x128x128xf32, #tpu.memory_space<vmem>>, vector<1x128x128xf32>
    %153 = vector.shape_cast %152 : vector<1x128x128xf32> to vector<128x128xf32>
    %cst_201 = arith.constant dense<0.000000e+00> : vector<64x128xf32>
    %154 = tpu.matmul %151, %153, %cst_201 {dimension_numbers = #tpu.dot_dimension_numbers<[1], [0], [0], [1], [0, 0, 1, 1], [], []>} : vector<64x128xf32>, vector<128x128xf32>, vector<64x128xf32> -> vector<64x128xf32>
    %155 = arith.addf %149, %154 : vector<64x128xf32>
    %c3_202 = arith.constant 3 : index
    %c0_203 = arith.constant 0 : index
    %c0_204 = arith.constant 0 : index
    %156 = vector.load %arg11[%c3_202, %c0_203, %c0_204] : memref<14x14x128xf32, #tpu.memory_space<vmem>>, vector<8x8x128xf32>
    %157 = vector.shape_cast %156 : vector<8x8x128xf32> to vector<64x128xf32>
    %c21 = arith.constant 21 : index
    %c0_205 = arith.constant 0 : index
    %c0_206 = arith.constant 0 : index
    %158 = vector.load %arg2[%c21, %c0_205, %c0_206] : memref<49x128x128xf32, #tpu.memory_space<vmem>>, vector<1x128x128xf32>
    %159 = vector.shape_cast %158 : vector<1x128x128xf32> to vector<128x128xf32>
    %cst_207 = arith.constant dense<0.000000e+00> : vector<64x128xf32>
    %160 = tpu.matmul %157, %159, %cst_207 {dimension_numbers = #tpu.dot_dimension_numbers<[1], [0], [0], [1], [0, 0, 1, 1], [], []>} : vector<64x128xf32>, vector<128x128xf32>, vector<64x128xf32> -> vector<64x128xf32>
    %161 = arith.addf %155, %160 : vector<64x128xf32>
    %c3_208 = arith.constant 3 : index
    %c1_209 = arith.constant 1 : index
    %c0_210 = arith.constant 0 : index
    %162 = vector.load %arg11[%c3_208, %c1_209, %c0_210] : memref<14x14x128xf32, #tpu.memory_space<vmem>>, vector<8x8x128xf32>
    %163 = vector.shape_cast %162 : vector<8x8x128xf32> to vector<64x128xf32>
    %c22 = arith.constant 22 : index
    %c0_211 = arith.constant 0 : index
    %c0_212 = arith.constant 0 : index
    %164 = vector.load %arg2[%c22, %c0_211, %c0_212] : memref<49x128x128xf32, #tpu.memory_space<vmem>>, vector<1x128x128xf32>
    %165 = vector.shape_cast %164 : vector<1x128x128xf32> to vector<128x128xf32>
    %cst_213 = arith.constant dense<0.000000e+00> : vector<64x128xf32>
    %166 = tpu.matmul %163, %165, %cst_213 {dimension_numbers = #tpu.dot_dimension_numbers<[1], [0], [0], [1], [0, 0, 1, 1], [], []>} : vector<64x128xf32>, vector<128x128xf32>, vector<64x128xf32> -> vector<64x128xf32>
    %167 = arith.addf %161, %166 : vector<64x128xf32>
    %c3_214 = arith.constant 3 : index
    %c2_215 = arith.constant 2 : index
    %c0_216 = arith.constant 0 : index
    %168 = vector.load %arg11[%c3_214, %c2_215, %c0_216] : memref<14x14x128xf32, #tpu.memory_space<vmem>>, vector<8x8x128xf32>
    %169 = vector.shape_cast %168 : vector<8x8x128xf32> to vector<64x128xf32>
    %c23 = arith.constant 23 : index
    %c0_217 = arith.constant 0 : index
    %c0_218 = arith.constant 0 : index
    %170 = vector.load %arg2[%c23, %c0_217, %c0_218] : memref<49x128x128xf32, #tpu.memory_space<vmem>>, vector<1x128x128xf32>
    %171 = vector.shape_cast %170 : vector<1x128x128xf32> to vector<128x128xf32>
    %cst_219 = arith.constant dense<0.000000e+00> : vector<64x128xf32>
    %172 = tpu.matmul %169, %171, %cst_219 {dimension_numbers = #tpu.dot_dimension_numbers<[1], [0], [0], [1], [0, 0, 1, 1], [], []>} : vector<64x128xf32>, vector<128x128xf32>, vector<64x128xf32> -> vector<64x128xf32>
    %173 = arith.addf %167, %172 : vector<64x128xf32>
    %c3_220 = arith.constant 3 : index
    %c3_221 = arith.constant 3 : index
    %c0_222 = arith.constant 0 : index
    %174 = vector.load %arg11[%c3_220, %c3_221, %c0_222] : memref<14x14x128xf32, #tpu.memory_space<vmem>>, vector<8x8x128xf32>
    %175 = vector.shape_cast %174 : vector<8x8x128xf32> to vector<64x128xf32>
    %c24 = arith.constant 24 : index
    %c0_223 = arith.constant 0 : index
    %c0_224 = arith.constant 0 : index
    %176 = vector.load %arg2[%c24, %c0_223, %c0_224] : memref<49x128x128xf32, #tpu.memory_space<vmem>>, vector<1x128x128xf32>
    %177 = vector.shape_cast %176 : vector<1x128x128xf32> to vector<128x128xf32>
    %cst_225 = arith.constant dense<0.000000e+00> : vector<64x128xf32>
    %178 = tpu.matmul %175, %177, %cst_225 {dimension_numbers = #tpu.dot_dimension_numbers<[1], [0], [0], [1], [0, 0, 1, 1], [], []>} : vector<64x128xf32>, vector<128x128xf32>, vector<64x128xf32> -> vector<64x128xf32>
    %179 = arith.addf %173, %178 : vector<64x128xf32>
    %c3_226 = arith.constant 3 : index
    %c4_227 = arith.constant 4 : index
    %c0_228 = arith.constant 0 : index
    %180 = vector.load %arg11[%c3_226, %c4_227, %c0_228] : memref<14x14x128xf32, #tpu.memory_space<vmem>>, vector<8x8x128xf32>
    %181 = vector.shape_cast %180 : vector<8x8x128xf32> to vector<64x128xf32>
    %c25 = arith.constant 25 : index
    %c0_229 = arith.constant 0 : index
    %c0_230 = arith.constant 0 : index
    %182 = vector.load %arg2[%c25, %c0_229, %c0_230] : memref<49x128x128xf32, #tpu.memory_space<vmem>>, vector<1x128x128xf32>
    %183 = vector.shape_cast %182 : vector<1x128x128xf32> to vector<128x128xf32>
    %cst_231 = arith.constant dense<0.000000e+00> : vector<64x128xf32>
    %184 = tpu.matmul %181, %183, %cst_231 {dimension_numbers = #tpu.dot_dimension_numbers<[1], [0], [0], [1], [0, 0, 1, 1], [], []>} : vector<64x128xf32>, vector<128x128xf32>, vector<64x128xf32> -> vector<64x128xf32>
    %185 = arith.addf %179, %184 : vector<64x128xf32>
    %c3_232 = arith.constant 3 : index
    %c5_233 = arith.constant 5 : index
    %c0_234 = arith.constant 0 : index
    %186 = vector.load %arg11[%c3_232, %c5_233, %c0_234] : memref<14x14x128xf32, #tpu.memory_space<vmem>>, vector<8x8x128xf32>
    %187 = vector.shape_cast %186 : vector<8x8x128xf32> to vector<64x128xf32>
    %c26 = arith.constant 26 : index
    %c0_235 = arith.constant 0 : index
    %c0_236 = arith.constant 0 : index
    %188 = vector.load %arg2[%c26, %c0_235, %c0_236] : memref<49x128x128xf32, #tpu.memory_space<vmem>>, vector<1x128x128xf32>
    %189 = vector.shape_cast %188 : vector<1x128x128xf32> to vector<128x128xf32>
    %cst_237 = arith.constant dense<0.000000e+00> : vector<64x128xf32>
    %190 = tpu.matmul %187, %189, %cst_237 {dimension_numbers = #tpu.dot_dimension_numbers<[1], [0], [0], [1], [0, 0, 1, 1], [], []>} : vector<64x128xf32>, vector<128x128xf32>, vector<64x128xf32> -> vector<64x128xf32>
    %191 = arith.addf %185, %190 : vector<64x128xf32>
    %c3_238 = arith.constant 3 : index
    %c6_239 = arith.constant 6 : index
    %c0_240 = arith.constant 0 : index
    %192 = vector.load %arg11[%c3_238, %c6_239, %c0_240] : memref<14x14x128xf32, #tpu.memory_space<vmem>>, vector<8x8x128xf32>
    %193 = vector.shape_cast %192 : vector<8x8x128xf32> to vector<64x128xf32>
    %c27 = arith.constant 27 : index
    %c0_241 = arith.constant 0 : index
    %c0_242 = arith.constant 0 : index
    %194 = vector.load %arg2[%c27, %c0_241, %c0_242] : memref<49x128x128xf32, #tpu.memory_space<vmem>>, vector<1x128x128xf32>
    %195 = vector.shape_cast %194 : vector<1x128x128xf32> to vector<128x128xf32>
    %cst_243 = arith.constant dense<0.000000e+00> : vector<64x128xf32>
    %196 = tpu.matmul %193, %195, %cst_243 {dimension_numbers = #tpu.dot_dimension_numbers<[1], [0], [0], [1], [0, 0, 1, 1], [], []>} : vector<64x128xf32>, vector<128x128xf32>, vector<64x128xf32> -> vector<64x128xf32>
    %197 = arith.addf %191, %196 : vector<64x128xf32>
    %c4_244 = arith.constant 4 : index
    %c0_245 = arith.constant 0 : index
    %c0_246 = arith.constant 0 : index
    %198 = vector.load %arg11[%c4_244, %c0_245, %c0_246] : memref<14x14x128xf32, #tpu.memory_space<vmem>>, vector<8x8x128xf32>
    %199 = vector.shape_cast %198 : vector<8x8x128xf32> to vector<64x128xf32>
    %c28 = arith.constant 28 : index
    %c0_247 = arith.constant 0 : index
    %c0_248 = arith.constant 0 : index
    %200 = vector.load %arg2[%c28, %c0_247, %c0_248] : memref<49x128x128xf32, #tpu.memory_space<vmem>>, vector<1x128x128xf32>
    %201 = vector.shape_cast %200 : vector<1x128x128xf32> to vector<128x128xf32>
    %cst_249 = arith.constant dense<0.000000e+00> : vector<64x128xf32>
    %202 = tpu.matmul %199, %201, %cst_249 {dimension_numbers = #tpu.dot_dimension_numbers<[1], [0], [0], [1], [0, 0, 1, 1], [], []>} : vector<64x128xf32>, vector<128x128xf32>, vector<64x128xf32> -> vector<64x128xf32>
    %203 = arith.addf %197, %202 : vector<64x128xf32>
    %c4_250 = arith.constant 4 : index
    %c1_251 = arith.constant 1 : index
    %c0_252 = arith.constant 0 : index
    %204 = vector.load %arg11[%c4_250, %c1_251, %c0_252] : memref<14x14x128xf32, #tpu.memory_space<vmem>>, vector<8x8x128xf32>
    %205 = vector.shape_cast %204 : vector<8x8x128xf32> to vector<64x128xf32>
    %c29 = arith.constant 29 : index
    %c0_253 = arith.constant 0 : index
    %c0_254 = arith.constant 0 : index
    %206 = vector.load %arg2[%c29, %c0_253, %c0_254] : memref<49x128x128xf32, #tpu.memory_space<vmem>>, vector<1x128x128xf32>
    %207 = vector.shape_cast %206 : vector<1x128x128xf32> to vector<128x128xf32>
    %cst_255 = arith.constant dense<0.000000e+00> : vector<64x128xf32>
    %208 = tpu.matmul %205, %207, %cst_255 {dimension_numbers = #tpu.dot_dimension_numbers<[1], [0], [0], [1], [0, 0, 1, 1], [], []>} : vector<64x128xf32>, vector<128x128xf32>, vector<64x128xf32> -> vector<64x128xf32>
    %209 = arith.addf %203, %208 : vector<64x128xf32>
    %c4_256 = arith.constant 4 : index
    %c2_257 = arith.constant 2 : index
    %c0_258 = arith.constant 0 : index
    %210 = vector.load %arg11[%c4_256, %c2_257, %c0_258] : memref<14x14x128xf32, #tpu.memory_space<vmem>>, vector<8x8x128xf32>
    %211 = vector.shape_cast %210 : vector<8x8x128xf32> to vector<64x128xf32>
    %c30 = arith.constant 30 : index
    %c0_259 = arith.constant 0 : index
    %c0_260 = arith.constant 0 : index
    %212 = vector.load %arg2[%c30, %c0_259, %c0_260] : memref<49x128x128xf32, #tpu.memory_space<vmem>>, vector<1x128x128xf32>
    %213 = vector.shape_cast %212 : vector<1x128x128xf32> to vector<128x128xf32>
    %cst_261 = arith.constant dense<0.000000e+00> : vector<64x128xf32>
    %214 = tpu.matmul %211, %213, %cst_261 {dimension_numbers = #tpu.dot_dimension_numbers<[1], [0], [0], [1], [0, 0, 1, 1], [], []>} : vector<64x128xf32>, vector<128x128xf32>, vector<64x128xf32> -> vector<64x128xf32>
    %215 = arith.addf %209, %214 : vector<64x128xf32>
    %c4_262 = arith.constant 4 : index
    %c3_263 = arith.constant 3 : index
    %c0_264 = arith.constant 0 : index
    %216 = vector.load %arg11[%c4_262, %c3_263, %c0_264] : memref<14x14x128xf32, #tpu.memory_space<vmem>>, vector<8x8x128xf32>
    %217 = vector.shape_cast %216 : vector<8x8x128xf32> to vector<64x128xf32>
    %c31 = arith.constant 31 : index
    %c0_265 = arith.constant 0 : index
    %c0_266 = arith.constant 0 : index
    %218 = vector.load %arg2[%c31, %c0_265, %c0_266] : memref<49x128x128xf32, #tpu.memory_space<vmem>>, vector<1x128x128xf32>
    %219 = vector.shape_cast %218 : vector<1x128x128xf32> to vector<128x128xf32>
    %cst_267 = arith.constant dense<0.000000e+00> : vector<64x128xf32>
    %220 = tpu.matmul %217, %219, %cst_267 {dimension_numbers = #tpu.dot_dimension_numbers<[1], [0], [0], [1], [0, 0, 1, 1], [], []>} : vector<64x128xf32>, vector<128x128xf32>, vector<64x128xf32> -> vector<64x128xf32>
    %221 = arith.addf %215, %220 : vector<64x128xf32>
    %c4_268 = arith.constant 4 : index
    %c4_269 = arith.constant 4 : index
    %c0_270 = arith.constant 0 : index
    %222 = vector.load %arg11[%c4_268, %c4_269, %c0_270] : memref<14x14x128xf32, #tpu.memory_space<vmem>>, vector<8x8x128xf32>
    %223 = vector.shape_cast %222 : vector<8x8x128xf32> to vector<64x128xf32>
    %c32 = arith.constant 32 : index
    %c0_271 = arith.constant 0 : index
    %c0_272 = arith.constant 0 : index
    %224 = vector.load %arg2[%c32, %c0_271, %c0_272] : memref<49x128x128xf32, #tpu.memory_space<vmem>>, vector<1x128x128xf32>
    %225 = vector.shape_cast %224 : vector<1x128x128xf32> to vector<128x128xf32>
    %cst_273 = arith.constant dense<0.000000e+00> : vector<64x128xf32>
    %226 = tpu.matmul %223, %225, %cst_273 {dimension_numbers = #tpu.dot_dimension_numbers<[1], [0], [0], [1], [0, 0, 1, 1], [], []>} : vector<64x128xf32>, vector<128x128xf32>, vector<64x128xf32> -> vector<64x128xf32>
    %227 = arith.addf %221, %226 : vector<64x128xf32>
    %c4_274 = arith.constant 4 : index
    %c5_275 = arith.constant 5 : index
    %c0_276 = arith.constant 0 : index
    %228 = vector.load %arg11[%c4_274, %c5_275, %c0_276] : memref<14x14x128xf32, #tpu.memory_space<vmem>>, vector<8x8x128xf32>
    %229 = vector.shape_cast %228 : vector<8x8x128xf32> to vector<64x128xf32>
    %c33 = arith.constant 33 : index
    %c0_277 = arith.constant 0 : index
    %c0_278 = arith.constant 0 : index
    %230 = vector.load %arg2[%c33, %c0_277, %c0_278] : memref<49x128x128xf32, #tpu.memory_space<vmem>>, vector<1x128x128xf32>
    %231 = vector.shape_cast %230 : vector<1x128x128xf32> to vector<128x128xf32>
    %cst_279 = arith.constant dense<0.000000e+00> : vector<64x128xf32>
    %232 = tpu.matmul %229, %231, %cst_279 {dimension_numbers = #tpu.dot_dimension_numbers<[1], [0], [0], [1], [0, 0, 1, 1], [], []>} : vector<64x128xf32>, vector<128x128xf32>, vector<64x128xf32> -> vector<64x128xf32>
    %233 = arith.addf %227, %232 : vector<64x128xf32>
    %c4_280 = arith.constant 4 : index
    %c6_281 = arith.constant 6 : index
    %c0_282 = arith.constant 0 : index
    %234 = vector.load %arg11[%c4_280, %c6_281, %c0_282] : memref<14x14x128xf32, #tpu.memory_space<vmem>>, vector<8x8x128xf32>
    %235 = vector.shape_cast %234 : vector<8x8x128xf32> to vector<64x128xf32>
    %c34 = arith.constant 34 : index
    %c0_283 = arith.constant 0 : index
    %c0_284 = arith.constant 0 : index
    %236 = vector.load %arg2[%c34, %c0_283, %c0_284] : memref<49x128x128xf32, #tpu.memory_space<vmem>>, vector<1x128x128xf32>
    %237 = vector.shape_cast %236 : vector<1x128x128xf32> to vector<128x128xf32>
    %cst_285 = arith.constant dense<0.000000e+00> : vector<64x128xf32>
    %238 = tpu.matmul %235, %237, %cst_285 {dimension_numbers = #tpu.dot_dimension_numbers<[1], [0], [0], [1], [0, 0, 1, 1], [], []>} : vector<64x128xf32>, vector<128x128xf32>, vector<64x128xf32> -> vector<64x128xf32>
    %239 = arith.addf %233, %238 : vector<64x128xf32>
    %c5_286 = arith.constant 5 : index
    %c0_287 = arith.constant 0 : index
    %c0_288 = arith.constant 0 : index
    %240 = vector.load %arg11[%c5_286, %c0_287, %c0_288] : memref<14x14x128xf32, #tpu.memory_space<vmem>>, vector<8x8x128xf32>
    %241 = vector.shape_cast %240 : vector<8x8x128xf32> to vector<64x128xf32>
    %c35 = arith.constant 35 : index
    %c0_289 = arith.constant 0 : index
    %c0_290 = arith.constant 0 : index
    %242 = vector.load %arg2[%c35, %c0_289, %c0_290] : memref<49x128x128xf32, #tpu.memory_space<vmem>>, vector<1x128x128xf32>
    %243 = vector.shape_cast %242 : vector<1x128x128xf32> to vector<128x128xf32>
    %cst_291 = arith.constant dense<0.000000e+00> : vector<64x128xf32>
    %244 = tpu.matmul %241, %243, %cst_291 {dimension_numbers = #tpu.dot_dimension_numbers<[1], [0], [0], [1], [0, 0, 1, 1], [], []>} : vector<64x128xf32>, vector<128x128xf32>, vector<64x128xf32> -> vector<64x128xf32>
    %245 = arith.addf %239, %244 : vector<64x128xf32>
    %c5_292 = arith.constant 5 : index
    %c1_293 = arith.constant 1 : index
    %c0_294 = arith.constant 0 : index
    %246 = vector.load %arg11[%c5_292, %c1_293, %c0_294] : memref<14x14x128xf32, #tpu.memory_space<vmem>>, vector<8x8x128xf32>
    %247 = vector.shape_cast %246 : vector<8x8x128xf32> to vector<64x128xf32>
    %c36 = arith.constant 36 : index
    %c0_295 = arith.constant 0 : index
    %c0_296 = arith.constant 0 : index
    %248 = vector.load %arg2[%c36, %c0_295, %c0_296] : memref<49x128x128xf32, #tpu.memory_space<vmem>>, vector<1x128x128xf32>
    %249 = vector.shape_cast %248 : vector<1x128x128xf32> to vector<128x128xf32>
    %cst_297 = arith.constant dense<0.000000e+00> : vector<64x128xf32>
    %250 = tpu.matmul %247, %249, %cst_297 {dimension_numbers = #tpu.dot_dimension_numbers<[1], [0], [0], [1], [0, 0, 1, 1], [], []>} : vector<64x128xf32>, vector<128x128xf32>, vector<64x128xf32> -> vector<64x128xf32>
    %251 = arith.addf %245, %250 : vector<64x128xf32>
    %c5_298 = arith.constant 5 : index
    %c2_299 = arith.constant 2 : index
    %c0_300 = arith.constant 0 : index
    %252 = vector.load %arg11[%c5_298, %c2_299, %c0_300] : memref<14x14x128xf32, #tpu.memory_space<vmem>>, vector<8x8x128xf32>
    %253 = vector.shape_cast %252 : vector<8x8x128xf32> to vector<64x128xf32>
    %c37 = arith.constant 37 : index
    %c0_301 = arith.constant 0 : index
    %c0_302 = arith.constant 0 : index
    %254 = vector.load %arg2[%c37, %c0_301, %c0_302] : memref<49x128x128xf32, #tpu.memory_space<vmem>>, vector<1x128x128xf32>
    %255 = vector.shape_cast %254 : vector<1x128x128xf32> to vector<128x128xf32>
    %cst_303 = arith.constant dense<0.000000e+00> : vector<64x128xf32>
    %256 = tpu.matmul %253, %255, %cst_303 {dimension_numbers = #tpu.dot_dimension_numbers<[1], [0], [0], [1], [0, 0, 1, 1], [], []>} : vector<64x128xf32>, vector<128x128xf32>, vector<64x128xf32> -> vector<64x128xf32>
    %257 = arith.addf %251, %256 : vector<64x128xf32>
    %c5_304 = arith.constant 5 : index
    %c3_305 = arith.constant 3 : index
    %c0_306 = arith.constant 0 : index
    %258 = vector.load %arg11[%c5_304, %c3_305, %c0_306] : memref<14x14x128xf32, #tpu.memory_space<vmem>>, vector<8x8x128xf32>
    %259 = vector.shape_cast %258 : vector<8x8x128xf32> to vector<64x128xf32>
    %c38 = arith.constant 38 : index
    %c0_307 = arith.constant 0 : index
    %c0_308 = arith.constant 0 : index
    %260 = vector.load %arg2[%c38, %c0_307, %c0_308] : memref<49x128x128xf32, #tpu.memory_space<vmem>>, vector<1x128x128xf32>
    %261 = vector.shape_cast %260 : vector<1x128x128xf32> to vector<128x128xf32>
    %cst_309 = arith.constant dense<0.000000e+00> : vector<64x128xf32>
    %262 = tpu.matmul %259, %261, %cst_309 {dimension_numbers = #tpu.dot_dimension_numbers<[1], [0], [0], [1], [0, 0, 1, 1], [], []>} : vector<64x128xf32>, vector<128x128xf32>, vector<64x128xf32> -> vector<64x128xf32>
    %263 = arith.addf %257, %262 : vector<64x128xf32>
    %c5_310 = arith.constant 5 : index
    %c4_311 = arith.constant 4 : index
    %c0_312 = arith.constant 0 : index
    %264 = vector.load %arg11[%c5_310, %c4_311, %c0_312] : memref<14x14x128xf32, #tpu.memory_space<vmem>>, vector<8x8x128xf32>
    %265 = vector.shape_cast %264 : vector<8x8x128xf32> to vector<64x128xf32>
    %c39 = arith.constant 39 : index
    %c0_313 = arith.constant 0 : index
    %c0_314 = arith.constant 0 : index
    %266 = vector.load %arg2[%c39, %c0_313, %c0_314] : memref<49x128x128xf32, #tpu.memory_space<vmem>>, vector<1x128x128xf32>
    %267 = vector.shape_cast %266 : vector<1x128x128xf32> to vector<128x128xf32>
    %cst_315 = arith.constant dense<0.000000e+00> : vector<64x128xf32>
    %268 = tpu.matmul %265, %267, %cst_315 {dimension_numbers = #tpu.dot_dimension_numbers<[1], [0], [0], [1], [0, 0, 1, 1], [], []>} : vector<64x128xf32>, vector<128x128xf32>, vector<64x128xf32> -> vector<64x128xf32>
    %269 = arith.addf %263, %268 : vector<64x128xf32>
    %c5_316 = arith.constant 5 : index
    %c5_317 = arith.constant 5 : index
    %c0_318 = arith.constant 0 : index
    %270 = vector.load %arg11[%c5_316, %c5_317, %c0_318] : memref<14x14x128xf32, #tpu.memory_space<vmem>>, vector<8x8x128xf32>
    %271 = vector.shape_cast %270 : vector<8x8x128xf32> to vector<64x128xf32>
    %c40 = arith.constant 40 : index
    %c0_319 = arith.constant 0 : index
    %c0_320 = arith.constant 0 : index
    %272 = vector.load %arg2[%c40, %c0_319, %c0_320] : memref<49x128x128xf32, #tpu.memory_space<vmem>>, vector<1x128x128xf32>
    %273 = vector.shape_cast %272 : vector<1x128x128xf32> to vector<128x128xf32>
    %cst_321 = arith.constant dense<0.000000e+00> : vector<64x128xf32>
    %274 = tpu.matmul %271, %273, %cst_321 {dimension_numbers = #tpu.dot_dimension_numbers<[1], [0], [0], [1], [0, 0, 1, 1], [], []>} : vector<64x128xf32>, vector<128x128xf32>, vector<64x128xf32> -> vector<64x128xf32>
    %275 = arith.addf %269, %274 : vector<64x128xf32>
    %c5_322 = arith.constant 5 : index
    %c6_323 = arith.constant 6 : index
    %c0_324 = arith.constant 0 : index
    %276 = vector.load %arg11[%c5_322, %c6_323, %c0_324] : memref<14x14x128xf32, #tpu.memory_space<vmem>>, vector<8x8x128xf32>
    %277 = vector.shape_cast %276 : vector<8x8x128xf32> to vector<64x128xf32>
    %c41 = arith.constant 41 : index
    %c0_325 = arith.constant 0 : index
    %c0_326 = arith.constant 0 : index
    %278 = vector.load %arg2[%c41, %c0_325, %c0_326] : memref<49x128x128xf32, #tpu.memory_space<vmem>>, vector<1x128x128xf32>
    %279 = vector.shape_cast %278 : vector<1x128x128xf32> to vector<128x128xf32>
    %cst_327 = arith.constant dense<0.000000e+00> : vector<64x128xf32>
    %280 = tpu.matmul %277, %279, %cst_327 {dimension_numbers = #tpu.dot_dimension_numbers<[1], [0], [0], [1], [0, 0, 1, 1], [], []>} : vector<64x128xf32>, vector<128x128xf32>, vector<64x128xf32> -> vector<64x128xf32>
    %281 = arith.addf %275, %280 : vector<64x128xf32>
    %c6_328 = arith.constant 6 : index
    %c0_329 = arith.constant 0 : index
    %c0_330 = arith.constant 0 : index
    %282 = vector.load %arg11[%c6_328, %c0_329, %c0_330] : memref<14x14x128xf32, #tpu.memory_space<vmem>>, vector<8x8x128xf32>
    %283 = vector.shape_cast %282 : vector<8x8x128xf32> to vector<64x128xf32>
    %c42 = arith.constant 42 : index
    %c0_331 = arith.constant 0 : index
    %c0_332 = arith.constant 0 : index
    %284 = vector.load %arg2[%c42, %c0_331, %c0_332] : memref<49x128x128xf32, #tpu.memory_space<vmem>>, vector<1x128x128xf32>
    %285 = vector.shape_cast %284 : vector<1x128x128xf32> to vector<128x128xf32>
    %cst_333 = arith.constant dense<0.000000e+00> : vector<64x128xf32>
    %286 = tpu.matmul %283, %285, %cst_333 {dimension_numbers = #tpu.dot_dimension_numbers<[1], [0], [0], [1], [0, 0, 1, 1], [], []>} : vector<64x128xf32>, vector<128x128xf32>, vector<64x128xf32> -> vector<64x128xf32>
    %287 = arith.addf %281, %286 : vector<64x128xf32>
    %c6_334 = arith.constant 6 : index
    %c1_335 = arith.constant 1 : index
    %c0_336 = arith.constant 0 : index
    %288 = vector.load %arg11[%c6_334, %c1_335, %c0_336] : memref<14x14x128xf32, #tpu.memory_space<vmem>>, vector<8x8x128xf32>
    %289 = vector.shape_cast %288 : vector<8x8x128xf32> to vector<64x128xf32>
    %c43 = arith.constant 43 : index
    %c0_337 = arith.constant 0 : index
    %c0_338 = arith.constant 0 : index
    %290 = vector.load %arg2[%c43, %c0_337, %c0_338] : memref<49x128x128xf32, #tpu.memory_space<vmem>>, vector<1x128x128xf32>
    %291 = vector.shape_cast %290 : vector<1x128x128xf32> to vector<128x128xf32>
    %cst_339 = arith.constant dense<0.000000e+00> : vector<64x128xf32>
    %292 = tpu.matmul %289, %291, %cst_339 {dimension_numbers = #tpu.dot_dimension_numbers<[1], [0], [0], [1], [0, 0, 1, 1], [], []>} : vector<64x128xf32>, vector<128x128xf32>, vector<64x128xf32> -> vector<64x128xf32>
    %293 = arith.addf %287, %292 : vector<64x128xf32>
    %c6_340 = arith.constant 6 : index
    %c2_341 = arith.constant 2 : index
    %c0_342 = arith.constant 0 : index
    %294 = vector.load %arg11[%c6_340, %c2_341, %c0_342] : memref<14x14x128xf32, #tpu.memory_space<vmem>>, vector<8x8x128xf32>
    %295 = vector.shape_cast %294 : vector<8x8x128xf32> to vector<64x128xf32>
    %c44 = arith.constant 44 : index
    %c0_343 = arith.constant 0 : index
    %c0_344 = arith.constant 0 : index
    %296 = vector.load %arg2[%c44, %c0_343, %c0_344] : memref<49x128x128xf32, #tpu.memory_space<vmem>>, vector<1x128x128xf32>
    %297 = vector.shape_cast %296 : vector<1x128x128xf32> to vector<128x128xf32>
    %cst_345 = arith.constant dense<0.000000e+00> : vector<64x128xf32>
    %298 = tpu.matmul %295, %297, %cst_345 {dimension_numbers = #tpu.dot_dimension_numbers<[1], [0], [0], [1], [0, 0, 1, 1], [], []>} : vector<64x128xf32>, vector<128x128xf32>, vector<64x128xf32> -> vector<64x128xf32>
    %299 = arith.addf %293, %298 : vector<64x128xf32>
    %c6_346 = arith.constant 6 : index
    %c3_347 = arith.constant 3 : index
    %c0_348 = arith.constant 0 : index
    %300 = vector.load %arg11[%c6_346, %c3_347, %c0_348] : memref<14x14x128xf32, #tpu.memory_space<vmem>>, vector<8x8x128xf32>
    %301 = vector.shape_cast %300 : vector<8x8x128xf32> to vector<64x128xf32>
    %c45 = arith.constant 45 : index
    %c0_349 = arith.constant 0 : index
    %c0_350 = arith.constant 0 : index
    %302 = vector.load %arg2[%c45, %c0_349, %c0_350] : memref<49x128x128xf32, #tpu.memory_space<vmem>>, vector<1x128x128xf32>
    %303 = vector.shape_cast %302 : vector<1x128x128xf32> to vector<128x128xf32>
    %cst_351 = arith.constant dense<0.000000e+00> : vector<64x128xf32>
    %304 = tpu.matmul %301, %303, %cst_351 {dimension_numbers = #tpu.dot_dimension_numbers<[1], [0], [0], [1], [0, 0, 1, 1], [], []>} : vector<64x128xf32>, vector<128x128xf32>, vector<64x128xf32> -> vector<64x128xf32>
    %305 = arith.addf %299, %304 : vector<64x128xf32>
    %c6_352 = arith.constant 6 : index
    %c4_353 = arith.constant 4 : index
    %c0_354 = arith.constant 0 : index
    %306 = vector.load %arg11[%c6_352, %c4_353, %c0_354] : memref<14x14x128xf32, #tpu.memory_space<vmem>>, vector<8x8x128xf32>
    %307 = vector.shape_cast %306 : vector<8x8x128xf32> to vector<64x128xf32>
    %c46 = arith.constant 46 : index
    %c0_355 = arith.constant 0 : index
    %c0_356 = arith.constant 0 : index
    %308 = vector.load %arg2[%c46, %c0_355, %c0_356] : memref<49x128x128xf32, #tpu.memory_space<vmem>>, vector<1x128x128xf32>
    %309 = vector.shape_cast %308 : vector<1x128x128xf32> to vector<128x128xf32>
    %cst_357 = arith.constant dense<0.000000e+00> : vector<64x128xf32>
    %310 = tpu.matmul %307, %309, %cst_357 {dimension_numbers = #tpu.dot_dimension_numbers<[1], [0], [0], [1], [0, 0, 1, 1], [], []>} : vector<64x128xf32>, vector<128x128xf32>, vector<64x128xf32> -> vector<64x128xf32>
    %311 = arith.addf %305, %310 : vector<64x128xf32>
    %c6_358 = arith.constant 6 : index
    %c5_359 = arith.constant 5 : index
    %c0_360 = arith.constant 0 : index
    %312 = vector.load %arg11[%c6_358, %c5_359, %c0_360] : memref<14x14x128xf32, #tpu.memory_space<vmem>>, vector<8x8x128xf32>
    %313 = vector.shape_cast %312 : vector<8x8x128xf32> to vector<64x128xf32>
    %c47 = arith.constant 47 : index
    %c0_361 = arith.constant 0 : index
    %c0_362 = arith.constant 0 : index
    %314 = vector.load %arg2[%c47, %c0_361, %c0_362] : memref<49x128x128xf32, #tpu.memory_space<vmem>>, vector<1x128x128xf32>
    %315 = vector.shape_cast %314 : vector<1x128x128xf32> to vector<128x128xf32>
    %cst_363 = arith.constant dense<0.000000e+00> : vector<64x128xf32>
    %316 = tpu.matmul %313, %315, %cst_363 {dimension_numbers = #tpu.dot_dimension_numbers<[1], [0], [0], [1], [0, 0, 1, 1], [], []>} : vector<64x128xf32>, vector<128x128xf32>, vector<64x128xf32> -> vector<64x128xf32>
    %317 = arith.addf %311, %316 : vector<64x128xf32>
    %c6_364 = arith.constant 6 : index
    %c6_365 = arith.constant 6 : index
    %c0_366 = arith.constant 0 : index
    %318 = vector.load %arg11[%c6_364, %c6_365, %c0_366] : memref<14x14x128xf32, #tpu.memory_space<vmem>>, vector<8x8x128xf32>
    %319 = vector.shape_cast %318 : vector<8x8x128xf32> to vector<64x128xf32>
    %c48 = arith.constant 48 : index
    %c0_367 = arith.constant 0 : index
    %c0_368 = arith.constant 0 : index
    %320 = vector.load %arg2[%c48, %c0_367, %c0_368] : memref<49x128x128xf32, #tpu.memory_space<vmem>>, vector<1x128x128xf32>
    %321 = vector.shape_cast %320 : vector<1x128x128xf32> to vector<128x128xf32>
    %cst_369 = arith.constant dense<0.000000e+00> : vector<64x128xf32>
    %322 = tpu.matmul %319, %321, %cst_369 {dimension_numbers = #tpu.dot_dimension_numbers<[1], [0], [0], [1], [0, 0, 1, 1], [], []>} : vector<64x128xf32>, vector<128x128xf32>, vector<64x128xf32> -> vector<64x128xf32>
    %323 = arith.addf %317, %322 : vector<64x128xf32>
    %324 = tpu.concatenate %28, %323 in 1 : vector<64x128xf32>, vector<64x128xf32> -> vector<64x256xf32>
    %c0_370 = arith.constant 0 : index
    %c0_371 = arith.constant 0 : index
    %325 = vector.load %arg3[%c0_370, %c0_371] : memref<256x512xf32, #tpu.memory_space<vmem>>, vector<256x512xf32>
    %cst_372 = arith.constant dense<0.000000e+00> : vector<64x512xf32>
    %326 = tpu.matmul %324, %325, %cst_372 {dimension_numbers = #tpu.dot_dimension_numbers<[1], [0], [0], [1], [0, 0, 1, 1], [], []>} : vector<64x256xf32>, vector<256x512xf32>, vector<64x512xf32> -> vector<64x512xf32>
    %c0_373 = arith.constant 0 : index
    %c0_374 = arith.constant 0 : index
    %327 = vector.load %arg4[%c0_373, %c0_374] : memref<1x512xf32, #tpu.memory_space<vmem>>, vector<1x512xf32>
    %328 = vector.broadcast %327 : vector<1x512xf32> to vector<64x512xf32>
    %329 = arith.addf %326, %328 : vector<64x512xf32>
    %c0_375 = arith.constant 0 : index
    %c0_376 = arith.constant 0 : index
    %330 = vector.load %arg7[%c0_375, %c0_376] : memref<512x512xf32, #tpu.memory_space<vmem>>, vector<512x512xf32>
    %cst_377 = arith.constant dense<0.000000e+00> : vector<64x512xf32>
    %331 = tpu.matmul %329, %330, %cst_377 {dimension_numbers = #tpu.dot_dimension_numbers<[1], [0], [0], [1], [0, 0, 1, 1], [], []>} : vector<64x512xf32>, vector<512x512xf32>, vector<64x512xf32> -> vector<64x512xf32>
    %cst_378 = arith.constant dense<0.000000e+00> : vector<512xf32>
    %332 = vector.multi_reduction <add>, %331, %cst_378 [0] : vector<64x512xf32> to vector<512xf32>
    %333 = vector.shape_cast %332 : vector<512xf32> to vector<1x512xf32>
    %cst_379 = arith.constant 9.765625E-4 : f32
    %334 = vector.broadcast %cst_379 : f32 to vector<1x512xf32>
    %335 = arith.mulf %333, %334 : vector<1x512xf32>
    %336 = vector.broadcast %335 : vector<1x512xf32> to vector<64x512xf32>
    %337 = arith.subf %329, %336 : vector<64x512xf32>
    %338 = arith.mulf %337, %337 : vector<64x512xf32>
    %c0_380 = arith.constant 0 : index
    %c0_381 = arith.constant 0 : index
    %339 = vector.load %arg7[%c0_380, %c0_381] : memref<512x512xf32, #tpu.memory_space<vmem>>, vector<512x512xf32>
    %cst_382 = arith.constant dense<0.000000e+00> : vector<64x512xf32>
    %340 = tpu.matmul %338, %339, %cst_382 {dimension_numbers = #tpu.dot_dimension_numbers<[1], [0], [0], [1], [0, 0, 1, 1], [], []>} : vector<64x512xf32>, vector<512x512xf32>, vector<64x512xf32> -> vector<64x512xf32>
    %cst_383 = arith.constant dense<0.000000e+00> : vector<512xf32>
    %341 = vector.multi_reduction <add>, %340, %cst_383 [0] : vector<64x512xf32> to vector<512xf32>
    %342 = vector.shape_cast %341 : vector<512xf32> to vector<1x512xf32>
    %cst_384 = arith.constant 9.765625E-4 : f32
    %343 = vector.broadcast %cst_384 : f32 to vector<1x512xf32>
    %344 = arith.mulf %342, %343 : vector<1x512xf32>
    %c0_385 = arith.constant 0 : index
    %c0_386 = arith.constant 0 : index
    %345 = vector.load %arg5[%c0_385, %c0_386] : memref<1x512xf32, #tpu.memory_space<vmem>>, vector<1x512xf32>
    %cst_387 = arith.constant 9.99999974E-6 : f32
    %346 = vector.broadcast %cst_387 : f32 to vector<1x512xf32>
    %347 = arith.addf %344, %346 : vector<1x512xf32>
    %348 = math.rsqrt %347 : vector<1x512xf32>
    %349 = arith.mulf %345, %348 : vector<1x512xf32>
    %350 = vector.broadcast %349 : vector<1x512xf32> to vector<64x512xf32>
    %351 = arith.mulf %337, %350 : vector<64x512xf32>
    %c0_388 = arith.constant 0 : index
    %c0_389 = arith.constant 0 : index
    %352 = vector.load %arg6[%c0_388, %c0_389] : memref<1x512xf32, #tpu.memory_space<vmem>>, vector<1x512xf32>
    %353 = vector.broadcast %352 : vector<1x512xf32> to vector<64x512xf32>
    %354 = arith.addf %351, %353 : vector<64x512xf32>
    %cst_390 = arith.constant 0.000000e+00 : f32
    %355 = vector.broadcast %cst_390 : f32 to vector<64x512xf32>
    %356 = arith.maximumf %354, %355 : vector<64x512xf32>
    %c0_391 = arith.constant 0 : index
    %c0_392 = arith.constant 0 : index
    %357 = vector.load %arg8[%c0_391, %c0_392] : memref<512x128xf32, #tpu.memory_space<vmem>>, vector<512x128xf32>
    %cst_393 = arith.constant dense<0.000000e+00> : vector<64x128xf32>
    %358 = tpu.matmul %356, %357, %cst_393 {dimension_numbers = #tpu.dot_dimension_numbers<[1], [0], [0], [1], [0, 0, 1, 1], [], []>} : vector<64x512xf32>, vector<512x128xf32>, vector<64x128xf32> -> vector<64x128xf32>
    %c0_394 = arith.constant 0 : index
    %c0_395 = arith.constant 0 : index
    %c0_396 = arith.constant 0 : index
    %359 = vector.load %arg9[%c0_394, %c0_395, %c0_396] : memref<1x64x128xf32, #tpu.memory_space<vmem>>, vector<1x64x128xf32>
    %360 = vector.shape_cast %359 : vector<1x64x128xf32> to vector<64x128xf32>
    %361 = arith.mulf %358, %360 : vector<64x128xf32>
    %362 = arith.addf %28, %361 : vector<64x128xf32>
    %363 = vector.shape_cast %362 : vector<64x128xf32> to vector<8x8x128xf32>
    %c3_397 = arith.constant 3 : index
    %c3_398 = arith.constant 3 : index
    %c0_399 = arith.constant 0 : index
    %364 = vector.load %arg11[%c3_397, %c3_398, %c0_399] : memref<14x14x128xf32, #tpu.memory_space<vmem>>, vector<8x8x128xf32>
    tpu.vector_store %arg11[%c3_397, %c3_398, %c0_399], %363 {strides = array<i32>} : memref<14x14x128xf32, #tpu.memory_space<vmem>>, vector<8x8x128xf32>,
    %c1_i32 = arith.constant 1 : i32
    %365 = arith.cmpi eq, %arg0, %c1_i32 : i32
    %366 = arith.extui %365 : i1 to i32
    %c0_i32_400 = arith.constant 0 : i32
    %367 = arith.cmpi ne, %366, %c0_i32_400 : i32
    scf.if %367 {
      %368 = vector.shape_cast %362 : vector<64x128xf32> to vector<8x8x128xf32>
      %c0_401 = arith.constant 0 : index
      %c0_402 = arith.constant 0 : index
      %c0_403 = arith.constant 0 : index
      %369 = vector.load %arg10[%c0_401, %c0_402, %c0_403] : memref<8x8x128xf32, #tpu.memory_space<vmem>>, vector<8x8x128xf32>
      tpu.vector_store %arg10[%c0_401, %c0_402, %c0_403], %368 {strides = array<i32>} : memref<8x8x128xf32, #tpu.memory_space<vmem>>, vector<8x8x128xf32>,
    } else {
    }
    return
  }
  func.func @transform_0(%arg0: i32) -> (i32, i32, i32) {
    %c0_i32 = arith.constant 0 : i32
    %c0_i32_0 = arith.constant 0 : i32
    %c0_i32_1 = arith.constant 0 : i32
    %c0_i32_2 = arith.constant 0 : i32
    return %c0_i32, %c0_i32_0, %c0_i32_1 : i32, i32, i32
  }
  func.func @transform_1(%arg0: i32) -> (i32, i32, i32) {
    %c0_i32 = arith.constant 0 : i32
    %c0_i32_0 = arith.constant 0 : i32
    %c0_i32_1 = arith.constant 0 : i32
    %c0_i32_2 = arith.constant 0 : i32
    return %c0_i32, %c0_i32_0, %c0_i32_1 : i32, i32, i32
  }
  func.func @transform_2(%arg0: i32) -> (i32, i32) {
    %c0_i32 = arith.constant 0 : i32
    %c0_i32_0 = arith.constant 0 : i32
    %c0_i32_1 = arith.constant 0 : i32
    return %c0_i32, %c0_i32_0 : i32, i32
  }
  func.func @transform_3(%arg0: i32) -> (i32, i32) {
    %c0_i32 = arith.constant 0 : i32
    %c0_i32_0 = arith.constant 0 : i32
    %c0_i32_1 = arith.constant 0 : i32
    return %c0_i32, %c0_i32_0 : i32, i32
  }
  func.func @transform_4(%arg0: i32) -> (i32, i32) {
    %c0_i32 = arith.constant 0 : i32
    %c0_i32_0 = arith.constant 0 : i32
    %c0_i32_1 = arith.constant 0 : i32
    return %c0_i32, %c0_i32_0 : i32, i32
  }
  func.func @transform_5(%arg0: i32) -> (i32, i32) {
    %c0_i32 = arith.constant 0 : i32
    %c0_i32_0 = arith.constant 0 : i32
    %c0_i32_1 = arith.constant 0 : i32
    return %c0_i32, %c0_i32_0 : i32, i32
  }
  func.func @transform_6(%arg0: i32) -> (i32, i32) {
    %c0_i32 = arith.constant 0 : i32
    %c0_i32_0 = arith.constant 0 : i32
    %c0_i32_1 = arith.constant 0 : i32
    return %c0_i32, %c0_i32_0 : i32, i32
  }
  func.func @transform_7(%arg0: i32) -> (i32, i32) {
    %c0_i32 = arith.constant 0 : i32
    %c0_i32_0 = arith.constant 0 : i32
    %c0_i32_1 = arith.constant 0 : i32
    return %c0_i32, %c0_i32_0 : i32, i32
  }
  func.func @transform_8(%arg0: i32) -> (i32, i32, i32) {
    %c0_i32 = arith.constant 0 : i32
    %c0_i32_0 = arith.constant 0 : i32
    %c0_i32_1 = arith.constant 0 : i32
    return %arg0, %c0_i32, %c0_i32_0 : i32, i32, i32
  }
  func.func @transform_9(%arg0: i32) -> (i32, i32, i32) {
    %c0_i32 = arith.constant 0 : i32
    %c0_i32_0 = arith.constant 0 : i32
    %c0_i32_1 = arith.constant 0 : i32
    %c0_i32_2 = arith.constant 0 : i32
    return %c0_i32, %c0_i32_0, %c0_i32_1 : i32, i32, i32
  }
}

</mosaic_0001>

<bundles_post_ra>
// kernel: nca_forward.1
= control target key start
LH: loop header
LB: loop body
LE: loop exit
PB: predicated region body
PF: predicated region fallthrough
CT: control target
= control target key end

     0   :  { %s10890_s0 = inlined_call_operand.vmem [shape: f32[8,8,128], index: 0, kind: input, shape index: {}]   ;;  %s10891_s1 = inlined_call_operand.hbm [shape: f32[49,128,128], index: 1, kind: input, shape index: {}]   ;;  %s10892_s2 = inlined_call_operand.hbm [shape: f32[256,512], index: 2, kind: input, shape index: {}]   ;;  %s10893_s3 = inlined_call_operand.hbm [shape: f32[1,512], index: 3, kind: input, shape index: {}]   ;;  %s10894_s4 = inlined_call_operand.hbm [shape: f32[1,512], index: 4, kind: input, shape index: {}]   ;;  %s10895_s5 = inlined_call_operand.hbm [shape: f32[1,512], index: 5, kind: input, shape index: {}]   ;;  %s10896_s6 = inlined_call_operand.hbm [shape: f32[512,512], index: 6, kind: input, shape index: {}]   ;;  %s10897_s7 = inlined_call_operand.hbm [shape: f32[512,128], index: 7, kind: input, shape index: {}]   ;;  %s10898_s8 = inlined_call_operand.hbm [shape: f32[2,64,128], index: 8, kind: input, shape index: {}]   ;;  %s10899_s9 = inlined_call_operand.vmem [shape: f32[8,8,128], index: 9, kind: output, shape index: {}]  }
   0x1   :  { %10938 = sst [smem:[#allocation47_spill]] %s10892_s2 }
   0x2   :  { %14 = vsyncpa [#allocation4], 0 }
   0x3   :  { %15 = vsyncpa [#allocation6], 0 }
   0x4   :  { %16 = vsyncpa [#allocation9], 0 }
   0x5   :  { %17 = vsyncpa [#allocation12], 0 }
   0x6   :  { %18 = vsyncpa [#allocation15], 0 }
   0x7   :  { %20 = vsyncpa [#allocation15 + $0x1], 0  ;;  %s7815_s30 = smov 0   ;;  %s7817_s10 = smov 0  }
   0x8   :  { %s7819_s11 = smov 0   ;;  %s7821_s12 = smov 0  }
   0x9 LB: > { %s10939_s2 = sld [smem:[#allocation47_spill]]  ;;  %s7839_s16 = sadd.s32 4294967295, %s7752_s12   ;;  %s7752_s12 = sphi %s7821_s12, %s11060_s12   ;;  %s7748_s11 = sphi %s7819_s11, %s11059_s11   ;;  %s7744_s10 = sphi %s7817_s10, %s11058_s10   ;;  %s7740_s30 = sphi %s7815_s30, %s11057_s30  }
   0xa   : > { %p6978_p0 = scmp.ge.s32.totalorder %s7752_s12, 1  ;;  %p215_p1 = scmp.eq.s32.totalorder %s7839_s16, 0 }
   0xb   : > { %p246_p2 = scmp.lt.s32.totalorder %s7752_s12, 3  ;;  %p6979_p3 = scmp.ne.s32.totalorder %s7839_s16, 0 }
   0xc   : > { %s7754_s18 = smov [#allocation5]   ;;  %s301_s22 = sshll.u32 %s10894_s4, 4  ;;  %s302_s22 = int_to_ptr.hbm [resolvable:$true] %s301_s22 }
   0xd   : > { %p7845_p4 = pnand %p6978_p0, %p246_p2  ;;  %s276_s19 = sshll.u32 %s7754_s18, 4  ;;  %s277_s19 = int_to_ptr.vmem [resolvable:$true] %s276_s19 }
   0xe   : > { %s324_s26 = sshll.u32 %s10896_s6, 4  ;;  %s7755_s27 = smov [#allocation8]   ;;  %s325_s26 = int_to_ptr.hbm [resolvable:$true] %s324_s26 }
   0xf   : > { %s274_s15 = sshll.u32 %s10939_s2, 4  ;;  %p7066_p5 = pneg %p7845_p4  ;;  %s275_s15 = int_to_ptr.hbm [resolvable:$true] %s274_s15 }
  0x10   : > { %s303_s28 = sshll.u32 %s7755_s27, 4  ;;  %s7756_s29 = smov 512   ;;  %s304_s28 = int_to_ptr.vmem [resolvable:$true] %s303_s28 }
  0x11   : > { %p7856_p6 = pnand %p7066_p5, %p215_p1  ;;  %s7757_s13 = smov 32  }
  0x12   : > { %s260_s20 = sshll.u32 %s10891_s1, 4  ;;  %s7758_s21 = smov [#allocation11]   ;;  %s261_s20 = int_to_ptr.hbm [resolvable:$true] %s260_s20 }
  0x13   : > { %7072 = dma.hbm_to_vmem [thread:$0]  (!%p7856_p6), %s275_s15, 16384, %s277_s19, [#allocation6], %s7756_s29, %s7756_s29, %s7757_s13  }
  0x14   : > { %7078 = dma.hbm_to_vmem [thread:$0]  (!%p7856_p6), %s302_s22, 64, %s304_s28, [#allocation9]  }
  0x15   : > { %s326_s2 = sshll.u32 %s7758_s21, 4  ;;  %s7759_s24 = smov [#allocation3]   ;;  %s327_s2 = int_to_ptr.vmem [resolvable:$true] %s326_s2 }
  0x16   : > { %7084 = dma.hbm_to_vmem [thread:$0]  (!%p7856_p6), %s325_s26, 32768, %s327_s2, [#allocation12], %s7756_s29, %s7756_s29, %s7757_s13  }
  0x17   : > { %s262_s25 = sshll.u32 %s7759_s24, 4  ;;  %s10900_s27 = smov 128   ;;  %s263_s25 = int_to_ptr.vmem [resolvable:$true] %s262_s25 }
  0x18   : > { %s7761_s15 = smov 8   ;;  %s289_s28 = sshll.u32 %s10893_s3, 4  ;;  %s290_s28 = int_to_ptr.hbm [resolvable:$true] %s289_s28 }
  0x19   : > { %7069 = dma.hbm_to_vmem [thread:$0]  (!%p7856_p6), %s261_s20, 100352, %s263_s25, [#allocation4], %s10900_s27, %s10900_s27, %s7761_s15  }
  0x1a   : > { %s7762_s14 = smov [#allocation7]   ;;  %s313_s13 = sshll.u32 %s10895_s5, 4  ;;  %s314_s13 = int_to_ptr.hbm [resolvable:$true] %s313_s13 }
  0x1b   : > { %s291_s2 = sshll.u32 %s7762_s14, 4  ;;  %s7763_s18 = smov [#allocation10]   ;;  %s292_s2 = int_to_ptr.vmem [resolvable:$true] %s291_s2 }
  0x1c   : > { %7075 = dma.hbm_to_vmem [thread:$0]  (!%p7856_p6), %s290_s28, 64, %s292_s2, [#allocation6]  }
  0x1d   : > { %s315_s20 = sshll.u32 %s7763_s18, 4  ;;  %s338_s25 = sshll.u32 %s10897_s7, 4  ;;  %s316_s20 = int_to_ptr.vmem [resolvable:$true] %s315_s20  ;;  %s339_s25 = int_to_ptr.hbm [resolvable:$true] %s338_s25 }
  0x1e   : > { %7081 = dma.hbm_to_vmem [thread:$0]  (!%p7856_p6), %s314_s13, 64, %s316_s20, [#allocation9]  }
  0x1f   : > { %s7764_s19 = smov [#allocation13]   ;;  %s7896_s28 = sadd.s32 1, %s7752_s12  }
  0x20   : > { %s340_s22 = sshll.u32 %s7764_s19, 4  ;;  %s198_s14 = ssub.s32 %s7752_s12, %s7896_s28  ;;  %s341_s22 = int_to_ptr.vmem [resolvable:$true] %s340_s22 }
  0x21   : > { %7087 = dma.hbm_to_vmem [thread:$0]  (!%p7856_p6), %s339_s25, 8192, %s341_s22, [#allocation12], %s10900_s27, %s10900_s27, %s7761_s15  }
  0x22   : > { %s201_s2 = sadd.s32 1, %s7748_s11  ;;  %p199_p7 = scmp.eq.s32.totalorder %s198_s14, 0 }
  0x23   : > { %p208_p8 = scmp.ne.s32.totalorder %s7748_s11, %s7744_s10  ;;  %p209_p9 = scmp.eq.s32.totalorder %s7752_s12, 0 }
  0x24   : > { %p214_p10 = scmp.ne.s32.totalorder %s7744_s10, %s7740_s30  ;;  %p7099_p13 = scmp.lt.s32.totalorder %s7752_s12, 2 }
  0x25   : > { %s7907_s26 = scalar_select %p199_p7, %s7748_s11, %s201_s2  }
  0x26   : > { %p210_p11 = por %p209_p9, %p208_p8  ;;  %p7911_p12 = por %p215_p1, %p214_p10 }
  0x27   : > { %s354_s23 = sand.u32 1, %s7748_s11   ;;  %s7003_s18 = sshll.u32 %s7752_s12, 6 }
  0x28   : > { %s6987_s13 = sshll.u32 %s354_s23, 6  ;;  %s363_s24 = scalar_lea.hbm %s10898_s8, %s7003_s18 }
  0x29   : > { %s358_s25 = scalar_lea.vmem [#allocation14], %s6987_s13  ;;  %s364_s22 = sshll.u32 %s363_s24, 4  ;;  %s365_s22 = int_to_ptr.hbm [resolvable:$true] %s364_s22 }
  0x2a   : > { %s366_s19 = sshll.u32 %s358_s25, 4  ;;  %p7921_p0 = pnand %p7099_p13, %p210_p11  ;;  %s367_s19 = int_to_ptr.vmem [resolvable:$true] %s366_s19 }
  0x2b   : > { %s355_s14 = scalar_lea.sflag [#allocation15], %s354_s23  ;;  %s7672_s2 = sshra.s32 %s365_s22, 4  ;;  %s7673_s2 = int_to_ptr.hbm [resolvable:$true] %s7672_s2 }
  0x2c   : > { %s7674_s27 = scalar_lea.hbm %s7673_s2, 64  ;;  %p7676_p5 = pneg %p7921_p0 }
  0x2d   : > { %p7675_p2 = scmp.ne.s32.totalorder %s7673_s2, %s7674_s27  ;;  %s7679_s18 = scalar_lea.hbm %s10898_s8, 128 }
  0x2e   : > { %p7680_p8 = scmp.lt.s32.totalorder %s7673_s2, %s10898_s8  ;;  %p7681_p9 = scmp.lt.s32.totalorder %s7679_s18, %s7674_s27 }
  0x2f   : > { %p7677_p6 = pnand %p7676_p5, %p7675_p2 }
  0x30   : > { %p7682_p10 = por %p7681_p9, %p7680_p8 }
  0x31   : > { %p7678_p7 = pneg %p7677_p6 }
  0x33   : > { %p7683_p11 = pnand %p7682_p10, %p7678_p7 }
  0x35   : > { %7686 = shalt.err (!%p7683_p11)
}
  0x36   : > { %s10944_s23 = smov 128   ;;  %378 = sbr.rel (%p7845_p4) target bundleno = 2233 (0x8b9), region = 56 }
  0x37   : > { %7091 = dma.hbm_to_vmem [thread:$0]  (!%p7921_p0), %s365_s22, 1024, %s367_s19, %s355_s14, %s10944_s23, %s10944_s23, %s7761_s15  }
  0x3b   : > { %7719 = dma.done.wait (%p215_p1), [#allocation4], 100352  }
  0x3c   : > { %7721 = vsyncadd (%p215_p1), [#allocation4], 4294866944 }
  0x3d   : > { %7723 = dma.done.wait (%p215_p1), [#allocation6], 16448  }
  0x3e   : > { %7725 = vsyncadd (%p215_p1), [#allocation6], 4294950848 }
  0x3f   : > { %7727 = dma.done.wait (%p215_p1), [#allocation9], 128  }
  0x40   : > { %7729 = vsyncadd (%p215_p1), [#allocation9], 4294967168 }
  0x41   : > { %7731 = dma.done.wait (%p215_p1), [#allocation12], 40960  }
  0x42   : > { %7733 = vsyncadd (%p215_p1), [#allocation12], 4294926336  ;;  %s415_s17 = sand.u32 1, %s7744_s10  }
  0x43   : > { %s6998_s27 = sshll.u32 %s415_s17, 6  ;;  %s416_s15 = scalar_lea.sflag [#allocation15], %s415_s17 }
  0x44   : > { %s7957_s24 = scalar_lea.vmem [#allocation14], %s6998_s27 }
  0x45   : > { %7735 = dma.done.wait (%p7911_p12), %s416_s15, 1024  }
  0x46   : > { %7737 = vsyncadd (%p7911_p12), %s416_s15, 4294966272  ;;  %453 = sbr.rel (%p6979_p3) target bundleno = 84 (0x54), region = 92 }
  0x4b   : > { %v454_v0 = vld [vmem:[%s10890_s0] sm:$0xff]  ;;  %v455_v1 = vld [vmem:[%s10890_s0 + $0x8] sm:$0xff]  ;;  %v456_v2 = vld [vmem:[%s10890_s0 + $0x10] sm:$0xff] }
  0x4c   : > { %463 = vst [vmem:[#allocation2 + $0x33] sm:$0xff] %v454_v0  ;;  %v457_v3 = vld [vmem:[%s10890_s0 + $0x18] sm:$0xff]  ;;  %v458_v4 = vld [vmem:[%s10890_s0 + $0x20] sm:$0xff]  ;;  %v459_v5 = vld [vmem:[%s10890_s0 + $0x28] sm:$0xff] }
  0x4d   : > { %464 = vst [vmem:[#allocation2 + $0x43] sm:$0xff] %v455_v1  ;;  %v460_v6 = vld [vmem:[%s10890_s0 + $0x30] sm:$0xff]  ;;  %v461_v7 = vld [vmem:[%s10890_s0 + $0x38] sm:$0xff] }
  0x4e   : > { %465 = vst [vmem:[#allocation2 + $0x53] sm:$0xff] %v456_v2 }
  0x4f   : > { %466 = vst [vmem:[#allocation2 + $0x63] sm:$0xff] %v457_v3 }
  0x50   : > { %467 = vst [vmem:[#allocation2 + $0x73] sm:$0xff] %v458_v4 }
  0x51   : > { %468 = vst [vmem:[#allocation2 + $0x83] sm:$0xff] %v459_v5 }
  0x52   : > { %469 = vst [vmem:[#allocation2 + $0x93] sm:$0xff] %v460_v6 }
  0x53   : > { %470 = vst [vmem:[#allocation2 + $0xa3] sm:$0xff] %v461_v7 }
  0x54 PF: > { %v659_v8 = vld [vmem:[#allocation3 + $0xf8] sm:$0xff]  ;;  %v658_v9 = vld [vmem:[#allocation3 + $0xf0] sm:$0xff]  ;;  %v657_v10 = vld [vmem:[#allocation3 + $0xe8] sm:$0xff]  ;;  %vm6474_vm5 = vcmask 1040384   ;;  %vm6476_vm13 = vcmask 1042434   ;;  %vm6478_vm14 = vcmask 1041408  }
  0x55   : > { %7004 = vmatpush.msra.mxu1 %v659_v8  ;;  %660 = vmatpush.msra.mxu0 %v659_v8  ;;  %v656_v11 = vld [vmem:[#allocation3 + $0xe0] sm:$0xff]  ;;  %v655_v12 = vld [vmem:[#allocation3 + $0xd8] sm:$0xff]  ;;  %v765_v14 = vld [vmem:[#allocation3 + $0x170] sm:$0xff]  ;;  %p7000_p1 = scmp.ne.s32.totalorder %s7839_s16, 1 }
  0x56   : > { %v766_v13 = vld [vmem:[#allocation3 + $0x178] sm:$0xff]  ;;  %v505_v16 = vld [vmem:[#allocation2 + $0x45] sm:$0x1]  ;;  %v537_v17 = vld [vmem:[#allocation2 + $0x44] sm:$0x1] }
  0x57   : > { %7005 = vmatpush.msra.mxu1 %v658_v9  ;;  %661 = vmatpush.msra.mxu0 %v658_v9  ;;  %v840_v15 = vld [vmem:[#allocation3 + $0x1f8] sm:$0xff]  ;;  %513 = vst [vmem:[#allocation2 + $0x41] sm:$0x1] %v505_v16  ;;  %v764_v18 = vld [vmem:[#allocation3 + $0x168] sm:$0xff]  ;;  %v839_v19 = vld [vmem:[#allocation3 + $0x1f0] sm:$0xff] }
  0x58   : > { %767 = vmatpush.msra.mxu2 %v766_v13  ;;  %v654_v20 = vld [vmem:[#allocation3 + $0xd0] sm:$0xff]  ;;  %841 = vmatpush.msra.mxu3 %v840_v15  ;;  %545 = vst [vmem:[#allocation2 + $0x42] sm:$0x1] %v537_v17  ;;  %v653_v21 = vld [vmem:[#allocation3 + $0xc8] sm:$0xff]  ;;  %v763_v22 = vld [vmem:[#allocation3 + $0x160] sm:$0xff] }
  0x59   : > { %7006 = vmatpush.msra.mxu1 %v657_v10  ;;  %662 = vmatpush.msra.mxu0 %v657_v10  ;;  %v838_v23 = vld [vmem:[#allocation3 + $0x1e8] sm:$0xff]  ;;  %v475_v24 = vld [vmem:[#allocation2 + $0x66] sm:$0x1]  ;;  %v507_v26 = vld [vmem:[#allocation2 + $0x65] sm:$0x1] }
  0x5a   : > { %768 = vmatpush.msra.mxu2 %v765_v14  ;;  %842 = vmatpush.msra.mxu3 %v839_v19  ;;  %v491_v25 = vld [vmem:[#allocation2 + $0x69] sm:$0x1]  ;;  %v762_v27 = vld [vmem:[#allocation3 + $0x158] sm:$0xff]  ;;  %v837_v28 = vld [vmem:[#allocation3 + $0x1e0] sm:$0xff]  ;;  %483 = vst [vmem:[#allocation2 + $0x60] sm:$0x1] %v475_v24 }
  0x5b   : > { %7007 = vmatpush.msra.mxu1 %v656_v11  ;;  %663 = vmatpush.msra.mxu0 %v656_v11  ;;  %v523_v29 = vld [vmem:[#allocation2 + $0x68] sm:$0x1]  ;;  %v652_v30 = vld [vmem:[#allocation3 + $0xc0] sm:$0xff]  ;;  %499 = vst [vmem:[#allocation2 + $0x6b] sm:$0x1] %v491_v25  ;;  %v761_v33 = vld [vmem:[#allocation3 + $0x150] sm:$0xff] }
  0x5c   : > { %769 = vmatpush.msra.mxu2 %v764_v18  ;;  %843 = vmatpush.msra.mxu3 %v838_v23  ;;  %v539_v31 = vld [vmem:[#allocation2 + $0x64] sm:$0x1]  ;;  %515 = vst [vmem:[#allocation2 + $0x61] sm:$0x1] %v507_v26  ;;  %v555_v32 = vld [vmem:[#allocation2 + $0x67] sm:$0x1] }
  0x5d   : > { %7008 = vmatpush.msra.mxu1 %v655_v12  ;;  %664 = vmatpush.msra.mxu0 %v655_v12  ;;  %v836_v34 = vld [vmem:[#allocation3 + $0x1d8] sm:$0xff]  ;;  %531 = vst [vmem:[#allocation2 + $0x6c] sm:$0x1] %v523_v29  ;;  %v506_v36 = vld [vmem:[#allocation2 + $0x55] sm:$0x1]  ;;  %v760_v38 = vld [vmem:[#allocation3 + $0x148] sm:$0xff] }
  0x5e   : > { %770 = vmatpush.msra.mxu2 %v763_v22  ;;  %v651_v35 = vld [vmem:[#allocation3 + $0xb8] sm:$0xff]  ;;  %844 = vmatpush.msra.mxu3 %v837_v28  ;;  %547 = vst [vmem:[#allocation2 + $0x62] sm:$0x1] %v539_v31  ;;  %v538_v37 = vld [vmem:[#allocation2 + $0x54] sm:$0x1]  ;;  %v649_v41 = vld [vmem:[#allocation3 + $0xa8] sm:$0xff] }
  0x5f   : > { %7009 = vmatpush.msra.mxu1 %v654_v20  ;;  %665 = vmatpush.msra.mxu0 %v654_v20  ;;  %v835_v39 = vld [vmem:[#allocation3 + $0x1d0] sm:$0xff]  ;;  %563 = vst [vmem:[#allocation2 + $0x6d] sm:$0x1] %v555_v32  ;;  %v759_v42 = vld [vmem:[#allocation3 + $0x140] sm:$0xff]  ;;  %v834_v43 = vld [vmem:[#allocation3 + $0x1c8] sm:$0xff] }
  0x60   : > { %771 = vmatpush.msra.mxu2 %v762_v27  ;;  %v650_v40 = vld [vmem:[#allocation3 + $0xb0] sm:$0xff]  ;;  %845 = vmatpush.msra.mxu3 %v836_v34  ;;  %514 = vst [vmem:[#allocation2 + $0x51] sm:$0x1] %v506_v36  ;;  %v758_v44 = vld [vmem:[#allocation3 + $0x138] sm:$0xff]  ;;  %v833_v45 = vld [vmem:[#allocation3 + $0x1c0] sm:$0xff] }
  0x61   : > { %7010 = vmatpush.msra.mxu1 %v653_v21  ;;  %666 = vmatpush.msra.mxu0 %v653_v21  ;;  %546 = vst [vmem:[#allocation2 + $0x52] sm:$0x1] %v538_v37  ;;  %v474_v46 = vld [vmem:[#allocation2 + $0x56] sm:$0x1]  ;;  %v490_v47 = vld [vmem:[#allocation2 + $0x59] sm:$0x1] }
  0x62   : > { %772 = vmatpush.msra.mxu2 %v761_v33  ;;  %846 = vmatpush.msra.mxu3 %v835_v39  ;;  %482 = vst [vmem:[#allocation2 + $0x50] sm:$0x1] %v474_v46  ;;  %v522_v48 = vld [vmem:[#allocation2 + $0x58] sm:$0x1]  ;;  %v648_v49 = vld [vmem:[#allocation3 + $0xa0] sm:$0xff]  ;;  %v757_v51 = vld [vmem:[#allocation3 + $0x130] sm:$0xff] }
  0x63   : > { %7011 = vmatpush.msra.mxu1 %v652_v30  ;;  %667 = vmatpush.msra.mxu0 %v652_v30  ;;  %498 = vst [vmem:[#allocation2 + $0x5b] sm:$0x1] %v490_v47  ;;  %v554_v50 = vld [vmem:[#allocation2 + $0x57] sm:$0x1]  ;;  %v832_v52 = vld [vmem:[#allocation3 + $0x1b8] sm:$0xff]  ;;  %v756_v56 = vld [vmem:[#allocation3 + $0x128] sm:$0xff] }
  0x64   : > { %773 = vmatpush.msra.mxu2 %v760_v38  ;;  %847 = vmatpush.msra.mxu3 %v834_v43  ;;  %530 = vst [vmem:[#allocation2 + $0x5c] sm:$0x1] %v522_v48  ;;  %v647_v53 = vld [vmem:[#allocation3 + $0x98] sm:$0xff]  ;;  %v831_v57 = vld [vmem:[#allocation3 + $0x1b0] sm:$0xff]  ;;  %v645_v59 = vld [vmem:[#allocation3 + $0x88] sm:$0xff] }
  0x65   : > { %7012 = vmatpush.msra.mxu1 %v651_v35  ;;  %668 = vmatpush.msra.mxu0 %v651_v35  ;;  %v7989_v54 = vld [vmem:[#allocation2 + $0x60] sm:$0xff]  ;;  %562 = vst [vmem:[#allocation2 + $0x5d] sm:$0x1] %v554_v50  ;;  %v646_v58 = vld [vmem:[#allocation3 + $0x90] sm:$0xff]  ;;  %v830_v61 = vld [vmem:[#allocation3 + $0x1a8] sm:$0xff] }
  0x66   : > { %774 = vmatpush.msra.mxu2 %v759_v42  ;;  %848 = vmatpush.msra.mxu3 %v833_v45  ;;  %v570_v55 = vld [vmem:[#allocation2 + $0x68] sm:$0x3f]  ;;  %571 = vst [vmem:[#allocation2] sm:$0xff] %v7989_v54  ;;  %v755_v60 = vld [vmem:[#allocation3 + $0x120] sm:$0xff]  ;;  %v754_v0 = vld [vmem:[#allocation3 + $0x118] sm:$0xff] }
  0x67   : > { %7013 = vmatpush.msra.mxu1 %v650_v40  ;;  %669 = vmatpush.msra.mxu0 %v650_v40  ;;  %572 = vst [vmem:[#allocation2 + $0x8] sm:$0x3f] %v570_v55  ;;  %v644_v62 = vld [vmem:[#allocation3 + $0x80] sm:$0xff]  ;;  %v489_v3 = vld [vmem:[#allocation2 + $0x49] sm:$0x1]  ;;  %v634_v5 = vld [vmem:[#allocation3 + $0x78] sm:$0xff] }
  0x68   : > { %775 = vmatpush.msra.mxu2 %v758_v44  ;;  %849 = vmatpush.msra.mxu3 %v832_v52  ;;  %v829_v1 = vld [vmem:[#allocation3 + $0x1a0] sm:$0xff]  ;;  %v521_v6 = vld [vmem:[#allocation2 + $0x48] sm:$0x1]  ;;  %497 = vst [vmem:[#allocation2 + $0x4b] sm:$0x1] %v489_v3  ;;  %v914_v9 = vld [vmem:[#allocation3 + $0x278] sm:$0xff] }
  0x69   : > { %7014 = vmatpush.msra.mxu1 %v649_v41  ;;  %670 = vmatpush.msra.mxu0 %v649_v41  ;;  %v7992_v63 = vld [vmem:[#allocation2 + $0x50] sm:$0xff]  ;;  %v473_v2 = vld [vmem:[#allocation2 + $0x46] sm:$0x1]  ;;  %v553_v8 = vld [vmem:[#allocation2 + $0x47] sm:$0x1] }
  0x6a   : > { %776 = vmatpush.msra.mxu2 %v757_v51  ;;  %850 = vmatpush.msra.mxu3 %v831_v57  ;;  %583 = vst [vmem:[#allocation2 + $0x10] sm:$0xff] %v7992_v63  ;;  %v7995_v4 = vld [vmem:[#allocation2 + $0x41] sm:$0xff]  ;;  %v753_v10 = vld [vmem:[#allocation3 + $0x110] sm:$0xff]  ;;  %v828_v13 = vld [vmem:[#allocation3 + $0x198] sm:$0xff] }
  0x6b   : > { %7015 = vmatpush.msra.mxu1 %v648_v49  ;;  %671 = vmatpush.msra.mxu0 %v648_v49  ;;  %481 = vst [vmem:[#allocation2 + $0x40] sm:$0x1] %v473_v2  ;;  %v508_v11 = vld [vmem:[#allocation2 + $0x75] sm:$0x1]  ;;  %v540_v14 = vld [vmem:[#allocation2 + $0x74] sm:$0x1] }
  0x6c   : > { %777 = vmatpush.msra.mxu2 %v756_v56  ;;  %851 = vmatpush.msra.mxu3 %v830_v61  ;;  %v581_v7 = vld [vmem:[#allocation2 + $0x58] sm:$0x3f]  ;;  %529 = vst [vmem:[#allocation2 + $0x4c] sm:$0x1] %v521_v6  ;;  %v633_v15 = vld [vmem:[#allocation3 + $0x70] sm:$0xff]  ;;  %v752_v17 = vld [vmem:[#allocation3 + $0x108] sm:$0xff] }
  0x6d   : > { %7016 = vmatpush.msra.mxu1 %v647_v53  ;;  %672 = vmatpush.msra.mxu0 %v647_v53  ;;  %584 = vst [vmem:[#allocation2 + $0x18] sm:$0x3f] %v581_v7  ;;  %v913_v16 = vld [vmem:[#allocation3 + $0x270] sm:$0xff]  ;;  %v632_v19 = vld [vmem:[#allocation3 + $0x68] sm:$0xff]  ;;  %v631_v20 = vld [vmem:[#allocation3 + $0x60] sm:$0xff] }
  0x6e   : > { %778 = vmatpush.msra.mxu2 %v755_v60  ;;  %852 = vmatpush.msra.mxu3 %v829_v1  ;;  %v635_v12 = vld [vmem:[#allocation2 + $0x1] sm:$0xff]  ;;  %561 = vst [vmem:[#allocation2 + $0x4d] sm:$0x1] %v553_v8  ;;  %v827_v18 = vld [vmem:[#allocation3 + $0x190] sm:$0xff]  ;;  %v630_v30 = vld [vmem:[#allocation3 + $0x58] sm:$0xff] }
  0x6f   : > { %7017 = vmatpush.msra.mxu1 %v646_v58  ;;  %673 = vmatpush.msra.mxu0 %v646_v58  ;;  %516 = vst [vmem:[#allocation2 + $0x71] sm:$0x1] %v508_v11  ;;  %v912_v21 = vld [vmem:[#allocation3 + $0x268] sm:$0xff]  ;;  %v751_v23 = vld [vmem:[#allocation3 + $0x100] sm:$0xff]  ;;  %v504_v26 = vld [vmem:[#allocation2 + $0x35] sm:$0x1] }
  0x70   : > { %779 = vmatpush.msra.mxu2 %v754_v0  ;;  %853 = vmatpush.msra.mxu3 %v828_v13  ;;  %548 = vst [vmem:[#allocation2 + $0x72] sm:$0x1] %v540_v14  ;;  %v826_v24 = vld [vmem:[#allocation3 + $0x188] sm:$0xff]  ;;  %v911_v25 = vld [vmem:[#allocation3 + $0x260] sm:$0xff]  ;;  %v536_v27 = vld [vmem:[#allocation2 + $0x34] sm:$0x1] }
  0x71   : > { %7018 = vmatpush.msra.mxu1 %v645_v59  ;;  %674 = vmatpush.msra.mxu0 %v645_v59  ;;  %v8001_v28 = vld [vmem:[#allocation2 + $0x51] sm:$0xff]  ;;  %512 = vst [vmem:[#allocation2 + $0x31] sm:$0x1] %v504_v26  ;;  %v742_v33 = vld [vmem:[#allocation2 + $0x2] sm:$0xff]  ;;  %v488_v2 = vld [vmem:[#allocation2 + $0x39] sm:$0x1] }
  0x72   : > { %780 = vmatpush.msra.mxu2 %v753_v10  ;;  %v7998_v22 = vld [vmem:[#allocation2 + $0x40] sm:$0xff]  ;;  %854 = vmatpush.msra.mxu3 %v827_v18  ;;  %v910_v31 = vld [vmem:[#allocation3 + $0x258] sm:$0xff]  ;;  %544 = vst [vmem:[#allocation2 + $0x32] sm:$0x1] %v536_v27  ;;  %v629_v35 = vld [vmem:[#allocation3 + $0x50] sm:$0xff] }
  0x73   : > { %7019 = vmatpush.msra.mxu1 %v644_v62  ;;  %675 = vmatpush.msra.mxu0 %v644_v62  ;;  %595 = vst [vmem:[#allocation2 + $0x20] sm:$0xff] %v7998_v22  ;;  %v825_v34 = vld [vmem:[#allocation3 + $0x180] sm:$0xff]  ;;  %v909_v36 = vld [vmem:[#allocation3 + $0x250] sm:$0xff]  ;;  %v1062_v37 = vld [vmem:[#allocation3 + $0x378] sm:$0xff] }
  0x74   : > { %688 = vmatmul.f32.vlgmr.msra.gmra.mxu1 %v7995_v4  ;;  %676 = vmatmul.f32.vlgmr.msra.gmra.mxu0 %v635_v12  ;;  %v8003_v29 = vld [vmem:[#allocation2 + $0x11] sm:$0xff]  ;;  %v816_v38 = vld [vmem:[#allocation2 + $0x3] sm:$0xff]  ;;  %496 = vst [vmem:[#allocation2 + $0x3b] sm:$0x1] %v488_v2 }
  0x75   : > { %701 = vmatpush.msrb.mxu1 %v634_v5  ;;  %915 = vmatpush.msrb.mxu0 %v914_v9  ;;  %v593_v32 = vld [vmem:[#allocation2 + $0x48] sm:$0x3f]  ;;  %v1136_v41 = vld [vmem:[#allocation3 + $0x3f8] sm:$0xff]  ;;  %v1061_v42 = vld [vmem:[#allocation3 + $0x370] sm:$0xff] }
  0x76   : > { %781 = vmatpush.msra.mxu2 %v752_v17  ;;  %855 = vmatpush.msra.mxu3 %v826_v24  ;;  %596 = vst [vmem:[#allocation2 + $0x28] sm:$0x3f] %v593_v32  ;;  %v628_v39 = vld [vmem:[#allocation3 + $0x48] sm:$0xff]  ;;  %v627_v43 = vld [vmem:[#allocation3 + $0x40] sm:$0xff]  ;;  %v626_v46 = vld [vmem:[#allocation3 + $0x38] sm:$0xff] }
  0x77   : > { %702 = vmatpush.msrb.mxu1 %v633_v15  ;;  %916 = vmatpush.msrb.mxu0 %v913_v16  ;;  %v908_v40 = vld [vmem:[#allocation3 + $0x248] sm:$0xff]  ;;  %v907_v44 = vld [vmem:[#allocation3 + $0x240] sm:$0xff]  ;;  %v906_v47 = vld [vmem:[#allocation3 + $0x238] sm:$0xff] }
  0x78   : > { %782 = vmatpush.msra.mxu2 %v751_v23  ;;  %856 = vmatpush.msra.mxu3 %v825_v34  ;;  %v8007_v45 = vld [vmem:[#allocation2 + $0x61] sm:$0xff]  ;;  %v1135_v49 = vld [vmem:[#allocation3 + $0x3f0] sm:$0xff]  ;;  %v622_v3 = vld [vmem:[#allocation3 + $0x18] sm:$0xff] }
  0x79   : > { %703 = vmatpush.msrb.mxu1 %v632_v19  ;;  %917 = vmatpush.msrb.mxu0 %v912_v21  ;;  %v8011_v50 = vld [vmem:[#allocation2 + $0x12] sm:$0xff]  ;;  %v1060_v53 = vld [vmem:[#allocation3 + $0x368] sm:$0xff]  ;;  %v1059_v59 = vld [vmem:[#allocation3 + $0x360] sm:$0xff] }
  0x7a   : > { %783 = vmatmul.f32.vlgmr.msra.gmra.mxu2 %v742_v33  ;;  %857 = vmatmul.f32.vlgmr.msra.gmra.mxu3 %v816_v38  ;;  %v625_v51 = vld [vmem:[#allocation3 + $0x30] sm:$0xff]  ;;  %v624_v56 = vld [vmem:[#allocation3 + $0x28] sm:$0xff]  ;;  %v623_v61 = vld [vmem:[#allocation3 + $0x20] sm:$0xff] }
  0x7b   : > { %704 = vmatpush.msrb.mxu1 %v631_v20  ;;  %918 = vmatpush.msrb.mxu0 %v911_v25  ;;  %v905_v52 = vld [vmem:[#allocation3 + $0x230] sm:$0xff]  ;;  %v904_v57 = vld [vmem:[#allocation3 + $0x228] sm:$0xff]  ;;  %v903_v62 = vld [vmem:[#allocation3 + $0x220] sm:$0xff] }
  0x7c   : > { %691 = vmatmul.f32.gmra.mxu1 %v8001_v28  ;;  %679 = vmatmul.f32.gmra.mxu0 %v8003_v29  ;;  %v8015_v55 = vld [vmem:[#allocation2 + $0x13] sm:$0xff]  ;;  %v1134_v58 = vld [vmem:[#allocation3 + $0x3e8] sm:$0xff]  ;;  %v1133_v6 = vld [vmem:[#allocation3 + $0x3e0] sm:$0xff] }
  0x7d   : > { %705 = vmatpush.msrb.mxu1 %v630_v30  ;;  %919 = vmatpush.msrb.mxu0 %v910_v31  ;;  %v8009_v48 = vld [vmem:[#allocation2 + $0x21] sm:$0xff]  ;;  %v472_v60 = vld [vmem:[#allocation2 + $0x36] sm:$0x1]  ;;  %v902_v5 = vld [vmem:[#allocation3 + $0x218] sm:$0xff] }
  0x7e   : > { %1063 = vmatpush.msrb.mxu2 %v1062_v37  ;;  %1137 = vmatpush.msrb.mxu3 %v1136_v41  ;;  %480 = vst [vmem:[#allocation2 + $0x30] sm:$0x1] %v472_v60  ;;  %v8019_v0 = vld [vmem:[#allocation2 + $0x71] sm:$0xff]  ;;  %v8023_v7 = vld [vmem:[#allocation2 + $0x22] sm:$0xff] }
  0x7f   : > { %706 = vmatpush.msrb.mxu1 %v629_v35  ;;  %920 = vmatpush.msrb.mxu0 %v909_v36  ;;  %v8021_v1 = vld [vmem:[#allocation2 + $0x31] sm:$0xff]  ;;  %v8027_v11 = vld [vmem:[#allocation2 + $0x23] sm:$0xff] }
  0x80   : > { %1064 = vmatpush.msrb.mxu2 %v1061_v42  ;;  %1138 = vmatpush.msrb.mxu3 %v1135_v49  ;;  %v621_v8 = vld [vmem:[#allocation3 + $0x10] sm:$0xff]  ;;  %v1058_v10 = vld [vmem:[#allocation3 + $0x358] sm:$0xff]  ;;  %v620_v12 = vld [vmem:[#allocation3 + $0x8] sm:$0xff] }
  0x81   : > { %707 = vmatpush.msrb.mxu1 %v628_v39  ;;  %921 = vmatpush.msrb.mxu0 %v908_v40  ;;  %v901_v9 = vld [vmem:[#allocation3 + $0x210] sm:$0xff]  ;;  %v900_v13 = vld [vmem:[#allocation3 + $0x208] sm:$0xff]  ;;  %v1132_v14 = vld [vmem:[#allocation3 + $0x3d8] sm:$0xff] }
  0x82   : > { %786 = vmatmul.f32.gmra.mxu2 %v8011_v50  ;;  %860 = vmatmul.f32.gmra.mxu3 %v8015_v55  ;;  %v1057_v15 = vld [vmem:[#allocation3 + $0x350] sm:$0xff]  ;;  %v619_v16 = vld [vmem:[#allocation3] sm:$0xff]  ;;  %v988_v19 = vld [vmem:[#allocation3 + $0x2f8] sm:$0xff] }
  0x83   : > { %708 = vmatpush.msrb.mxu1 %v627_v43  ;;  %922 = vmatpush.msrb.mxu0 %v907_v44  ;;  %v899_v17 = vld [vmem:[#allocation3 + $0x200] sm:$0xff]  ;;  %v1210_v20 = vld [vmem:[#allocation3 + $0x478] sm:$0xff]  ;;  %v1131_v21 = vld [vmem:[#allocation3 + $0x3d0] sm:$0xff] }
  0x84   : > { %694 = vmatmul.f32.gmra.mxu1 %v8007_v45  ;;  %682 = vmatmul.f32.gmra.mxu0 %v8009_v48  ;;  %v890_v18 = vld [vmem:[#allocation2 + $0x4] sm:$0xff]  ;;  %v8031_v23 = vld [vmem:[#allocation2 + $0x32] sm:$0xff] }
  0x85   : > { %709 = vmatpush.msrb.mxu1 %v626_v46  ;;  %923 = vmatpush.msrb.mxu0 %v906_v47  ;;  %v987_v24 = vld [vmem:[#allocation3 + $0x2f0] sm:$0xff]  ;;  %v1056_v26 = vld [vmem:[#allocation3 + $0x348] sm:$0xff]  ;;  %v1055_v33 = vld [vmem:[#allocation3 + $0x340] sm:$0xff] }
  0x86   : > { %1065 = vmatpush.msrb.mxu2 %v1060_v53  ;;  %1139 = vmatpush.msrb.mxu3 %v1134_v58  ;;  %v1209_v25 = vld [vmem:[#allocation3 + $0x470] sm:$0xff]  ;;  %v986_v30 = vld [vmem:[#allocation3 + $0x2e8] sm:$0xff]  ;;  %v985_v34 = vld [vmem:[#allocation3 + $0x2e0] sm:$0xff] }
  0x87   : > { %710 = vmatpush.msrb.mxu1 %v625_v51  ;;  %924 = vmatpush.msrb.mxu0 %v905_v52  ;;  %v8034_v27 = vld [vmem:[#allocation2 + $0x33] sm:$0xff]  ;;  %v1208_v31 = vld [vmem:[#allocation3 + $0x468] sm:$0xff]  ;;  %v1207_v35 = vld [vmem:[#allocation3 + $0x460] sm:$0xff] }
  0x88   : > { %1066 = vmatpush.msrb.mxu2 %v1059_v59  ;;  %1140 = vmatpush.msrb.mxu3 %v1133_v6  ;;  %v1130_v32 = vld [vmem:[#allocation3 + $0x3c8] sm:$0xff]  ;;  %v8038_v36 = vld [vmem:[#allocation2 + $0x14] sm:$0xff]  ;;  %v1129_v39 = vld [vmem:[#allocation3 + $0x3c0] sm:$0xff] }
  0x89   : > { %711 = vmatpush.msrb.mxu1 %v624_v56  ;;  %925 = vmatpush.msrb.mxu0 %v904_v57  ;;  %v984_v37 = vld [vmem:[#allocation3 + $0x2d8] sm:$0xff]  ;;  %v8040_v40 = vld [vmem:[#allocation2 + $0x42] sm:$0xff]  ;;  %v983_v41 = vld [vmem:[#allocation3 + $0x2d0] sm:$0xff] }
  0x8a   : > { %789 = vmatmul.f32.gmra.mxu2 %v8023_v7  ;;  %863 = vmatmul.f32.gmra.mxu3 %v8027_v11  ;;  %v1206_v38 = vld [vmem:[#allocation3 + $0x458] sm:$0xff]  ;;  %v1205_v42 = vld [vmem:[#allocation3 + $0x450] sm:$0xff]  ;;  %v8044_v44 = vld [vmem:[#allocation2 + $0x43] sm:$0xff] }
  0x8b   : > { %712 = vmatpush.msrb.mxu1 %v623_v61  ;;  %926 = vmatpush.msrb.mxu0 %v903_v62  ;;  %v1054_v43 = vld [vmem:[#allocation3 + $0x338] sm:$0xff]  ;;  %v982_v46 = vld [vmem:[#allocation3 + $0x2c8] sm:$0xff]  ;;  %v1053_v51 = vld [vmem:[#allocation3 + $0x330] sm:$0xff] }
  0x8c   : > { %697 = vmatmul.f32.gmra.mxu1 %v8019_v0  ;;  %685 = vmatmul.f32.gmra.mxu0 %v8021_v1  ;;  %v1128_v47 = vld [vmem:[#allocation3 + $0x3b8] sm:$0xff]  ;;  %v1204_v49 = vld [vmem:[#allocation3 + $0x448] sm:$0xff]  ;;  %v981_v52 = vld [vmem:[#allocation3 + $0x2c0] sm:$0xff] }
  0x8d   : > { %713 = vmatpush.msrb.mxu1 %v622_v3  ;;  %927 = vmatpush.msrb.mxu0 %v902_v5  ;;  %v1127_v53 = vld [vmem:[#allocation3 + $0x3b0] sm:$0xff]  ;;  %v8048_v56 = vld [vmem:[#allocation2 + $0x24] sm:$0xff]  ;;  %v980_v57 = vld [vmem:[#allocation3 + $0x2b8] sm:$0xff] }
  0x8e   : > { %1067 = vmatpush.msrb.mxu2 %v1058_v10  ;;  %1141 = vmatpush.msrb.mxu3 %v1132_v14  ;;  %v1203_v58 = vld [vmem:[#allocation3 + $0x440] sm:$0xff]  ;;  %v8050_v59 = vld [vmem:[#allocation2 + $0x52] sm:$0xff]  ;;  %v1126_v60 = vld [vmem:[#allocation3 + $0x3a8] sm:$0xff] }
  0x8f   : > { %714 = vmatpush.msrb.mxu1 %v621_v8  ;;  %928 = vmatpush.msrb.mxu0 %v901_v9  ;;  %v476_v61 = vld [vmem:[#allocation2 + $0x76] sm:$0x1]  ;;  %v1052_v2 = vld [vmem:[#allocation3 + $0x328] sm:$0xff]  ;;  %v1202_v5 = vld [vmem:[#allocation3 + $0x438] sm:$0xff] }
  0x90   : > { %1068 = vmatpush.msrb.mxu2 %v1057_v15  ;;  %1142 = vmatpush.msrb.mxu3 %v1131_v21  ;;  %v979_v62 = vld [vmem:[#allocation3 + $0x2b0] sm:$0xff]  ;;  %484 = vst [vmem:[#allocation2 + $0x70] sm:$0x1] %v476_v61  ;;  %v978_v6 = vld [vmem:[#allocation3 + $0x2a8] sm:$0xff]  ;;  %v1051_v8 = vld [vmem:[#allocation3 + $0x320] sm:$0xff] }
  0x91   : > { %715 = vmatpush.msrb.mxu1 %v620_v12  ;;  %929 = vmatpush.msrb.mxu0 %v900_v13  ;;  %v8054_v3 = vld [vmem:[#allocation2 + $0x53] sm:$0xff]  ;;  %v1125_v9 = vld [vmem:[#allocation3 + $0x3a0] sm:$0xff] }
  0x92   : > { %792 = vmatmul.f32.gmra.mxu2 %v8031_v23  ;;  %866 = vmatmul.f32.gmra.mxu3 %v8034_v27  ;;  %v1201_v10 = vld [vmem:[#allocation3 + $0x430] sm:$0xff]  ;;  %v977_v12 = vld [vmem:[#allocation3 + $0x2a0] sm:$0xff]  ;;  %v1050_v13 = vld [vmem:[#allocation3 + $0x318] sm:$0xff] }
  0x93   : > { %716 = vmatpush.msrb.mxu1 %v619_v16  ;;  %930 = vmatpush.msrb.mxu0 %v899_v17  ;;  %v8058_v14 = vld [vmem:[#allocation2 + $0x30] sm:$0xff]  ;;  %v492_v16 = vld [vmem:[#allocation2 + $0x79] sm:$0x1] }
  0x94   : > { %717 = vmatmul.f32.vlgmr.msrb.gmra.mxu1 %v7989_v54  ;;  %931 = vmatmul.f32.vlgmr.msrb.gmra.mxu0 %v890_v18  ;;  %v8060_v15 = vld [vmem:[#allocation2 + $0x34] sm:$0xff]  ;;  %v1200_v18 = vld [vmem:[#allocation3 + $0x428] sm:$0xff]  ;;  %500 = vst [vmem:[#allocation2 + $0x7b] sm:$0x1] %v492_v16 }
  0x95   : > { %989 = vmatpush.msra.mxu1 %v988_v19  ;;  %1211 = vmatpush.msra.mxu0 %v1210_v20  ;;  %v1124_v17 = vld [vmem:[#allocation3 + $0x398] sm:$0xff]  ;;  %v8062_v19 = vld [vmem:[#allocation2 + $0x62] sm:$0xff]  ;;  %v1049_v21 = vld [vmem:[#allocation3 + $0x310] sm:$0xff] }
  0x96   : > { %1069 = vmatpush.msrb.mxu2 %v1056_v26  ;;  %1143 = vmatpush.msrb.mxu3 %v1130_v32  ;;  %v976_v20 = vld [vmem:[#allocation3 + $0x298] sm:$0xff]  ;;  %v1199_v26 = vld [vmem:[#allocation3 + $0x420] sm:$0xff]  ;;  %v1122_v32 = vld [vmem:[#allocation3 + $0x388] sm:$0xff] }
  0x97   : > { %990 = vmatpush.msra.mxu1 %v987_v24  ;;  %1212 = vmatpush.msra.mxu0 %v1209_v25  ;;  %v1123_v24 = vld [vmem:[#allocation3 + $0x390] sm:$0xff]  ;;  %v8066_v25 = vld [vmem:[#allocation2 + $0x63] sm:$0xff]  ;;  %v1428_v16 = vld [vmem:[#allocation3 + $0x5d8] sm:$0xff] }
  0x98   : > { %1070 = vmatpush.msrb.mxu2 %v1055_v33  ;;  %1144 = vmatpush.msrb.mxu3 %v1129_v39  ;;  %v1198_v33 = vld [vmem:[#allocation3 + $0x418] sm:$0xff]  ;;  %v1197_v39 = vld [vmem:[#allocation3 + $0x410] sm:$0xff] }
  0x99   : > { %991 = vmatpush.msra.mxu1 %v986_v30  ;;  %1213 = vmatpush.msra.mxu0 %v1208_v31  ;;  %v975_v30 = vld [vmem:[#allocation3 + $0x290] sm:$0xff]  ;;  %v1048_v31 = vld [vmem:[#allocation3 + $0x308] sm:$0xff] }
  0x9a   : > { %795 = vmatmul.f32.gmra.mxu2 %v8040_v40  ;;  %869 = vmatmul.f32.gmra.mxu3 %v8044_v44  ;;  %v8080_v61 = vld [vmem:[#allocation2 + $0x54] sm:$0xff] }
  0x9b   : > { %992 = vmatpush.msra.mxu1 %v985_v34  ;;  %1214 = vmatpush.msra.mxu0 %v1207_v35  ;;  %v974_v34 = vld [vmem:[#allocation3 + $0x288] sm:$0xff]  ;;  %v1047_v35 = vld [vmem:[#allocation3 + $0x300] sm:$0xff] }
  0x9c   : > { %720 = vmatmul.f32.gmra.mxu1 %v7992_v63  ;;  %934 = vmatmul.f32.gmra.mxu0 %v8038_v36 }
  0x9d   : > { %993 = vmatpush.msra.mxu1 %v984_v37  ;;  %1215 = vmatpush.msra.mxu0 %v1206_v38  ;;  %v8070_v37 = vld [vmem:[#allocation2 + $0x44] sm:$0xff] }
  0x9e   : > { %1071 = vmatpush.msrb.mxu2 %v1054_v43  ;;  %1145 = vmatpush.msrb.mxu3 %v1128_v47  ;;  %v1121_v38 = vld [vmem:[#allocation3 + $0x380] sm:$0xff]  ;;  %v1358_v43 = vld [vmem:[#allocation3 + $0x578] sm:$0xff] }
  0x9f   : > { %994 = vmatpush.msra.mxu1 %v983_v41  ;;  %1216 = vmatpush.msra.mxu0 %v1205_v42  ;;  %v8072_v41 = vld [vmem:[#allocation2 + $0x72] sm:$0xff]  ;;  %v973_v42 = vld [vmem:[#allocation3 + $0x280] sm:$0xff] }
  0xa0   : > { %1072 = vmatpush.msrb.mxu2 %v1053_v51  ;;  %1146 = vmatpush.msrb.mxu3 %v1127_v53  ;;  %v8076_v47 = vld [vmem:[#allocation2 + $0x73] sm:$0xff]  ;;  %v1195_v53 = vld [vmem:[#allocation3 + $0x400] sm:$0xff] }
  0xa1   : > { %995 = vmatpush.msra.mxu1 %v982_v46  ;;  %1217 = vmatpush.msra.mxu0 %v1204_v49  ;;  %v1196_v46 = vld [vmem:[#allocation3 + $0x408] sm:$0xff]  ;;  %v1284_v49 = vld [vmem:[#allocation3 + $0x4f8] sm:$0xff] }
  0xa2   : > { %798 = vmatmul.f32.gmra.mxu2 %v8050_v59  ;;  %1147 = vmatpush.msrb.mxu3 %v1126_v60  ;;  %v1432_v51 = vld [vmem:[#allocation3 + $0x5f8] sm:$0xff]  ;;  %v1356_v60 = vld [vmem:[#allocation3 + $0x568] sm:$0xff] }
  0xa3   : > { %996 = vmatpush.msra.mxu1 %v981_v52  ;;  %1218 = vmatpush.msra.mxu0 %v1203_v58  ;;  %v1357_v52 = vld [vmem:[#allocation3 + $0x570] sm:$0xff] }
  0xa4   : > { %723 = vmatmul.f32.gmra.mxu1 %v7998_v22  ;;  %937 = vmatmul.f32.gmra.mxu0 %v8048_v56  ;;  %v1431_v58 = vld [vmem:[#allocation3 + $0x5f0] sm:$0xff] }
  0xa5   : > { %997 = vmatpush.msra.mxu1 %v980_v57  ;;  %1073 = vmatpush.msrb.mxu2 %v1052_v2  ;;  %v1283_v57 = vld [vmem:[#allocation3 + $0x4f0] sm:$0xff]  ;;  %v1506_v2 = vld [vmem:[#allocation3 + $0x678] sm:$0xff] }
  0xa6   : > { %872 = vmatmul.f32.gmra.mxu3 %v8054_v3  ;;  %1219 = vmatpush.msra.mxu0 %v1202_v5  ;;  %v1038_v5 = vld [vmem:[#allocation2 + $0x6] sm:$0xff] }
  0xa7   : > { %998 = vmatpush.msra.mxu1 %v979_v62  ;;  %1074 = vmatpush.msrb.mxu2 %v1051_v8  ;;  %v1430_v62 = vld [vmem:[#allocation3 + $0x5e8] sm:$0xff]  ;;  %v1355_v8 = vld [vmem:[#allocation3 + $0x560] sm:$0xff] }
  0xa8   : > { %1148 = vmatpush.msrb.mxu3 %v1125_v9  ;;  %1220 = vmatpush.msra.mxu0 %v1201_v10  ;;  %v1429_v9 = vld [vmem:[#allocation3 + $0x5e0] sm:$0xff]  ;;  %v1505_v10 = vld [vmem:[#allocation3 + $0x670] sm:$0xff] }
  0xa9   : > { %999 = vmatpush.msra.mxu1 %v978_v6  ;;  %1075 = vmatpush.msrb.mxu2 %v1050_v13  ;;  %v1282_v6 = vld [vmem:[#allocation3 + $0x4e8] sm:$0xff]  ;;  %v1354_v13 = vld [vmem:[#allocation3 + $0x558] sm:$0xff] }
  0xaa   : > { %1149 = vmatpush.msrb.mxu3 %v1124_v17  ;;  %1221 = vmatpush.msra.mxu0 %v1200_v18  ;;  %v1504_v17 = vld [vmem:[#allocation3 + $0x668] sm:$0xff]  ;;  %v520_v18 = vld [vmem:[#allocation2 + $0x38] sm:$0x1] }
  0xab   : > { %1000 = vmatpush.msra.mxu1 %v977_v12  ;;  %801 = vmatmul.f32.gmra.mxu2 %v8062_v19  ;;  %v1281_v12 = vld [vmem:[#allocation3 + $0x4e0] sm:$0xff]  ;;  %528 = vst [vmem:[#allocation2 + $0x3c] sm:$0x1] %v520_v18 }
  0xac   : > { %726 = vmatmul.f32.gmra.mxu1 %v8058_v14  ;;  %940 = vmatmul.f32.gmra.mxu0 %v8060_v15  ;;  %v1347_v18 = vld [vmem:[#allocation3 + $0x520] sm:$0xff] }
  0xad   : > { %1001 = vmatpush.msra.mxu1 %v976_v20  ;;  %1076 = vmatpush.msrb.mxu2 %v1049_v21  ;;  %v552_v20 = vld [vmem:[#allocation2 + $0x37] sm:$0x1]  ;;  %v8085_v21 = vld [vmem:[#allocation2 + $0x64] sm:$0xff] }
  0xae   : > { %1150 = vmatpush.msrb.mxu3 %v1123_v24  ;;  %1222 = vmatpush.msra.mxu0 %v1199_v26  ;;  %560 = vst [vmem:[#allocation2 + $0x3d] sm:$0x1] %v552_v20  ;;  %v8087_v24 = vld [vmem:[#allocation2 + $0x16] sm:$0xff]  ;;  %v1421_v20 = vld [vmem:[#allocation3 + $0x5a0] sm:$0xff] }
  0xaf   : > { %875 = vmatmul.f32.gmra.mxu3 %v8066_v25  ;;  %1002 = vmatpush.msra.mxu1 %v975_v30  ;;  %v1280_v26 = vld [vmem:[#allocation3 + $0x4d8] sm:$0xff]  ;;  %v1353_v30 = vld [vmem:[#allocation3 + $0x550] sm:$0xff] }
  0xb0   : > { %1077 = vmatpush.msrb.mxu2 %v1048_v31  ;;  %1151 = vmatpush.msrb.mxu3 %v1122_v32  ;;  %v1427_v31 = vld [vmem:[#allocation3 + $0x5d0] sm:$0xff]  ;;  %v1503_v32 = vld [vmem:[#allocation3 + $0x660] sm:$0xff] }
  0xb1   : > { %1223 = vmatpush.msra.mxu0 %v1198_v33  ;;  %1003 = vmatpush.msra.mxu1 %v974_v34  ;;  %v1279_v33 = vld [vmem:[#allocation3 + $0x4d0] sm:$0xff]  ;;  %v1352_v34 = vld [vmem:[#allocation3 + $0x548] sm:$0xff] }
  0xb2   : > { %1078 = vmatpush.msrb.mxu2 %v1047_v35  ;;  %1152 = vmatpush.msrb.mxu3 %v1121_v38  ;;  %v1426_v35 = vld [vmem:[#allocation3 + $0x5c8] sm:$0xff]  ;;  %v1502_v38 = vld [vmem:[#allocation3 + $0x658] sm:$0xff] }
  0xb3   : > { %1224 = vmatpush.msra.mxu0 %v1197_v39  ;;  %804 = vmatmul.f32.gmra.mxu2 %v8072_v41  ;;  %v8093_v39 = vld [vmem:[#allocation2 + $0x70] sm:$0xff] }
  0xb4   : > { %729 = vmatmul.f32.gmra.mxu1 %v7998_v22  ;;  %943 = vmatmul.f32.gmra.mxu0 %v8070_v37 }
  0xb5   : > { %1004 = vmatpush.msra.mxu1 %v973_v42  ;;  %1359 = vmatpush.msra.mxu2 %v1358_v43  ;;  %v8095_v42 = vld [vmem:[#allocation2 + $0x74] sm:$0xff]  ;;  %v8097_v43 = vld [vmem:[#allocation2 + $0x26] sm:$0xff] }
  0xb6   : > { %1225 = vmatpush.msra.mxu0 %v1196_v46  ;;  %1433 = vmatpush.msra.mxu3 %v1432_v51  ;;  %v1278_v46 = vld [vmem:[#allocation3 + $0x4c8] sm:$0xff]  ;;  %v1425_v51 = vld [vmem:[#allocation3 + $0x5c0] sm:$0xff] }
  0xb7   : > { %878 = vmatmul.f32.gmra.mxu3 %v8076_v47  ;;  %1285 = vmatpush.msrb.mxu1 %v1284_v49  ;;  %v1351_v49 = vld [vmem:[#allocation3 + $0x540] sm:$0xff] }
  0xb8   : > { %1360 = vmatpush.msra.mxu2 %v1357_v52  ;;  %1226 = vmatpush.msra.mxu0 %v1195_v53  ;;  %v1501_v52 = vld [vmem:[#allocation3 + $0x650] sm:$0xff]  ;;  %v1277_v53 = vld [vmem:[#allocation3 + $0x4c0] sm:$0xff] }
  0xb9   : > { %1286 = vmatpush.msrb.mxu1 %v1283_v57  ;;  %1434 = vmatpush.msra.mxu3 %v1431_v58  ;;  %v1350_v57 = vld [vmem:[#allocation3 + $0x538] sm:$0xff]  ;;  %v964_v58 = vld [vmem:[#allocation2 + $0x5] sm:$0xff] }
  0xba   : > { %1361 = vmatpush.msra.mxu2 %v1356_v60  ;;  %1507 = vmatpush.msrb.mxu0 %v1506_v2  ;;  %v1424_v60 = vld [vmem:[#allocation3 + $0x5b8] sm:$0xff] }
  0xbb   : > { %1435 = vmatpush.msra.mxu3 %v1430_v62  ;;  %1079 = vmatmul.f32.vlgmr.msrb.gmra.mxu2 %v1038_v5  ;;  %v1500_v62 = vld [vmem:[#allocation3 + $0x648] sm:$0xff]  ;;  %v8103_v2 = vld [vmem:[#allocation2 + $0x36] sm:$0xff] }
  0xbc   : > { %732 = vmatmul.f32.gmra.mxu1 %v7992_v63  ;;  %946 = vmatmul.f32.gmra.mxu0 %v8080_v61  ;;  %v1276_v5 = vld [vmem:[#allocation3 + $0x4b8] sm:$0xff] }
  0xbd   : > { %1287 = vmatpush.msrb.mxu1 %v1282_v6  ;;  %1362 = vmatpush.msra.mxu2 %v1355_v8  ;;  %v1349_v6 = vld [vmem:[#allocation3 + $0x530] sm:$0xff] }
  0xbe   : > { %1436 = vmatpush.msra.mxu3 %v1429_v9  ;;  %1508 = vmatpush.msrb.mxu0 %v1505_v10  ;;  %v1423_v8 = vld [vmem:[#allocation3 + $0x5b0] sm:$0xff]  ;;  %v1499_v9 = vld [vmem:[#allocation3 + $0x640] sm:$0xff] }
  0xbf   : > { %1153 = vmatmul.f32.vlgmr.msrb.gmra.mxu3 %v7992_v63  ;;  %1288 = vmatpush.msrb.mxu1 %v1281_v12  ;;  %v1275_v10 = vld [vmem:[#allocation3 + $0x4b0] sm:$0xff] }
  0xc0   : > { %1363 = vmatpush.msra.mxu2 %v1354_v13  ;;  %1437 = vmatpush.msra.mxu3 %v1428_v16  ;;  %v8108_v12 = vld [vmem:[#allocation2 + $0x15] sm:$0xff]  ;;  %v1422_v13 = vld [vmem:[#allocation3 + $0x5a8] sm:$0xff] }
  0xc1   : > { %1509 = vmatpush.msrb.mxu0 %v1504_v17  ;;  %1289 = vmatpush.msrb.mxu1 %v1280_v26  ;;  %v1042_v16 = vld [vmem:[#allocation2 + $0x46] sm:$0xff]  ;;  %v1497_v26 = vld [vmem:[#allocation3 + $0x630] sm:$0xff] }
  0xc2   : > { %1364 = vmatpush.msra.mxu2 %v1353_v30  ;;  %1438 = vmatpush.msra.mxu3 %v1427_v31  ;;  %v1274_v17 = vld [vmem:[#allocation3 + $0x4a8] sm:$0xff]  ;;  %v1273_v30 = vld [vmem:[#allocation3 + $0x4a0] sm:$0xff]  ;;  %v524_v31 = vld [vmem:[#allocation2 + $0x78] sm:$0x1] }
  0xc3   : > { %1082 = vmatmul.f32.gmra.mxu2 %v8087_v24  ;;  %1510 = vmatpush.msrb.mxu0 %v1503_v32  ;;  %v556_v32 = vld [vmem:[#allocation2 + $0x77] sm:$0x1]  ;;  %532 = vst [vmem:[#allocation2 + $0x7c] sm:$0x1] %v524_v31 }
  0xc4   : > { %735 = vmatmul.f32.gmra.mxu1 %v7989_v54  ;;  %949 = vmatmul.f32.gmra.mxu0 %v8085_v21  ;;  %564 = vst [vmem:[#allocation2 + $0x7d] sm:$0x1] %v556_v32  ;;  %v1579_v31 = vld [vmem:[#allocation3 + $0x6f0] sm:$0xff]  ;;  %v1652_v32 = vld [vmem:[#allocation3 + $0x768] sm:$0xff] }
  0xc5   : > { %1290 = vmatpush.msrb.mxu1 %v1279_v33  ;;  %1365 = vmatpush.msra.mxu2 %v1352_v34  ;;  %v8113_v33 = vld [vmem:[#allocation2 + $0x25] sm:$0xff] }
  0xc6   : > { %1439 = vmatpush.msra.mxu3 %v1426_v35  ;;  %1511 = vmatpush.msrb.mxu0 %v1502_v38  ;;  %v1496_v34 = vld [vmem:[#allocation3 + $0x628] sm:$0xff]  ;;  %v477_v35 = vld [vmem:[#allocation2 + $0x86] sm:$0x1]  ;;  %v509_v38 = vld [vmem:[#allocation2 + $0x85] sm:$0x1] }
  0xc7   : > { %1156 = vmatmul.f32.gmra.mxu3 %v7998_v22  ;;  %1291 = vmatpush.msrb.mxu1 %v1278_v46  ;;  %v541_v46 = vld [vmem:[#allocation2 + $0x84] sm:$0x1]  ;;  %485 = vst [vmem:[#allocation2 + $0x80] sm:$0x1] %v477_v35  ;;  %v1726_v35 = vld [vmem:[#allocation3 + $0x7e8] sm:$0xff] }
  0xc8   : > { %1366 = vmatpush.msra.mxu2 %v1351_v49  ;;  %1440 = vmatpush.msra.mxu3 %v1425_v51  ;;  %v1043_v49 = vld [vmem:[#allocation2 + $0x56] sm:$0xff]  ;;  %517 = vst [vmem:[#allocation2 + $0x81] sm:$0x1] %v509_v38 }
  0xc9   : > { %1512 = vmatpush.msrb.mxu0 %v1501_v52  ;;  %1292 = vmatpush.msrb.mxu1 %v1277_v53  ;;  %v1272_v51 = vld [vmem:[#allocation3 + $0x498] sm:$0xff]  ;;  %v1419_v52 = vld [vmem:[#allocation3 + $0x590] sm:$0xff]  ;;  %v1495_v53 = vld [vmem:[#allocation3 + $0x620] sm:$0xff]  ;;  %549 = vst [vmem:[#allocation2 + $0x82] sm:$0x1] %v541_v46 }
  0xca   : > { %1367 = vmatpush.msra.mxu2 %v1350_v57  ;;  %1441 = vmatpush.msra.mxu3 %v1424_v60  ;;  %v1271_v57 = vld [vmem:[#allocation3 + $0x490] sm:$0xff]  ;;  %v1802_v38 = vld [vmem:[#allocation3 + $0x878] sm:$0xff]  ;;  %v1578_v46 = vld [vmem:[#allocation3 + $0x6e8] sm:$0xff] }
  0xcb   : > { %1085 = vmatmul.f32.gmra.mxu2 %v8097_v43  ;;  %1513 = vmatpush.msrb.mxu0 %v1500_v62  ;;  %v8118_v60 = vld [vmem:[#allocation2 + $0x35] sm:$0xff] }
  0xcc   : > { %738 = vmatmul.f32.gmra.mxu1 %v8093_v39  ;;  %952 = vmatmul.f32.gmra.mxu0 %v8095_v42  ;;  %v1494_v62 = vld [vmem:[#allocation3 + $0x618] sm:$0xff] }
  0xcd   : > { %1293 = vmatpush.msrb.mxu1 %v1276_v5  ;;  %1368 = vmatpush.msra.mxu2 %v1349_v6  ;;  %v1044_v5 = vld [vmem:[#allocation2 + $0x66] sm:$0xff] }
  0xce   : > { %1442 = vmatpush.msra.mxu3 %v1423_v8  ;;  %1514 = vmatpush.msrb.mxu0 %v1499_v9  ;;  %v1270_v6 = vld [vmem:[#allocation3 + $0x488] sm:$0xff]  ;;  %v1343_v8 = vld [vmem:[#allocation3 + $0x500] sm:$0xff] }
  0xcf   : > { %1159 = vmatmul.f32.gmra.mxu3 %v8058_v14  ;;  %v1348_v14 = vld [vmem:[#allocation3 + $0x528] sm:$0xff]  ;;  %1294 = vmatpush.msrb.mxu1 %v1275_v10  ;;  %v1417_v9 = vld [vmem:[#allocation3 + $0x580] sm:$0xff]  ;;  %v1493_v10 = vld [vmem:[#allocation3 + $0x610] sm:$0xff] }
  0xd0   : > { %1369 = vmatpush.msra.mxu2 %v1348_v14  ;;  %1443 = vmatpush.msra.mxu3 %v1422_v13  ;;  %v1269_v14 = vld [vmem:[#allocation3 + $0x480] sm:$0xff] }
  0xd1   : > { %1295 = vmatpush.msrb.mxu1 %v1274_v17  ;;  %v1728_v17 = vld [vmem:[#allocation3 + $0x7f8] sm:$0xff] }
  0xd2   : > { %1370 = vmatpush.msra.mxu2 %v1347_v18  ;;  %1444 = vmatpush.msra.mxu3 %v1421_v20  ;;  %v1045_v18 = vld [vmem:[#allocation2 + $0x76] sm:$0xff] }
  0xd3   : > { %1088 = vmatmul.f32.gmra.mxu2 %v8103_v2  ;;  %1296 = vmatpush.msrb.mxu1 %v1273_v30  ;;  %v1580_v20 = vld [vmem:[#allocation3 + $0x6f8] sm:$0xff]  ;;  %v8131_v30 = vld [vmem:[#allocation2 + $0x80] sm:$0xff] }
  0xd4   : > { %1005 = vmatmul.f32.vlgmr.msra.gmra.mxu1 %v964_v58  ;;  %1227 = vmatmul.f32.vlgmr.msra.gmra.mxu0 %v8003_v29  ;;  %v1498_v29 = vld [vmem:[#allocation3 + $0x638] sm:$0xff]  ;;  %v1344_v58 = vld [vmem:[#allocation3 + $0x508] sm:$0xff] }
  0xd5   : > { %1515 = vmatpush.msrb.mxu0 %v1498_v29  ;;  %1297 = vmatpush.msrb.mxu1 %v1272_v51  ;;  %v8125_v29 = vld [vmem:[#allocation2 + $0x45] sm:$0xff] }
  0xd6   : > { %v1725_v51 = vld [vmem:[#allocation3 + $0x7e0] sm:$0xff] }
  0xd7   : > { %1162 = vmatmul.f32.gmra.mxu3 %v7998_v22  ;;  %v1346_v22 = vld [vmem:[#allocation3 + $0x518] sm:$0xff]  ;;  %1516 = vmatpush.msrb.mxu0 %v1497_v26  ;;  %v1653_v26 = vld [vmem:[#allocation3 + $0x770] sm:$0xff] }
  0xd8   : > { %1371 = vmatpush.msra.mxu2 %v1346_v22  ;;  %1298 = vmatpush.msrb.mxu1 %v1271_v57  ;;  %v1727_v22 = vld [vmem:[#allocation3 + $0x7f0] sm:$0xff] }
  0xd9   : > { %1517 = vmatpush.msrb.mxu0 %v1496_v34  ;;  %v8136_v34 = vld [vmem:[#allocation2 + $0x55] sm:$0xff] }
  0xda   : > { %1299 = vmatpush.msrb.mxu1 %v1270_v6  ;;  %v1649_v6 = vld [vmem:[#allocation3 + $0x750] sm:$0xff] }
  0xdb   : > { %1091 = vmatmul.f32.gmra.mxu2 %v1042_v16  ;;  %1518 = vmatpush.msrb.mxu0 %v1495_v53  ;;  %v1492_v16 = vld [vmem:[#allocation3 + $0x608] sm:$0xff]  ;;  %v1650_v53 = vld [vmem:[#allocation3 + $0x758] sm:$0xff] }
  0xdc   : > { %1008 = vmatmul.f32.gmra.mxu1 %v8108_v12  ;;  %1230 = vmatmul.f32.gmra.mxu0 %v8009_v48  ;;  %v1420_v48 = vld [vmem:[#allocation3 + $0x598] sm:$0xff] }
  0xdd   : > { %1445 = vmatpush.msra.mxu3 %v1420_v48  ;;  %1519 = vmatpush.msrb.mxu0 %v1494_v62  ;;  %v1724_v62 = vld [vmem:[#allocation3 + $0x7d8] sm:$0xff] }
  0xde   : > { %1300 = vmatpush.msrb.mxu1 %v1269_v14  ;;  %v1648_v14 = vld [vmem:[#allocation3 + $0x748] sm:$0xff] }
  0xdf   : > { %1165 = vmatmul.f32.gmra.mxu3 %v7992_v63  ;;  %v1345_v63 = vld [vmem:[#allocation3 + $0x510] sm:$0xff]  ;;  %1520 = vmatpush.msrb.mxu0 %v1493_v10 }
  0xe0   : > { %1372 = vmatpush.msra.mxu2 %v1345_v63  ;;  %1446 = vmatpush.msra.mxu3 %v1419_v52  ;;  %v1801_v63 = vld [vmem:[#allocation3 + $0x870] sm:$0xff]  ;;  %v1577_v52 = vld [vmem:[#allocation3 + $0x6e0] sm:$0xff] }
  0xe1   : > { %1521 = vmatpush.msrb.mxu0 %v1492_v16  ;;  %1581 = vmatpush.msra.mxu1 %v1580_v20  ;;  %v1575_v10 = vld [vmem:[#allocation3 + $0x6d0] sm:$0xff]  ;;  %v1798_v20 = vld [vmem:[#allocation3 + $0x858] sm:$0xff] }
  0xe2   : > { %1373 = vmatpush.msra.mxu2 %v1344_v58  ;;  %v8146_v58 = vld [vmem:[#allocation2 + $0x65] sm:$0xff]  ;;  %v8156_v16 = vld [vmem:[#allocation2 + $0x75] sm:$0xff] }
  0xe3   : > { %1094 = vmatmul.f32.gmra.mxu2 %v1043_v49  ;;  %1582 = vmatpush.msra.mxu1 %v1579_v31  ;;  %v1651_v49 = vld [vmem:[#allocation3 + $0x760] sm:$0xff]  ;;  %v1797_v31 = vld [vmem:[#allocation3 + $0x850] sm:$0xff] }
  0xe4   : > { %1011 = vmatmul.f32.gmra.mxu1 %v8113_v33  ;;  %1233 = vmatmul.f32.gmra.mxu0 %v8021_v1  ;;  %v1418_v1 = vld [vmem:[#allocation3 + $0x588] sm:$0xff] }
  0xe5   : > { %1447 = vmatpush.msra.mxu3 %v1418_v1  ;;  %1374 = vmatpush.msra.mxu2 %v1343_v8  ;;  %v1723_v8 = vld [vmem:[#allocation3 + $0x7d0] sm:$0xff] }
  0xe6   : > { %1583 = vmatpush.msra.mxu1 %v1578_v46 }
  0xe7   : > { %1168 = vmatmul.f32.gmra.mxu3 %v7989_v54  ;;  %v1654_v54 = vld [vmem:[#allocation3 + $0x778] sm:$0xff] }
  0xe8   : > { %1448 = vmatpush.msra.mxu3 %v1417_v9  ;;  %1655 = vmatpush.msrb.mxu2 %v1654_v54  ;;  %v1799_v9 = vld [vmem:[#allocation3 + $0x860] sm:$0xff] }
  0xe9   : > { %1584 = vmatpush.msra.mxu1 %v1577_v52  ;;  %v1796_v52 = vld [vmem:[#allocation3 + $0x848] sm:$0xff] }
  0xea   : > { %1729 = vmatpush.msrb.mxu3 %v1728_v17  ;;  %1656 = vmatpush.msrb.mxu2 %v1653_v26 }
  0xeb   : > { %1097 = vmatmul.f32.gmra.mxu2 %v1044_v5  ;;  %v1800_v5 = vld [vmem:[#allocation3 + $0x868] sm:$0xff] }
  0xec   : > { %1014 = vmatmul.f32.gmra.mxu1 %v8118_v60  ;;  %1236 = vmatmul.f32.gmra.mxu0 %v7995_v4 }
  0xed   : > { %1730 = vmatpush.msrb.mxu3 %v1727_v22  ;;  %1657 = vmatpush.msrb.mxu2 %v1652_v32  ;;  %v1721_v22 = vld [vmem:[#allocation3 + $0x7c0] sm:$0xff] }
  0xee   : > { %v1573_v32 = vld [vmem:[#allocation3 + $0x6c0] sm:$0xff] }
  0xef   : > { %1171 = vmatmul.f32.gmra.mxu3 %v8093_v39  ;;  %v1491_v39 = vld [vmem:[#allocation3 + $0x600] sm:$0xff]  ;;  %1658 = vmatpush.msrb.mxu2 %v1651_v49 }
  0xf0   : > { %1522 = vmatpush.msrb.mxu0 %v1491_v39  ;;  %1731 = vmatpush.msrb.mxu3 %v1726_v35  ;;  %v1647_v39 = vld [vmem:[#allocation3 + $0x740] sm:$0xff]  ;;  %v1646_v35 = vld [vmem:[#allocation3 + $0x738] sm:$0xff] }
  0xf1   : > { %v8123_v13 = vpop.f32.mrf.mxu1  ;;  %v8127_v4 = vpop.f32.mrf.mxu0  ;;  %1659 = vmatpush.msrb.mxu2 %v1650_v53 }
  0xf2   : > { %1803 = vmatpush.msra.mxu0 %v1802_v38  ;;  %1732 = vmatpush.msrb.mxu3 %v1725_v51 }
  0xf3   : > { %1100 = vmatmul.f32.gmra.mxu2 %v1045_v18 }
  0xf4   : > { %1017 = vmatmul.f32.gmra.mxu1 %v8125_v29  ;;  %1239 = vmatmul.f32.gmra.mxu0 %v8001_v28 }
  0xf5   : > { %1804 = vmatpush.msra.mxu0 %v1801_v63  ;;  %1733 = vmatpush.msrb.mxu3 %v1724_v62  ;;  %v1720_v63 = vld [vmem:[#allocation3 + $0x7b8] sm:$0xff]  ;;  %v1645_v62 = vld [vmem:[#allocation3 + $0x730] sm:$0xff] }
  0xf6   : > { %1660 = vmatpush.msrb.mxu2 %v1649_v6 }
  0xf7   : > { %1174 = vmatmul.f32.gmra.mxu3 %v8131_v30  ;;  %1805 = vmatpush.msra.mxu0 %v1800_v5 }
  0xf8   : > { %1734 = vmatpush.msrb.mxu3 %v1723_v8  ;;  %1661 = vmatpush.msrb.mxu2 %v1648_v14  ;;  %v1644_v8 = vld [vmem:[#allocation3 + $0x728] sm:$0xff] }
  0xf9   : > { %v8134_v48 = vpop.f32.mrf.mxu1  ;;  %v8138_v28 = vpop.f32.mrf.mxu0  ;;  %1806 = vmatpush.msra.mxu0 %v1799_v9 }
  0xfa   : > { %1662 = vmatpush.msrb.mxu2 %v1647_v39  ;;  %v1793_v39 = vld [vmem:[#allocation3 + $0x830] sm:$0xff] }
  0xfb   : > { %1375 = vmatmul.f32.vlgmr.msra.gmra.mxu2 %v8015_v55  ;;  %1807 = vmatpush.msra.mxu0 %v1798_v20  ;;  %v1643_v20 = vld [vmem:[#allocation3 + $0x720] sm:$0xff] }
  0xfc   : > { %1020 = vmatmul.f32.gmra.mxu1 %v8136_v34  ;;  %1242 = vmatmul.f32.gmra.mxu0 %v8007_v45 }
  0xfd   : > { %v784_v45 = vpop.f32.mrf.mxu2  ;;  %v858_v55 = vpop.f32.mrf.mxu3  ;;  %1808 = vmatpush.msra.mxu0 %v1797_v31  ;;  %1663 = vmatpush.msrb.mxu2 %v1646_v35 }
  0xff   : > { %1449 = vmatmul.f32.vlgmr.msra.gmra.mxu3 %v8038_v36  ;;  %v1576_v36 = vld [vmem:[#allocation3 + $0x6d8] sm:$0xff]  ;;  %1809 = vmatpush.msra.mxu0 %v1796_v52  ;;  %v1715_v52 = vld [vmem:[#allocation3 + $0x790] sm:$0xff] }
 0x100   : > { %1585 = vmatpush.msra.mxu1 %v1576_v36  ;;  %1664 = vmatpush.msrb.mxu2 %v1645_v62  ;;  %v1795_v36 = vld [vmem:[#allocation3 + $0x840] sm:$0xff] }
 0x101   : > { %v8144_v57 = vpop.f32.mrf.mxu1  ;;  %v8148_v1 = vpop.f32.mrf.mxu0  ;;  %1810 = vmatpush.msra.mxu0 %v1795_v36  ;;  %v1790_v36 = vld [vmem:[#allocation3 + $0x818] sm:$0xff] }
 0x102   : > { %1586 = vmatpush.msra.mxu1 %v1575_v10  ;;  %1665 = vmatpush.msrb.mxu2 %v1644_v8  ;;  %v1566_v8 = vld [vmem:[#allocation3 + $0x688] sm:$0xff] }
 0x103   : > { %1378 = vmatmul.f32.gmra.mxu2 %v8027_v11  ;;  %v1722_v11 = vld [vmem:[#allocation3 + $0x7c8] sm:$0xff] }
 0x104   : > { %1023 = vmatmul.f32.gmra.mxu1 %v8146_v58  ;;  %1245 = vmatmul.f32.gmra.mxu0 %v8019_v0  ;;  %v8160_v0 = vld [vmem:[#allocation2 + $0x81] sm:$0xff] }
 0x105   : > { %v787_v18 = vpop.f32.mrf.mxu2  ;;  %v8162_v26 = vpop.f32.mrf.mxu3  ;;  %1735 = vmatpush.msrb.mxu3 %v1722_v11  ;;  %1666 = vmatpush.msrb.mxu2 %v1643_v20 }
 0x107   : > { %1452 = vmatmul.f32.gmra.mxu3 %v8048_v56  ;;  %v1574_v56 = vld [vmem:[#allocation3 + $0x6c8] sm:$0xff] }
 0x108   : > { %1587 = vmatpush.msra.mxu1 %v1574_v56  ;;  %1736 = vmatpush.msrb.mxu3 %v1721_v22 }
 0x109   : > { %v8154_v54 = vpop.f32.mrf.mxu1  ;;  %v8158_v17 = vpop.f32.mrf.mxu0 }
 0x10a   : > { %1588 = vmatpush.msra.mxu1 %v1573_v32  ;;  %1737 = vmatpush.msrb.mxu3 %v1720_v63  ;;  %v493_v32 = vld [vmem:[#allocation2 + $0x89] sm:$0x1]  ;;  %v1641_v63 = vld [vmem:[#allocation3 + $0x710] sm:$0xff] }
 0x10b   : > { %1381 = vmatmul.f32.gmra.mxu2 %v8034_v27  ;;  %501 = vst [vmem:[#allocation2 + $0x8b] sm:$0x1] %v493_v32  ;;  %v1948_v32 = vld [vmem:[#allocation3 + $0x968] sm:$0xff] }
 0x10c   : > { %1026 = vmatmul.f32.gmra.mxu1 %v8156_v16  ;;  %1248 = vmatmul.f32.gmra.mxu0 %v8160_v0 }
 0x10d   : > { %v8169_v51 = vpop.f32.mrf.mxu2  ;;  %v8171_v53 = vpop.f32.mrf.mxu3 }
 0x10f   : > { %1455 = vmatmul.f32.gmra.mxu3 %v8060_v15  ;;  %v1572_v15 = vld [vmem:[#allocation3 + $0x6b8] sm:$0xff] }
 0x110   : > { %1589 = vmatpush.msra.mxu1 %v1572_v15 }
 0x111   : > { %v718_v38 = vpop.f32.mrf.mxu1  ;;  %v932_v46 = vpop.f32.mrf.mxu0 }
 0x112   : > { %v719_v49 = vadd.f32 %v718_v38, %v8127_v4  ;;  %v1719_v4 = vld [vmem:[#allocation3 + $0x7b0] sm:$0xff]  ;;  %v1792_v38 = vld [vmem:[#allocation3 + $0x828] sm:$0xff] }
 0x113   : > { %1384 = vmatmul.f32.gmra.mxu2 %v8044_v44  ;;  %1738 = vmatpush.msrb.mxu3 %v1719_v4  ;;  %v1794_v44 = vld [vmem:[#allocation3 + $0x838] sm:$0xff] }
 0x114   : > { %v808_v27 = vadd.f32 %v784_v45, %v719_v49  ;;  %1301 = vmatmul.f32.vlgmr.msrb.gmra.mxu1 %v8011_v50  ;;  %1523 = vmatmul.f32.vlgmr.msrb.gmra.mxu0 %v8108_v12  ;;  %v1571_v45 = vld [vmem:[#allocation3 + $0x6b0] sm:$0xff]  ;;  %v1568_v49 = vld [vmem:[#allocation3 + $0x698] sm:$0xff] }
 0x115   : > { %1590 = vmatpush.msra.mxu1 %v1571_v45  ;;  %v8180_v10 = vpop.f32.mrf.mxu2  ;;  %v8182_v14 = vpop.f32.mrf.mxu3  ;;  %1811 = vmatpush.msra.mxu0 %v1794_v44 }
 0x116   : > { %v882_v5 = vadd.f32 %v858_v55, %v808_v27  ;;  %v1718_v55 = vld [vmem:[#allocation3 + $0x7a8] sm:$0xff]  ;;  %v1791_v27 = vld [vmem:[#allocation3 + $0x820] sm:$0xff] }
 0x117   : > { %1458 = vmatmul.f32.gmra.mxu3 %v8070_v37  ;;  %v1570_v37 = vld [vmem:[#allocation3 + $0x6a8] sm:$0xff]  ;;  %1812 = vmatpush.msra.mxu0 %v1793_v39  ;;  %v1949_v39 = vld [vmem:[#allocation3 + $0x970] sm:$0xff] }
 0x118   : > { %v8176_v6 = vadd.f32 %v932_v46, %v882_v5  ;;  %1739 = vmatpush.msrb.mxu3 %v1718_v55  ;;  %1591 = vmatpush.msra.mxu1 %v1570_v37  ;;  %v525_v5 = vld [vmem:[#allocation2 + $0x88] sm:$0x1] }
 0x119   : > { %v721_v50 = vpop.f32.mrf.mxu1  ;;  %v935_v9 = vpop.f32.mrf.mxu0  ;;  %1813 = vmatpush.msra.mxu0 %v1792_v38  ;;  %533 = vst [vmem:[#allocation2 + $0x8c] sm:$0x1] %v525_v5  ;;  %v2022_v38 = vld [vmem:[#allocation3 + $0x9e8] sm:$0xff]  ;;  %v1946_v5 = vld [vmem:[#allocation3 + $0x958] sm:$0xff] }
 0x11a   : > { %v722_v12 = vadd.f32 %v721_v50, %v8138_v28  ;;  %v1717_v28 = vld [vmem:[#allocation3 + $0x7a0] sm:$0xff] }
 0x11b   : > { %1387 = vmatmul.f32.gmra.mxu2 %v8054_v3  ;;  %1740 = vmatpush.msrb.mxu3 %v1717_v28  ;;  %v1716_v3 = vld [vmem:[#allocation3 + $0x798] sm:$0xff]  ;;  %v1639_v50 = vld [vmem:[#allocation3 + $0x700] sm:$0xff] }
 0x11c   : > { %v809_v11 = vadd.f32 %v787_v18, %v722_v12  ;;  %1304 = vmatmul.f32.gmra.mxu1 %v8023_v7  ;;  %1526 = vmatmul.f32.gmra.mxu0 %v8113_v33  ;;  %v1569_v18 = vld [vmem:[#allocation3 + $0x6a0] sm:$0xff]  ;;  %v1642_v7 = vld [vmem:[#allocation3 + $0x718] sm:$0xff]  ;;  %v1789_v12 = vld [vmem:[#allocation3 + $0x810] sm:$0xff] }
 0x11d   : > { %1592 = vmatpush.msra.mxu1 %v1569_v18  ;;  %1667 = vmatpush.msrb.mxu2 %v1642_v7  ;;  %v8194_v46 = vpop.f32.mrf.mxu3  ;;  %v8225_v18 = vld [vmem:[#allocation2 + $0x84] sm:$0xff] }
 0x11e   : > { %v883_v56 = vadd.f32 %v8162_v26, %v809_v11  ;;  %v8192_v26 = vpop.f32.mrf.mxu2  ;;  %1741 = vmatpush.msrb.mxu3 %v1716_v3  ;;  %1814 = vmatpush.msra.mxu0 %v1791_v27  ;;  %v1787_v7 = vld [vmem:[#allocation3 + $0x800] sm:$0xff] }
 0x11f   : > { %1461 = vmatmul.f32.gmra.mxu3 %v8080_v61  ;;  %1593 = vmatpush.msra.mxu1 %v1568_v49  ;;  %v1630_v49 = vld [vmem:[#allocation2 + $0x20] sm:$0xff] }
 0x120   : > { %v8188_v22 = vadd.f32 %v935_v9, %v883_v56  ;;  %1668 = vmatpush.msrb.mxu2 %v1641_v63  ;;  %1742 = vmatpush.msrb.mxu3 %v1715_v52  ;;  %v1713_v9 = vld [vmem:[#allocation3 + $0x780] sm:$0xff] }
 0x121   : > { %v724_v31 = vpop.f32.mrf.mxu1  ;;  %v938_v33 = vpop.f32.mrf.mxu0  ;;  %1815 = vmatpush.msra.mxu0 %v1790_v36  ;;  %v1341_v56 = vld [vmem:[#allocation2 + $0x83] sm:$0xff] }
 0x122   : > { %v725_v35 = vadd.f32 %v724_v31, %v8148_v1  ;;  %v2023_v31 = vld [vmem:[#allocation3 + $0x9f0] sm:$0xff]  ;;  %v1947_v52 = vld [vmem:[#allocation3 + $0x960] sm:$0xff]  ;;  %v2096_v36 = vld [vmem:[#allocation3 + $0xa68] sm:$0xff] }
 0x123   : > { %1390 = vmatmul.f32.gmra.mxu2 %v8066_v25  ;;  %v1714_v25 = vld [vmem:[#allocation3 + $0x788] sm:$0xff]  ;;  %1816 = vmatpush.msra.mxu0 %v1789_v12  ;;  %v2019_v12 = vld [vmem:[#allocation3 + $0x9d0] sm:$0xff] }
 0x124   : > { %v810_v61 = vadd.f32 %v8169_v51, %v725_v35  ;;  %1307 = vmatmul.f32.gmra.mxu1 %v8031_v23  ;;  %1529 = vmatmul.f32.gmra.mxu0 %v8118_v60  ;;  %v1567_v51 = vld [vmem:[#allocation3 + $0x690] sm:$0xff]  ;;  %v1640_v23 = vld [vmem:[#allocation3 + $0x708] sm:$0xff] }
 0x125   : > { %1594 = vmatpush.msra.mxu1 %v1567_v51  ;;  %1669 = vmatpush.msrb.mxu2 %v1640_v23  ;;  %v1704_v27 = vld [vmem:[#allocation2 + $0x21] sm:$0xff]  ;;  %v2097_v23 = vld [vmem:[#allocation3 + $0xa70] sm:$0xff] }
 0x126   : > { %v884_v1 = vadd.f32 %v8171_v53, %v810_v61  ;;  %v8205_v53 = vpop.f32.mrf.mxu2  ;;  %1743 = vmatpush.msrb.mxu3 %v1714_v25  ;;  %v2021_v51 = vld [vmem:[#allocation3 + $0x9e0] sm:$0xff]  ;;  %v2020_v25 = vld [vmem:[#allocation3 + $0x9d8] sm:$0xff] }
 0x127   : > { %1464 = vmatmul.f32.gmra.mxu3 %v8085_v21  ;;  %1595 = vmatpush.msra.mxu1 %v1566_v8 }
 0x128   : > { %v8201_v15 = vadd.f32 %v938_v33, %v884_v1  ;;  %1670 = vmatpush.msrb.mxu2 %v1639_v50  ;;  %1744 = vmatpush.msrb.mxu3 %v1713_v9  ;;  %v1874_v1 = vld [vmem:[#allocation3 + $0x8e8] sm:$0xff]  ;;  %v1872_v50 = vld [vmem:[#allocation3 + $0x8d8] sm:$0xff] }
 0x129   : > { %v727_v62 = vpop.f32.mrf.mxu1  ;;  %v941_v60 = vpop.f32.mrf.mxu0  ;;  %v8250_v9 = vld [vmem:[#allocation2 + $0x31] sm:$0xff] }
 0x12a   : > { %v728_v4 = vadd.f32 %v727_v62, %v8158_v17  ;;  %v8207_v45 = vpop.f32.mrf.mxu3 }
 0x12b   : > { %1393 = vmatmul.f32.gmra.mxu2 %v8076_v47  ;;  %v2024_v47 = vld [vmem:[#allocation3 + $0x9f8] sm:$0xff] }
 0x12c   : > { %v811_v21 = vadd.f32 %v8180_v10, %v728_v4  ;;  %1310 = vmatmul.f32.gmra.mxu1 %v8040_v40  ;;  %1532 = vmatmul.f32.gmra.mxu0 %v8125_v29  ;;  %v1565_v10 = vld [vmem:[#allocation3 + $0x680] sm:$0xff]  ;;  %v1950_v40 = vld [vmem:[#allocation3 + $0x978] sm:$0xff] }
 0x12d   : > { %1596 = vmatpush.msra.mxu1 %v1565_v10  ;;  %1951 = vmatpush.msra.mxu2 %v1950_v40  ;;  %v2095_v10 = vld [vmem:[#allocation3 + $0xa60] sm:$0xff] }
 0x12e   : > { %v885_v17 = vadd.f32 %v8182_v14, %v811_v21  ;;  %v8218_v37 = vpop.f32.mrf.mxu2  ;;  %v1788_v14 = vld [vmem:[#allocation3 + $0x808] sm:$0xff]  ;;  %2025 = vmatpush.msra.mxu3 %v2024_v47  ;;  %v1631_v21 = vld [vmem:[#allocation2 + $0x30] sm:$0xff] }
 0x12f   : > { %1467 = vmatmul.f32.gmra.mxu3 %v8095_v42  ;;  %1817 = vmatpush.msra.mxu0 %v1788_v14  ;;  %v1876_v42 = vld [vmem:[#allocation3 + $0x8f8] sm:$0xff] }
 0x130   : > { %v8214_v55 = vadd.f32 %v941_v60, %v885_v17  ;;  %1877 = vmatpush.msrb.mxu1 %v1876_v42  ;;  %1952 = vmatpush.msra.mxu2 %v1949_v39  ;;  %v1873_v60 = vld [vmem:[#allocation3 + $0x8e0] sm:$0xff]  ;;  %v1945_v17 = vld [vmem:[#allocation3 + $0x950] sm:$0xff] }
 0x131   : > { %v730_v44 = vpop.f32.mrf.mxu1  ;;  %v944_v29 = vpop.f32.mrf.mxu0  ;;  %1818 = vmatpush.msra.mxu0 %v1787_v7  ;;  %2026 = vmatpush.msra.mxu3 %v2023_v31  ;;  %v1632_v42 = vld [vmem:[#allocation2 + $0x40] sm:$0xff] }
 0x132   : > { %v731_v11 = vadd.f32 %v730_v44, %v8123_v13  ;;  %v8220_v20 = vpop.f32.mrf.mxu3  ;;  %1953 = vmatpush.msra.mxu2 %v1948_v32  ;;  %v1944_v44 = vld [vmem:[#allocation3 + $0x948] sm:$0xff]  ;;  %v1943_v7 = vld [vmem:[#allocation3 + $0x940] sm:$0xff]  ;;  %v2093_v32 = vld [vmem:[#allocation3 + $0xa50] sm:$0xff] }
 0x133   : > { %1396 = vmatmul.f32.gmra.mxu2 %v1341_v56  ;;  %2027 = vmatpush.msra.mxu3 %v2022_v38  ;;  %v2094_v56 = vld [vmem:[#allocation3 + $0xa58] sm:$0xff]  ;;  %v8268_v31 = vld [vmem:[#allocation2 + $0x41] sm:$0xff] }
 0x134   : > { %v812_v28 = vadd.f32 %v8192_v26, %v731_v11  ;;  %1313 = vmatmul.f32.gmra.mxu1 %v8050_v59  ;;  %1535 = vmatmul.f32.gmra.mxu0 %v8136_v34  ;;  %v1875_v59 = vld [vmem:[#allocation3 + $0x8f0] sm:$0xff] }
 0x135   : > { %1878 = vmatpush.msrb.mxu1 %v1875_v59  ;;  %1954 = vmatpush.msra.mxu2 %v1947_v52  ;;  %v2017_v59 = vld [vmem:[#allocation3 + $0x9c0] sm:$0xff] }
 0x136   : > { %v886_v13 = vadd.f32 %v8194_v46, %v812_v28  ;;  %v8232_v3 = vpop.f32.mrf.mxu2  ;;  %v2098_v46 = vld [vmem:[#allocation3 + $0xa78] sm:$0xff]  ;;  %2028 = vmatpush.msra.mxu3 %v2021_v51 }
 0x137   : > { %1470 = vmatmul.f32.gmra.mxu3 %v8225_v18  ;;  %2099 = vmatpush.msrb.mxu0 %v2098_v46  ;;  %v1778_v46 = vld [vmem:[#allocation2 + $0x22] sm:$0xff]  ;;  %v1868_v51 = vld [vmem:[#allocation3 + $0x8b8] sm:$0xff] }
 0x138   : > { %v8228_v33 = vadd.f32 %v944_v29, %v886_v13  ;;  %1879 = vmatpush.msrb.mxu1 %v1874_v1  ;;  %1955 = vmatpush.msra.mxu2 %v1946_v5  ;;  %v8256_v29 = vld [vmem:[#allocation2 + $0x82] sm:$0xff]  ;;  %v2015_v5 = vld [vmem:[#allocation3 + $0x9b0] sm:$0xff] }
 0x139   : > { %v733_v34 = vpop.f32.mrf.mxu1  ;;  %v947_v35 = vpop.f32.mrf.mxu0  ;;  %2100 = vmatpush.msrb.mxu0 %v2097_v23  ;;  %2029 = vmatpush.msra.mxu3 %v2020_v25  ;;  %v1870_v13 = vld [vmem:[#allocation3 + $0x8c8] sm:$0xff]  ;;  %v1941_v23 = vld [vmem:[#allocation3 + $0x930] sm:$0xff] }
 0x13a   : > { %v734_v26 = vadd.f32 %v733_v34, %v8134_v48  ;;  %v8234_v61 = vpop.f32.mrf.mxu3  ;;  %1880 = vmatpush.msrb.mxu1 %v1873_v60  ;;  %1956 = vmatpush.msra.mxu2 %v1945_v17  ;;  %v2092_v1 = vld [vmem:[#allocation3 + $0xa48] sm:$0xff]  ;;  %v8281_v60 = vld [vmem:[#allocation2 + $0x51] sm:$0xff] }
 0x13b   : > { %1671 = vmatmul.f32.vlgmr.msrb.gmra.mxu2 %v1630_v49  ;;  %2101 = vmatpush.msrb.mxu0 %v2096_v36  ;;  %v8287_v36 = vld [vmem:[#allocation2 + $0x32] sm:$0xff] }
 0x13c   : > { %v813_v63 = vadd.f32 %v8205_v53, %v734_v26  ;;  %1316 = vmatmul.f32.gmra.mxu1 %v8062_v19  ;;  %1538 = vmatmul.f32.gmra.mxu0 %v8146_v58  ;;  %v1942_v26 = vld [vmem:[#allocation3 + $0x938] sm:$0xff] }
 0x13d   : > { %1881 = vmatpush.msrb.mxu1 %v1872_v50  ;;  %2030 = vmatpush.msra.mxu3 %v2019_v12  ;;  %v2090_v50 = vld [vmem:[#allocation3 + $0xa38] sm:$0xff] }
 0x13e   : > { %v887_v48 = vadd.f32 %v8207_v45, %v813_v63  ;;  %v8243_v53 = vpop.f32.mrf.mxu2  ;;  %2102 = vmatpush.msrb.mxu0 %v2095_v10  ;;  %1957 = vmatpush.msra.mxu2 %v1944_v44  ;;  %v1866_v10 = vld [vmem:[#allocation3 + $0x8a8] sm:$0xff] }
 0x13f   : > { %1745 = vmatmul.f32.vlgmr.msrb.gmra.mxu3 %v1704_v27  ;;  %v1633_v27 = vld [vmem:[#allocation2 + $0x50] sm:$0xff]  ;;  %v8297_v44 = vld [vmem:[#allocation2 + $0x61] sm:$0xff] }
 0x140   : > { %v8240_v62 = vadd.f32 %v947_v35, %v887_v48  ;;  %2103 = vmatpush.msrb.mxu0 %v2094_v56  ;;  %1958 = vmatpush.msra.mxu2 %v1943_v7  ;;  %v1869_v35 = vld [vmem:[#allocation3 + $0x8c0] sm:$0xff] }
 0x141   : > { %v736_v19 = vpop.f32.mrf.mxu1  ;;  %v950_v4 = vpop.f32.mrf.mxu0  ;;  %v8303_v7 = vld [vmem:[#allocation2 + $0x42] sm:$0xff] }
 0x142   : > { %v737_v58 = vadd.f32 %v736_v19, %v8144_v57  ;;  %v8245_v45 = vpop.f32.mrf.mxu3  ;;  %2104 = vmatpush.msrb.mxu0 %v2093_v32  ;;  %1959 = vmatpush.msra.mxu2 %v1942_v26  ;;  %v2091_v19 = vld [vmem:[#allocation3 + $0xa40] sm:$0xff]  ;;  %v2088_v32 = vld [vmem:[#allocation3 + $0xa28] sm:$0xff]  ;;  %v1635_v26 = vld [vmem:[#allocation2 + $0x70] sm:$0xff] }
 0x143   : > { %1674 = vmatmul.f32.gmra.mxu2 %v1631_v21 }
 0x144   : > { %v814_v8 = vadd.f32 %v8218_v37, %v737_v58  ;;  %1319 = vmatmul.f32.gmra.mxu1 %v8072_v41  ;;  %1541 = vmatmul.f32.gmra.mxu0 %v8156_v16  ;;  %v1871_v41 = vld [vmem:[#allocation3 + $0x8d0] sm:$0xff]  ;;  %v8258_v37 = vld [vmem:[#allocation2 + $0x85] sm:$0xff] }
 0x145   : > { %1882 = vmatpush.msrb.mxu1 %v1871_v41  ;;  %2105 = vmatpush.msrb.mxu0 %v2092_v1  ;;  %v1867_v58 = vld [vmem:[#allocation3 + $0x8b0] sm:$0xff]  ;;  %v1939_v41 = vld [vmem:[#allocation3 + $0x920] sm:$0xff] }
 0x146   : > { %v888_v57 = vadd.f32 %v8220_v20, %v814_v8  ;;  %v8261_v47 = vpop.f32.mrf.mxu2  ;;  %v2018_v20 = vld [vmem:[#allocation3 + $0x9c8] sm:$0xff]  ;;  %1960 = vmatpush.msra.mxu2 %v1941_v23  ;;  %v2011_v1 = vld [vmem:[#allocation3 + $0x990] sm:$0xff] }
 0x147   : > { %1748 = vmatmul.f32.gmra.mxu3 %v8250_v9  ;;  %1883 = vmatpush.msrb.mxu1 %v1870_v13  ;;  %v2014_v8 = vld [vmem:[#allocation3 + $0x9a8] sm:$0xff] }
 0x148   : > { %v8253_v40 = vadd.f32 %v950_v4, %v888_v57  ;;  %2031 = vmatpush.msra.mxu3 %v2018_v20  ;;  %2106 = vmatpush.msrb.mxu0 %v2091_v19  ;;  %v1634_v57 = vld [vmem:[#allocation2 + $0x60] sm:$0xff]  ;;  %v510_v20 = vld [vmem:[#allocation2 + $0x95] sm:$0x1]  ;;  %v2010_v19 = vld [vmem:[#allocation3 + $0x988] sm:$0xff] }
 0x149   : > { %v739_v16 = vpop.f32.mrf.mxu1  ;;  %v953_v11 = vpop.f32.mrf.mxu0  ;;  %1884 = vmatpush.msrb.mxu1 %v1869_v35  ;;  %518 = vst [vmem:[#allocation2 + $0x91] sm:$0x1] %v510_v20 }
 0x14a   : > { %v740_v14 = vadd.f32 %v739_v16, %v8154_v54  ;;  %v8263_v28 = vpop.f32.mrf.mxu3  ;;  %2032 = vmatpush.msra.mxu3 %v2017_v59  ;;  %2107 = vmatpush.msrb.mxu0 %v2090_v50  ;;  %v2013_v16 = vld [vmem:[#allocation3 + $0x9a0] sm:$0xff]  ;;  %v2012_v59 = vld [vmem:[#allocation3 + $0x998] sm:$0xff] }
 0x14b   : > { %1677 = vmatmul.f32.gmra.mxu2 %v1632_v42  ;;  %1885 = vmatpush.msrb.mxu1 %v1868_v51  ;;  %v1938_v42 = vld [vmem:[#allocation3 + $0x918] sm:$0xff]  ;;  %v2009_v50 = vld [vmem:[#allocation3 + $0x980] sm:$0xff] }
 0x14c   : > { %v815_v39 = vadd.f32 %v8232_v3, %v740_v14  ;;  %1322 = vmatmul.f32.gmra.mxu1 %v8256_v29  ;;  %1544 = vmatmul.f32.gmra.mxu0 %v8258_v37  ;;  %v478_v14 = vld [vmem:[#allocation2 + $0x96] sm:$0x1] }
 0x14d   : > { %1886 = vmatpush.msrb.mxu1 %v1867_v58  ;;  %486 = vst [vmem:[#allocation2 + $0x90] sm:$0x1] %v478_v14  ;;  %v2086_v58 = vld [vmem:[#allocation3 + $0xa18] sm:$0xff] }
 0x14e   : > { %v889_v54 = vadd.f32 %v8234_v61, %v815_v39  ;;  %v8275_v63 = vpop.f32.mrf.mxu2  ;;  %v2016_v61 = vld [vmem:[#allocation3 + $0x9b8] sm:$0xff] }
 0x14f   : > { %1751 = vmatmul.f32.gmra.mxu3 %v8268_v31  ;;  %1887 = vmatpush.msrb.mxu1 %v1866_v10  ;;  %v2246_v10 = vld [vmem:[#allocation3 + $0xb78] sm:$0xff] }
 0x150   : > { %v8271_v34 = vadd.f32 %v953_v11, %v889_v54  ;;  %2033 = vmatpush.msra.mxu3 %v2016_v61  ;;  %v2089_v11 = vld [vmem:[#allocation3 + $0xa30] sm:$0xff]  ;;  %v2320_v14 = vld [vmem:[#allocation3 + $0xbf8] sm:$0xff] }
 0x151   : > { %v1006_v3 = vpop.f32.mrf.mxu1  ;;  %v1228_v38 = vpop.f32.mrf.mxu0  ;;  %2108 = vmatpush.msrb.mxu0 %v2089_v11 }
 0x152   : > { %v1030_v49 = vadd.f32 %v1006_v3, %v8176_v6  ;;  %v8277_v52 = vpop.f32.mrf.mxu3  ;;  %2034 = vmatpush.msra.mxu3 %v2015_v5  ;;  %v557_v3 = vld [vmem:[#allocation2 + $0x87] sm:$0x1] }
 0x153   : > { %1680 = vmatmul.f32.gmra.mxu2 %v1633_v27  ;;  %2109 = vmatpush.msrb.mxu0 %v2088_v32  ;;  %565 = vst [vmem:[#allocation2 + $0x8d] sm:$0x1] %v557_v3  ;;  %v2087_v27 = vld [vmem:[#allocation3 + $0xa20] sm:$0xff] }
 0x154   : > { %v1104_v48 = vadd.f32 %v8243_v53, %v1030_v49  ;;  %1597 = vmatmul.f32.vlgmr.msra.gmra.mxu1 %v8087_v24  ;;  %1819 = vmatmul.f32.vlgmr.msra.gmra.mxu0 %v1778_v46  ;;  %v1940_v24 = vld [vmem:[#allocation3 + $0x928] sm:$0xff]  ;;  %v1864_v46 = vld [vmem:[#allocation3 + $0x898] sm:$0xff]  ;;  %v1937_v49 = vld [vmem:[#allocation3 + $0x910] sm:$0xff] }
 0x155   : > { %1961 = vmatpush.msra.mxu2 %v1940_v24  ;;  %2035 = vmatpush.msra.mxu3 %v2014_v8  ;;  %v1935_v8 = vld [vmem:[#allocation3 + $0x900] sm:$0xff] }
 0x156   : > { %v1178_v6 = vadd.f32 %v8245_v45, %v1104_v48  ;;  %v8290_v45 = vpop.f32.mrf.mxu2  ;;  %2110 = vmatpush.msrb.mxu0 %v2087_v27 }
 0x157   : > { %1754 = vmatmul.f32.gmra.mxu3 %v8281_v60  ;;  %1962 = vmatpush.msra.mxu2 %v1939_v41 }
 0x158   : > { %v8284_v4 = vadd.f32 %v1228_v38, %v1178_v6  ;;  %2036 = vmatpush.msra.mxu3 %v2013_v16  ;;  %v8319_v6 = vld [vmem:[#allocation2 + $0x52] sm:$0xff]  ;;  %2111 = vmatpush.msrb.mxu0 %v2086_v58  ;;  %v8333_v16 = vld [vmem:[#allocation2 + $0x62] sm:$0xff] }
 0x159   : > { %v1009_v53 = vpop.f32.mrf.mxu1  ;;  %v1231_v25 = vpop.f32.mrf.mxu0  ;;  %1963 = vmatpush.msra.mxu2 %v1938_v42  ;;  %v2172_v42 = vld [vmem:[#allocation3 + $0xaf8] sm:$0xff]  ;;  %v2317_v58 = vld [vmem:[#allocation3 + $0xbe0] sm:$0xff] }
 0x15a   : > { %v1031_v21 = vadd.f32 %v1009_v53, %v8188_v22  ;;  %v8292_v17 = vpop.f32.mrf.mxu3  ;;  %2037 = vmatpush.msra.mxu3 %v2012_v59  ;;  %v2319_v59 = vld [vmem:[#allocation3 + $0xbf0] sm:$0xff] }
 0x15b   : > { %1683 = vmatmul.f32.gmra.mxu2 %v1634_v57  ;;  %v2085_v57 = vld [vmem:[#allocation3 + $0xa10] sm:$0xff] }
 0x15c   : > { %v1105_v12 = vadd.f32 %v8261_v47, %v1031_v21  ;;  %1600 = vmatmul.f32.gmra.mxu1 %v8097_v43  ;;  %1822 = vmatmul.f32.gmra.mxu0 %v8287_v36  ;;  %v542_v47 = vld [vmem:[#allocation2 + $0x94] sm:$0x1]  ;;  %v1865_v43 = vld [vmem:[#allocation3 + $0x8a0] sm:$0xff]  ;;  %v1862_v21 = vld [vmem:[#allocation3 + $0x888] sm:$0xff] }
 0x15d   : > { %1888 = vmatpush.msrb.mxu1 %v1865_v43  ;;  %550 = vst [vmem:[#allocation2 + $0x92] sm:$0x1] %v542_v47  ;;  %1964 = vmatpush.msra.mxu2 %v1937_v49  ;;  %v7159_v43 = vld [vmem:[#allocation2 + $0x56] sm:$0xff] }
 0x15e   : > { %v1179_v22 = vadd.f32 %v8263_v28, %v1105_v12  ;;  %v8306_v54 = vpop.f32.mrf.mxu2  ;;  %2038 = vmatpush.msra.mxu3 %v2011_v1  ;;  %2112 = vmatpush.msrb.mxu0 %v2085_v57  ;;  %v2386_v1 = vld [vmem:[#allocation3 + $0xc78] sm:$0xff] }
 0x15f   : > { %1757 = vmatmul.f32.gmra.mxu3 %v8297_v44  ;;  %1889 = vmatpush.msrb.mxu1 %v1864_v46  ;;  %v8348_v46 = vld [vmem:[#allocation2 + $0x72] sm:$0xff] }
 0x160   : > { %v8300_v56 = vadd.f32 %v1231_v25, %v1179_v22  ;;  %2039 = vmatpush.msra.mxu3 %v2010_v19  ;;  %v7158_v25 = vld [vmem:[#allocation2 + $0x46] sm:$0xff] }
 0x161   : > { %v1012_v39 = vpop.f32.mrf.mxu1  ;;  %v1234_v13 = vpop.f32.mrf.mxu0  ;;  %v2000_v19 = vld [vmem:[#allocation2 + $0x25] sm:$0xff] }
 0x162   : > { %v1032_v28 = vadd.f32 %v1012_v39, %v8201_v15  ;;  %v8308_v35 = vpop.f32.mrf.mxu3  ;;  %v8313_v15 = vld [vmem:[#allocation2 + $0x71] sm:$0xff]  ;;  %2040 = vmatpush.msra.mxu3 %v2009_v50 }
 0x163   : > { %1686 = vmatmul.f32.gmra.mxu2 %v1635_v26  ;;  %v2245_v39 = vld [vmem:[#allocation3 + $0xb70] sm:$0xff]  ;;  %v2244_v26 = vld [vmem:[#allocation3 + $0xb68] sm:$0xff] }
 0x164   : > { %v1106_v38 = vadd.f32 %v8275_v63, %v1032_v28  ;;  %1603 = vmatmul.f32.gmra.mxu1 %v8103_v2  ;;  %1825 = vmatmul.f32.gmra.mxu0 %v8303_v7  ;;  %v1863_v2 = vld [vmem:[#allocation3 + $0x890] sm:$0xff]  ;;  %v1936_v63 = vld [vmem:[#allocation3 + $0x908] sm:$0xff]  ;;  %v2083_v28 = vld [vmem:[#allocation3 + $0xa00] sm:$0xff] }
 0x165   : > { %1890 = vmatpush.msrb.mxu1 %v1863_v2  ;;  %1965 = vmatpush.msra.mxu2 %v1936_v63  ;;  %v1637_v47 = vld [vmem:[#allocation2 + $0x90] sm:$0xff]  ;;  %v1926_v2 = vld [vmem:[#allocation2 + $0x24] sm:$0xff] }
 0x166   : > { %v1180_v61 = vadd.f32 %v8277_v52, %v1106_v38  ;;  %v8322_v52 = vpop.f32.mrf.mxu2  ;;  %2321 = vmatpush.msrb.mxu3 %v2320_v14  ;;  %v2241_v14 = vld [vmem:[#allocation3 + $0xb50] sm:$0xff] }
 0x167   : > { %1760 = vmatmul.f32.gmra.mxu3 %v8313_v15  ;;  %1891 = vmatpush.msrb.mxu1 %v1862_v21  ;;  %v2242_v21 = vld [vmem:[#allocation3 + $0xb58] sm:$0xff] }
 0x168   : > { %v8316_v48 = vadd.f32 %v1234_v13, %v1180_v61  ;;  %1966 = vmatpush.msra.mxu2 %v1935_v8  ;;  %v8342_v13 = vld [vmem:[#allocation2 + $0x91] sm:$0xff]  ;;  %2322 = vmatpush.msrb.mxu3 %v2319_v59  ;;  %v2318_v61 = vld [vmem:[#allocation3 + $0xbe8] sm:$0xff] }
 0x169   : > { %v1015_v51 = vpop.f32.mrf.mxu1  ;;  %v1237_v23 = vpop.f32.mrf.mxu0  ;;  %v8375_v59 = vld [vmem:[#allocation2 + $0x92] sm:$0xff] }
 0x16a   : > { %v1033_v5 = vadd.f32 %v1015_v51, %v8214_v55  ;;  %v8324_v24 = vpop.f32.mrf.mxu3  ;;  %2247 = vmatpush.msrb.mxu2 %v2246_v10  ;;  %2323 = vmatpush.msrb.mxu3 %v2318_v61  ;;  %v7160_v51 = vld [vmem:[#allocation2 + $0x66] sm:$0xff] }
 0x16b   : > { %1689 = vmatmul.f32.gmra.mxu2 %v8131_v30  ;;  %v2084_v30 = vld [vmem:[#allocation3 + $0xa08] sm:$0xff] }
 0x16c   : > { %v1107_v53 = vadd.f32 %v8290_v45, %v1033_v5  ;;  %1606 = vmatmul.f32.gmra.mxu1 %v7158_v25  ;;  %1828 = vmatmul.f32.gmra.mxu0 %v8319_v6  ;;  %v1861_v45 = vld [vmem:[#allocation3 + $0x880] sm:$0xff] }
 0x16d   : > { %1892 = vmatpush.msrb.mxu1 %v1861_v45  ;;  %2113 = vmatpush.msrb.mxu0 %v2084_v30  ;;  %v2243_v5 = vld [vmem:[#allocation3 + $0xb60] sm:$0xff]  ;;  %v2316_v45 = vld [vmem:[#allocation3 + $0xbd8] sm:$0xff] }
 0x16e   : > { %v1181_v55 = vadd.f32 %v8292_v17, %v1107_v53  ;;  %v8336_v11 = vpop.f32.mrf.mxu2  ;;  %2248 = vmatpush.msrb.mxu2 %v2245_v39  ;;  %v2385_v53 = vld [vmem:[#allocation3 + $0xc70] sm:$0xff]  ;;  %2324 = vmatpush.msrb.mxu3 %v2317_v58  ;;  %v2168_v30 = vld [vmem:[#allocation3 + $0xad8] sm:$0xff]  ;;  %v2240_v39 = vld [vmem:[#allocation3 + $0xb48] sm:$0xff] }
 0x16f   : > { %1763 = vmatmul.f32.gmra.mxu3 %v8160_v0  ;;  %2173 = vmatpush.msra.mxu1 %v2172_v42  ;;  %v1852_v58 = vld [vmem:[#allocation2 + $0x23] sm:$0xff] }
 0x170   : > { %v8330_v12 = vadd.f32 %v1237_v23, %v1181_v55  ;;  %2114 = vmatpush.msrb.mxu0 %v2083_v28  ;;  %2249 = vmatpush.msrb.mxu2 %v2244_v26  ;;  %v2170_v23 = vld [vmem:[#allocation3 + $0xae8] sm:$0xff] }
 0x171   : > { %v1018_v41 = vpop.f32.mrf.mxu1  ;;  %v1240_v22 = vpop.f32.mrf.mxu0  ;;  %2325 = vmatpush.msrb.mxu3 %v2316_v45  ;;  %v2314_v26 = vld [vmem:[#allocation3 + $0xbc8] sm:$0xff]  ;;  %v1929_v45 = vld [vmem:[#allocation2 + $0x54] sm:$0xff] }
 0x172   : > { %v1034_v17 = vadd.f32 %v1018_v41, %v8228_v33  ;;  %v8338_v20 = vpop.f32.mrf.mxu3  ;;  %2387 = vmatpush.msra.mxu0 %v2386_v1  ;;  %2250 = vmatpush.msrb.mxu2 %v2243_v5  ;;  %v1927_v41 = vld [vmem:[#allocation2 + $0x34] sm:$0xff]  ;;  %v2166_v1 = vld [vmem:[#allocation3 + $0xac8] sm:$0xff] }
 0x173   : > { %1692 = vmatmul.f32.gmra.mxu2 %v1637_v47  ;;  %v8367_v47 = vld [vmem:[#allocation2 + $0x35] sm:$0xff] }
 0x174   : > { %v1108_v0 = vadd.f32 %v8306_v54, %v1034_v17  ;;  %1609 = vmatmul.f32.gmra.mxu1 %v7159_v43  ;;  %1831 = vmatmul.f32.gmra.mxu0 %v8333_v16  ;;  %v2171_v54 = vld [vmem:[#allocation3 + $0xaf0] sm:$0xff]  ;;  %v2383_v43 = vld [vmem:[#allocation3 + $0xc60] sm:$0xff] }
 0x175   : > { %2174 = vmatpush.msra.mxu1 %v2171_v54  ;;  %2388 = vmatpush.msra.mxu0 %v2385_v53  ;;  %v7161_v17 = vld [vmem:[#allocation2 + $0x76] sm:$0xff] }
 0x176   : > { %v1182_v33 = vadd.f32 %v8308_v35, %v1108_v0  ;;  %v8351_v35 = vpop.f32.mrf.mxu2  ;;  %2251 = vmatpush.msrb.mxu2 %v2242_v21  ;;  %v2315_v0 = vld [vmem:[#allocation3 + $0xbd0] sm:$0xff] }
 0x177   : > { %1766 = vmatmul.f32.gmra.mxu3 %v8342_v13  ;;  %2175 = vmatpush.msra.mxu1 %v2170_v23  ;;  %v2381_v23 = vld [vmem:[#allocation3 + $0xc50] sm:$0xff] }
 0x178   : > { %v8345_v32 = vadd.f32 %v1240_v22, %v1182_v33  ;;  %2252 = vmatpush.msrb.mxu2 %v2241_v14  ;;  %2326 = vmatpush.msrb.mxu3 %v2315_v0  ;;  %v8373_v33 = vld [vmem:[#allocation2 + $0x86] sm:$0xff] }
 0x179   : > { %v1021_v3 = vpop.f32.mrf.mxu1  ;;  %v1243_v38 = vpop.f32.mrf.mxu0  ;;  %v2379_v14 = vld [vmem:[#allocation3 + $0xc40] sm:$0xff]  ;;  %v2236_v0 = vld [vmem:[#allocation3 + $0xb28] sm:$0xff] }
 0x17a   : > { %v1035_v49 = vadd.f32 %v1021_v3, %v8240_v62  ;;  %v8353_v27 = vpop.f32.mrf.mxu3  ;;  %2253 = vmatpush.msrb.mxu2 %v2240_v39  ;;  %v2382_v3 = vld [vmem:[#allocation3 + $0xc58] sm:$0xff]  ;;  %2327 = vmatpush.msrb.mxu3 %v2314_v26 }
 0x17b   : > { %1967 = vmatmul.f32.vlgmr.msra.gmra.mxu2 %v1926_v2  ;;  %v2239_v2 = vld [vmem:[#allocation3 + $0xb40] sm:$0xff]  ;;  %v2378_v26 = vld [vmem:[#allocation3 + $0xc38] sm:$0xff] }
 0x17c   : > { %v1109_v63 = vadd.f32 %v8322_v52, %v1035_v49  ;;  %1612 = vmatmul.f32.gmra.mxu1 %v7160_v51  ;;  %1834 = vmatmul.f32.gmra.mxu0 %v8348_v46  ;;  %v2169_v52 = vld [vmem:[#allocation3 + $0xae0] sm:$0xff] }
 0x17d   : > { %2176 = vmatpush.msra.mxu1 %v2169_v52  ;;  %v1928_v49 = vld [vmem:[#allocation2 + $0x44] sm:$0xff]  ;;  %2254 = vmatpush.msrb.mxu2 %v2239_v2 }
 0x17e   : > { %v1183_v62 = vadd.f32 %v8324_v24, %v1109_v63  ;;  %v8361_v57 = vpop.f32.mrf.mxu2  ;;  %v2384_v24 = vld [vmem:[#allocation3 + $0xc68] sm:$0xff]  ;;  %v2313_v51 = vld [vmem:[#allocation3 + $0xbc0] sm:$0xff] }
 0x17f   : > { %2041 = vmatmul.f32.vlgmr.msra.gmra.mxu3 %v2000_v19  ;;  %2389 = vmatpush.msra.mxu0 %v2384_v24  ;;  %v8385_v63 = vld [vmem:[#allocation2 + $0x45] sm:$0xff]  ;;  %v2238_v19 = vld [vmem:[#allocation3 + $0xb38] sm:$0xff] }
 0x180   : > { %v8358_v25 = vadd.f32 %v1243_v38, %v1183_v62  ;;  %2177 = vmatpush.msra.mxu1 %v2168_v30  ;;  %2328 = vmatpush.msrb.mxu3 %v2313_v51  ;;  %v2074_v52 = vld [vmem:[#allocation2 + $0x26] sm:$0xff]  ;;  %v2311_v30 = vld [vmem:[#allocation3 + $0xbb0] sm:$0xff] }
 0x181   : > { %v1024_v8 = vpop.f32.mrf.mxu1  ;;  %v1246_v55 = vpop.f32.mrf.mxu0  ;;  %2390 = vmatpush.msra.mxu0 %v2383_v43  ;;  %2255 = vmatpush.msrb.mxu2 %v2238_v19  ;;  %v2235_v2 = vld [vmem:[#allocation3 + $0xb20] sm:$0xff] }
 0x182   : > { %v1036_v50 = vadd.f32 %v1024_v8, %v8253_v40  ;;  %v8363_v10 = vpop.f32.mrf.mxu3  ;;  %v2312_v8 = vld [vmem:[#allocation3 + $0xbb8] sm:$0xff]  ;;  %v2309_v51 = vld [vmem:[#allocation3 + $0xba0] sm:$0xff] }
 0x183   : > { %1970 = vmatmul.f32.gmra.mxu2 %v1927_v41  ;;  %2391 = vmatpush.msra.mxu0 %v2382_v3  ;;  %v2164_v41 = vld [vmem:[#allocation3 + $0xab8] sm:$0xff] }
 0x184   : > { %v1110_v22 = vadd.f32 %v8336_v11, %v1036_v50  ;;  %1615 = vmatmul.f32.gmra.mxu1 %v7161_v17  ;;  %1837 = vmatmul.f32.gmra.mxu0 %v8256_v29  ;;  %v2167_v11 = vld [vmem:[#allocation3 + $0xad0] sm:$0xff] }
 0x185   : > { %2178 = vmatpush.msra.mxu1 %v2167_v11  ;;  %2392 = vmatpush.msra.mxu0 %v2381_v23  ;;  %v8397_v17 = vld [vmem:[#allocation2 + $0x55] sm:$0xff] }
 0x186   : > { %v1184_v40 = vadd.f32 %v8338_v20, %v1110_v22  ;;  %v8378_v54 = vpop.f32.mrf.mxu2  ;;  %2329 = vmatpush.msrb.mxu3 %v2312_v8  ;;  %v2237_v22 = vld [vmem:[#allocation3 + $0xb30] sm:$0xff] }
 0x187   : > { %2044 = vmatmul.f32.gmra.mxu3 %v8367_v47  ;;  %2179 = vmatpush.msra.mxu1 %v2166_v1  ;;  %v8403_v11 = vld [vmem:[#allocation2 + $0x33] sm:$0xff]  ;;  %v2162_v1 = vld [vmem:[#allocation3 + $0xaa8] sm:$0xff] }
 0x188   : > { %v8370_v42 = vadd.f32 %v1246_v55, %v1184_v40  ;;  %v2380_v55 = vld [vmem:[#allocation3 + $0xc48] sm:$0xff]  ;;  %2256 = vmatpush.msrb.mxu2 %v2237_v22  ;;  %2330 = vmatpush.msrb.mxu3 %v2311_v30  ;;  %v2377_v23 = vld [vmem:[#allocation3 + $0xc30] sm:$0xff]  ;;  %v2160_v30 = vld [vmem:[#allocation3 + $0xa98] sm:$0xff] }
 0x189   : > { %v1027_v29 = vpop.f32.mrf.mxu1  ;;  %v1249_v28 = vpop.f32.mrf.mxu0  ;;  %2393 = vmatpush.msra.mxu0 %v2380_v55  ;;  %v1931_v22 = vld [vmem:[#allocation2 + $0x74] sm:$0xff] }
 0x18a   : > { %v1037_v20 = vadd.f32 %v1027_v29, %v8271_v34  ;;  %v8380_v38 = vpop.f32.mrf.mxu3  ;;  %v8405_v29 = vld [vmem:[#allocation2 + $0x36] sm:$0xff]  ;;  %2257 = vmatpush.msrb.mxu2 %v2236_v0 }
 0x18b   : > { %1973 = vmatmul.f32.gmra.mxu2 %v1928_v49  ;;  %2394 = vmatpush.msra.mxu0 %v2379_v14  ;;  %v1930_v49 = vld [vmem:[#allocation2 + $0x64] sm:$0xff]  ;;  %v2233_v14 = vld [vmem:[#allocation3 + $0xb10] sm:$0xff] }
 0x18c   : > { %v1111_v61 = vadd.f32 %v8351_v35, %v1037_v20  ;;  %1618 = vmatmul.f32.gmra.mxu1 %v8373_v33  ;;  %1840 = vmatmul.f32.gmra.mxu0 %v8375_v59  ;;  %v2165_v35 = vld [vmem:[#allocation3 + $0xac0] sm:$0xff]  ;;  %v2310_v20 = vld [vmem:[#allocation3 + $0xba8] sm:$0xff]  ;;  %v2307_v0 = vld [vmem:[#allocation3 + $0xb90] sm:$0xff] }
 0x18d   : > { %2180 = vmatpush.msra.mxu1 %v2165_v35  ;;  %2331 = vmatpush.msrb.mxu3 %v2310_v20  ;;  %v494_v35 = vld [vmem:[#allocation2 + $0x99] sm:$0x1] }
 0x18e   : > { %v1185_v34 = vadd.f32 %v8353_v27, %v1111_v61  ;;  %v8392_v27 = vpop.f32.mrf.mxu2  ;;  %2395 = vmatpush.msra.mxu0 %v2378_v26  ;;  %2258 = vmatpush.msrb.mxu2 %v2235_v2  ;;  %502 = vst [vmem:[#allocation2 + $0x9b] sm:$0x1] %v494_v35  ;;  %v8439_v26 = vld [vmem:[#allocation2 + $0x53] sm:$0xff] }
 0x18f   : > { %2047 = vmatmul.f32.gmra.mxu3 %v8385_v63  ;;  %2181 = vmatpush.msra.mxu1 %v2164_v41 }
 0x190   : > { %v8388_v5 = vadd.f32 %v1249_v28, %v1185_v34  ;;  %v8415_v34 = vld [vmem:[#allocation2 + $0x65] sm:$0xff]  ;;  %2332 = vmatpush.msrb.mxu3 %v2309_v51  ;;  %2396 = vmatpush.msra.mxu0 %v2377_v23  ;;  %v2374_v51 = vld [vmem:[#allocation3 + $0xc18] sm:$0xff] }
 0x191   : > { %v1302_v62 = vpop.f32.mrf.mxu1  ;;  %v1524_v53 = vpop.f32.mrf.mxu0 }
 0x192   : > { %v1326_v21 = vadd.f32 %v1302_v62, %v8284_v4  ;;  %v8394_v50 = vpop.f32.mrf.mxu3  ;;  %v2234_v62 = vld [vmem:[#allocation3 + $0xb18] sm:$0xff] }
 0x193   : > { %1976 = vmatmul.f32.gmra.mxu2 %v1929_v45  ;;  %v2308_v45 = vld [vmem:[#allocation3 + $0xb98] sm:$0xff] }
 0x194   : > { %v1400_v24 = vadd.f32 %v8361_v57, %v1326_v21  ;;  %1893 = vmatmul.f32.vlgmr.msrb.gmra.mxu1 %v1852_v58  ;;  %2115 = vmatmul.f32.vlgmr.msrb.gmra.mxu0 %v2074_v52  ;;  %v2163_v57 = vld [vmem:[#allocation3 + $0xab0] sm:$0xff]  ;;  %v8423_v21 = vld [vmem:[#allocation2 + $0x46] sm:$0xff] }
 0x195   : > { %2182 = vmatpush.msra.mxu1 %v2163_v57  ;;  %2259 = vmatpush.msrb.mxu2 %v2234_v62  ;;  %v8433_v57 = vld [vmem:[#allocation2 + $0x75] sm:$0xff]  ;;  %v2231_v62 = vld [vmem:[#allocation3 + $0xb00] sm:$0xff] }
 0x196   : > { %v1474_v4 = vadd.f32 %v8363_v10, %v1400_v24  ;;  %v8408_v28 = vpop.f32.mrf.mxu2  ;;  %v2376_v24 = vld [vmem:[#allocation3 + $0xc28] sm:$0xff]  ;;  %2333 = vmatpush.msrb.mxu3 %v2308_v45 }
 0x197   : > { %2050 = vmatmul.f32.gmra.mxu3 %v8397_v17  ;;  %2183 = vmatpush.msra.mxu1 %v2162_v1 }
 0x198   : > { %v8400_v40 = vadd.f32 %v1524_v53, %v1474_v4  ;;  %v8421_v53 = vld [vmem:[#allocation2 + $0x43] sm:$0xff]  ;;  %2397 = vmatpush.msra.mxu0 %v2376_v24  ;;  %2260 = vmatpush.msrb.mxu2 %v2233_v14  ;;  %v2608_v14 = vld [vmem:[#allocation3 + $0xdf8] sm:$0xff] }
 0x199   : > { %v1305_v43 = vpop.f32.mrf.mxu1  ;;  %v1527_v39 = vpop.f32.mrf.mxu0  ;;  %2334 = vmatpush.msrb.mxu3 %v2307_v0  ;;  %v8456_v24 = vld [vmem:[#allocation2 + $0x63] sm:$0xff]  ;;  %v1933_v0 = vld [vmem:[#allocation2 + $0x94] sm:$0xff] }
 0x19a   : > { %v1327_v10 = vadd.f32 %v1305_v43, %v8300_v56  ;;  %v8410_v3 = vpop.f32.mrf.mxu3  ;;  %v2375_v43 = vld [vmem:[#allocation3 + $0xc20] sm:$0xff] }
 0x19b   : > { %1979 = vmatmul.f32.gmra.mxu2 %v1930_v49  ;;  %2398 = vmatpush.msra.mxu0 %v2375_v43  ;;  %v2460_v43 = vld [vmem:[#allocation3 + $0xcf8] sm:$0xff] }
 0x19c   : > { %v1401_v61 = vadd.f32 %v8378_v54, %v1327_v10  ;;  %1896 = vmatmul.f32.gmra.mxu1 %v8403_v11  ;;  %2118 = vmatmul.f32.gmra.mxu0 %v8405_v29  ;;  %v2161_v54 = vld [vmem:[#allocation3 + $0xaa0] sm:$0xff]  ;;  %v2232_v10 = vld [vmem:[#allocation3 + $0xb08] sm:$0xff] }
 0x19d   : > { %2184 = vmatpush.msra.mxu1 %v2161_v54  ;;  %2261 = vmatpush.msrb.mxu2 %v2232_v10  ;;  %v2158_v54 = vld [vmem:[#allocation3 + $0xa88] sm:$0xff] }
 0x19e   : > { %v1475_v56 = vadd.f32 %v8380_v38, %v1401_v61  ;;  %v526_v38 = vld [vmem:[#allocation2 + $0x98] sm:$0x1]  ;;  %v8426_v55 = vpop.f32.mrf.mxu2  ;;  %2399 = vmatpush.msra.mxu0 %v2374_v51 }
 0x19f   : > { %2053 = vmatmul.f32.gmra.mxu3 %v8415_v34  ;;  %534 = vst [vmem:[#allocation2 + $0x9c] sm:$0x1] %v526_v38  ;;  %2185 = vmatpush.msra.mxu1 %v2160_v30  ;;  %v8441_v61 = vld [vmem:[#allocation2 + $0x56] sm:$0xff]  ;;  %v2372_v30 = vld [vmem:[#allocation3 + $0xc08] sm:$0xff] }
 0x1a0   : > { %v8418_v19 = vadd.f32 %v1527_v39, %v1475_v56  ;;  %v2306_v56 = vld [vmem:[#allocation3 + $0xb88] sm:$0xff]  ;;  %2262 = vmatpush.msrb.mxu2 %v2231_v62  ;;  %v8474_v51 = vld [vmem:[#allocation2 + $0x73] sm:$0xff] }
 0x1a1   : > { %v1308_v58 = vpop.f32.mrf.mxu1  ;;  %v1530_v52 = vpop.f32.mrf.mxu0  ;;  %2335 = vmatpush.msrb.mxu3 %v2306_v56 }
 0x1a2   : > { %v1328_v8 = vadd.f32 %v1308_v58, %v8316_v48  ;;  %v8428_v41 = vpop.f32.mrf.mxu3  ;;  %v2305_v58 = vld [vmem:[#allocation3 + $0xb80] sm:$0xff] }
 0x1a3   : > { %1982 = vmatmul.f32.gmra.mxu2 %v1931_v22  ;;  %2336 = vmatpush.msrb.mxu3 %v2305_v58  ;;  %v2682_v58 = vld [vmem:[#allocation3 + $0xe78] sm:$0xff] }
 0x1a4   : > { %v1402_v4 = vadd.f32 %v8392_v27, %v1328_v8  ;;  %1899 = vmatmul.f32.gmra.mxu1 %v8421_v53  ;;  %2121 = vmatmul.f32.gmra.mxu0 %v8423_v21  ;;  %v2159_v27 = vld [vmem:[#allocation3 + $0xa90] sm:$0xff]  ;;  %v2534_v8 = vld [vmem:[#allocation3 + $0xd78] sm:$0xff] }
 0x1a5   : > { %2186 = vmatpush.msra.mxu1 %v2159_v27  ;;  %2535 = vmatpush.msra.mxu2 %v2534_v8  ;;  %v2533_v27 = vld [vmem:[#allocation3 + $0xd70] sm:$0xff]  ;;  %v2458_v8 = vld [vmem:[#allocation3 + $0xce8] sm:$0xff] }
 0x1a6   : > { %v1476_v48 = vadd.f32 %v8394_v50, %v1402_v4  ;;  %v558_v50 = vld [vmem:[#allocation2 + $0x97] sm:$0x1]  ;;  %v8444_v2 = vpop.f32.mrf.mxu2  ;;  %v8458_v4 = vld [vmem:[#allocation2 + $0x66] sm:$0xff]  ;;  %2609 = vmatpush.msra.mxu3 %v2608_v14  ;;  %v2530_v14 = vld [vmem:[#allocation3 + $0xd58] sm:$0xff] }
 0x1a7   : > { %2056 = vmatmul.f32.gmra.mxu3 %v8433_v57  ;;  %566 = vst [vmem:[#allocation2 + $0x9d] sm:$0x1] %v558_v50  ;;  %2187 = vmatpush.msra.mxu1 %v2158_v54  ;;  %v8468_v10 = vld [vmem:[#allocation2 + $0x95] sm:$0xff] }
 0x1a8   : > { %v8436_v39 = vadd.f32 %v1530_v52, %v1476_v48  ;;  %v2373_v52 = vld [vmem:[#allocation3 + $0xc10] sm:$0xff]  ;;  %2536 = vmatpush.msra.mxu2 %v2533_v27 }
 0x1a9   : > { %v1311_v20 = vpop.f32.mrf.mxu1  ;;  %v1533_v49 = vpop.f32.mrf.mxu0  ;;  %2400 = vmatpush.msra.mxu0 %v2373_v52  ;;  %v8476_v54 = vld [vmem:[#allocation2 + $0x76] sm:$0xff] }
 0x1aa   : > { %v1329_v1 = vadd.f32 %v1311_v20, %v8330_v12  ;;  %v8446_v23 = vpop.f32.mrf.mxu3  ;;  %v2371_v20 = vld [vmem:[#allocation3 + $0xc00] sm:$0xff] }
 0x1ab   : > { %1985 = vmatmul.f32.gmra.mxu2 %v8225_v18  ;;  %2401 = vmatpush.msra.mxu0 %v2372_v30 }
 0x1ac   : > { %v1403_v35 = vadd.f32 %v8408_v28, %v1329_v1  ;;  %1902 = vmatmul.f32.gmra.mxu1 %v8439_v26  ;;  %2124 = vmatmul.f32.gmra.mxu0 %v8441_v61  ;;  %v2157_v28 = vld [vmem:[#allocation3 + $0xa80] sm:$0xff]  ;;  %v2532_v1 = vld [vmem:[#allocation3 + $0xd68] sm:$0xff] }
 0x1ad   : > { %2188 = vmatpush.msra.mxu1 %v2157_v28  ;;  %2402 = vmatpush.msra.mxu0 %v2371_v20 }
 0x1ae   : > { %v1477_v12 = vadd.f32 %v8410_v3, %v1403_v35  ;;  %v8461_v3 = vpop.f32.mrf.mxu2  ;;  %2537 = vmatpush.msra.mxu2 %v2532_v1  ;;  %v2603_v1 = vld [vmem:[#allocation3 + $0xdd0] sm:$0xff] }
 0x1af   : > { %2059 = vmatmul.f32.gmra.mxu3 %v8258_v37  ;;  %2461 = vmatpush.msrb.mxu1 %v2460_v43 }
 0x1b0   : > { %v8453_v38 = vadd.f32 %v1533_v49, %v1477_v12  ;;  %v2607_v49 = vld [vmem:[#allocation3 + $0xdf0] sm:$0xff]  ;;  %v2606_v12 = vld [vmem:[#allocation3 + $0xde8] sm:$0xff]  ;;  %2683 = vmatpush.msrb.mxu0 %v2682_v58 }
 0x1b1   : > { %v1314_v45 = vpop.f32.mrf.mxu1  ;;  %v1536_v22 = vpop.f32.mrf.mxu0  ;;  %2610 = vmatpush.msra.mxu3 %v2607_v49  ;;  %v7162_v49 = vld [vmem:[#allocation2 + $0x83] sm:$0xff] }
 0x1b2   : > { %v1330_v18 = vadd.f32 %v1314_v45, %v8345_v32  ;;  %v8463_v48 = vpop.f32.mrf.mxu3  ;;  %v2531_v45 = vld [vmem:[#allocation3 + $0xd60] sm:$0xff] }
 0x1b3   : > { %1988 = vmatmul.f32.gmra.mxu2 %v1933_v0  ;;  %2611 = vmatpush.msra.mxu3 %v2606_v12 }
 0x1b4   : > { %v1404_v37 = vadd.f32 %v8426_v55, %v1330_v18  ;;  %1905 = vmatmul.f32.gmra.mxu1 %v8456_v24  ;;  %2127 = vmatmul.f32.gmra.mxu0 %v8458_v4  ;;  %v2459_v55 = vld [vmem:[#allocation3 + $0xcf0] sm:$0xff] }
 0x1b5   : > { %2462 = vmatpush.msrb.mxu1 %v2459_v55  ;;  %2538 = vmatpush.msra.mxu2 %v2531_v45  ;;  %v2681_v18 = vld [vmem:[#allocation3 + $0xe70] sm:$0xff]  ;;  %v2678_v45 = vld [vmem:[#allocation3 + $0xe58] sm:$0xff] }
 0x1b6   : > { %v1478_v32 = vadd.f32 %v8428_v41, %v1404_v37  ;;  %v8479_v62 = vpop.f32.mrf.mxu2  ;;  %2684 = vmatpush.msrb.mxu0 %v2681_v18  ;;  %v2529_v55 = vld [vmem:[#allocation3 + $0xd50] sm:$0xff]  ;;  %v2527_v18 = vld [vmem:[#allocation3 + $0xd40] sm:$0xff] }
 0x1b7   : > { %2062 = vmatmul.f32.gmra.mxu3 %v8468_v10  ;;  %2463 = vmatpush.msrb.mxu1 %v2458_v8  ;;  %v2602_v8 = vld [vmem:[#allocation3 + $0xdc8] sm:$0xff] }
 0x1b8   : > { %v8471_v50 = vadd.f32 %v1536_v22, %v1478_v32  ;;  %v2605_v22 = vld [vmem:[#allocation3 + $0xde0] sm:$0xff]  ;;  %2539 = vmatpush.msra.mxu2 %v2530_v14  ;;  %v2677_v14 = vld [vmem:[#allocation3 + $0xe50] sm:$0xff] }
 0x1b9   : > { %v1317_v56 = vpop.f32.mrf.mxu1  ;;  %v1539_v35 = vpop.f32.mrf.mxu0  ;;  %2612 = vmatpush.msra.mxu3 %v2605_v22  ;;  %v2454_v22 = vld [vmem:[#allocation3 + $0xcc8] sm:$0xff] }
 0x1ba   : > { %v1331_v41 = vadd.f32 %v1317_v56, %v8358_v25  ;;  %v8481_v52 = vpop.f32.mrf.mxu3  ;;  %2540 = vmatpush.msra.mxu2 %v2529_v55  ;;  %v2679_v56 = vld [vmem:[#allocation3 + $0xe60] sm:$0xff]  ;;  %v7163_v55 = vld [vmem:[#allocation2 + $0x30] sm:$0xff] }
 0x1bb   : > { %2263 = vmatmul.f32.vlgmr.msrb.gmra.mxu2 %v8250_v9  ;;  %v2680_v9 = vld [vmem:[#allocation3 + $0xe68] sm:$0xff] }
 0x1bc   : > { %v1405_v28 = vadd.f32 %v8444_v2, %v1331_v41  ;;  %1908 = vmatmul.f32.gmra.mxu1 %v8474_v51  ;;  %2130 = vmatmul.f32.gmra.mxu0 %v8476_v54  ;;  %v2457_v2 = vld [vmem:[#allocation3 + $0xce0] sm:$0xff]  ;;  %v2528_v41 = vld [vmem:[#allocation3 + $0xd48] sm:$0xff] }
 0x1bd   : > { %2464 = vmatpush.msrb.mxu1 %v2457_v2  ;;  %2685 = vmatpush.msrb.mxu0 %v2680_v9  ;;  %v2601_v2 = vld [vmem:[#allocation3 + $0xdc0] sm:$0xff] }
 0x1be   : > { %v1479_v25 = vadd.f32 %v8446_v23, %v1405_v28  ;;  %v8492_v27 = vpop.f32.mrf.mxu2  ;;  %v2604_v23 = vld [vmem:[#allocation3 + $0xdd8] sm:$0xff]  ;;  %2541 = vmatpush.msra.mxu2 %v2528_v41  ;;  %v2524_v41 = vld [vmem:[#allocation3 + $0xd28] sm:$0xff] }
 0x1bf   : > { %2337 = vmatmul.f32.vlgmr.msrb.gmra.mxu3 %v8287_v36  ;;  %v2456_v36 = vld [vmem:[#allocation3 + $0xcd8] sm:$0xff]  ;;  %2686 = vmatpush.msrb.mxu0 %v2679_v56  ;;  %v2675_v56 = vld [vmem:[#allocation3 + $0xe40] sm:$0xff] }
 0x1c0   : > { %v8488_v30 = vadd.f32 %v1539_v35, %v1479_v25  ;;  %2613 = vmatpush.msra.mxu3 %v2604_v23  ;;  %2465 = vmatpush.msrb.mxu1 %v2456_v36  ;;  %v8505_v28 = vld [vmem:[#allocation2 + $0x96] sm:$0xff] }
 0x1c1   : > { %v1320_v0 = vpop.f32.mrf.mxu1  ;;  %v1542_v37 = vpop.f32.mrf.mxu0  ;;  %2687 = vmatpush.msrb.mxu0 %v2678_v45  ;;  %2542 = vmatpush.msra.mxu2 %v2527_v18  ;;  %v2597_v18 = vld [vmem:[#allocation3 + $0xda0] sm:$0xff] }
 0x1c2   : > { %v1332_v43 = vadd.f32 %v1320_v0, %v8370_v42  ;;  %v8494_v32 = vpop.f32.mrf.mxu3  ;;  %2614 = vmatpush.msra.mxu3 %v2603_v1  ;;  %v2599_v1 = vld [vmem:[#allocation3 + $0xdb0] sm:$0xff] }
 0x1c3   : > { %2266 = vmatmul.f32.gmra.mxu2 %v8268_v31  ;;  %2688 = vmatpush.msrb.mxu0 %v2677_v14  ;;  %v543_v14 = vld [vmem:[#allocation2 + $0xa4] sm:$0x1] }
 0x1c4   : > { %v1406_v20 = vadd.f32 %v8461_v3, %v1332_v43  ;;  %1911 = vmatmul.f32.gmra.mxu1 %v7162_v49  ;;  %2133 = vmatmul.f32.gmra.mxu0 %v8373_v33  ;;  %v2455_v3 = vld [vmem:[#allocation3 + $0xcd0] sm:$0xff]  ;;  %551 = vst [vmem:[#allocation2 + $0xa2] sm:$0x1] %v543_v14 }
 0x1c5   : > { %v8503_v33 = vld [vmem:[#allocation2 + $0x93] sm:$0xff]  ;;  %2466 = vmatpush.msrb.mxu1 %v2455_v3  ;;  %2615 = vmatpush.msra.mxu3 %v2602_v8 }
 0x1c6   : > { %v1480_v42 = vadd.f32 %v8463_v48, %v1406_v20  ;;  %v8508_v48 = vpop.f32.mrf.mxu2 }
 0x1c7   : > { %2340 = vmatmul.f32.gmra.mxu3 %v8303_v7  ;;  %2467 = vmatpush.msrb.mxu1 %v2454_v22  ;;  %v2523_v22 = vld [vmem:[#allocation3 + $0xd20] sm:$0xff] }
 0x1c8   : > { %v8500_v35 = vadd.f32 %v1542_v37, %v1480_v42  ;;  %2616 = vmatpush.msra.mxu3 %v2601_v2  ;;  %v2526_v37 = vld [vmem:[#allocation3 + $0xd38] sm:$0xff]  ;;  %v2525_v42 = vld [vmem:[#allocation3 + $0xd30] sm:$0xff]  ;;  %v511_v2 = vld [vmem:[#allocation2 + $0xa5] sm:$0x1] }
 0x1c9   : > { %v1323_v12 = vpop.f32.mrf.mxu1  ;;  %v1545_v58 = vpop.f32.mrf.mxu0  ;;  %2543 = vmatpush.msra.mxu2 %v2526_v37  ;;  %519 = vst [vmem:[#allocation2 + $0xa1] sm:$0x1] %v511_v2  ;;  %v2830_v2 = vld [vmem:[#allocation3 + $0xf78] sm:$0xff] }
 0x1ca   : > { %v1333_v31 = vadd.f32 %v1323_v12, %v8388_v5  ;;  %v8510_v25 = vpop.f32.mrf.mxu3 }
 0x1cb   : > { %2269 = vmatmul.f32.gmra.mxu2 %v8281_v60  ;;  %v2676_v60 = vld [vmem:[#allocation3 + $0xe48] sm:$0xff] }
 0x1cc   : > { %v1407_v7 = vadd.f32 %v8479_v62, %v1333_v31  ;;  %1914 = vmatmul.f32.gmra.mxu1 %v8503_v33  ;;  %2136 = vmatmul.f32.gmra.mxu0 %v8505_v28  ;;  %v2453_v62 = vld [vmem:[#allocation3 + $0xcc0] sm:$0xff] }
 0x1cd   : > { %2468 = vmatpush.msrb.mxu1 %v2453_v62  ;;  %2689 = vmatpush.msrb.mxu0 %v2676_v60  ;;  %v2227_v60 = vld [vmem:[#allocation2 + $0x81] sm:$0xff] }
 0x1ce   : > { %v1481_v5 = vadd.f32 %v8481_v52, %v1407_v7  ;;  %v8521_v20 = vpop.f32.mrf.mxu2  ;;  %v2600_v52 = vld [vmem:[#allocation3 + $0xdb8] sm:$0xff]  ;;  %2544 = vmatpush.msra.mxu2 %v2525_v42  ;;  %v7164_v7 = vld [vmem:[#allocation2 + $0x40] sm:$0xff]  ;;  %v2521_v42 = vld [vmem:[#allocation3 + $0xd10] sm:$0xff] }
 0x1cf   : > { %2343 = vmatmul.f32.gmra.mxu3 %v8319_v6  ;;  %v2452_v6 = vld [vmem:[#allocation3 + $0xcb8] sm:$0xff]  ;;  %2690 = vmatpush.msrb.mxu0 %v2675_v56  ;;  %v2671_v56 = vld [vmem:[#allocation3 + $0xe20] sm:$0xff] }
 0x1d0   : > { %v8517_v0 = vadd.f32 %v1545_v58, %v1481_v5  ;;  %2617 = vmatpush.msra.mxu3 %v2600_v52  ;;  %2469 = vmatpush.msrb.mxu1 %v2452_v6  ;;  %v2673_v5 = vld [vmem:[#allocation3 + $0xe30] sm:$0xff]  ;;  %v2448_v6 = vld [vmem:[#allocation3 + $0xc98] sm:$0xff] }
 0x1d1   : > { %v1598_v43 = vpop.f32.mrf.mxu1  ;;  %v1820_v23 = vpop.f32.mrf.mxu0  ;;  %2545 = vmatpush.msra.mxu2 %v2524_v41 }
 0x1d2   : > { %v1622_v9 = vadd.f32 %v1598_v43, %v8400_v40  ;;  %v8523_v49 = vpop.f32.mrf.mxu3  ;;  %2618 = vmatpush.msra.mxu3 %v2599_v1  ;;  %v2595_v1 = vld [vmem:[#allocation3 + $0xd90] sm:$0xff] }
 0x1d3   : > { %2272 = vmatmul.f32.gmra.mxu2 %v8297_v44  ;;  %v2674_v44 = vld [vmem:[#allocation3 + $0xe38] sm:$0xff] }
 0x1d4   : > { %v1696_v36 = vadd.f32 %v8492_v27, %v1622_v9  ;;  %2189 = vmatmul.f32.vlgmr.msra.gmra.mxu1 %v7163_v55  ;;  %2403 = vmatmul.f32.vlgmr.msra.gmra.mxu0 %v8403_v11  ;;  %v2451_v27 = vld [vmem:[#allocation3 + $0xcb0] sm:$0xff]  ;;  %v2672_v9 = vld [vmem:[#allocation3 + $0xe28] sm:$0xff] }
 0x1d5   : > { %2470 = vmatpush.msrb.mxu1 %v2451_v27  ;;  %2691 = vmatpush.msrb.mxu0 %v2674_v44  ;;  %v7165_v55 = vld [vmem:[#allocation2 + $0x50] sm:$0xff] }
 0x1d6   : > { %v1770_v40 = vadd.f32 %v8494_v32, %v1696_v36  ;;  %v8533_v31 = vpop.f32.mrf.mxu2  ;;  %v2598_v32 = vld [vmem:[#allocation3 + $0xda8] sm:$0xff]  ;;  %2546 = vmatpush.msra.mxu2 %v2523_v22  ;;  %v2519_v22 = vld [vmem:[#allocation3 + $0xd00] sm:$0xff] }
 0x1d7   : > { %2346 = vmatmul.f32.gmra.mxu3 %v8333_v16  ;;  %v2450_v16 = vld [vmem:[#allocation3 + $0xca8] sm:$0xff]  ;;  %2692 = vmatpush.msrb.mxu0 %v2673_v5 }
 0x1d8   : > { %v8529_v3 = vadd.f32 %v1820_v23, %v1770_v40  ;;  %2619 = vmatpush.msra.mxu3 %v2598_v32  ;;  %2471 = vmatpush.msrb.mxu1 %v2450_v16  ;;  %v2596_v23 = vld [vmem:[#allocation3 + $0xd98] sm:$0xff]  ;;  %v2446_v16 = vld [vmem:[#allocation3 + $0xc88] sm:$0xff] }
 0x1d9   : > { %v1601_v12 = vpop.f32.mrf.mxu1  ;;  %v1823_v11 = vpop.f32.mrf.mxu0  ;;  %2693 = vmatpush.msrb.mxu0 %v2672_v9  ;;  %v2670_v32 = vld [vmem:[#allocation3 + $0xe18] sm:$0xff]  ;;  %v2829_v9 = vld [vmem:[#allocation3 + $0xf70] sm:$0xff] }
 0x1da   : > { %v1623_v58 = vadd.f32 %v1601_v12, %v8418_v19  ;;  %v8535_v8 = vpop.f32.mrf.mxu3  ;;  %2620 = vmatpush.msra.mxu3 %v2597_v18  ;;  %v2669_v18 = vld [vmem:[#allocation3 + $0xe10] sm:$0xff] }
 0x1db   : > { %2275 = vmatmul.f32.gmra.mxu2 %v8313_v15  ;;  %2694 = vmatpush.msrb.mxu0 %v2671_v56 }
 0x1dc   : > { %v1697_v45 = vadd.f32 %v8508_v48, %v1623_v58  ;;  %2192 = vmatmul.f32.gmra.mxu1 %v7164_v7  ;;  %2406 = vmatmul.f32.gmra.mxu0 %v8421_v53  ;;  %v2449_v48 = vld [vmem:[#allocation3 + $0xca0] sm:$0xff]  ;;  %v2522_v53 = vld [vmem:[#allocation3 + $0xd18] sm:$0xff] }
 0x1dd   : > { %2472 = vmatpush.msrb.mxu1 %v2449_v48  ;;  %2547 = vmatpush.msra.mxu2 %v2522_v53  ;;  %v7166_v7 = vld [vmem:[#allocation2 + $0x60] sm:$0xff] }
 0x1de   : > { %v1771_v19 = vadd.f32 %v8510_v25, %v1697_v45  ;;  %v8545_v25 = vpop.f32.mrf.mxu2  ;;  %2621 = vmatpush.msra.mxu3 %v2596_v23  ;;  %2695 = vmatpush.msrb.mxu0 %v2670_v32  ;;  %v2756_v23 = vld [vmem:[#allocation3 + $0xef8] sm:$0xff]  ;;  %v2901_v32 = vld [vmem:[#allocation3 + $0xfe0] sm:$0xff] }
 0x1df   : > { %2349 = vmatmul.f32.gmra.mxu3 %v8348_v46  ;;  %v479_v46 = vld [vmem:[#allocation2 + $0xa6] sm:$0x1]  ;;  %2473 = vmatpush.msrb.mxu1 %v2448_v6  ;;  %v2828_v6 = vld [vmem:[#allocation3 + $0xf68] sm:$0xff] }
 0x1e0   : > { %v8541_v62 = vadd.f32 %v1823_v11, %v1771_v19  ;;  %487 = vst [vmem:[#allocation2 + $0xa0] sm:$0x1] %v479_v46  ;;  %2548 = vmatpush.msra.mxu2 %v2521_v42  ;;  %2622 = vmatpush.msra.mxu3 %v2595_v1  ;;  %v2593_v19 = vld [vmem:[#allocation3 + $0xd80] sm:$0xff] }
 0x1e1   : > { %v1604_v37 = vpop.f32.mrf.mxu1  ;;  %v1826_v43 = vpop.f32.mrf.mxu0  ;;  %2696 = vmatpush.msrb.mxu0 %v2669_v18  ;;  %v2667_v46 = vld [vmem:[#allocation3 + $0xe00] sm:$0xff] }
 0x1e2   : > { %v1624_v15 = vadd.f32 %v1604_v37, %v8436_v39  ;;  %v8547_v52 = vpop.f32.mrf.mxu3  ;;  %v8551_v39 = vld [vmem:[#allocation2 + $0x82] sm:$0xff] }
 0x1e3   : > { %2278 = vmatmul.f32.gmra.mxu2 %v2227_v60  ;;  %v8576_v60 = vld [vmem:[#allocation2 + $0xa2] sm:$0xff] }
 0x1e4   : > { %v1698_v36 = vadd.f32 %v8521_v20, %v1624_v15  ;;  %2195 = vmatmul.f32.gmra.mxu1 %v7165_v55  ;;  %2409 = vmatmul.f32.gmra.mxu0 %v8439_v26  ;;  %v2447_v20 = vld [vmem:[#allocation3 + $0xc90] sm:$0xff]  ;;  %v2520_v26 = vld [vmem:[#allocation3 + $0xd08] sm:$0xff]  ;;  %v8582_v42 = vld [vmem:[#allocation2 + $0x80] sm:$0xff] }
 0x1e5   : > { %2474 = vmatpush.msrb.mxu1 %v2447_v20  ;;  %2549 = vmatpush.msra.mxu2 %v2520_v26  ;;  %v8584_v1 = vld [vmem:[#allocation2 + $0x83] sm:$0xff]  ;;  %v2978_v26 = vld [vmem:[#allocation3 + $0x1078] sm:$0xff] }
 0x1e6   : > { %v1772_v40 = vadd.f32 %v8523_v49, %v1698_v36  ;;  %v8558_v58 = vpop.f32.mrf.mxu2  ;;  %v2594_v49 = vld [vmem:[#allocation3 + $0xd88] sm:$0xff]  ;;  %v2903_v36 = vld [vmem:[#allocation3 + $0xff0] sm:$0xff] }
 0x1e7   : > { %2352 = vmatmul.f32.gmra.mxu3 %v8551_v39  ;;  %2475 = vmatpush.msrb.mxu1 %v2446_v16  ;;  %v2902_v20 = vld [vmem:[#allocation3 + $0xfe8] sm:$0xff]  ;;  %v2826_v16 = vld [vmem:[#allocation3 + $0xf58] sm:$0xff] }
 0x1e8   : > { %v8554_v27 = vadd.f32 %v1826_v43, %v1772_v40  ;;  %2623 = vmatpush.msra.mxu3 %v2594_v49  ;;  %2550 = vmatpush.msra.mxu2 %v2519_v22  ;;  %v2229_v43 = vld [vmem:[#allocation2 + $0xa1] sm:$0xff] }
 0x1e9   : > { %v1607_v41 = vpop.f32.mrf.mxu1  ;;  %v1829_v12 = vpop.f32.mrf.mxu0  ;;  %v2827_v49 = vld [vmem:[#allocation3 + $0xf60] sm:$0xff] }
 0x1ea   : > { %v1625_v11 = vadd.f32 %v1607_v41, %v8453_v38  ;;  %v8560_v44 = vpop.f32.mrf.mxu3  ;;  %2624 = vmatpush.msra.mxu3 %v2593_v19  ;;  %2831 = vmatpush.msrb.mxu2 %v2830_v2 }
 0x1eb   : > { %2281 = vmatmul.f32.gmra.mxu2 %v8342_v13  ;;  %v2904_v13 = vld [vmem:[#allocation3 + $0xff8] sm:$0xff] }
 0x1ec   : > { %v1699_v45 = vadd.f32 %v8533_v31, %v1625_v11  ;;  %2198 = vmatmul.f32.gmra.mxu1 %v7166_v7  ;;  %2412 = vmatmul.f32.gmra.mxu0 %v8456_v24  ;;  %v2445_v31 = vld [vmem:[#allocation3 + $0xc80] sm:$0xff]  ;;  %v2754_v11 = vld [vmem:[#allocation3 + $0xee8] sm:$0xff] }
 0x1ed   : > { %2476 = vmatpush.msrb.mxu1 %v2445_v31  ;;  %2905 = vmatpush.msrb.mxu3 %v2904_v13 }
 0x1ee   : > { %v1773_v38 = vadd.f32 %v8535_v8, %v1699_v45  ;;  %v8570_v53 = vpop.f32.mrf.mxu2  ;;  %v2668_v8 = vld [vmem:[#allocation3 + $0xe08] sm:$0xff]  ;;  %2832 = vmatpush.msrb.mxu2 %v2829_v9  ;;  %v2977_v45 = vld [vmem:[#allocation3 + $0x1070] sm:$0xff] }
 0x1ef   : > { %2355 = vmatmul.f32.gmra.mxu3 %v8375_v59  ;;  %2697 = vmatpush.msrb.mxu0 %v2668_v8  ;;  %v7167_v59 = vld [vmem:[#allocation2 + $0x70] sm:$0xff]  ;;  %v2975_v8 = vld [vmem:[#allocation3 + $0x1060] sm:$0xff]  ;;  %v2898_v9 = vld [vmem:[#allocation3 + $0xfc8] sm:$0xff] }
 0x1f0   : > { %v8566_v5 = vadd.f32 %v1829_v12, %v1773_v38  ;;  %2757 = vmatpush.msra.mxu1 %v2756_v23  ;;  %2906 = vmatpush.msrb.mxu3 %v2903_v36  ;;  %v8613_v23 = vld [vmem:[#allocation2 + $0xa3] sm:$0xff] }
 0x1f1   : > { %v1610_v14 = vpop.f32.mrf.mxu1  ;;  %v1832_v24 = vpop.f32.mrf.mxu0  ;;  %2698 = vmatpush.msrb.mxu0 %v2667_v46  ;;  %2833 = vmatpush.msrb.mxu2 %v2828_v6  ;;  %v2750_v36 = vld [vmem:[#allocation3 + $0xec8] sm:$0xff]  ;;  %v2897_v6 = vld [vmem:[#allocation3 + $0xfc0] sm:$0xff] }
 0x1f2   : > { %v1626_v48 = vadd.f32 %v1610_v14, %v8471_v50  ;;  %v8572_v37 = vpop.f32.mrf.mxu3  ;;  %2907 = vmatpush.msrb.mxu3 %v2902_v20  ;;  %v7168_v14 = vld [vmem:[#allocation2 + $0x90] sm:$0xff] }
 0x1f3   : > { %2284 = vmatmul.f32.gmra.mxu2 %v2229_v43  ;;  %2979 = vmatpush.msra.mxu0 %v2978_v26  ;;  %v2824_v43 = vld [vmem:[#allocation3 + $0xf48] sm:$0xff] }
 0x1f4   : > { %v1700_v15 = vadd.f32 %v8545_v25, %v1626_v48  ;;  %2201 = vmatmul.f32.gmra.mxu1 %v7167_v59  ;;  %2415 = vmatmul.f32.gmra.mxu0 %v8474_v51  ;;  %v2755_v25 = vld [vmem:[#allocation3 + $0xef0] sm:$0xff] }
 0x1f5   : > { %2758 = vmatpush.msra.mxu1 %v2755_v25  ;;  %2834 = vmatpush.msrb.mxu2 %v2827_v49  ;;  %v2899_v48 = vld [vmem:[#allocation3 + $0xfd0] sm:$0xff]  ;;  %v2823_v25 = vld [vmem:[#allocation3 + $0xf40] sm:$0xff]  ;;  %v2972_v49 = vld [vmem:[#allocation3 + $0x1048] sm:$0xff] }
 0x1f6   : > { %v1774_v50 = vadd.f32 %v8547_v52, %v1700_v15  ;;  %v8587_v56 = vpop.f32.mrf.mxu2  ;;  %2908 = vmatpush.msrb.mxu3 %v2901_v32  ;;  %2980 = vmatpush.msra.mxu0 %v2977_v45  ;;  %v2748_v45 = vld [vmem:[#allocation3 + $0xeb8] sm:$0xff] }
 0x1f7   : > { %2358 = vmatmul.f32.gmra.mxu3 %v8576_v60  ;;  %2759 = vmatpush.msra.mxu1 %v2754_v11 }
 0x1f8   : > { %v8579_v55 = vadd.f32 %v1832_v24, %v1774_v50  ;;  %2835 = vmatpush.msrb.mxu2 %v2826_v16  ;;  %v2825_v24 = vld [vmem:[#allocation3 + $0xf50] sm:$0xff]  ;;  %v2974_v50 = vld [vmem:[#allocation3 + $0x1058] sm:$0xff] }
 0x1f9   : > { %v1613_v51 = vpop.f32.mrf.mxu1  ;;  %v1835_v40 = vpop.f32.mrf.mxu0 }
 0x1fa   : > { %v1627_v52 = vadd.f32 %v1613_v51, %v8488_v30  ;;  %v8589_v41 = vpop.f32.mrf.mxu3  ;;  %2836 = vmatpush.msrb.mxu2 %v2825_v24  ;;  %v2973_v51 = vld [vmem:[#allocation3 + $0x1050] sm:$0xff] }
 0x1fb   : > { %2551 = vmatmul.f32.vlgmr.msra.gmra.mxu2 %v8367_v47  ;;  %v2976_v47 = vld [vmem:[#allocation3 + $0x1068] sm:$0xff] }
 0x1fc   : > { %v1701_v12 = vadd.f32 %v8558_v58, %v1627_v52  ;;  %2204 = vmatmul.f32.gmra.mxu1 %v8582_v42  ;;  %2418 = vmatmul.f32.gmra.mxu0 %v8584_v1  ;;  %v2753_v58 = vld [vmem:[#allocation3 + $0xee0] sm:$0xff] }
 0x1fd   : > { %2760 = vmatpush.msra.mxu1 %v2753_v58  ;;  %2981 = vmatpush.msra.mxu0 %v2976_v47  ;;  %v2749_v52 = vld [vmem:[#allocation3 + $0xec0] sm:$0xff]  ;;  %v2821_v58 = vld [vmem:[#allocation3 + $0xf30] sm:$0xff] }
 0x1fe   : > { %v1775_v30 = vadd.f32 %v8560_v44, %v1701_v12  ;;  %v8600_v18 = vpop.f32.mrf.mxu2  ;;  %v2900_v44 = vld [vmem:[#allocation3 + $0xfd8] sm:$0xff]  ;;  %2837 = vmatpush.msrb.mxu2 %v2824_v43  ;;  %v2658_v12 = vld [vmem:[#allocation2 + $0x40] sm:$0xff]  ;;  %v2969_v43 = vld [vmem:[#allocation3 + $0x1030] sm:$0xff] }
 0x1ff   : > { %2625 = vmatmul.f32.vlgmr.msra.gmra.mxu3 %v8405_v29  ;;  %v2752_v29 = vld [vmem:[#allocation3 + $0xed8] sm:$0xff]  ;;  %2982 = vmatpush.msra.mxu0 %v2975_v8  ;;  %v2819_v8 = vld [vmem:[#allocation3 + $0xf20] sm:$0xff] }
 0x200   : > { %v8596_v7 = vadd.f32 %v1835_v40, %v1775_v30  ;;  %2909 = vmatpush.msrb.mxu3 %v2900_v44  ;;  %2761 = vmatpush.msra.mxu1 %v2752_v29  ;;  %v2970_v29 = vld [vmem:[#allocation3 + $0x1038] sm:$0xff] }
 0x201   : > { %v1616_v22 = vpop.f32.mrf.mxu1  ;;  %v1838_v38 = vpop.f32.mrf.mxu0  ;;  %2983 = vmatpush.msra.mxu0 %v2974_v50  ;;  %2838 = vmatpush.msrb.mxu2 %v2823_v25 }
 0x202   : > { %v1628_v19 = vadd.f32 %v1616_v22, %v8500_v35  ;;  %v8602_v31 = vpop.f32.mrf.mxu3  ;;  %2910 = vmatpush.msrb.mxu3 %v2899_v48  ;;  %v2971_v22 = vld [vmem:[#allocation3 + $0x1040] sm:$0xff]  ;;  %v2746_v48 = vld [vmem:[#allocation3 + $0xea8] sm:$0xff] }
 0x203   : > { %2554 = vmatmul.f32.gmra.mxu2 %v8385_v63  ;;  %2984 = vmatpush.msra.mxu0 %v2973_v51  ;;  %v2968_v51 = vld [vmem:[#allocation3 + $0x1028] sm:$0xff] }
 0x204   : > { %v1702_v2 = vadd.f32 %v8570_v53, %v1628_v19  ;;  %2207 = vmatmul.f32.gmra.mxu1 %v7168_v14  ;;  %2421 = vmatmul.f32.gmra.mxu0 %v8503_v33  ;;  %v2751_v53 = vld [vmem:[#allocation3 + $0xed0] sm:$0xff]  ;;  %v8611_v33 = vld [vmem:[#allocation2 + $0xa0] sm:$0xff] }
 0x205   : > { %2762 = vmatpush.msra.mxu1 %v2751_v53  ;;  %2911 = vmatpush.msrb.mxu3 %v2898_v9  ;;  %v2747_v19 = vld [vmem:[#allocation3 + $0xeb0] sm:$0xff]  ;;  %v2893_v53 = vld [vmem:[#allocation3 + $0xfa0] sm:$0xff]  ;;  %v2818_v9 = vld [vmem:[#allocation3 + $0xf18] sm:$0xff] }
 0x206   : > { %v1776_v35 = vadd.f32 %v8572_v37, %v1702_v2  ;;  %v8616_v37 = vpop.f32.mrf.mxu2  ;;  %2985 = vmatpush.msra.mxu0 %v2972_v49  ;;  %v8639_v2 = vld [vmem:[#allocation2 + $0x50] sm:$0xff]  ;;  %v2967_v49 = vld [vmem:[#allocation3 + $0x1020] sm:$0xff] }
 0x207   : > { %2628 = vmatmul.f32.gmra.mxu3 %v8423_v21  ;;  %2763 = vmatpush.msra.mxu1 %v2750_v36  ;;  %v8653_v36 = vld [vmem:[#allocation2 + $0x60] sm:$0xff] }
 0x208   : > { %v8608_v13 = vadd.f32 %v1838_v38, %v1776_v35  ;;  %2912 = vmatpush.msrb.mxu3 %v2897_v6  ;;  %2986 = vmatpush.msra.mxu0 %v2971_v22  ;;  %v7170_v35 = vld [vmem:[#allocation2 + $0x44] sm:$0xff]  ;;  %v2892_v6 = vld [vmem:[#allocation3 + $0xf98] sm:$0xff] }
 0x209   : > { %v1619_v15 = vpop.f32.mrf.mxu1  ;;  %v1841_v59 = vpop.f32.mrf.mxu0  ;;  %2764 = vmatpush.msra.mxu1 %v2749_v52  ;;  %v2515_v52 = vld [vmem:[#allocation2 + $0x85] sm:$0xff] }
 0x20a   : > { %v1629_v63 = vadd.f32 %v1619_v15, %v8517_v0  ;;  %v8618_v46 = vpop.f32.mrf.mxu3  ;;  %2987 = vmatpush.msra.mxu0 %v2970_v29  ;;  %v495_v15 = vld [vmem:[#allocation2 + $0xa9] sm:$0x1]  ;;  %v2889_v29 = vld [vmem:[#allocation3 + $0xf80] sm:$0xff] }
 0x20b   : > { %2557 = vmatmul.f32.gmra.mxu2 %v8397_v17  ;;  %v2896_v17 = vld [vmem:[#allocation3 + $0xfb8] sm:$0xff]  ;;  %2765 = vmatpush.msra.mxu1 %v2748_v45  ;;  %503 = vst [vmem:[#allocation2 + $0xab] sm:$0x1] %v495_v15  ;;  %v2890_v22 = vld [vmem:[#allocation3 + $0xf88] sm:$0xff] }
 0x20c   : > { %v1703_v21 = vadd.f32 %v8587_v56, %v1629_v63  ;;  %2210 = vmatmul.f32.gmra.mxu1 %v8611_v33  ;;  %2424 = vmatmul.f32.gmra.mxu0 %v8613_v23  ;;  %v2822_v56 = vld [vmem:[#allocation3 + $0xf38] sm:$0xff] }
 0x20d   : > { %2839 = vmatpush.msrb.mxu2 %v2822_v56  ;;  %2913 = vmatpush.msrb.mxu3 %v2896_v17  ;;  %v2891_v17 = vld [vmem:[#allocation3 + $0xf90] sm:$0xff] }
 0x20e   : > { %v1777_v0 = vadd.f32 %v8589_v41, %v1703_v21  ;;  %v8629_v41 = vpop.f32.mrf.mxu2  ;;  %2766 = vmatpush.msra.mxu1 %v2747_v19  ;;  %2988 = vmatpush.msra.mxu0 %v2969_v43  ;;  %v2966_v19 = vld [vmem:[#allocation3 + $0x1018] sm:$0xff] }
 0x20f   : > { %2631 = vmatmul.f32.gmra.mxu3 %v8441_v61  ;;  %v7169_v61 = vld [vmem:[#allocation2 + $0x34] sm:$0xff]  ;;  %2840 = vmatpush.msrb.mxu2 %v2821_v58 }
 0x210   : > { %v8625_v40 = vadd.f32 %v1841_v59, %v1777_v0  ;;  %2767 = vmatpush.msra.mxu1 %v2746_v48  ;;  %v527_v59 = vld [vmem:[#allocation2 + $0xa8] sm:$0x1]  ;;  %v8658_v0 = vld [vmem:[#allocation2 + $0x90] sm:$0xff]  ;;  %2989 = vmatpush.msra.mxu0 %v2968_v51  ;;  %v3126_v48 = vld [vmem:[#allocation3 + $0x1178] sm:$0xff] }
 0x211   : > { %v1894_v20 = vpop.f32.mrf.mxu1  ;;  %v2116_v26 = vpop.f32.mrf.mxu0  ;;  %535 = vst [vmem:[#allocation2 + $0xac] sm:$0x1] %v527_v59  ;;  %v3124_v51 = vld [vmem:[#allocation3 + $0x1168] sm:$0xff] }
 0x212   : > { %v1918_v11 = vadd.f32 %v1894_v20, %v8529_v3  ;;  %v8631_v30 = vpop.f32.mrf.mxu3  ;;  %v2895_v3 = vld [vmem:[#allocation3 + $0xfb0] sm:$0xff]  ;;  %577 = vst [vmem:[#allocation2 + $0xb0] sm:$0xff] %v8658_v0  ;;  %2990 = vmatpush.msra.mxu0 %v2967_v49 }
 0x213   : > { %2560 = vmatmul.f32.gmra.mxu2 %v8415_v34  ;;  %2914 = vmatpush.msrb.mxu3 %v2895_v3  ;;  %v2894_v34 = vld [vmem:[#allocation3 + $0xfa8] sm:$0xff]  ;;  %v7171_v20 = vld [vmem:[#allocation2 + $0x54] sm:$0xff] }
 0x214   : > { %v1992_v32 = vadd.f32 %v8600_v18, %v1918_v11  ;;  %2477 = vmatmul.f32.vlgmr.msrb.gmra.mxu1 %v7169_v61  ;;  %2699 = vmatmul.f32.vlgmr.msrb.gmra.mxu0 %v2658_v12  ;;  %v2820_v18 = vld [vmem:[#allocation3 + $0xf28] sm:$0xff] }
 0x215   : > { %2841 = vmatpush.msrb.mxu2 %v2820_v18  ;;  %2915 = vmatpush.msrb.mxu3 %v2894_v34  ;;  %v8665_v12 = vld [vmem:[#allocation2 + $0x86] sm:$0xff] }
 0x216   : > { %v2066_v16 = vadd.f32 %v8602_v31, %v1992_v32  ;;  %v8642_v14 = vpop.f32.mrf.mxu2  ;;  %v2816_v61 = vld [vmem:[#allocation3 + $0xf08] sm:$0xff]  ;;  %2991 = vmatpush.msra.mxu0 %v2966_v19  ;;  %v2815_v34 = vld [vmem:[#allocation3 + $0xf00] sm:$0xff]  ;;  %v3122_v19 = vld [vmem:[#allocation3 + $0x1158] sm:$0xff] }
 0x217   : > { %2634 = vmatmul.f32.gmra.mxu3 %v8458_v4  ;;  %2842 = vmatpush.msrb.mxu2 %v2819_v8 }
 0x218   : > { %v8636_v38 = vadd.f32 %v2116_v26, %v2066_v16  ;;  %2916 = vmatpush.msrb.mxu3 %v2893_v53  ;;  %v2817_v26 = vld [vmem:[#allocation3 + $0xf10] sm:$0xff]  ;;  %v2517_v59 = vld [vmem:[#allocation2 + $0xa5] sm:$0xff] }
 0x219   : > { %v1897_v44 = vpop.f32.mrf.mxu1  ;;  %v2119_v47 = vpop.f32.mrf.mxu0  ;;  %2843 = vmatpush.msrb.mxu2 %v2818_v9  ;;  %v8671_v16 = vld [vmem:[#allocation2 + $0x70] sm:$0xff]  ;;  %v3052_v9 = vld [vmem:[#allocation3 + $0x10f8] sm:$0xff] }
 0x21a   : > { %v1919_v31 = vadd.f32 %v1897_v44, %v8541_v62  ;;  %v8644_v24 = vpop.f32.mrf.mxu3  ;;  %2917 = vmatpush.msrb.mxu3 %v2892_v6 }
 0x21b   : > { %2563 = vmatmul.f32.gmra.mxu2 %v8433_v57  ;;  %v559_v57 = vld [vmem:[#allocation2 + $0xa7] sm:$0x1] }
 0x21c   : > { %v1993_v4 = vadd.f32 %v8616_v37, %v1919_v31  ;;  %2480 = vmatmul.f32.gmra.mxu1 %v7170_v35  ;;  %2702 = vmatmul.f32.gmra.mxu0 %v8639_v2  ;;  %v2745_v37 = vld [vmem:[#allocation3 + $0xea0] sm:$0xff]  ;;  %567 = vst [vmem:[#allocation2 + $0xad] sm:$0x1] %v559_v57  ;;  %v2742_v31 = vld [vmem:[#allocation3 + $0xe88] sm:$0xff] }
 0x21d   : > { %2768 = vmatpush.msra.mxu1 %v2745_v37  ;;  %2844 = vmatpush.msrb.mxu2 %v2817_v26  ;;  %v2963_v57 = vld [vmem:[#allocation3 + $0x1000] sm:$0xff]  ;;  %v3274_v26 = vld [vmem:[#allocation3 + $0x1278] sm:$0xff] }
 0x21e   : > { %v2067_v62 = vadd.f32 %v8618_v46, %v1993_v4  ;;  %v8656_v25 = vpop.f32.mrf.mxu2  ;;  %2918 = vmatpush.msrb.mxu3 %v2891_v17  ;;  %v2965_v4 = vld [vmem:[#allocation3 + $0x1010] sm:$0xff]  ;;  %v2806_v17 = vld [vmem:[#allocation2 + $0x42] sm:$0xff] }
 0x21f   : > { %2637 = vmatmul.f32.gmra.mxu3 %v8476_v54  ;;  %2845 = vmatpush.msrb.mxu2 %v2816_v61  ;;  %v3123_v61 = vld [vmem:[#allocation3 + $0x1160] sm:$0xff] }
 0x220   : > { %v8650_v63 = vadd.f32 %v2119_v47, %v2067_v62  ;;  %2919 = vmatpush.msrb.mxu3 %v2890_v22  ;;  %v7172_v47 = vld [vmem:[#allocation2 + $0x64] sm:$0xff]  ;;  %2992 = vmatpush.msra.mxu0 %v2965_v4  ;;  %v2807_v4 = vld [vmem:[#allocation2 + $0x52] sm:$0xff] }
 0x221   : > { %v1900_v50 = vpop.f32.mrf.mxu1  ;;  %v2122_v21 = vpop.f32.mrf.mxu0  ;;  %2846 = vmatpush.msrb.mxu2 %v2815_v34 }
 0x222   : > { %v1920_v46 = vadd.f32 %v1900_v50, %v8554_v27  ;;  %v8660_v54 = vpop.f32.mrf.mxu3  ;;  %v2744_v27 = vld [vmem:[#allocation3 + $0xe98] sm:$0xff]  ;;  %2920 = vmatpush.msrb.mxu3 %v2889_v29  ;;  %v3125_v50 = vld [vmem:[#allocation3 + $0x1170] sm:$0xff] }
 0x223   : > { %2769 = vmatpush.msra.mxu1 %v2744_v27  ;;  %2566 = vmatmul.f32.gmra.mxu2 %v2515_v52  ;;  %v8698_v52 = vld [vmem:[#allocation2 + $0x84] sm:$0xff] }
 0x224   : > { %v1994_v56 = vadd.f32 %v8629_v41, %v1920_v46  ;;  %2483 = vmatmul.f32.gmra.mxu1 %v7171_v20  ;;  %2705 = vmatmul.f32.gmra.mxu0 %v8653_v36  ;;  %v2743_v41 = vld [vmem:[#allocation3 + $0xe90] sm:$0xff]  ;;  %v3198_v27 = vld [vmem:[#allocation3 + $0x11e8] sm:$0xff] }
 0x225   : > { %2770 = vmatpush.msra.mxu1 %v2743_v41  ;;  %3127 = vmatpush.msra.mxu2 %v3126_v48  ;;  %v3199_v46 = vld [vmem:[#allocation3 + $0x11f0] sm:$0xff]  ;;  %v3050_v41 = vld [vmem:[#allocation3 + $0x10e8] sm:$0xff] }
 0x226   : > { %v2068_v11 = vadd.f32 %v8631_v30, %v1994_v56  ;;  %v8674_v30 = vpop.f32.mrf.mxu2  ;;  %v7174_v48 = vld [vmem:[#allocation2 + $0x94] sm:$0xff] }
 0x227   : > { %2640 = vmatmul.f32.gmra.mxu3 %v8665_v12  ;;  %2771 = vmatpush.msra.mxu1 %v2742_v31 }
 0x228   : > { %v8668_v32 = vadd.f32 %v2122_v21, %v2068_v11  ;;  %v8692_v21 = vld [vmem:[#allocation2 + $0xa6] sm:$0xff]  ;;  %3128 = vmatpush.msra.mxu2 %v3125_v50 }
 0x229   : > { %v1903_v45 = vpop.f32.mrf.mxu1  ;;  %v2125_v58 = vpop.f32.mrf.mxu0 }
 0x22a   : > { %v1921_v3 = vadd.f32 %v1903_v45, %v8566_v5  ;;  %v8676_v18 = vpop.f32.mrf.mxu3  ;;  %3129 = vmatpush.msra.mxu2 %v3124_v51  ;;  %v2880_v45 = vld [vmem:[#allocation2 + $0x43] sm:$0xff] }
 0x22b   : > { %2569 = vmatmul.f32.gmra.mxu2 %v8468_v10  ;;  %v3200_v10 = vld [vmem:[#allocation3 + $0x11f8] sm:$0xff] }
 0x22c   : > { %v1995_v44 = vadd.f32 %v8642_v14, %v1921_v3  ;;  %2486 = vmatmul.f32.gmra.mxu1 %v7172_v47  ;;  %2708 = vmatmul.f32.gmra.mxu0 %v8671_v16  ;;  %v2741_v14 = vld [vmem:[#allocation3 + $0xe80] sm:$0xff]  ;;  %v3273_v3 = vld [vmem:[#allocation3 + $0x1270] sm:$0xff] }
 0x22d   : > { %2772 = vmatpush.msra.mxu1 %v2741_v14  ;;  %3201 = vmatpush.msra.mxu3 %v3200_v10  ;;  %v3271_v10 = vld [vmem:[#allocation3 + $0x1260] sm:$0xff] }
 0x22e   : > { %v2069_v5 = vadd.f32 %v8644_v24, %v1995_v44  ;;  %v8686_v43 = vpop.f32.mrf.mxu2  ;;  %v2964_v24 = vld [vmem:[#allocation3 + $0x1008] sm:$0xff]  ;;  %3130 = vmatpush.msra.mxu2 %v3123_v61 }
 0x22f   : > { %2643 = vmatmul.f32.gmra.mxu3 %v8505_v28  ;;  %2993 = vmatpush.msra.mxu0 %v2964_v24  ;;  %v7173_v28 = vld [vmem:[#allocation2 + $0x74] sm:$0xff]  ;;  %v2732_v61 = vld [vmem:[#allocation2 + $0x41] sm:$0xff] }
 0x230   : > { %v8682_v35 = vadd.f32 %v2125_v58, %v2069_v5  ;;  %3053 = vmatpush.msrb.mxu1 %v3052_v9  ;;  %3202 = vmatpush.msra.mxu3 %v3199_v46  ;;  %v3197_v58 = vld [vmem:[#allocation3 + $0x11e0] sm:$0xff]  ;;  %v3196_v5 = vld [vmem:[#allocation3 + $0x11d8] sm:$0xff]  ;;  %v3195_v24 = vld [vmem:[#allocation3 + $0x11d0] sm:$0xff] }
 0x231   : > { %v1906_v8 = vpop.f32.mrf.mxu1  ;;  %v2128_v62 = vpop.f32.mrf.mxu0  ;;  %2994 = vmatpush.msra.mxu0 %v2963_v57  ;;  %3131 = vmatpush.msra.mxu2 %v3122_v19  ;;  %v3270_v57 = vld [vmem:[#allocation3 + $0x1258] sm:$0xff] }
 0x232   : > { %v1922_v53 = vadd.f32 %v1906_v8, %v8579_v55  ;;  %v8688_v15 = vpop.f32.mrf.mxu3  ;;  %3203 = vmatpush.msra.mxu3 %v3198_v27  ;;  %v3048_v8 = vld [vmem:[#allocation3 + $0x10d8] sm:$0xff]  ;;  %v3193_v27 = vld [vmem:[#allocation3 + $0x11c0] sm:$0xff] }
 0x233   : > { %2572 = vmatmul.f32.gmra.mxu2 %v2517_v59  ;;  %3275 = vmatpush.msrb.mxu0 %v3274_v26  ;;  %v3269_v26 = vld [vmem:[#allocation3 + $0x1250] sm:$0xff] }
 0x234   : > { %v1996_v37 = vadd.f32 %v8656_v25, %v1922_v53  ;;  %2489 = vmatmul.f32.gmra.mxu1 %v7173_v28  ;;  %2711 = vmatmul.f32.gmra.mxu0 %v8582_v42  ;;  %v3051_v25 = vld [vmem:[#allocation3 + $0x10f0] sm:$0xff]  ;;  %v8724_v28 = vld [vmem:[#allocation2 + $0xa4] sm:$0xff] }
 0x235   : > { %3054 = vmatpush.msrb.mxu1 %v3051_v25  ;;  %3204 = vmatpush.msra.mxu3 %v3197_v58  ;;  %v8718_v53 = vld [vmem:[#allocation2 + $0x53] sm:$0xff]  ;;  %v2808_v25 = vld [vmem:[#allocation2 + $0x62] sm:$0xff] }
 0x236   : > { %v2070_v55 = vadd.f32 %v8660_v54, %v1996_v37  ;;  %v8701_v54 = vpop.f32.mrf.mxu2  ;;  %3276 = vmatpush.msrb.mxu0 %v3273_v3  ;;  %v3120_v37 = vld [vmem:[#allocation3 + $0x1148] sm:$0xff]  ;;  %v3192_v3 = vld [vmem:[#allocation3 + $0x11b8] sm:$0xff] }
 0x237   : > { %2646 = vmatmul.f32.gmra.mxu3 %v8692_v21  ;;  %3055 = vmatpush.msrb.mxu1 %v3050_v41 }
 0x238   : > { %v8695_v6 = vadd.f32 %v2128_v62, %v2070_v55  ;;  %3205 = vmatpush.msra.mxu3 %v3196_v5  ;;  %v3121_v62 = vld [vmem:[#allocation3 + $0x1150] sm:$0xff]  ;;  %v3194_v55 = vld [vmem:[#allocation3 + $0x11c8] sm:$0xff] }
 0x239   : > { %v1909_v42 = vpop.f32.mrf.mxu1  ;;  %v2131_v56 = vpop.f32.mrf.mxu0  ;;  %3132 = vmatpush.msra.mxu2 %v3121_v62  ;;  %v3117_v5 = vld [vmem:[#allocation3 + $0x1130] sm:$0xff] }
 0x23a   : > { %v1923_v20 = vadd.f32 %v1909_v42, %v8596_v7  ;;  %v8703_v11 = vpop.f32.mrf.mxu3  ;;  %3206 = vmatpush.msra.mxu3 %v3195_v24  ;;  %v3046_v42 = vld [vmem:[#allocation3 + $0x10c8] sm:$0xff] }
 0x23b   : > { %2847 = vmatmul.f32.vlgmr.msrb.gmra.mxu2 %v2806_v17 }
 0x23c   : > { %v1997_v49 = vadd.f32 %v8674_v30, %v1923_v20  ;;  %2492 = vmatmul.f32.gmra.mxu1 %v8698_v52  ;;  %2714 = vmatmul.f32.gmra.mxu0 %v8658_v0  ;;  %v3049_v30 = vld [vmem:[#allocation3 + $0x10e0] sm:$0xff] }
 0x23d   : > { %3056 = vmatpush.msrb.mxu1 %v3049_v30  ;;  %3133 = vmatpush.msra.mxu2 %v3120_v37  ;;  %v8734_v20 = vld [vmem:[#allocation2 + $0x63] sm:$0xff] }
 0x23e   : > { %v2071_v7 = vadd.f32 %v8676_v18, %v1997_v49  ;;  %v8712_v34 = vpop.f32.mrf.mxu2  ;;  %v3272_v18 = vld [vmem:[#allocation3 + $0x1268] sm:$0xff]  ;;  %3207 = vmatpush.msra.mxu3 %v3194_v55  ;;  %v3118_v49 = vld [vmem:[#allocation3 + $0x1138] sm:$0xff] }
 0x23f   : > { %2921 = vmatmul.f32.vlgmr.msrb.gmra.mxu3 %v2880_v45  ;;  %3277 = vmatpush.msrb.mxu0 %v3272_v18  ;;  %v3268_v30 = vld [vmem:[#allocation3 + $0x1248] sm:$0xff]  ;;  %v8746_v18 = vld [vmem:[#allocation2 + $0x73] sm:$0xff] }
 0x240   : > { %v8709_v22 = vadd.f32 %v2131_v56, %v2071_v7  ;;  %3057 = vmatpush.msrb.mxu1 %v3048_v8  ;;  %v3119_v56 = vld [vmem:[#allocation3 + $0x1140] sm:$0xff]  ;;  %3208 = vmatpush.msra.mxu3 %v3193_v27  ;;  %v3116_v8 = vld [vmem:[#allocation3 + $0x1128] sm:$0xff] }
 0x241   : > { %v1912_v44 = vpop.f32.mrf.mxu1  ;;  %v2134_v47 = vpop.f32.mrf.mxu0  ;;  %3278 = vmatpush.msrb.mxu0 %v3271_v10  ;;  %3134 = vmatpush.msra.mxu2 %v3119_v56  ;;  %v2954_v7 = vld [vmem:[#allocation2 + $0x44] sm:$0xff]  ;;  %v8754_v10 = vld [vmem:[#allocation2 + $0x54] sm:$0xff] }
 0x242   : > { %v1924_v31 = vadd.f32 %v1912_v44, %v8608_v13  ;;  %v8714_v29 = vpop.f32.mrf.mxu3  ;;  %v2809_v44 = vld [vmem:[#allocation2 + $0x72] sm:$0xff]  ;;  %3209 = vmatpush.msra.mxu3 %v3192_v3  ;;  %v3190_v37 = vld [vmem:[#allocation3 + $0x11a8] sm:$0xff] }
 0x243   : > { %2850 = vmatmul.f32.gmra.mxu2 %v2807_v4  ;;  %3279 = vmatpush.msrb.mxu0 %v3270_v57  ;;  %v3191_v4 = vld [vmem:[#allocation3 + $0x11b0] sm:$0xff]  ;;  %v3042_v55 = vld [vmem:[#allocation3 + $0x10a8] sm:$0xff]  ;;  %v3115_v57 = vld [vmem:[#allocation3 + $0x1120] sm:$0xff] }
 0x244   : > { %v1998_v14 = vadd.f32 %v8686_v43, %v1924_v31  ;;  %2495 = vmatmul.f32.gmra.mxu1 %v7174_v48  ;;  %2717 = vmatmul.f32.gmra.mxu0 %v8611_v33  ;;  %v3047_v43 = vld [vmem:[#allocation3 + $0x10d0] sm:$0xff]  ;;  %v3044_v31 = vld [vmem:[#allocation3 + $0x10b8] sm:$0xff] }
 0x245   : > { %3058 = vmatpush.msrb.mxu1 %v3047_v43  ;;  %3280 = vmatpush.msrb.mxu0 %v3269_v26  ;;  %v8769_v26 = vld [vmem:[#allocation2 + $0x61] sm:$0xff]  ;;  %v3113_v3 = vld [vmem:[#allocation3 + $0x1110] sm:$0xff] }
 0x246   : > { %v2072_v13 = vadd.f32 %v8688_v15, %v1998_v14  ;;  %v8727_v15 = vpop.f32.mrf.mxu2  ;;  %3135 = vmatpush.msra.mxu2 %v3118_v49  ;;  %v3267_v14 = vld [vmem:[#allocation3 + $0x1240] sm:$0xff]  ;;  %3210 = vmatpush.msra.mxu3 %v3191_v4  ;;  %v8787_v4 = vld [vmem:[#allocation2 + $0x71] sm:$0xff] }
 0x247   : > { %2924 = vmatmul.f32.gmra.mxu3 %v8718_v53  ;;  %3059 = vmatpush.msrb.mxu1 %v3046_v42  ;;  %v575_v42 = vld [vmem:[#allocation2 + $0x98] sm:$0x3f]  ;;  %v8771_v49 = vld [vmem:[#allocation2 + $0x64] sm:$0xff] }
 0x248   : > { %v8721_v59 = vadd.f32 %v2134_v47, %v2072_v13  ;;  %3281 = vmatpush.msrb.mxu0 %v3268_v30  ;;  %3136 = vmatpush.msra.mxu2 %v3117_v5  ;;  %v8752_v13 = vld [vmem:[#allocation2 + $0x51] sm:$0xff]  ;;  %578 = vst [vmem:[#allocation2 + $0xb8] sm:$0x3f] %v575_v42  ;;  %v3112_v5 = vld [vmem:[#allocation3 + $0x1108] sm:$0xff] }
 0x249   : > { %v1915_v33 = vpop.f32.mrf.mxu1  ;;  %v2137_v9 = vpop.f32.mrf.mxu0  ;;  %3211 = vmatpush.msra.mxu3 %v3190_v37  ;;  %v8781_v30 = vld [vmem:[#allocation2 + $0x93] sm:$0xff] }
 0x24a   : > { %v1925_v50 = vadd.f32 %v1915_v33, %v8625_v40  ;;  %v8729_v46 = vpop.f32.mrf.mxu3  ;;  %3282 = vmatpush.msrb.mxu0 %v3267_v14  ;;  %3137 = vmatpush.msra.mxu2 %v3116_v8  ;;  %v3266_v33 = vld [vmem:[#allocation3 + $0x1238] sm:$0xff] }
 0x24b   : > { %2853 = vmatmul.f32.gmra.mxu2 %v2808_v25  ;;  %v3189_v25 = vld [vmem:[#allocation3 + $0x11a0] sm:$0xff] }
 0x24c   : > { %v1999_v51 = vadd.f32 %v8701_v54, %v1925_v50  ;;  %2498 = vmatmul.f32.gmra.mxu1 %v8724_v28  ;;  %2720 = vmatmul.f32.gmra.mxu0 %v8658_v0  ;;  %v3045_v54 = vld [vmem:[#allocation3 + $0x10c0] sm:$0xff] }
 0x24d   : > { %3060 = vmatpush.msrb.mxu1 %v3045_v54  ;;  %3283 = vmatpush.msrb.mxu0 %v3266_v33  ;;  %v3038_v33 = vld [vmem:[#allocation3 + $0x1088] sm:$0xff] }
 0x24e   : > { %v2073_v40 = vadd.f32 %v8703_v11, %v1999_v51  ;;  %v8741_v11 = vpop.f32.mrf.mxu2  ;;  %3138 = vmatpush.msra.mxu2 %v3115_v57  ;;  %v3265_v51 = vld [vmem:[#allocation3 + $0x1230] sm:$0xff]  ;;  %3212 = vmatpush.msra.mxu3 %v3189_v25  ;;  %v3422_v25 = vld [vmem:[#allocation3 + $0x1378] sm:$0xff] }
 0x24f   : > { %2927 = vmatmul.f32.gmra.mxu3 %v8734_v20  ;;  %3061 = vmatpush.msrb.mxu1 %v3044_v31  ;;  %v3261_v57 = vld [vmem:[#allocation3 + $0x1210] sm:$0xff] }
 0x250   : > { %v8737_v17 = vadd.f32 %v2137_v9, %v2073_v40  ;;  %3284 = vmatpush.msrb.mxu0 %v3265_v51  ;;  %v3114_v40 = vld [vmem:[#allocation3 + $0x1118] sm:$0xff] }
 0x251   : > { %v2190_v41 = vpop.f32.mrf.mxu1  ;;  %v2404_v45 = vpop.f32.mrf.mxu0  ;;  %3139 = vmatpush.msra.mxu2 %v3114_v40 }
 0x252   : > { %v2214_v58 = vadd.f32 %v2190_v41, %v8636_v38  ;;  %v8743_v19 = vpop.f32.mrf.mxu3  ;;  %v3188_v41 = vld [vmem:[#allocation3 + $0x1198] sm:$0xff] }
 0x253   : > { %2856 = vmatmul.f32.gmra.mxu2 %v2809_v44  ;;  %3213 = vmatpush.msra.mxu3 %v3188_v41  ;;  %v3187_v44 = vld [vmem:[#allocation3 + $0x1190] sm:$0xff]  ;;  %v3348_v41 = vld [vmem:[#allocation3 + $0x12f8] sm:$0xff] }
 0x254   : > { %v2288_v47 = vadd.f32 %v8712_v34, %v2214_v58  ;;  %2773 = vmatmul.f32.vlgmr.msra.gmra.mxu1 %v2732_v61  ;;  %2995 = vmatmul.f32.vlgmr.msra.gmra.mxu0 %v2954_v7  ;;  %v3043_v34 = vld [vmem:[#allocation3 + $0x10b0] sm:$0xff]  ;;  %v3264_v61 = vld [vmem:[#allocation3 + $0x1228] sm:$0xff]  ;;  %v3040_v58 = vld [vmem:[#allocation3 + $0x1098] sm:$0xff] }
 0x255   : > { %3062 = vmatpush.msrb.mxu1 %v3043_v34  ;;  %3285 = vmatpush.msrb.mxu0 %v3264_v61  ;;  %v8789_v34 = vld [vmem:[#allocation2 + $0x74] sm:$0xff] }
 0x256   : > { %v2362_v38 = vadd.f32 %v8714_v29, %v2288_v47  ;;  %v8757_v43 = vpop.f32.mrf.mxu2  ;;  %3140 = vmatpush.msra.mxu2 %v3113_v3  ;;  %v3263_v47 = vld [vmem:[#allocation3 + $0x1220] sm:$0xff]  ;;  %3214 = vmatpush.msra.mxu3 %v3187_v44  ;;  %v3421_v61 = vld [vmem:[#allocation3 + $0x1370] sm:$0xff] }
 0x257   : > { %2930 = vmatmul.f32.gmra.mxu3 %v8746_v18  ;;  %3063 = vmatpush.msrb.mxu1 %v3042_v55  ;;  %v3185_v55 = vld [vmem:[#allocation3 + $0x1180] sm:$0xff]  ;;  %v8817_v44 = vld [vmem:[#allocation2 + $0x91] sm:$0xff] }
 0x258   : > { %v8749_v48 = vadd.f32 %v2404_v45, %v2362_v38  ;;  %3286 = vmatpush.msrb.mxu0 %v3263_v47  ;;  %3141 = vmatpush.msra.mxu2 %v3112_v5 }
 0x259   : > { %v2193_v62 = vpop.f32.mrf.mxu1  ;;  %v2407_v24 = vpop.f32.mrf.mxu0 }
 0x25a   : > { %v2215_v29 = vadd.f32 %v2193_v62, %v8650_v63  ;;  %v8759_v9 = vpop.f32.mrf.mxu3  ;;  %v3186_v62 = vld [vmem:[#allocation3 + $0x1188] sm:$0xff] }
 0x25b   : > { %2859 = vmatmul.f32.gmra.mxu2 %v8551_v39  ;;  %3215 = vmatpush.msra.mxu3 %v3186_v62  ;;  %v3102_v62 = vld [vmem:[#allocation2 + $0x46] sm:$0xff] }
 0x25c   : > { %v2289_v50 = vadd.f32 %v8727_v15, %v2215_v29  ;;  %2776 = vmatmul.f32.gmra.mxu1 %v8752_v13  ;;  %2998 = vmatmul.f32.gmra.mxu0 %v8754_v10  ;;  %v3041_v15 = vld [vmem:[#allocation3 + $0x10a0] sm:$0xff] }
 0x25d   : > { %3064 = vmatpush.msrb.mxu1 %v3041_v15  ;;  %3216 = vmatpush.msra.mxu3 %v3185_v55 }
 0x25e   : > { %v2363_v63 = vadd.f32 %v8729_v46, %v2289_v50  ;;  %v8774_v46 = vpop.f32.mrf.mxu2  ;;  %v3111_v50 = vld [vmem:[#allocation3 + $0x1100] sm:$0xff] }
 0x25f   : > { %2933 = vmatmul.f32.gmra.mxu3 %v8584_v1  ;;  %v2811_v1 = vld [vmem:[#allocation2 + $0x92] sm:$0xff]  ;;  %3065 = vmatpush.msrb.mxu1 %v3040_v58 }
 0x260   : > { %v8766_v56 = vadd.f32 %v2407_v24, %v2363_v63  ;;  %v3262_v24 = vld [vmem:[#allocation3 + $0x1218] sm:$0xff]  ;;  %3142 = vmatpush.msra.mxu2 %v3111_v50  ;;  %v3495_v58 = vld [vmem:[#allocation3 + $0x13f0] sm:$0xff]  ;;  %v3493_v50 = vld [vmem:[#allocation3 + $0x13e0] sm:$0xff] }
 0x261   : > { %v2196_v27 = vpop.f32.mrf.mxu1  ;;  %v2410_v54 = vpop.f32.mrf.mxu0  ;;  %3287 = vmatpush.msrb.mxu0 %v3262_v24 }
 0x262   : > { %v2216_v39 = vadd.f32 %v2196_v27, %v8668_v32  ;;  %v8776_v45 = vpop.f32.mrf.mxu3  ;;  %3423 = vmatpush.msrb.mxu2 %v3422_v25 }
 0x263   : > { %2862 = vmatmul.f32.gmra.mxu2 %v2811_v1  ;;  %3288 = vmatpush.msrb.mxu0 %v3261_v57  ;;  %v8811_v1 = vld [vmem:[#allocation2 + $0xb3] sm:$0xff] }
 0x264   : > { %v2290_v7 = vadd.f32 %v8741_v11, %v2216_v39  ;;  %2779 = vmatmul.f32.gmra.mxu1 %v8769_v26  ;;  %3001 = vmatmul.f32.gmra.mxu0 %v8771_v49  ;;  %v3039_v11 = vld [vmem:[#allocation3 + $0x1090] sm:$0xff]  ;;  %v3418_v57 = vld [vmem:[#allocation3 + $0x1358] sm:$0xff] }
 0x265   : > { %3066 = vmatpush.msrb.mxu1 %v3039_v11  ;;  %3424 = vmatpush.msrb.mxu2 %v3421_v61  ;;  %v8819_v11 = vld [vmem:[#allocation2 + $0x94] sm:$0xff]  ;;  %v3567_v61 = vld [vmem:[#allocation3 + $0x1460] sm:$0xff] }
 0x266   : > { %v2364_v32 = vadd.f32 %v8743_v19, %v2290_v7  ;;  %v8792_v8 = vpop.f32.mrf.mxu2  ;;  %v3259_v7 = vld [vmem:[#allocation3 + $0x1200] sm:$0xff] }
 0x267   : > { %2936 = vmatmul.f32.gmra.mxu3 %v8781_v30  ;;  %3067 = vmatpush.msrb.mxu1 %v3038_v33  ;;  %v3419_v33 = vld [vmem:[#allocation3 + $0x1360] sm:$0xff] }
 0x268   : > { %v8784_v31 = vadd.f32 %v2410_v54, %v2364_v32  ;;  %v2813_v54 = vld [vmem:[#allocation2 + $0xb2] sm:$0xff]  ;;  %v3420_v32 = vld [vmem:[#allocation3 + $0x1368] sm:$0xff] }
 0x269   : > { %v2199_v38 = vpop.f32.mrf.mxu1  ;;  %v2413_v14 = vpop.f32.mrf.mxu0  ;;  %3425 = vmatpush.msrb.mxu2 %v3420_v32  ;;  %v8846_v32 = vld [vmem:[#allocation2 + $0xb4] sm:$0xff] }
 0x26a   : > { %v2217_v19 = vadd.f32 %v2199_v38, %v8682_v35  ;;  %v8794_v29 = vpop.f32.mrf.mxu3  ;;  %v3494_v38 = vld [vmem:[#allocation3 + $0x13e8] sm:$0xff] }
 0x26b   : > { %2865 = vmatmul.f32.gmra.mxu2 %v8576_v60  ;;  %v3496_v60 = vld [vmem:[#allocation3 + $0x13f8] sm:$0xff] }
 0x26c   : > { %v2291_v37 = vadd.f32 %v8757_v43, %v2217_v19  ;;  %2782 = vmatmul.f32.gmra.mxu1 %v8787_v4  ;;  %3004 = vmatmul.f32.gmra.mxu0 %v8789_v34  ;;  %v3037_v43 = vld [vmem:[#allocation3 + $0x1080] sm:$0xff] }
 0x26d   : > { %3068 = vmatpush.msrb.mxu1 %v3037_v43  ;;  %3497 = vmatpush.msrb.mxu3 %v3496_v60  ;;  %v3103_v60 = vld [vmem:[#allocation2 + $0x56] sm:$0xff] }
 0x26e   : > { %v2365_v35 = vadd.f32 %v8759_v9, %v2291_v37  ;;  %v8805_v40 = vpop.f32.mrf.mxu2  ;;  %v3260_v9 = vld [vmem:[#allocation3 + $0x1208] sm:$0xff]  ;;  %3426 = vmatpush.msrb.mxu2 %v3419_v33  ;;  %v3489_v33 = vld [vmem:[#allocation3 + $0x13c0] sm:$0xff] }
 0x26f   : > { %2939 = vmatmul.f32.gmra.mxu3 %v8613_v23  ;;  %3289 = vmatpush.msrb.mxu0 %v3260_v9  ;;  %v7175_v23 = vld [vmem:[#allocation2 + $0x81] sm:$0xff] }
 0x270   : > { %v8801_v63 = vadd.f32 %v2413_v14, %v2365_v35  ;;  %3349 = vmatpush.msra.mxu1 %v3348_v41  ;;  %3498 = vmatpush.msrb.mxu3 %v3495_v58  ;;  %v3570_v14 = vld [vmem:[#allocation3 + $0x1478] sm:$0xff]  ;;  %v3346_v37 = vld [vmem:[#allocation3 + $0x12e8] sm:$0xff]  ;;  %v3569_v35 = vld [vmem:[#allocation3 + $0x1470] sm:$0xff] }
 0x271   : > { %v2202_v51 = vpop.f32.mrf.mxu1  ;;  %v2416_v42 = vpop.f32.mrf.mxu0  ;;  %3290 = vmatpush.msrb.mxu0 %v3259_v7  ;;  %3427 = vmatpush.msrb.mxu2 %v3418_v57  ;;  %v3491_v41 = vld [vmem:[#allocation3 + $0x13d0] sm:$0xff]  ;;  %v3416_v7 = vld [vmem:[#allocation3 + $0x1348] sm:$0xff] }
 0x272   : > { %v2218_v15 = vadd.f32 %v2202_v51, %v8695_v6  ;;  %v8807_v27 = vpop.f32.mrf.mxu3  ;;  %3499 = vmatpush.msrb.mxu3 %v3494_v38  ;;  %v3566_v38 = vld [vmem:[#allocation3 + $0x1458] sm:$0xff]  ;;  %v3028_v57 = vld [vmem:[#allocation2 + $0x45] sm:$0xff] }
 0x273   : > { %2868 = vmatmul.f32.gmra.mxu2 %v2813_v54  ;;  %3571 = vmatpush.msra.mxu0 %v3570_v14  ;;  %v3104_v14 = vld [vmem:[#allocation2 + $0x66] sm:$0xff] }
 0x274   : > { %v2292_v39 = vadd.f32 %v8774_v46, %v2218_v15  ;;  %2785 = vmatmul.f32.gmra.mxu1 %v7175_v23  ;;  %3007 = vmatmul.f32.gmra.mxu0 %v8698_v52  ;;  %v3347_v46 = vld [vmem:[#allocation3 + $0x12f0] sm:$0xff]  ;;  %v3568_v15 = vld [vmem:[#allocation3 + $0x1468] sm:$0xff] }
 0x275   : > { %3350 = vmatpush.msra.mxu1 %v3347_v46  ;;  %3500 = vmatpush.msrb.mxu3 %v3493_v50  ;;  %v3417_v23 = vld [vmem:[#allocation3 + $0x1350] sm:$0xff] }
 0x276   : > { %v2366_v6 = vadd.f32 %v8776_v45, %v2292_v39  ;;  %v8822_v5 = vpop.f32.mrf.mxu2  ;;  %3572 = vmatpush.msra.mxu0 %v3569_v35  ;;  %v3344_v39 = vld [vmem:[#allocation3 + $0x12d8] sm:$0xff]  ;;  %3428 = vmatpush.msrb.mxu2 %v3417_v23  ;;  %v3563_v23 = vld [vmem:[#allocation3 + $0x1440] sm:$0xff] }
 0x277   : > { %2942 = vmatmul.f32.gmra.mxu3 %v8811_v1  ;;  %3351 = vmatpush.msra.mxu1 %v3346_v37  ;;  %v8844_v46 = vld [vmem:[#allocation2 + $0xb1] sm:$0xff]  ;;  %v3415_v37 = vld [vmem:[#allocation3 + $0x1340] sm:$0xff] }
 0x278   : > { %v8814_v3 = vadd.f32 %v2416_v42, %v2366_v6  ;;  %3573 = vmatpush.msra.mxu0 %v3568_v15  ;;  %3429 = vmatpush.msrb.mxu2 %v3416_v7  ;;  %v3414_v35 = vld [vmem:[#allocation3 + $0x1338] sm:$0xff] }
 0x279   : > { %v2205_v52 = vpop.f32.mrf.mxu1  ;;  %v2419_v47 = vpop.f32.mrf.mxu0 }
 0x27a   : > { %v2219_v45 = vadd.f32 %v2205_v52, %v8709_v22  ;;  %v8824_v19 = vpop.f32.mrf.mxu3  ;;  %3574 = vmatpush.msra.mxu0 %v3567_v61  ;;  %3430 = vmatpush.msrb.mxu2 %v3415_v37 }
 0x27b   : > { %3143 = vmatmul.f32.vlgmr.msra.gmra.mxu2 %v3102_v62 }
 0x27c   : > { %v2293_v24 = vadd.f32 %v8792_v8, %v2219_v45  ;;  %2788 = vmatmul.f32.gmra.mxu1 %v8817_v44  ;;  %3010 = vmatmul.f32.gmra.mxu0 %v8819_v11  ;;  %v3345_v8 = vld [vmem:[#allocation3 + $0x12e0] sm:$0xff]  ;;  %v3490_v45 = vld [vmem:[#allocation3 + $0x13c8] sm:$0xff] }
 0x27d   : > { %3352 = vmatpush.msra.mxu1 %v3345_v8  ;;  %3575 = vmatpush.msra.mxu0 %v3566_v38  ;;  %v3338_v38 = vld [vmem:[#allocation3 + $0x12a8] sm:$0xff] }
 0x27e   : > { %v2367_v22 = vadd.f32 %v8794_v29, %v2293_v24  ;;  %v8834_v42 = vpop.f32.mrf.mxu2  ;;  %v3492_v29 = vld [vmem:[#allocation3 + $0x13d8] sm:$0xff]  ;;  %v3342_v24 = vld [vmem:[#allocation3 + $0x12c8] sm:$0xff]  ;;  %3431 = vmatpush.msrb.mxu2 %v3414_v35 }
 0x27f   : > { %3217 = vmatmul.f32.vlgmr.msra.gmra.mxu3 %v8639_v2  ;;  %v7176_v2 = vld [vmem:[#allocation2 + $0xa1] sm:$0xff]  ;;  %3353 = vmatpush.msra.mxu1 %v3344_v39  ;;  %v3487_v39 = vld [vmem:[#allocation3 + $0x13b0] sm:$0xff] }
 0x280   : > { %v8830_v55 = vadd.f32 %v2419_v47, %v2367_v22  ;;  %3501 = vmatpush.msrb.mxu3 %v3492_v29  ;;  %v3565_v22 = vld [vmem:[#allocation3 + $0x1450] sm:$0xff]  ;;  %v3564_v29 = vld [vmem:[#allocation3 + $0x1448] sm:$0xff] }
 0x281   : > { %v2208_v43 = vpop.f32.mrf.mxu1  ;;  %v2422_v25 = vpop.f32.mrf.mxu0  ;;  %3576 = vmatpush.msra.mxu0 %v3565_v22  ;;  %v3560_v35 = vld [vmem:[#allocation3 + $0x1428] sm:$0xff] }
 0x282   : > { %v2220_v51 = vadd.f32 %v2208_v43, %v8721_v59  ;;  %v8836_v9 = vpop.f32.mrf.mxu3  ;;  %3502 = vmatpush.msrb.mxu3 %v3491_v41  ;;  %v3339_v41 = vld [vmem:[#allocation3 + $0x12b0] sm:$0xff] }
 0x283   : > { %3146 = vmatmul.f32.gmra.mxu2 %v3103_v60  ;;  %v3105_v60 = vld [vmem:[#allocation2 + $0x76] sm:$0xff]  ;;  %3577 = vmatpush.msra.mxu0 %v3564_v29 }
 0x284   : > { %v2294_v54 = vadd.f32 %v8805_v40, %v2220_v51  ;;  %2791 = vmatmul.f32.gmra.mxu1 %v7176_v2  ;;  %3013 = vmatmul.f32.gmra.mxu0 %v8724_v28  ;;  %v3343_v40 = vld [vmem:[#allocation3 + $0x12d0] sm:$0xff] }
 0x285   : > { %3354 = vmatpush.msra.mxu1 %v3343_v40  ;;  %3503 = vmatpush.msrb.mxu3 %v3490_v45  ;;  %v3413_v2 = vld [vmem:[#allocation3 + $0x1330] sm:$0xff] }
 0x286   : > { %v2368_v59 = vadd.f32 %v8807_v27, %v2294_v54  ;;  %v8848_v27 = vld [vmem:[#allocation2 + $0x80] sm:$0xff]  ;;  %v8851_v47 = vpop.f32.mrf.mxu2  ;;  %v3340_v54 = vld [vmem:[#allocation3 + $0x12b8] sm:$0xff]  ;;  %3432 = vmatpush.msrb.mxu2 %v3413_v2  ;;  %3578 = vmatpush.msra.mxu0 %v3563_v23  ;;  %v3483_v29 = vld [vmem:[#allocation3 + $0x1390] sm:$0xff] }
 0x287   : > { %3220 = vmatmul.f32.gmra.mxu3 %v8653_v36  ;;  %589 = vst [vmem:[#allocation2 + $0xc0] sm:$0xff] %v8848_v27  ;;  %3355 = vmatpush.msra.mxu1 %v3342_v24  ;;  %v8874_v40 = vld [vmem:[#allocation2 + $0x55] sm:$0xff] }
 0x288   : > { %v8841_v6 = vadd.f32 %v2422_v25, %v2368_v59  ;;  %3504 = vmatpush.msrb.mxu3 %v3489_v33  ;;  %v3561_v24 = vld [vmem:[#allocation3 + $0x1430] sm:$0xff] }
 0x289   : > { %v2211_v58 = vpop.f32.mrf.mxu1  ;;  %v2425_v28 = vpop.f32.mrf.mxu0  ;;  %v8905_v2 = vld [vmem:[#allocation2 + $0x75] sm:$0xff] }
 0x28a   : > { %v2221_v52 = vadd.f32 %v2211_v58, %v8737_v17  ;;  %v8854_v36 = vpop.f32.mrf.mxu3  ;;  %v3486_v58 = vld [vmem:[#allocation3 + $0x13a8] sm:$0xff] }
 0x28b   : > { %3149 = vmatmul.f32.gmra.mxu2 %v3104_v14  ;;  %v3411_v14 = vld [vmem:[#allocation3 + $0x1320] sm:$0xff] }
 0x28c   : > { %v2295_v62 = vadd.f32 %v8822_v5, %v2221_v52  ;;  %2794 = vmatmul.f32.gmra.mxu1 %v8844_v46  ;;  %3016 = vmatmul.f32.gmra.mxu0 %v8846_v32  ;;  %v3341_v5 = vld [vmem:[#allocation3 + $0x12c0] sm:$0xff] }
 0x28d   : > { %3356 = vmatpush.msra.mxu1 %v3341_v5 }
 0x28e   : > { %v2369_v17 = vadd.f32 %v8824_v19, %v2295_v62  ;;  %v8864_v51 = vpop.f32.mrf.mxu2  ;;  %v3488_v19 = vld [vmem:[#allocation3 + $0x13b8] sm:$0xff]  ;;  %v3485_v62 = vld [vmem:[#allocation3 + $0x13a0] sm:$0xff] }
 0x28f   : > { %3223 = vmatmul.f32.gmra.mxu3 %v8671_v16  ;;  %3357 = vmatpush.msra.mxu1 %v3340_v54  ;;  %v3408_v54 = vld [vmem:[#allocation3 + $0x1308] sm:$0xff] }
 0x290   : > { %v8860_v50 = vadd.f32 %v2425_v28, %v2369_v17  ;;  %3505 = vmatpush.msrb.mxu3 %v3488_v19  ;;  %v3562_v28 = vld [vmem:[#allocation3 + $0x1438] sm:$0xff]  ;;  %v8899_v19 = vld [vmem:[#allocation2 + $0xa0] sm:$0xff] }
 0x291   : > { %v2478_v8 = vpop.f32.mrf.mxu1  ;;  %v2700_v43 = vpop.f32.mrf.mxu0  ;;  %3358 = vmatpush.msra.mxu1 %v3339_v41  ;;  %3579 = vmatpush.msra.mxu0 %v3562_v28  ;;  %v3410_v17 = vld [vmem:[#allocation3 + $0x1318] sm:$0xff]  ;;  %v3407_v28 = vld [vmem:[#allocation3 + $0x1300] sm:$0xff] }
 0x292   : > { %v2502_v25 = vadd.f32 %v2478_v8, %v8749_v48  ;;  %v8866_v15 = vpop.f32.mrf.mxu3  ;;  %3506 = vmatpush.msrb.mxu3 %v3487_v39  ;;  %v8907_v39 = vld [vmem:[#allocation2 + $0x81] sm:$0xff] }
 0x293   : > { %3152 = vmatmul.f32.gmra.mxu2 %v3105_v60  ;;  %3359 = vmatpush.msra.mxu1 %v3338_v38  ;;  %v3559_v60 = vld [vmem:[#allocation3 + $0x1420] sm:$0xff]  ;;  %v3557_v38 = vld [vmem:[#allocation3 + $0x1410] sm:$0xff] }
 0x294   : > { %v2576_v16 = vadd.f32 %v8834_v42, %v2502_v25  ;;  %3069 = vmatmul.f32.vlgmr.msrb.gmra.mxu1 %v3028_v57  ;;  %3291 = vmatmul.f32.vlgmr.msrb.gmra.mxu0 %v8752_v13  ;;  %v3412_v42 = vld [vmem:[#allocation3 + $0x1328] sm:$0xff]  ;;  %v3107_v57 = vld [vmem:[#allocation2 + $0x96] sm:$0xff] }
 0x295   : > { %3433 = vmatpush.msrb.mxu2 %v3412_v42  ;;  %3507 = vmatpush.msrb.mxu3 %v3486_v58  ;;  %v3409_v25 = vld [vmem:[#allocation3 + $0x1310] sm:$0xff]  ;;  %v3482_v42 = vld [vmem:[#allocation3 + $0x1388] sm:$0xff] }
 0x296   : > { %v2650_v48 = vadd.f32 %v8836_v9, %v2576_v16  ;;  %v8877_v9 = vpop.f32.mrf.mxu2  ;;  %3580 = vmatpush.msra.mxu0 %v3561_v24  ;;  %v3334_v58 = vld [vmem:[#allocation3 + $0x1288] sm:$0xff] }
 0x297   : > { %3226 = vmatmul.f32.gmra.mxu3 %v8848_v27  ;;  %3434 = vmatpush.msrb.mxu2 %v3411_v14 }
 0x298   : > { %v8871_v59 = vadd.f32 %v2700_v43, %v2650_v48  ;;  %3508 = vmatpush.msrb.mxu3 %v3485_v62  ;;  %3581 = vmatpush.msra.mxu0 %v3560_v35  ;;  %v3336_v43 = vld [vmem:[#allocation3 + $0x1298] sm:$0xff]  ;;  %v7178_v35 = vld [vmem:[#allocation2 + $0x85] sm:$0xff] }
 0x299   : > { %v2481_v61 = vpop.f32.mrf.mxu1  ;;  %v2703_v13 = vpop.f32.mrf.mxu0  ;;  %3435 = vmatpush.msrb.mxu2 %v3410_v17  ;;  %v3718_v62 = vld [vmem:[#allocation3 + $0x1578] sm:$0xff] }
 0x29a   : > { %v2503_v7 = vadd.f32 %v2481_v61, %v8766_v56  ;;  %v8879_v52 = vpop.f32.mrf.mxu3  ;;  %3582 = vmatpush.msra.mxu0 %v3559_v60  ;;  %v3558_v61 = vld [vmem:[#allocation3 + $0x1418] sm:$0xff] }
 0x29b   : > { %3155 = vmatmul.f32.gmra.mxu2 %v8665_v12  ;;  %v3484_v12 = vld [vmem:[#allocation3 + $0x1398] sm:$0xff] }
 0x29c   : > { %v2577_v45 = vadd.f32 %v8851_v47, %v2503_v7  ;;  %3072 = vmatmul.f32.gmra.mxu1 %v8874_v40  ;;  %3294 = vmatmul.f32.gmra.mxu0 %v8769_v26  ;;  %v3337_v47 = vld [vmem:[#allocation3 + $0x12a0] sm:$0xff] }
 0x29d   : > { %v8889_v26 = vld [vmem:[#allocation2 + $0x65] sm:$0xff]  ;;  %3360 = vmatpush.msra.mxu1 %v3337_v47  ;;  %3509 = vmatpush.msrb.mxu3 %v3484_v12 }
 0x29e   : > { %v2651_v56 = vadd.f32 %v8854_v36, %v2577_v45  ;;  %v8892_v5 = vpop.f32.mrf.mxu2  ;;  %3436 = vmatpush.msrb.mxu2 %v3409_v25  ;;  %3583 = vmatpush.msra.mxu0 %v3558_v61  ;;  %v3481_v45 = vld [vmem:[#allocation3 + $0x1380] sm:$0xff]  ;;  %v3791_v25 = vld [vmem:[#allocation3 + $0x15f0] sm:$0xff]  ;;  %v3642_v61 = vld [vmem:[#allocation3 + $0x14e8] sm:$0xff] }
 0x29f   : > { %3229 = vmatmul.f32.gmra.mxu3 %v8658_v0  ;;  %3361 = vmatpush.msra.mxu1 %v3336_v43  ;;  %v3555_v43 = vld [vmem:[#allocation3 + $0x1400] sm:$0xff] }
 0x2a0   : > { %v8886_v37 = vadd.f32 %v2703_v13, %v2651_v56  ;;  %3510 = vmatpush.msrb.mxu3 %v3483_v29  ;;  %3437 = vmatpush.msrb.mxu2 %v3408_v54  ;;  %v7177_v56 = vld [vmem:[#allocation2 + $0xb0] sm:$0xff]  ;;  %v3716_v29 = vld [vmem:[#allocation3 + $0x1568] sm:$0xff] }
 0x2a1   : > { %v2484_v33 = vpop.f32.mrf.mxu1  ;;  %v2706_v22 = vpop.f32.mrf.mxu0  ;;  %3584 = vmatpush.msra.mxu0 %v3557_v38  ;;  %v8937_v54 = vld [vmem:[#allocation2 + $0xa1] sm:$0xff] }
 0x2a2   : > { %v2504_v36 = vadd.f32 %v2484_v33, %v8784_v31  ;;  %v8894_v8 = vpop.f32.mrf.mxu3  ;;  %3511 = vmatpush.msrb.mxu3 %v3482_v42  ;;  %3438 = vmatpush.msrb.mxu2 %v3407_v28  ;;  %v3865_v28 = vld [vmem:[#allocation3 + $0x1670] sm:$0xff] }
 0x2a3   : > { %3158 = vmatmul.f32.gmra.mxu2 %v3107_v57  ;;  %v3644_v57 = vld [vmem:[#allocation3 + $0x14f8] sm:$0xff] }
 0x2a4   : > { %v2578_v0 = vadd.f32 %v8864_v51, %v2504_v36  ;;  %3075 = vmatmul.f32.gmra.mxu1 %v8889_v26  ;;  %3297 = vmatmul.f32.gmra.mxu0 %v8787_v4  ;;  %v3335_v51 = vld [vmem:[#allocation3 + $0x1290] sm:$0xff] }
 0x2a5   : > { %3362 = vmatpush.msra.mxu1 %v3335_v51  ;;  %3512 = vmatpush.msrb.mxu3 %v3481_v45  ;;  %v8926_v36 = vld [vmem:[#allocation2 + $0xb6] sm:$0xff] }
 0x2a6   : > { %v2652_v31 = vadd.f32 %v8866_v15, %v2578_v0  ;;  %v587_v15 = vld [vmem:[#allocation2 + $0x88] sm:$0x3f]  ;;  %v8910_v41 = vpop.f32.mrf.mxu2  ;;  %3719 = vmatpush.msra.mxu2 %v3718_v62  ;;  %v3717_v0 = vld [vmem:[#allocation3 + $0x1570] sm:$0xff]  ;;  %v3714_v45 = vld [vmem:[#allocation3 + $0x1558] sm:$0xff] }
 0x2a7   : > { %3232 = vmatmul.f32.gmra.mxu3 %v8899_v19  ;;  %590 = vst [vmem:[#allocation2 + $0xc8] sm:$0x3f] %v587_v15  ;;  %3363 = vmatpush.msra.mxu1 %v3334_v58  ;;  %v3866_v15 = vld [vmem:[#allocation3 + $0x1678] sm:$0xff]  ;;  %v3789_v58 = vld [vmem:[#allocation3 + $0x15e0] sm:$0xff] }
 0x2a8   : > { %v8902_v16 = vadd.f32 %v2706_v22, %v2652_v31  ;;  %3720 = vmatpush.msra.mxu2 %v3717_v0 }
 0x2a9   : > { %v2487_v4 = vpop.f32.mrf.mxu1  ;;  %v2709_v48 = vpop.f32.mrf.mxu0 }
 0x2aa   : > { %v2505_v23 = vadd.f32 %v2487_v4, %v8801_v63  ;;  %v8912_v13 = vpop.f32.mrf.mxu3  ;;  %3721 = vmatpush.msra.mxu2 %v3716_v29 }
 0x2ab   : > { %3161 = vmatmul.f32.gmra.mxu2 %v8692_v21  ;;  %v3792_v21 = vld [vmem:[#allocation3 + $0x15f8] sm:$0xff] }
 0x2ac   : > { %v2579_v7 = vadd.f32 %v8877_v9, %v2505_v23  ;;  %3078 = vmatmul.f32.gmra.mxu1 %v8905_v2  ;;  %3300 = vmatmul.f32.gmra.mxu0 %v8907_v39  ;;  %v3333_v9 = vld [vmem:[#allocation3 + $0x1280] sm:$0xff] }
 0x2ad   : > { %3364 = vmatpush.msra.mxu1 %v3333_v9  ;;  %3793 = vmatpush.msra.mxu3 %v3792_v21  ;;  %v3787_v21 = vld [vmem:[#allocation3 + $0x15d0] sm:$0xff] }
 0x2ae   : > { %v2653_v63 = vadd.f32 %v8879_v52, %v2579_v7  ;;  %v8922_v33 = vpop.f32.mrf.mxu2  ;;  %v3556_v52 = vld [vmem:[#allocation3 + $0x1408] sm:$0xff]  ;;  %v3715_v7 = vld [vmem:[#allocation3 + $0x1560] sm:$0xff] }
 0x2af   : > { %3235 = vmatmul.f32.gmra.mxu3 %v7177_v56  ;;  %3585 = vmatpush.msra.mxu0 %v3556_v52  ;;  %v3713_v52 = vld [vmem:[#allocation3 + $0x1550] sm:$0xff] }
 0x2b0   : > { %v8919_v14 = vadd.f32 %v2709_v48, %v2653_v63  ;;  %3645 = vmatpush.msrb.mxu1 %v3644_v57  ;;  %3794 = vmatpush.msra.mxu3 %v3791_v25  ;;  %v3790_v48 = vld [vmem:[#allocation3 + $0x15e8] sm:$0xff] }
 0x2b1   : > { %v2490_v24 = vpop.f32.mrf.mxu1  ;;  %v2712_v47 = vpop.f32.mrf.mxu0  ;;  %3586 = vmatpush.msra.mxu0 %v3555_v43  ;;  %3722 = vmatpush.msra.mxu2 %v3715_v7  ;;  %v3712_v57 = vld [vmem:[#allocation3 + $0x1548] sm:$0xff] }
 0x2b2   : > { %v2506_v17 = vadd.f32 %v2490_v24, %v8814_v3  ;;  %v8924_v22 = vpop.f32.mrf.mxu3  ;;  %3795 = vmatpush.msra.mxu3 %v3790_v48  ;;  %v8966_v43 = vld [vmem:[#allocation2 + $0xc1] sm:$0xff]  ;;  %v3861_v48 = vld [vmem:[#allocation3 + $0x1650] sm:$0xff] }
 0x2b3   : > { %3164 = vmatmul.f32.gmra.mxu2 %v8926_v36  ;;  %3867 = vmatpush.msrb.mxu0 %v3866_v15  ;;  %v3786_v25 = vld [vmem:[#allocation3 + $0x15c8] sm:$0xff] }
 0x2b4   : > { %v2580_v12 = vadd.f32 %v8892_v5, %v2506_v17  ;;  %3081 = vmatmul.f32.gmra.mxu1 %v7178_v35  ;;  %3303 = vmatmul.f32.gmra.mxu0 %v8817_v44  ;;  %v3643_v5 = vld [vmem:[#allocation3 + $0x14f0] sm:$0xff]  ;;  %v7179_v17 = vld [vmem:[#allocation2 + $0xa5] sm:$0xff] }
 0x2b5   : > { %v8935_v44 = vld [vmem:[#allocation2 + $0x95] sm:$0xff]  ;;  %3646 = vmatpush.msrb.mxu1 %v3643_v5  ;;  %3796 = vmatpush.msra.mxu3 %v3789_v58 }
 0x2b6   : > { %v2654_v3 = vadd.f32 %v8894_v8, %v2580_v12  ;;  %v8940_v4 = vpop.f32.mrf.mxu2  ;;  %3868 = vmatpush.msrb.mxu0 %v3865_v28  ;;  %3723 = vmatpush.msra.mxu2 %v3714_v45  ;;  %v3863_v12 = vld [vmem:[#allocation3 + $0x1660] sm:$0xff]  ;;  %v3862_v5 = vld [vmem:[#allocation3 + $0x1658] sm:$0xff] }
 0x2b7   : > { %3238 = vmatmul.f32.gmra.mxu3 %v8848_v27  ;;  %3647 = vmatpush.msrb.mxu1 %v3642_v61  ;;  %v7180_v45 = vld [vmem:[#allocation2 + $0x52] sm:$0xff] }
 0x2b8   : > { %v8932_v31 = vadd.f32 %v2712_v47, %v2654_v3  ;;  %3724 = vmatpush.msra.mxu2 %v3713_v52 }
 0x2b9   : > { %v2493_v60 = vpop.f32.mrf.mxu1  ;;  %v2715_v51 = vpop.f32.mrf.mxu0 }
 0x2ba   : > { %v2507_v8 = vadd.f32 %v2493_v60, %v8830_v55  ;;  %v8942_v23 = vpop.f32.mrf.mxu3  ;;  %3725 = vmatpush.msra.mxu2 %v3712_v57  ;;  %v3638_v60 = vld [vmem:[#allocation3 + $0x14c8] sm:$0xff] }
 0x2bb   : > { %3439 = vmatmul.f32.vlgmr.msrb.gmra.mxu2 %v8718_v53  ;;  %v3864_v53 = vld [vmem:[#allocation3 + $0x1668] sm:$0xff] }
 0x2bc   : > { %v2581_v42 = vadd.f32 %v8910_v41, %v2507_v8  ;;  %3084 = vmatmul.f32.gmra.mxu1 %v8935_v44  ;;  %3306 = vmatmul.f32.gmra.mxu0 %v8937_v54  ;;  %v3641_v41 = vld [vmem:[#allocation3 + $0x14e0] sm:$0xff] }
 0x2bd   : > { %3648 = vmatpush.msrb.mxu1 %v3641_v41  ;;  %3869 = vmatpush.msrb.mxu0 %v3864_v53  ;;  %v3785_v8 = vld [vmem:[#allocation3 + $0x15c0] sm:$0xff] }
 0x2be   : > { %v2655_v55 = vadd.f32 %v8912_v13, %v2581_v42  ;;  %v8953_v62 = vpop.f32.mrf.mxu2  ;;  %v3788_v13 = vld [vmem:[#allocation3 + $0x15d8] sm:$0xff]  ;;  %v8986_v41 = vld [vmem:[#allocation2 + $0x83] sm:$0xff] }
 0x2bf   : > { %3513 = vmatmul.f32.vlgmr.msrb.gmra.mxu3 %v8754_v10  ;;  %v3640_v10 = vld [vmem:[#allocation3 + $0x14d8] sm:$0xff]  ;;  %3870 = vmatpush.msrb.mxu0 %v3863_v12  ;;  %v3859_v53 = vld [vmem:[#allocation3 + $0x1640] sm:$0xff] }
 0x2c0   : > { %v8949_v63 = vadd.f32 %v2715_v51, %v2655_v55  ;;  %3797 = vmatpush.msra.mxu3 %v3788_v13  ;;  %3649 = vmatpush.msrb.mxu1 %v3640_v10  ;;  %v3711_v51 = vld [vmem:[#allocation3 + $0x1540] sm:$0xff]  ;;  %v3710_v42 = vld [vmem:[#allocation3 + $0x1538] sm:$0xff]  ;;  %v3783_v13 = vld [vmem:[#allocation3 + $0x15b0] sm:$0xff] }
 0x2c1   : > { %v2496_v38 = vpop.f32.mrf.mxu1  ;;  %v2718_v56 = vpop.f32.mrf.mxu0  ;;  %3871 = vmatpush.msrb.mxu0 %v3862_v5  ;;  %3726 = vmatpush.msra.mxu2 %v3711_v51  ;;  %v7181_v57 = vld [vmem:[#allocation2 + $0x62] sm:$0xff] }
 0x2c2   : > { %v2508_v9 = vadd.f32 %v2496_v38, %v8841_v6  ;;  %v8955_v24 = vpop.f32.mrf.mxu3  ;;  %3798 = vmatpush.msra.mxu3 %v3787_v21  ;;  %v3636_v38 = vld [vmem:[#allocation3 + $0x14b8] sm:$0xff] }
 0x2c3   : > { %3442 = vmatmul.f32.gmra.mxu2 %v8734_v20  ;;  %3872 = vmatpush.msrb.mxu0 %v3861_v48  ;;  %v3858_v21 = vld [vmem:[#allocation3 + $0x1638] sm:$0xff]  ;;  %v9014_v48 = vld [vmem:[#allocation2 + $0xa3] sm:$0xff] }
 0x2c4   : > { %v2582_v47 = vadd.f32 %v8922_v33, %v2508_v9  ;;  %3087 = vmatmul.f32.gmra.mxu1 %v7179_v17  ;;  %3309 = vmatmul.f32.gmra.mxu0 %v8844_v46  ;;  %v3639_v33 = vld [vmem:[#allocation3 + $0x14d0] sm:$0xff]  ;;  %v8990_v9 = vld [vmem:[#allocation2 + $0x84] sm:$0xff] }
 0x2c5   : > { %v8964_v46 = vld [vmem:[#allocation2 + $0xb5] sm:$0xff]  ;;  %3650 = vmatpush.msrb.mxu1 %v3639_v33  ;;  %3799 = vmatpush.msra.mxu3 %v3786_v25 }
 0x2c6   : > { %v2656_v6 = vadd.f32 %v8924_v22, %v2582_v47  ;;  %v8969_v22 = vpop.f32.mrf.mxu2  ;;  %3727 = vmatpush.msra.mxu2 %v3710_v42  ;;  %v3857_v25 = vld [vmem:[#allocation3 + $0x1630] sm:$0xff]  ;;  %v3632_v42 = vld [vmem:[#allocation3 + $0x1498] sm:$0xff] }
 0x2c7   : > { %3516 = vmatmul.f32.gmra.mxu3 %v8771_v49  ;;  %3651 = vmatpush.msrb.mxu1 %v3638_v60 }
 0x2c8   : > { %v8961_v35 = vadd.f32 %v2718_v56, %v2656_v6  ;;  %3800 = vmatpush.msra.mxu3 %v3785_v8  ;;  %v3709_v56 = vld [vmem:[#allocation3 + $0x1530] sm:$0xff] }
 0x2c9   : > { %v2499_v0 = vpop.f32.mrf.mxu1  ;;  %v2721_v3 = vpop.f32.mrf.mxu0  ;;  %3728 = vmatpush.msra.mxu2 %v3709_v56  ;;  %v9027_v56 = vld [vmem:[#allocation2 + $0x85] sm:$0xff] }
 0x2ca   : > { %v2509_v20 = vadd.f32 %v2499_v0, %v8860_v50  ;;  %v8971_v29 = vpop.f32.mrf.mxu3  ;;  %v3634_v0 = vld [vmem:[#allocation3 + $0x14a8] sm:$0xff] }
 0x2cb   : > { %3445 = vmatmul.f32.gmra.mxu2 %v8746_v18  ;;  %v3860_v18 = vld [vmem:[#allocation3 + $0x1648] sm:$0xff] }
 0x2cc   : > { %v2583_v49 = vadd.f32 %v8940_v4, %v2509_v20  ;;  %3090 = vmatmul.f32.gmra.mxu1 %v8964_v46  ;;  %3312 = vmatmul.f32.gmra.mxu0 %v8966_v43  ;;  %v3637_v4 = vld [vmem:[#allocation3 + $0x14c0] sm:$0xff] }
 0x2cd   : > { %3652 = vmatpush.msrb.mxu1 %v3637_v4  ;;  %3873 = vmatpush.msrb.mxu0 %v3860_v18  ;;  %v3781_v20 = vld [vmem:[#allocation3 + $0x15a0] sm:$0xff]  ;;  %v7182_v4 = vld [vmem:[#allocation2 + $0x72] sm:$0xff] }
 0x2ce   : > { %v2657_v50 = vadd.f32 %v8942_v23, %v2583_v49  ;;  %v8982_v58 = vpop.f32.mrf.mxu2  ;;  %v3784_v23 = vld [vmem:[#allocation3 + $0x15b8] sm:$0xff] }
 0x2cf   : > { %3519 = vmatmul.f32.gmra.mxu3 %v8789_v34  ;;  %3653 = vmatpush.msrb.mxu1 %v3636_v38  ;;  %v3706_v49 = vld [vmem:[#allocation3 + $0x1518] sm:$0xff] }
 0x2d0   : > { %v8978_v15 = vadd.f32 %v2721_v3, %v2657_v50  ;;  %3801 = vmatpush.msra.mxu3 %v3784_v23  ;;  %3874 = vmatpush.msrb.mxu0 %v3859_v53  ;;  %v3707_v3 = vld [vmem:[#allocation3 + $0x1520] sm:$0xff]  ;;  %v3854_v53 = vld [vmem:[#allocation3 + $0x1618] sm:$0xff] }
 0x2d1   : > { %v2774_v61 = vpop.f32.mrf.mxu1  ;;  %v2996_v7 = vpop.f32.mrf.mxu0  ;;  %v3855_v23 = vld [vmem:[#allocation3 + $0x1620] sm:$0xff] }
 0x2d2   : > { %v2798_v55 = vadd.f32 %v2774_v61, %v8871_v59  ;;  %v8984_v28 = vpop.f32.mrf.mxu3  ;;  %3802 = vmatpush.msra.mxu3 %v3783_v13  ;;  %3875 = vmatpush.msrb.mxu0 %v3858_v21  ;;  %v3705_v61 = vld [vmem:[#allocation3 + $0x1510] sm:$0xff]  ;;  %v3778_v13 = vld [vmem:[#allocation3 + $0x1588] sm:$0xff] }
 0x2d3   : > { %3448 = vmatmul.f32.gmra.mxu2 %v8986_v41 }
 0x2d4   : > { %v2872_v34 = vadd.f32 %v8953_v62, %v2798_v55  ;;  %3365 = vmatmul.f32.vlgmr.msra.gmra.mxu1 %v7180_v45  ;;  %3587 = vmatmul.f32.vlgmr.msra.gmra.mxu0 %v8874_v40  ;;  %v3635_v62 = vld [vmem:[#allocation3 + $0x14b0] sm:$0xff]  ;;  %v3708_v40 = vld [vmem:[#allocation3 + $0x1528] sm:$0xff] }
 0x2d5   : > { %3654 = vmatpush.msrb.mxu1 %v3635_v62  ;;  %3729 = vmatpush.msra.mxu2 %v3708_v40  ;;  %v3779_v55 = vld [vmem:[#allocation3 + $0x1590] sm:$0xff]  ;;  %v9025_v45 = vld [vmem:[#allocation2 + $0x82] sm:$0xff] }
 0x2d6   : > { %v2946_v59 = vadd.f32 %v8955_v24, %v2872_v34  ;;  %v8998_v6 = vpop.f32.mrf.mxu2  ;;  %v3782_v24 = vld [vmem:[#allocation3 + $0x15a8] sm:$0xff]  ;;  %3876 = vmatpush.msrb.mxu0 %v3857_v25 }
 0x2d7   : > { %3522 = vmatmul.f32.gmra.mxu3 %v8990_v9  ;;  %3655 = vmatpush.msrb.mxu1 %v3634_v0  ;;  %v9047_v25 = vld [vmem:[#allocation2 + $0xc3] sm:$0xff] }
 0x2d8   : > { %v8994_v47 = vadd.f32 %v2996_v7, %v2946_v59  ;;  %3803 = vmatpush.msra.mxu3 %v3782_v24  ;;  %3730 = vmatpush.msra.mxu2 %v3707_v3  ;;  %v9018_v7 = vld [vmem:[#allocation2 + $0xa4] sm:$0xff]  ;;  %v3853_v24 = vld [vmem:[#allocation3 + $0x1610] sm:$0xff] }
 0x2d9   : > { %v2777_v17 = vpop.f32.mrf.mxu1  ;;  %v2999_v10 = vpop.f32.mrf.mxu0 }
 0x2da   : > { %v2799_v52 = vadd.f32 %v2777_v17, %v8886_v37  ;;  %v9000_v12 = vpop.f32.mrf.mxu3  ;;  %3804 = vmatpush.msra.mxu3 %v3781_v20  ;;  %3731 = vmatpush.msra.mxu2 %v3706_v49  ;;  %v3630_v17 = vld [vmem:[#allocation3 + $0x1488] sm:$0xff]  ;;  %v3940_v49 = vld [vmem:[#allocation3 + $0x16f8] sm:$0xff] }
 0x2db   : > { %3451 = vmatmul.f32.gmra.mxu2 %v8781_v30  ;;  %v3856_v30 = vld [vmem:[#allocation3 + $0x1628] sm:$0xff] }
 0x2dc   : > { %v2873_v33 = vadd.f32 %v8969_v22, %v2799_v52  ;;  %3368 = vmatmul.f32.gmra.mxu1 %v7181_v57  ;;  %3590 = vmatmul.f32.gmra.mxu0 %v8889_v26  ;;  %v3633_v22 = vld [vmem:[#allocation3 + $0x14a0] sm:$0xff] }
 0x2dd   : > { %3656 = vmatpush.msrb.mxu1 %v3633_v22  ;;  %3877 = vmatpush.msrb.mxu0 %v3856_v30  ;;  %v3777_v52 = vld [vmem:[#allocation3 + $0x1580] sm:$0xff]  ;;  %v7183_v22 = vld [vmem:[#allocation2 + $0x92] sm:$0xff] }
 0x2de   : > { %v2947_v37 = vadd.f32 %v8971_v29, %v2873_v33  ;;  %v9010_v50 = vpop.f32.mrf.mxu2  ;;  %v3780_v29 = vld [vmem:[#allocation3 + $0x1598] sm:$0xff]  ;;  %3732 = vmatpush.msra.mxu2 %v3705_v61  ;;  %v9055_v30 = vld [vmem:[#allocation2 + $0x70] sm:$0xff]  ;;  %v9063_v61 = vld [vmem:[#allocation2 + $0xa5] sm:$0xff] }
 0x2df   : > { %3525 = vmatmul.f32.gmra.mxu3 %v8819_v11  ;;  %3657 = vmatpush.msrb.mxu1 %v3632_v42  ;;  %v4014_v33 = vld [vmem:[#allocation3 + $0x1778] sm:$0xff]  ;;  %601 = vst [vmem:[#allocation2 + $0xd0] sm:$0xff] %v9055_v30  ;;  %v9061_v42 = vld [vmem:[#allocation2 + $0xa2] sm:$0xff] }
 0x2e0   : > { %v9006_v5 = vadd.f32 %v2999_v10, %v2947_v37  ;;  %3805 = vmatpush.msra.mxu3 %v3780_v29  ;;  %3878 = vmatpush.msrb.mxu0 %v3855_v23  ;;  %v3703_v10 = vld [vmem:[#allocation3 + $0x1500] sm:$0xff]  ;;  %v4087_v29 = vld [vmem:[#allocation3 + $0x17f0] sm:$0xff]  ;;  %v4086_v23 = vld [vmem:[#allocation3 + $0x17e8] sm:$0xff] }
 0x2e1   : > { %v2780_v60 = vpop.f32.mrf.mxu1  ;;  %v3002_v26 = vpop.f32.mrf.mxu0 }
 0x2e2   : > { %v2800_v51 = vadd.f32 %v2780_v60, %v8902_v16  ;;  %v9012_v8 = vpop.f32.mrf.mxu3  ;;  %3806 = vmatpush.msra.mxu3 %v3779_v55  ;;  %3879 = vmatpush.msrb.mxu0 %v3854_v53  ;;  %v4013_v60 = vld [vmem:[#allocation3 + $0x1770] sm:$0xff]  ;;  %v3768_v53 = vld [vmem:[#allocation2 + $0x61] sm:$0xff] }
 0x2e3   : > { %3454 = vmatmul.f32.gmra.mxu2 %v9014_v48 }
 0x2e4   : > { %v2874_v11 = vadd.f32 %v8982_v58, %v2800_v51  ;;  %3371 = vmatmul.f32.gmra.mxu1 %v7182_v4  ;;  %3593 = vmatmul.f32.gmra.mxu0 %v8905_v2  ;;  %v3631_v58 = vld [vmem:[#allocation3 + $0x1490] sm:$0xff]  ;;  %v3704_v2 = vld [vmem:[#allocation3 + $0x1508] sm:$0xff]  ;;  %v3851_v51 = vld [vmem:[#allocation3 + $0x1600] sm:$0xff] }
 0x2e5   : > { %3658 = vmatpush.msrb.mxu1 %v3631_v58  ;;  %3733 = vmatpush.msra.mxu2 %v3704_v2  ;;  %v4162_v58 = vld [vmem:[#allocation3 + $0x1878] sm:$0xff] }
 0x2e6   : > { %v2948_v16 = vadd.f32 %v8984_v28, %v2874_v11  ;;  %v9030_v59 = vpop.f32.mrf.mxu2  ;;  %3807 = vmatpush.msra.mxu3 %v3778_v13  ;;  %3880 = vmatpush.msrb.mxu0 %v3853_v24  ;;  %v4012_v11 = vld [vmem:[#allocation3 + $0x1768] sm:$0xff]  ;;  %v4011_v13 = vld [vmem:[#allocation3 + $0x1760] sm:$0xff] }
 0x2e7   : > { %3528 = vmatmul.f32.gmra.mxu3 %v9018_v7  ;;  %3659 = vmatpush.msrb.mxu1 %v3630_v17  ;;  %v4161_v17 = vld [vmem:[#allocation3 + $0x1870] sm:$0xff] }
 0x2e8   : > { %v9022_v18 = vadd.f32 %v3002_v26, %v2948_v16  ;;  %3734 = vmatpush.msra.mxu2 %v3703_v10  ;;  %3808 = vmatpush.msra.mxu3 %v3777_v52  ;;  %v9051_v26 = vld [vmem:[#allocation2 + $0xc4] sm:$0xff] }
 0x2e9   : > { %v2783_v34 = vpop.f32.mrf.mxu1  ;;  %v3005_v38 = vpop.f32.mrf.mxu0 }
 0x2ea   : > { %v2801_v28 = vadd.f32 %v2783_v34, %v8919_v14  ;;  %v9032_v62 = vpop.f32.mrf.mxu3  ;;  %4015 = vmatpush.msrb.mxu2 %v4014_v33  ;;  %v3694_v34 = vld [vmem:[#allocation2 + $0x60] sm:$0xff] }
 0x2eb   : > { %3457 = vmatmul.f32.gmra.mxu2 %v8811_v1  ;;  %v4088_v1 = vld [vmem:[#allocation3 + $0x17f8] sm:$0xff] }
 0x2ec   : > { %v2875_v40 = vadd.f32 %v8998_v6, %v2801_v28  ;;  %3374 = vmatmul.f32.gmra.mxu1 %v9025_v45  ;;  %3596 = vmatmul.f32.gmra.mxu0 %v9027_v56  ;;  %v3629_v6 = vld [vmem:[#allocation3 + $0x1480] sm:$0xff]  ;;  %v3938_v28 = vld [vmem:[#allocation3 + $0x16e8] sm:$0xff] }
 0x2ed   : > { %3660 = vmatpush.msrb.mxu1 %v3629_v6  ;;  %4089 = vmatpush.msrb.mxu3 %v4088_v1  ;;  %v3936_v1 = vld [vmem:[#allocation3 + $0x16d8] sm:$0xff] }
 0x2ee   : > { %v2949_v14 = vadd.f32 %v9000_v12, %v2875_v40  ;;  %v9043_v37 = vpop.f32.mrf.mxu2  ;;  %v3852_v12 = vld [vmem:[#allocation3 + $0x1608] sm:$0xff]  ;;  %4016 = vmatpush.msrb.mxu2 %v4013_v60  ;;  %v4085_v40 = vld [vmem:[#allocation3 + $0x17e0] sm:$0xff] }
 0x2ef   : > { %3531 = vmatmul.f32.gmra.mxu3 %v8846_v32  ;;  %3881 = vmatpush.msrb.mxu0 %v3852_v12  ;;  %v7184_v12 = vld [vmem:[#allocation2 + $0xb2] sm:$0xff]  ;;  %v4159_v60 = vld [vmem:[#allocation3 + $0x1860] sm:$0xff] }
 0x2f0   : > { %v9039_v21 = vadd.f32 %v3005_v38, %v2949_v14  ;;  %3941 = vmatpush.msra.mxu1 %v3940_v49  ;;  %4090 = vmatpush.msrb.mxu3 %v4087_v29  ;;  %v4010_v14 = vld [vmem:[#allocation3 + $0x1758] sm:$0xff]  ;;  %v4083_v49 = vld [vmem:[#allocation3 + $0x17d0] sm:$0xff] }
 0x2f1   : > { %v2786_v57 = vpop.f32.mrf.mxu1  ;;  %v3008_v0 = vpop.f32.mrf.mxu0  ;;  %3882 = vmatpush.msrb.mxu0 %v3851_v51  ;;  %4017 = vmatpush.msrb.mxu2 %v4012_v11  ;;  %v4008_v51 = vld [vmem:[#allocation3 + $0x1748] sm:$0xff] }
 0x2f2   : > { %v2802_v3 = vadd.f32 %v2786_v57, %v8932_v31  ;;  %v9045_v20 = vpop.f32.mrf.mxu3  ;;  %4091 = vmatpush.msrb.mxu3 %v4086_v23  ;;  %v4084_v57 = vld [vmem:[#allocation3 + $0x17d8] sm:$0xff]  ;;  %v9089_v11 = vld [vmem:[#allocation2 + $0xc5] sm:$0xff] }
 0x2f3   : > { %3460 = vmatmul.f32.gmra.mxu2 %v9047_v25  ;;  %4163 = vmatpush.msra.mxu0 %v4162_v58 }
 0x2f4   : > { %v2876_v32 = vadd.f32 %v9010_v50, %v2802_v3  ;;  %3377 = vmatmul.f32.gmra.mxu1 %v7183_v22  ;;  %3599 = vmatmul.f32.gmra.mxu0 %v8935_v44  ;;  %v3939_v44 = vld [vmem:[#allocation3 + $0x16f0] sm:$0xff] }
 0x2f5   : > { %3942 = vmatpush.msra.mxu1 %v3939_v44  ;;  %4018 = vmatpush.msrb.mxu2 %v4011_v13  ;;  %v3769_v22 = vld [vmem:[#allocation2 + $0x71] sm:$0xff] }
 0x2f6   : > { %v2950_v31 = vadd.f32 %v9012_v8, %v2876_v32  ;;  %v9066_v55 = vpop.f32.mrf.mxu2  ;;  %4092 = vmatpush.msrb.mxu3 %v4085_v40  ;;  %4164 = vmatpush.msra.mxu0 %v4161_v17  ;;  %v4009_v32 = vld [vmem:[#allocation3 + $0x1750] sm:$0xff] }
 0x2f7   : > { %3534 = vmatmul.f32.gmra.mxu3 %v9051_v26  ;;  %3943 = vmatpush.msra.mxu1 %v3938_v28  ;;  %v4081_v28 = vld [vmem:[#allocation3 + $0x17c0] sm:$0xff]  ;;  %v4157_v13 = vld [vmem:[#allocation3 + $0x1850] sm:$0xff] }
 0x2f8   : > { %v9057_v50 = vadd.f32 %v3008_v0, %v2950_v31  ;;  %4019 = vmatpush.msrb.mxu2 %v4010_v14  ;;  %4093 = vmatpush.msrb.mxu3 %v4084_v57  ;;  %v7185_v57 = vld [vmem:[#allocation2 + $0x56] sm:$0xff] }
 0x2f9   : > { %v2789_v4 = vpop.f32.mrf.mxu1  ;;  %v3011_v8 = vpop.f32.mrf.mxu0 }
 0x2fa   : > { %v2803_v16 = vadd.f32 %v2789_v4, %v8949_v63  ;;  %v9068_v2 = vpop.f32.mrf.mxu3  ;;  %4020 = vmatpush.msrb.mxu2 %v4009_v32  ;;  %4094 = vmatpush.msrb.mxu3 %v4083_v49  ;;  %v4155_v32 = vld [vmem:[#allocation3 + $0x1840] sm:$0xff] }
 0x2fb   : > { %3735 = vmatmul.f32.vlgmr.msra.gmra.mxu2 %v3694_v34  ;;  %v3934_v34 = vld [vmem:[#allocation3 + $0x16c8] sm:$0xff] }
 0x2fc   : > { %v2877_v38 = vadd.f32 %v9030_v59, %v2803_v16  ;;  %3380 = vmatmul.f32.gmra.mxu1 %v9061_v42  ;;  %3602 = vmatmul.f32.gmra.mxu0 %v9063_v61  ;;  %v3937_v59 = vld [vmem:[#allocation3 + $0x16e0] sm:$0xff]  ;;  %v4158_v16 = vld [vmem:[#allocation3 + $0x1858] sm:$0xff] }
 0x2fd   : > { %3944 = vmatpush.msra.mxu1 %v3937_v59  ;;  %4021 = vmatpush.msrb.mxu2 %v4008_v51  ;;  %v3842_v59 = vld [vmem:[#allocation2 + $0x62] sm:$0xff] }
 0x2fe   : > { %v2951_v63 = vadd.f32 %v9032_v62, %v2877_v38  ;;  %v9077_v33 = vpop.f32.mrf.mxu2  ;;  %v4160_v62 = vld [vmem:[#allocation3 + $0x1868] sm:$0xff]  ;;  %v4007_v38 = vld [vmem:[#allocation3 + $0x1740] sm:$0xff] }
 0x2ff   : > { %3809 = vmatmul.f32.vlgmr.msra.gmra.mxu3 %v3768_v53  ;;  %4165 = vmatpush.msra.mxu0 %v4160_v62  ;;  %v3932_v62 = vld [vmem:[#allocation3 + $0x16b8] sm:$0xff] }
 0x300   : > { %v9074_v10 = vadd.f32 %v3011_v8, %v2951_v63  ;;  %3945 = vmatpush.msra.mxu1 %v3936_v1  ;;  %v4082_v8 = vld [vmem:[#allocation3 + $0x17c8] sm:$0xff]  ;;  %4022 = vmatpush.msrb.mxu2 %v4007_v38  ;;  %v4006_v63 = vld [vmem:[#allocation3 + $0x1738] sm:$0xff]  ;;  %v4079_v1 = vld [vmem:[#allocation3 + $0x17b0] sm:$0xff] }
 0x301   : > { %v2792_v52 = vpop.f32.mrf.mxu1  ;;  %v3014_v24 = vpop.f32.mrf.mxu0  ;;  %4166 = vmatpush.msra.mxu0 %v4159_v60  ;;  %4095 = vmatpush.msrb.mxu3 %v4082_v8 }
 0x302   : > { %v2804_v6 = vadd.f32 %v2792_v52, %v8961_v35  ;;  %v9079_v0 = vpop.f32.mrf.mxu3  ;;  %4023 = vmatpush.msrb.mxu2 %v4006_v63  ;;  %v4156_v52 = vld [vmem:[#allocation3 + $0x1848] sm:$0xff] }
 0x303   : > { %3738 = vmatmul.f32.gmra.mxu2 %v9055_v30  ;;  %4167 = vmatpush.msra.mxu0 %v4158_v16  ;;  %v7186_v16 = vld [vmem:[#allocation2 + $0x66] sm:$0xff] }
 0x304   : > { %v2878_v3 = vadd.f32 %v9043_v37, %v2804_v6  ;;  %3383 = vmatmul.f32.gmra.mxu1 %v7184_v12  ;;  %3605 = vmatmul.f32.gmra.mxu0 %v8964_v46  ;;  %v3935_v37 = vld [vmem:[#allocation3 + $0x16d0] sm:$0xff]  ;;  %v9087_v46 = vld [vmem:[#allocation2 + $0xc2] sm:$0xff] }
 0x305   : > { %3946 = vmatpush.msra.mxu1 %v3935_v37  ;;  %4096 = vmatpush.msrb.mxu3 %v4081_v28  ;;  %v3697_v6 = vld [vmem:[#allocation2 + $0x90] sm:$0xff] }
 0x306   : > { %v2952_v35 = vadd.f32 %v9045_v20, %v2878_v3  ;;  %v9092_v4 = vpop.f32.mrf.mxu2  ;;  %4168 = vmatpush.msra.mxu0 %v4157_v13  ;;  %v4005_v3 = vld [vmem:[#allocation3 + $0x1730] sm:$0xff]  ;;  %v4002_v13 = vld [vmem:[#allocation3 + $0x1718] sm:$0xff] }
 0x307   : > { %3812 = vmatmul.f32.gmra.mxu3 %v3769_v22  ;;  %3947 = vmatpush.msra.mxu1 %v3934_v34  ;;  %v3771_v12 = vld [vmem:[#allocation2 + $0x91] sm:$0xff]  ;;  %v4003_v34 = vld [vmem:[#allocation3 + $0x1720] sm:$0xff] }
 0x308   : > { %v9085_v31 = vadd.f32 %v3014_v24, %v2952_v35  ;;  %4169 = vmatpush.msra.mxu0 %v4156_v52  ;;  %4024 = vmatpush.msrb.mxu2 %v4005_v3  ;;  %v3931_v35 = vld [vmem:[#allocation3 + $0x16b0] sm:$0xff]  ;;  %v4151_v3 = vld [vmem:[#allocation3 + $0x1820] sm:$0xff] }
 0x309   : > { %v2795_v29 = vpop.f32.mrf.mxu1  ;;  %v3017_v44 = vpop.f32.mrf.mxu0  ;;  %v3843_v37 = vld [vmem:[#allocation2 + $0x72] sm:$0xff] }
 0x30a   : > { %v2805_v20 = vadd.f32 %v2795_v29, %v8978_v15  ;;  %v9094_v23 = vpop.f32.mrf.mxu3  ;;  %4170 = vmatpush.msra.mxu0 %v4155_v32  ;;  %v7187_v52 = vld [vmem:[#allocation2 + $0x76] sm:$0xff]  ;;  %v9134_v32 = vld [vmem:[#allocation2 + $0x86] sm:$0xff] }
 0x30b   : > { %3741 = vmatmul.f32.gmra.mxu2 %v8848_v27  ;;  %v4080_v27 = vld [vmem:[#allocation3 + $0x17b8] sm:$0xff] }
 0x30c   : > { %v2879_v58 = vadd.f32 %v9066_v55, %v2805_v20  ;;  %3386 = vmatmul.f32.gmra.mxu1 %v9087_v46  ;;  %3608 = vmatmul.f32.gmra.mxu0 %v9089_v11  ;;  %v3933_v55 = vld [vmem:[#allocation3 + $0x16c0] sm:$0xff] }
 0x30d   : > { %3948 = vmatpush.msra.mxu1 %v3933_v55  ;;  %4097 = vmatpush.msrb.mxu3 %v4080_v27  ;;  %v3699_v27 = vld [vmem:[#allocation2 + $0xb0] sm:$0xff] }
 0x30e   : > { %v2953_v15 = vadd.f32 %v9068_v2, %v2879_v58  ;;  %v9105_v2 = vpop.f32.mrf.mxu2  ;;  %v3930_v58 = vld [vmem:[#allocation3 + $0x16a8] sm:$0xff] }
 0x30f   : > { %3815 = vmatmul.f32.gmra.mxu3 %v8907_v39  ;;  %3949 = vmatpush.msra.mxu1 %v3932_v62  ;;  %v4075_v62 = vld [vmem:[#allocation3 + $0x1790] sm:$0xff] }
 0x310   : > { %v9101_v53 = vadd.f32 %v3017_v44, %v2953_v15  ;;  %4098 = vmatpush.msrb.mxu3 %v4079_v1  ;;  %v4154_v44 = vld [vmem:[#allocation3 + $0x1838] sm:$0xff]  ;;  %v4153_v15 = vld [vmem:[#allocation3 + $0x1830] sm:$0xff] }
 0x311   : > { %v3070_v40 = vpop.f32.mrf.mxu1  ;;  %v3292_v17 = vpop.f32.mrf.mxu0  ;;  %3950 = vmatpush.msra.mxu1 %v3931_v35  ;;  %4171 = vmatpush.msra.mxu0 %v4154_v44  ;;  %v3845_v35 = vld [vmem:[#allocation2 + $0x92] sm:$0xff]  ;;  %v3999_v44 = vld [vmem:[#allocation3 + $0x1700] sm:$0xff] }
 0x312   : > { %v3094_v14 = vadd.f32 %v3070_v40, %v8994_v47  ;;  %v9107_v24 = vpop.f32.mrf.mxu3  ;;  %v599_v40 = vld [vmem:[#allocation2 + $0x78] sm:$0x3f] }
 0x313   : > { %3744 = vmatmul.f32.gmra.mxu2 %v3697_v6  ;;  %3951 = vmatpush.msra.mxu1 %v3930_v58  ;;  %602 = vst [vmem:[#allocation2 + $0xd8] sm:$0x3f] %v599_v40  ;;  %v3928_v6 = vld [vmem:[#allocation3 + $0x1698] sm:$0xff]  ;;  %v4149_v58 = vld [vmem:[#allocation3 + $0x1810] sm:$0xff] }
 0x314   : > { %v3168_v39 = vadd.f32 %v9077_v33, %v3094_v14  ;;  %3661 = vmatmul.f32.vlgmr.msrb.gmra.mxu1 %v7185_v57  ;;  %3883 = vmatmul.f32.vlgmr.msrb.gmra.mxu0 %v3842_v59  ;;  %v4004_v33 = vld [vmem:[#allocation3 + $0x1728] sm:$0xff]  ;;  %v3773_v57 = vld [vmem:[#allocation2 + $0xb1] sm:$0xff] }
 0x315   : > { %4025 = vmatpush.msrb.mxu2 %v4004_v33  ;;  %4172 = vmatpush.msra.mxu0 %v4153_v15  ;;  %v4152_v59 = vld [vmem:[#allocation3 + $0x1828] sm:$0xff] }
 0x316   : > { %v3242_v47 = vadd.f32 %v9079_v0, %v3168_v39  ;;  %v9114_v29 = vpop.f32.mrf.mxu2  ;;  %v4078_v0 = vld [vmem:[#allocation3 + $0x17a8] sm:$0xff]  ;;  %v4001_v39 = vld [vmem:[#allocation3 + $0x1710] sm:$0xff] }
 0x317   : > { %3818 = vmatmul.f32.gmra.mxu3 %v3771_v12  ;;  %4026 = vmatpush.msrb.mxu2 %v4003_v34 }
 0x318   : > { %v9111_v22 = vadd.f32 %v3292_v17, %v3242_v47  ;;  %4099 = vmatpush.msrb.mxu3 %v4078_v0  ;;  %4173 = vmatpush.msra.mxu0 %v4152_v59  ;;  %v4000_v47 = vld [vmem:[#allocation3 + $0x1708] sm:$0xff] }
 0x319   : > { %v3073_v49 = vpop.f32.mrf.mxu1  ;;  %v3295_v60 = vpop.f32.mrf.mxu0  ;;  %4027 = vmatpush.msrb.mxu2 %v4002_v13  ;;  %v3926_v0 = vld [vmem:[#allocation3 + $0x1688] sm:$0xff] }
 0x31a   : > { %v3095_v51 = vadd.f32 %v3073_v49, %v9006_v5  ;;  %v9116_v20 = vpop.f32.mrf.mxu3  ;;  %v4077_v5 = vld [vmem:[#allocation3 + $0x17a0] sm:$0xff]  ;;  %4174 = vmatpush.msra.mxu0 %v4151_v3  ;;  %v4074_v49 = vld [vmem:[#allocation3 + $0x1788] sm:$0xff]  ;;  %v3775_v40 = vld [vmem:[#allocation2 + $0xd1] sm:$0xff] }
 0x31b   : > { %3747 = vmatmul.f32.gmra.mxu2 %v8899_v19  ;;  %4100 = vmatpush.msrb.mxu3 %v4077_v5  ;;  %v4076_v19 = vld [vmem:[#allocation3 + $0x1798] sm:$0xff]  ;;  %v4148_v13 = vld [vmem:[#allocation3 + $0x1808] sm:$0xff] }
 0x31c   : > { %v3169_v8 = vadd.f32 %v9092_v4, %v3095_v51  ;;  %3664 = vmatmul.f32.gmra.mxu1 %v7186_v16  ;;  %3886 = vmatmul.f32.gmra.mxu0 %v3843_v37  ;;  %v3929_v4 = vld [vmem:[#allocation3 + $0x16a0] sm:$0xff] }
 0x31d   : > { %3952 = vmatpush.msra.mxu1 %v3929_v4  ;;  %4101 = vmatpush.msrb.mxu3 %v4076_v19  ;;  %v7188_v16 = vld [vmem:[#allocation2 + $0xc0] sm:$0xff] }
 0x31e   : > { %v3243_v38 = vadd.f32 %v9094_v23, %v3169_v8  ;;  %v9125_v23 = vpop.f32.mrf.mxu2  ;;  %4028 = vmatpush.msrb.mxu2 %v4001_v39  ;;  %v9150_v59 = vld [vmem:[#allocation2 + $0xa6] sm:$0xff] }
 0x31f   : > { %3821 = vmatmul.f32.gmra.mxu3 %v8937_v54  ;;  %3953 = vmatpush.msra.mxu1 %v3928_v6 }
 0x320   : > { %v9121_v28 = vadd.f32 %v3295_v60, %v3243_v38  ;;  %4102 = vmatpush.msrb.mxu3 %v4075_v62  ;;  %4029 = vmatpush.msrb.mxu2 %v4000_v47  ;;  %v4150_v60 = vld [vmem:[#allocation3 + $0x1818] sm:$0xff] }
 0x321   : > { %v3076_v55 = vpop.f32.mrf.mxu1  ;;  %v3298_v63 = vpop.f32.mrf.mxu0  ;;  %4175 = vmatpush.msra.mxu0 %v4150_v60  ;;  %v3991_v47 = vld [vmem:[#allocation2 + $0x74] sm:$0xff] }
 0x322   : > { %v3096_v17 = vadd.f32 %v3076_v55, %v9022_v18  ;;  %v9127_v14 = vpop.f32.mrf.mxu3  ;;  %4103 = vmatpush.msrb.mxu3 %v4074_v49  ;;  %4030 = vmatpush.msrb.mxu2 %v3999_v44  ;;  %v9165_v49 = vld [vmem:[#allocation2 + $0xc6] sm:$0xff]  ;;  %v3849_v60 = vld [vmem:[#allocation2 + $0xd2] sm:$0xff] }
 0x323   : > { %3750 = vmatmul.f32.gmra.mxu2 %v3699_v27  ;;  %4176 = vmatpush.msra.mxu0 %v4149_v58 }
 0x324   : > { %v3170_v54 = vadd.f32 %v9105_v2, %v3096_v17  ;;  %3667 = vmatmul.f32.gmra.mxu1 %v7187_v52  ;;  %3889 = vmatmul.f32.gmra.mxu0 %v9025_v45  ;;  %v3927_v2 = vld [vmem:[#allocation3 + $0x1690] sm:$0xff] }
 0x325   : > { %3954 = vmatpush.msra.mxu1 %v3927_v2  ;;  %4177 = vmatpush.msra.mxu0 %v4148_v13 }
 0x326   : > { %v3244_v18 = vadd.f32 %v9107_v24, %v3170_v54  ;;  %v3159_v24 = vpop.f32.mrf.mxu2  ;;  %v3847_v54 = vld [vmem:[#allocation2 + $0xb2] sm:$0xff] }
 0x327   : > { %3824 = vmatmul.f32.gmra.mxu3 %v3773_v57  ;;  %3955 = vmatpush.msra.mxu1 %v3926_v0 }
 0x328   : > { %v9132_v12 = vadd.f32 %v3298_v63, %v3244_v18  ;;  %v7189_v63 = vld [vmem:[#allocation2 + $0x96] sm:$0xff] }
 0x329   : > { %v3079_v1 = vpop.f32.mrf.mxu1  ;;  %v3301_v45 = vpop.f32.mrf.mxu0 }
 0x32a   : > { %v3097_v33 = vadd.f32 %v3079_v1, %v9039_v21  ;;  %v3233_v37 = vpop.f32.mrf.mxu3  ;;  %v4073_v21 = vld [vmem:[#allocation3 + $0x1780] sm:$0xff] }
 0x32b   : > { %3753 = vmatmul.f32.gmra.mxu2 %v7188_v16  ;;  %4104 = vmatpush.msrb.mxu3 %v4073_v21  ;;  %v3916_v16 = vld [vmem:[#allocation2 + $0x63] sm:$0xff] }
 0x32c   : > { %v3171_v51 = vadd.f32 %v9114_v29, %v3097_v33  ;;  %3670 = vmatmul.f32.gmra.mxu1 %v9134_v32  ;;  %3892 = vmatmul.f32.gmra.mxu0 %v3845_v35  ;;  %v3925_v29 = vld [vmem:[#allocation3 + $0x1680] sm:$0xff] }
 0x32d   : > { %3956 = vmatpush.msra.mxu1 %v3925_v29 }
 0x32e   : > { %v3245_v8 = vadd.f32 %v9116_v20, %v3171_v51  ;;  %v3162_v4 = vpop.f32.mrf.mxu2 }
 0x32f   : > { %3827 = vmatmul.f32.gmra.mxu3 %v8966_v43  ;;  %v4147_v43 = vld [vmem:[#allocation3 + $0x1800] sm:$0xff] }
 0x330   : > { %v9140_v34 = vadd.f32 %v3301_v45, %v3245_v8  ;;  %4178 = vmatpush.msra.mxu0 %v4147_v43  ;;  %v4065_v45 = vld [vmem:[#allocation2 + $0x75] sm:$0xff] }
 0x331   : > { %v3082_v38 = vpop.f32.mrf.mxu1  ;;  %v3304_v5 = vpop.f32.mrf.mxu0  ;;  %v3995_v43 = vld [vmem:[#allocation2 + $0xb4] sm:$0xff] }
 0x332   : > { %v3098_v15 = vadd.f32 %v3082_v38, %v9057_v50  ;;  %v3236_v55 = vpop.f32.mrf.mxu3  ;;  %v3993_v38 = vld [vmem:[#allocation2 + $0x94] sm:$0xff] }
 0x333   : > { %3756 = vmatmul.f32.gmra.mxu2 %v9055_v30  ;;  %v4064_v30 = vld [vmem:[#allocation2 + $0x65] sm:$0xff] }
 0x334   : > { %v3172_v20 = vadd.f32 %v9125_v23, %v3098_v15  ;;  %3673 = vmatmul.f32.gmra.mxu1 %v7189_v63  ;;  %3895 = vmatmul.f32.gmra.mxu0 %v9061_v42  ;;  %v3990_v42 = vld [vmem:[#allocation2 + $0x64] sm:$0xff]  ;;  %v3917_v15 = vld [vmem:[#allocation2 + $0x73] sm:$0xff] }
 0x336   : > { %v3246_v17 = vadd.f32 %v9127_v14, %v3172_v20  ;;  %v3165_v52 = vpop.f32.mrf.mxu2 }
 0x337   : > { %3830 = vmatmul.f32.gmra.mxu3 %v3775_v40 }
 0x338   : > { %v9148_v19 = vadd.f32 %v3304_v5, %v3246_v17  ;;  %v4067_v5 = vld [vmem:[#allocation2 + $0x95] sm:$0xff] }
 0x339   : > { %v3085_v50 = vpop.f32.mrf.mxu1  ;;  %v3307_v27 = vpop.f32.mrf.mxu0 }
 0x33a   : > { %v3099_v23 = vadd.f32 %v3085_v50, %v9074_v10  ;;  %v3239_v6 = vpop.f32.mrf.mxu3  ;;  %v4069_v50 = vld [vmem:[#allocation2 + $0xb5] sm:$0xff] }
 0x33b   : > { %4031 = vmatmul.f32.vlgmr.msrb.gmra.mxu2 %v3990_v42 }
 0x33c   : > { %v3173_v39 = vadd.f32 %v3159_v24, %v3099_v23  ;;  %3676 = vmatmul.f32.gmra.mxu1 %v9150_v59  ;;  %3898 = vmatmul.f32.gmra.mxu0 %v3847_v54  ;;  %v4141_v54 = vld [vmem:[#allocation2 + $0x96] sm:$0xff] }
 0x33e   : > { %v3247_v14 = vadd.f32 %v3233_v37, %v3173_v39  ;;  %v9157_v2 = vpop.f32.mrf.mxu2  ;;  %v3997_v39 = vld [vmem:[#allocation2 + $0xd4] sm:$0xff] }
 0x33f   : > { %4105 = vmatmul.f32.vlgmr.msrb.gmra.mxu3 %v4064_v30  ;;  %v4071_v30 = vld [vmem:[#allocation2 + $0xd5] sm:$0xff] }
 0x340   : > { %v9154_v57 = vadd.f32 %v3307_v27, %v3247_v14 }
 0x341   : > { %v3088_v18 = vpop.f32.mrf.mxu1  ;;  %v3310_v62 = vpop.f32.mrf.mxu0 }
 0x342   : > { %v3100_v3 = vadd.f32 %v3088_v18, %v9085_v31  ;;  %v9159_v10 = vpop.f32.mrf.mxu3  ;;  %v4143_v18 = vld [vmem:[#allocation2 + $0xb6] sm:$0xff] }
 0x343   : > { %4034 = vmatmul.f32.gmra.mxu2 %v3991_v47 }
 0x344   : > { %v3174_v1 = vadd.f32 %v3162_v4, %v3100_v3  ;;  %3679 = vmatmul.f32.gmra.mxu1 %v8926_v36  ;;  %3901 = vmatmul.f32.gmra.mxu0 %v9087_v46  ;;  %v4139_v4 = vld [vmem:[#allocation2 + $0x76] sm:$0xff]  ;;  %v4336_v3 = vld [vmem:[#allocation5 + $0x3e0] sm:$0xff] }
 0x345   : > { %4391 = vmatpush.msra.mxu2 %v4336_v3  ;;  %v4329_v3 = vld [vmem:[#allocation5 + $0x3a8] sm:$0xff] }
 0x346   : > { %v3248_v35 = vadd.f32 %v3236_v55, %v3174_v1  ;;  %v9168_v51 = vpop.f32.mrf.mxu2  ;;  %v4332_v1 = vld [vmem:[#allocation5 + $0x3c0] sm:$0xff] }
 0x347   : > { %4108 = vmatmul.f32.gmra.mxu3 %v4065_v45  ;;  %4392 = vmatpush.msra.mxu2 %v4332_v1 }
 0x348   : > { %v9163_v33 = vadd.f32 %v3310_v62, %v3248_v35 }
 0x349   : > { %v3091_v24 = vpop.f32.mrf.mxu1  ;;  %v3313_v31 = vpop.f32.mrf.mxu0 }
 0x34a   : > { %v3101_v37 = vadd.f32 %v3091_v24, %v9101_v53  ;;  %v9170_v0 = vpop.f32.mrf.mxu3  ;;  %v4138_v53 = vld [vmem:[#allocation2 + $0x66] sm:$0xff] }
 0x34b   : > { %4037 = vmatmul.f32.gmra.mxu2 %v8990_v9 }
 0x34c   : > { %v3175_v36 = vadd.f32 %v3165_v52, %v3101_v37  ;;  %3682 = vmatmul.f32.gmra.mxu1 %v9165_v49  ;;  %3904 = vmatmul.f32.gmra.mxu0 %v3849_v60  ;;  %v4328_v60 = vld [vmem:[#allocation5 + $0x3a0] sm:$0xff] }
 0x34d   : > { %4393 = vmatpush.msra.mxu2 %v4328_v60  ;;  %v4312_v60 = vld [vmem:[#allocation5 + $0x320] sm:$0xff] }
 0x34e   : > { %v3249_v46 = vadd.f32 %v3239_v6, %v3175_v36  ;;  %v9181_v58 = vpop.f32.mrf.mxu2  ;;  %v4269_v36 = vld [vmem:[#allocation5 + $0x1c8] sm:$0xff] }
 0x34f   : > { %4111 = vmatmul.f32.gmra.mxu3 %v9027_v56 }
 0x350   : > { %v9174_v44 = vadd.f32 %v3313_v31, %v3249_v46  ;;  %v4268_v31 = vld [vmem:[#allocation5 + $0x1c0] sm:$0xff] }
 0x351   : > { %v9177_v8 = vpop.f32.mrf.mxu1  ;;  %v9179_v21 = vpop.f32.mrf.mxu0  ;;  %v4264_v46 = vld [vmem:[#allocation5 + $0x1a0] sm:$0xff] }
 0x352   : > { %10945 = vst [vmem:[#allocation21_spill] sm:$0xff] %v9174_v44  ;;  %v9183_v29 = vpop.f32.mrf.mxu3  ;;  %v4217_v44 = vld [vmem:[#allocation5 + $0x28] sm:$0xff] }
 0x353   : > { %4040 = vmatmul.f32.gmra.mxu2 %v3993_v38  ;;  %v4337_v38 = vld [vmem:[#allocation5 + $0x3e8] sm:$0xff] }
 0x354   : > { %3957 = vmatmul.f32.vlgmr.msra.gmra.mxu1 %v3916_v16  ;;  %4179 = vmatmul.f32.vlgmr.msra.gmra.mxu0 %v4138_v53  ;;  %v4324_v16 = vld [vmem:[#allocation5 + $0x380] sm:$0xff]  ;;  %v4265_v53 = vld [vmem:[#allocation5 + $0x1a8] sm:$0xff] }
 0x355   : > { %4394 = vmatpush.msra.mxu2 %v4324_v16  ;;  %4473 = vmatpush.msrb.mxu0 %v4337_v38  ;;  %v4325_v16 = vld [vmem:[#allocation5 + $0x388] sm:$0xff]  ;;  %v4308_v38 = vld [vmem:[#allocation5 + $0x300] sm:$0xff] }
 0x356   : > { %v9189_v13 = vpop.f32.mrf.mxu2 }
 0x357   : > { %4114 = vmatmul.f32.gmra.mxu3 %v4067_v5 }
 0x359   : > { %v9185_v9 = vpop.f32.mrf.mxu1  ;;  %v9187_v56 = vpop.f32.mrf.mxu0 }
 0x35a   : > { %v9191_v55 = vpop.f32.mrf.mxu3 }
 0x35b   : > { %4043 = vmatmul.f32.gmra.mxu2 %v9018_v7  ;;  %v3919_v7 = vld [vmem:[#allocation2 + $0x93] sm:$0xff] }
 0x35c   : > { %3960 = vmatmul.f32.gmra.mxu1 %v3917_v15  ;;  %4182 = vmatmul.f32.gmra.mxu0 %v4139_v4  ;;  %v3923_v15 = vld [vmem:[#allocation2 + $0xd3] sm:$0xff] }
 0x35e   : > { %v9199_v40 = vpop.f32.mrf.mxu2 }
 0x35f   : > { %4117 = vmatmul.f32.gmra.mxu3 %v9063_v61 }
 0x361   : > { %v9195_v20 = vpop.f32.mrf.mxu1  ;;  %v9197_v63 = vpop.f32.mrf.mxu0 }
 0x362   : > { %v9201_v17 = vpop.f32.mrf.mxu3 }
 0x363   : > { %4046 = vmatmul.f32.gmra.mxu2 %v3995_v43  ;;  %v4145_v43 = vld [vmem:[#allocation2 + $0xd6] sm:$0xff] }
 0x364   : > { %3963 = vmatmul.f32.gmra.mxu1 %v8986_v41  ;;  %4185 = vmatmul.f32.gmra.mxu0 %v9134_v32 }
 0x366   : > { %v9209_v23 = vpop.f32.mrf.mxu2 }
 0x367   : > { %4120 = vmatmul.f32.gmra.mxu3 %v4069_v50 }
 0x369   : > { %v9205_v27 = vpop.f32.mrf.mxu1  ;;  %v9207_v61 = vpop.f32.mrf.mxu0 }
 0x36a   : > { %v9211_v52 = vpop.f32.mrf.mxu3 }
 0x36b   : > { %4049 = vmatmul.f32.gmra.mxu2 %v9051_v26  ;;  %v3921_v26 = vld [vmem:[#allocation2 + $0xb3] sm:$0xff] }
 0x36c   : > { %3966 = vmatmul.f32.gmra.mxu1 %v3919_v7  ;;  %4188 = vmatmul.f32.gmra.mxu0 %v4141_v54  ;;  %v4261_v54 = vld [vmem:[#allocation5 + $0x188] sm:$0xff] }
 0x36e   : > { %v9219_v6 = vpop.f32.mrf.mxu2 }
 0x36f   : > { %4123 = vmatmul.f32.gmra.mxu3 %v9089_v11 }
 0x371   : > { %v9215_v41 = vpop.f32.mrf.mxu1  ;;  %v9217_v32 = vpop.f32.mrf.mxu0 }
 0x372   : > { %v9221_v42 = vpop.f32.mrf.mxu3 }
 0x373   : > { %10946 = vst [vmem:[#allocation22_spill] sm:$0xff] %v9221_v42  ;;  %4052 = vmatmul.f32.gmra.mxu2 %v3997_v39  ;;  %v4333_v39 = vld [vmem:[#allocation5 + $0x3c8] sm:$0xff] }
 0x374   : > { %3969 = vmatmul.f32.gmra.mxu1 %v9014_v48  ;;  %4191 = vmatmul.f32.gmra.mxu0 %v9150_v59  ;;  %v4272_v48 = vld [vmem:[#allocation5 + $0x1e0] sm:$0xff]  ;;  %v4273_v59 = vld [vmem:[#allocation5 + $0x1e8] sm:$0xff] }
 0x375   : > { %4350 = vmatpush.msrb.mxu1 %v4272_v48  ;;  %4432 = vmatpush.msra.mxu3 %v4273_v59 }
 0x376   : > { %v9229_v62 = vpop.f32.mrf.mxu2  ;;  %4474 = vmatpush.msrb.mxu0 %v4333_v39  ;;  %v4244_v39 = vld [vmem:[#allocation5 + $0x100] sm:$0xff] }
 0x377   : > { %4126 = vmatmul.f32.gmra.mxu3 %v4071_v30  ;;  %10947 = vst [vmem:[#allocation23_spill] sm:$0xff] %v9229_v62  ;;  %4351 = vmatpush.msrb.mxu1 %v4268_v31  ;;  %v4256_v30 = vld [vmem:[#allocation5 + $0x160] sm:$0xff] }
 0x378   : > { %4433 = vmatpush.msra.mxu3 %v4269_v36  ;;  %4475 = vmatpush.msrb.mxu0 %v4329_v3  ;;  %v4252_v31 = vld [vmem:[#allocation5 + $0x140] sm:$0xff]  ;;  %v4317_v3 = vld [vmem:[#allocation5 + $0x348] sm:$0xff] }
 0x379   : > { %v9225_v14 = vpop.f32.mrf.mxu1  ;;  %v9227_v11 = vpop.f32.mrf.mxu0  ;;  %4352 = vmatpush.msrb.mxu1 %v4264_v46  ;;  %v4253_v46 = vld [vmem:[#allocation5 + $0x148] sm:$0xff] }
 0x37a   : > { %v9231_v47 = vpop.f32.mrf.mxu3  ;;  %4434 = vmatpush.msra.mxu3 %v4265_v53  ;;  %4476 = vmatpush.msrb.mxu0 %v4325_v16  ;;  %v4248_v53 = vld [vmem:[#allocation5 + $0x120] sm:$0xff]  ;;  %v4313_v16 = vld [vmem:[#allocation5 + $0x328] sm:$0xff] }
 0x37b   : > { %10948 = vst [vmem:[#allocation24_spill] sm:$0xff] %v9231_v47 }
 0x37c   : > { %3972 = vmatmul.f32.gmra.mxu1 %v3921_v26  ;;  %4194 = vmatmul.f32.gmra.mxu0 %v4143_v18  ;;  %v4316_v26 = vld [vmem:[#allocation5 + $0x340] sm:$0xff]  ;;  %v4257_v18 = vld [vmem:[#allocation5 + $0x168] sm:$0xff] }
 0x37d   : > { %4435 = vmatpush.msra.mxu3 %v4261_v54 }
 0x37e   : > { %v9237_v24 = vpop.f32.mrf.mxu2 }
 0x37f   : > { %4436 = vmatpush.msra.mxu3 %v4257_v18  ;;  %v4245_v18 = vld [vmem:[#allocation5 + $0x108] sm:$0xff] }
 0x381   : > { %v9233_v45 = vpop.f32.mrf.mxu1  ;;  %v9235_v35 = vpop.f32.mrf.mxu0  ;;  %4437 = vmatpush.msra.mxu3 %v4253_v46  ;;  %v4241_v46 = vld [vmem:[#allocation5 + $0xe8] sm:$0xff] }
 0x382   : > { %10949 = vst [vmem:[#allocation25_spill] sm:$0xff] %v9235_v35  ;;  %v9239_v37 = vpop.f32.mrf.mxu3 }
 0x384   : > { %3975 = vmatmul.f32.gmra.mxu1 %v9047_v25  ;;  %4197 = vmatmul.f32.gmra.mxu0 %v9165_v49  ;;  %v4260_v25 = vld [vmem:[#allocation5 + $0x180] sm:$0xff] }
 0x385   : > { %v4320_v49 = vld [vmem:[#allocation5 + $0x360] sm:$0xff]  ;;  %4353 = vmatpush.msrb.mxu1 %v4260_v25 }
 0x386   : > { %v9247_v50 = vpop.f32.mrf.mxu2  ;;  %4395 = vmatpush.msra.mxu2 %v4320_v49 }
 0x387   : > { %4354 = vmatpush.msrb.mxu1 %v4256_v30  ;;  %v4304_v30 = vld [vmem:[#allocation5 + $0x2e0] sm:$0xff] }
 0x388   : > { %4396 = vmatpush.msra.mxu2 %v4316_v26 }
 0x389   : > { %v9243_v5 = vpop.f32.mrf.mxu1  ;;  %v9245_v4 = vpop.f32.mrf.mxu0  ;;  %4355 = vmatpush.msrb.mxu1 %v4252_v31  ;;  %v4240_v31 = vld [vmem:[#allocation5 + $0xe0] sm:$0xff] }
 0x38a   : > { %10950 = vst [vmem:[#allocation26_spill] sm:$0xff] %v9243_v5  ;;  %v9249_v7 = vpop.f32.mrf.mxu3  ;;  %4397 = vmatpush.msra.mxu2 %v4312_v60  ;;  %v4300_v60 = vld [vmem:[#allocation5 + $0x2c0] sm:$0xff] }
 0x38b   : > { %10951 = vst [vmem:[#allocation27_spill] sm:$0xff] %v9245_v4  ;;  %4356 = vmatpush.msrb.mxu1 %v4248_v53  ;;  %v4233_v4 = vld [vmem:[#allocation5 + $0xa8] sm:$0xff]  ;;  %v4284_v5 = vld [vmem:[#allocation5 + $0x240] sm:$0xff] }
 0x38c   : > { %3978 = vmatmul.f32.gmra.mxu1 %v3923_v15  ;;  %4200 = vmatmul.f32.gmra.mxu0 %v4145_v43  ;;  %v4249_v15 = vld [vmem:[#allocation5 + $0x128] sm:$0xff] }
 0x38d   : > { %4398 = vmatpush.msra.mxu2 %v4308_v38  ;;  %v4321_v43 = vld [vmem:[#allocation5 + $0x368] sm:$0xff]  ;;  %4438 = vmatpush.msra.mxu3 %v4249_v15 }
 0x38e   : > { %v9255_v59 = vpop.f32.mrf.mxu2  ;;  %4477 = vmatpush.msrb.mxu0 %v4321_v43  ;;  %4357 = vmatpush.msrb.mxu1 %v4244_v39  ;;  %v4236_v43 = vld [vmem:[#allocation5 + $0xc0] sm:$0xff] }
 0x38f   : > { %4399 = vmatpush.msra.mxu2 %v4304_v30  ;;  %4439 = vmatpush.msra.mxu3 %v4245_v18  ;;  %v4296_v39 = vld [vmem:[#allocation5 + $0x2a0] sm:$0xff]  ;;  %v4237_v18 = vld [vmem:[#allocation5 + $0xc8] sm:$0xff] }
 0x390   : > { %4478 = vmatpush.msrb.mxu0 %v4317_v3  ;;  %4358 = vmatpush.msrb.mxu1 %v4240_v31  ;;  %v4309_v3 = vld [vmem:[#allocation5 + $0x308] sm:$0xff]  ;;  %v4232_v31 = vld [vmem:[#allocation5 + $0xa0] sm:$0xff] }
 0x391   : > { %v9251_v48 = vpop.f32.mrf.mxu1  ;;  %v9253_v1 = vpop.f32.mrf.mxu0  ;;  %4400 = vmatpush.msra.mxu2 %v4300_v60  ;;  %4440 = vmatpush.msra.mxu3 %v4241_v46  ;;  %v4292_v60 = vld [vmem:[#allocation5 + $0x280] sm:$0xff]  ;;  %v4305_v46 = vld [vmem:[#allocation5 + $0x2e8] sm:$0xff] }
 0x392   : > { %v9257_v36 = vpop.f32.mrf.mxu3  ;;  %4479 = vmatpush.msrb.mxu0 %v4313_v16  ;;  %4359 = vmatpush.msrb.mxu1 %v4236_v43  ;;  %v4229_v16 = vld [vmem:[#allocation5 + $0x88] sm:$0xff]  ;;  %v4228_v43 = vld [vmem:[#allocation5 + $0x80] sm:$0xff] }
 0x393   : > { %4401 = vmatpush.msra.mxu2 %v4296_v39  ;;  %4441 = vmatpush.msra.mxu3 %v4237_v18  ;;  %v4288_v39 = vld [vmem:[#allocation5 + $0x260] sm:$0xff]  ;;  %v4225_v18 = vld [vmem:[#allocation5 + $0x68] sm:$0xff] }
 0x394   : > { %4480 = vmatpush.msrb.mxu0 %v4309_v3  ;;  %4360 = vmatpush.msrb.mxu1 %v4232_v31  ;;  %v4301_v31 = vld [vmem:[#allocation5 + $0x2c8] sm:$0xff] }
 0x395   : > { %4402 = vmatpush.msra.mxu2 %v4292_v60  ;;  %4442 = vmatpush.msra.mxu3 %v4233_v4  ;;  %v4221_v4 = vld [vmem:[#allocation5 + $0x48] sm:$0xff]  ;;  %v4224_v60 = vld [vmem:[#allocation5 + $0x60] sm:$0xff] }
 0x396   : > { %v9263_v54 = vpop.f32.mrf.mxu2  ;;  %4481 = vmatpush.msrb.mxu0 %v4305_v46  ;;  %4361 = vmatpush.msrb.mxu1 %v4228_v43  ;;  %v4297_v46 = vld [vmem:[#allocation5 + $0x2a8] sm:$0xff] }
 0x397   : > { %4443 = vmatpush.msra.mxu3 %v4229_v16  ;;  %4403 = vmatpush.msra.mxu2 %v4288_v39  ;;  %v4213_v16 = vld [vmem:[#allocation5 + $0x8] sm:$0xff]  ;;  %v4220_v39 = vld [vmem:[#allocation5 + $0x40] sm:$0xff] }
 0x398   : > { %4482 = vmatpush.msrb.mxu0 %v4301_v31  ;;  %4362 = vmatpush.msrb.mxu1 %v4224_v60  ;;  %v4289_v31 = vld [vmem:[#allocation5 + $0x268] sm:$0xff]  ;;  %v3390_v60 = vadd.f32 %v9177_v8, %v9111_v22 }
 0x399   : > { %v9259_v25 = vpop.f32.mrf.mxu1  ;;  %v9261_v49 = vpop.f32.mrf.mxu0  ;;  %4444 = vmatpush.msra.mxu3 %v4225_v18  ;;  %4404 = vmatpush.msra.mxu2 %v4284_v5  ;;  %v4280_v18 = vld [vmem:[#allocation5 + $0x220] sm:$0xff]  ;;  %v9291_v5 = vld [vmem:[#allocation2 + $0x33] sm:$0xff] }
 0x39a   : > { %v9265_v26 = vpop.f32.mrf.mxu3  ;;  %4483 = vmatpush.msrb.mxu0 %v4297_v46  ;;  %4363 = vmatpush.msrb.mxu1 %v4220_v39  ;;  %v4216_v46 = vld [vmem:[#allocation5 + $0x20] sm:$0xff] }
 0x39b   : > { %4445 = vmatpush.msra.mxu3 %v4221_v4  ;;  %4405 = vmatpush.msra.mxu2 %v4280_v18  ;;  %v3464_v18 = vadd.f32 %v9157_v2, %v3390_v60  ;;  %v9305_v8 = vld [vmem:[#allocation2 + $0x43] sm:$0xff]  ;;  %v3391_v2 = vadd.f32 %v9185_v9, %v9121_v28  ;;  %v4274_v60 = vld [vmem:[#allocation5 + $0x1f0] sm:$0xff] }
 0x39c   : > { %4364 = vmatpush.msrb.mxu1 %v4216_v46  ;;  %v4334_v46 = vld [vmem:[#allocation5 + $0x3d0] sm:$0xff] }
 0x39d   : > { %4446 = vmatpush.msra.mxu3 %v4217_v44  ;;  %v4285_v44 = vld [vmem:[#allocation5 + $0x248] sm:$0xff] }
 0x39e   : > { %v9271_v15 = vpop.f32.mrf.mxu2 }
 0x39f   : > { %4447 = vmatpush.msra.mxu3 %v4213_v16  ;;  %v4276_v16 = vld [vmem:[#allocation5 + $0x200] sm:$0xff] }
 0x3a0   : > { %4448 = vmatmul.f32.vlgmr.msra.gmra.mxu3 %v9291_v5  ;;  %4406 = vmatpush.msra.mxu2 %v4276_v16 }
 0x3a1   : > { %v9267_v53 = vpop.f32.mrf.mxu1  ;;  %v9269_v38 = vpop.f32.mrf.mxu0 }
 0x3a2   : > { %v9273_v30 = vpop.f32.mrf.mxu3 }
 0x3a3   : > { %10952 = vst [vmem:[#allocation28_spill] sm:$0xff] %v9273_v30  ;;  %v4338_v30 = vld [vmem:[#allocation5 + $0x3f0] sm:$0xff] }
 0x3a4   : > { %4555 = vmatpush.msrb.mxu2 %v4338_v30 }
 0x3a6   : > { %v9279_v35 = vpop.f32.mrf.mxu2  ;;  %4556 = vmatpush.msrb.mxu2 %v4334_v46  ;;  %v4271_v46 = vld [vmem:[#allocation5 + $0x1d8] sm:$0xff] }
 0x3a7   : > { %10953 = vst [vmem:[#allocation29_spill] sm:$0xff] %v9279_v35  ;;  %v4293_v35 = vld [vmem:[#allocation5 + $0x288] sm:$0xff] }
 0x3a8   : > { %4484 = vmatpush.msrb.mxu0 %v4293_v35  ;;  %v4281_v35 = vld [vmem:[#allocation5 + $0x228] sm:$0xff]  ;;  %4451 = vmatmul.f32.gmra.mxu3 %v9305_v8 }
 0x3a9   : > { %v9275_v47 = vpop.f32.mrf.mxu1  ;;  %v9277_v62 = vpop.f32.mrf.mxu0 }
 0x3aa   : > { %v9281_v3 = vpop.f32.mrf.mxu3  ;;  %4485 = vmatpush.msrb.mxu0 %v4289_v31  ;;  %v4212_v31 = vld [vmem:[#allocation5] sm:$0xff] }
 0x3ab   : > { %10954 = vst [vmem:[#allocation30_spill] sm:$0xff] %v9281_v3  ;;  %4365 = vmatpush.msrb.mxu1 %v4212_v31  ;;  %v3465_v31 = vadd.f32 %v9168_v51, %v3391_v2  ;;  %v4326_v2 = vld [vmem:[#allocation5 + $0x390] sm:$0xff] }
 0x3ac   : > { %4486 = vmatpush.msrb.mxu0 %v4285_v44  ;;  %4366 = vmatmul.f32.vlgmr.msrb.gmra.mxu1 %v9291_v5  ;;  %v3538_v44 = vadd.f32 %v9159_v10, %v3464_v18  ;;  %v4270_v10 = vld [vmem:[#allocation5 + $0x1d0] sm:$0xff] }
 0x3ad   : > { %4514 = vmatpush.msra.mxu1 %v4274_v60  ;;  %v4330_v18 = vld [vmem:[#allocation5 + $0x3b0] sm:$0xff]  ;;  %v3539_v51 = vadd.f32 %v9170_v0, %v3465_v31 }
 0x3ae   : > { %v9287_v43 = vpop.f32.mrf.mxu2  ;;  %4487 = vmatpush.msrb.mxu0 %v4281_v35  ;;  %v3612_v30 = vadd.f32 %v9179_v21, %v3538_v44  ;;  %4557 = vmatpush.msrb.mxu2 %v4330_v18  ;;  %v9323_v60 = vld [vmem:[#allocation2 + $0x53] sm:$0xff]  ;;  %v3392_v21 = vadd.f32 %v9195_v20, %v9132_v12 }
 0x3af   : > { %10956 = vst [vmem:[#allocation32_spill] sm:$0xff] %v9287_v43  ;;  %v4277_v43 = vld [vmem:[#allocation5 + $0x208] sm:$0xff]  ;;  %4515 = vmatpush.msra.mxu1 %v4270_v10  ;;  %v4266_v44 = vld [vmem:[#allocation5 + $0x1b0] sm:$0xff] }
 0x3b0   : > { %4488 = vmatpush.msrb.mxu0 %v4277_v43  ;;  %v4275_v43 = vld [vmem:[#allocation5 + $0x1f8] sm:$0xff]  ;;  %v3686_v28 = vadd.f32 %v9251_v48, %v3612_v30  ;;  %4454 = vmatmul.f32.gmra.mxu3 %v9323_v60  ;;  %v3466_v0 = vadd.f32 %v9181_v58, %v3392_v21  ;;  %v4262_v31 = vld [vmem:[#allocation5 + $0x190] sm:$0xff] }
 0x3b1   : > { %v9283_v42 = vpop.f32.mrf.mxu1  ;;  %v9285_v3 = vpop.f32.mrf.mxu0  ;;  %4596 = vmatpush.msrb.mxu3 %v4275_v43  ;;  %4516 = vmatpush.msra.mxu1 %v4266_v44  ;;  %v4267_v43 = vld [vmem:[#allocation5 + $0x1b8] sm:$0xff]  ;;  %v4322_v12 = vld [vmem:[#allocation5 + $0x370] sm:$0xff]  ;;  %v9341_v44 = vld [vmem:[#allocation2 + $0x63] sm:$0xff] }
 0x3b2   : > { %10955 = vst [vmem:[#allocation31_spill] sm:$0xff] %v9285_v3  ;;  %v9289_v4 = vpop.f32.mrf.mxu3  ;;  %4558 = vmatpush.msrb.mxu2 %v4326_v2  ;;  %v3760_v48 = vadd.f32 %v9237_v24, %v3686_v28  ;;  %v4339_v30 = vld [vmem:[#allocation5 + $0x3f8] sm:$0xff]  ;;  %v3540_v58 = vadd.f32 %v9183_v29, %v3466_v0  ;;  %v4254_v0 = vld [vmem:[#allocation5 + $0x150] sm:$0xff] }
 0x3b3   : > { %10957 = vst [vmem:[#allocation33_spill] sm:$0xff] %v9289_v4  ;;  %4597 = vmatpush.msrb.mxu3 %v4271_v46  ;;  %4637 = vmatpush.msra.mxu0 %v4339_v30  ;;  %v3613_v46 = vadd.f32 %v9187_v56, %v3539_v51  ;;  %v4263_v2 = vld [vmem:[#allocation5 + $0x198] sm:$0xff]  ;;  %v3393_v56 = vadd.f32 %v9205_v27, %v9140_v34  ;;  %v4318_v51 = vld [vmem:[#allocation5 + $0x350] sm:$0xff] }
 0x3b4   : > { %4369 = vmatmul.f32.gmra.mxu1 %v9305_v8  ;;  %4559 = vmatpush.msrb.mxu2 %v4322_v12  ;;  %v3834_v20 = vadd.f32 %v9239_v37, %v3760_v48  ;;  %v4259_v30 = vld [vmem:[#allocation5 + $0x178] sm:$0xff]  ;;  %v3614_v29 = vadd.f32 %v9197_v63, %v3540_v58  ;;  %v3394_v63 = vadd.f32 %v9215_v41, %v9148_v19  ;;  %v4310_v58 = vld [vmem:[#allocation5 + $0x310] sm:$0xff] }
 0x3b5   : > { %4598 = vmatpush.msrb.mxu3 %v4267_v43  ;;  %4517 = vmatpush.msra.mxu1 %v4262_v31  ;;  %v3687_v24 = vadd.f32 %v9259_v25, %v3613_v46  ;;  %v4335_v43 = vld [vmem:[#allocation5 + $0x3d8] sm:$0xff]  ;;  %v4258_v25 = vld [vmem:[#allocation5 + $0x170] sm:$0xff]  ;;  %v3467_v34 = vadd.f32 %v9189_v13, %v3393_v56 }
 0x3b6   : > { %v9301_v3 = vpop.f32.mrf.mxu2  ;;  %4638 = vmatpush.msra.mxu0 %v4335_v43  ;;  %4560 = vmatpush.msrb.mxu2 %v4318_v51  ;;  %v3908_v21 = vadd.f32 %v9253_v1, %v3834_v20  ;;  %v4331_v46 = vld [vmem:[#allocation5 + $0x3b8] sm:$0xff]  ;;  %v3688_v1 = vadd.f32 %v9267_v53, %v3614_v29 }
 0x3b7   : > { %4599 = vmatpush.msrb.mxu3 %v4263_v2  ;;  %4518 = vmatpush.msra.mxu1 %v4258_v25  ;;  %v3761_v48 = vadd.f32 %v9247_v50, %v3687_v24  ;;  %v4314_v2 = vld [vmem:[#allocation5 + $0x330] sm:$0xff]  ;;  %v4255_v24 = vld [vmem:[#allocation5 + $0x158] sm:$0xff]  ;;  %v3541_v13 = vadd.f32 %v9191_v55, %v3467_v34 }
 0x3b8   : > { %4457 = vmatmul.f32.gmra.mxu3 %v9341_v44  ;;  %4639 = vmatpush.msra.mxu0 %v4331_v46  ;;  %v9357_v20 = vld [vmem:[#allocation2 + $0x73] sm:$0xff]  ;;  %v3762_v51 = vadd.f32 %v9255_v59, %v3688_v1 }
 0x3b9   : > { %v9296_v4 = vpop.f32.mrf.mxu1  ;;  %v9298_v39 = vpop.f32.mrf.mxu0  ;;  %4600 = vmatpush.msrb.mxu3 %v4259_v30  ;;  %4519 = vmatpush.msra.mxu1 %v4254_v0  ;;  %v3835_v43 = vadd.f32 %v9249_v7, %v3761_v48  ;;  %v4327_v25 = vld [vmem:[#allocation5 + $0x398] sm:$0xff]  ;;  %v3615_v41 = vadd.f32 %v9207_v61, %v3541_v13  ;;  %v4246_v59 = vld [vmem:[#allocation5 + $0x110] sm:$0xff] }
 0x3ba   : > { %v9303_v22 = vpop.f32.mrf.mxu3  ;;  %4561 = vmatpush.msrb.mxu2 %v4314_v2  ;;  %4640 = vmatpush.msra.mxu0 %v4327_v25  ;;  %v4251_v55 = vld [vmem:[#allocation5 + $0x138] sm:$0xff]  ;;  %v3395_v2 = vadd.f32 %v9225_v14, %v9154_v57 }
 0x3bb   : > { %10958 = vst [vmem:[#allocation34_spill] sm:$0xff] %v9303_v22  ;;  %4601 = vmatpush.msrb.mxu3 %v4255_v24  ;;  %v3909_v56 = vadd.f32 %v9261_v49, %v3835_v43  ;;  %v4323_v30 = vld [vmem:[#allocation5 + $0x378] sm:$0xff]  ;;  %v4306_v49 = vld [vmem:[#allocation5 + $0x2f0] sm:$0xff]  ;;  %v3689_v29 = vadd.f32 %v9275_v47, %v3615_v41 }
 0x3bc   : > { %4372 = vmatmul.f32.gmra.mxu1 %v9323_v60  ;;  %4562 = vmatpush.msrb.mxu2 %v4310_v58  ;;  %v4319_v61 = vld [vmem:[#allocation5 + $0x358] sm:$0xff]  ;;  %v4242_v47 = vld [vmem:[#allocation5 + $0xf0] sm:$0xff]  ;;  %v3469_v14 = vadd.f32 %v9209_v23, %v3395_v2  ;;  %v9417_v2 = vld [vmem:[#allocation2 + $0xa3] sm:$0xff] }
 0x3bd   : > { %4602 = vmatpush.msrb.mxu3 %v4251_v55  ;;  %4641 = vmatpush.msra.mxu0 %v4323_v30  ;;  %v4302_v43 = vld [vmem:[#allocation5 + $0x2d0] sm:$0xff]  ;;  %v3763_v1 = vadd.f32 %v9263_v54, %v3689_v29  ;;  %v4243_v25 = vld [vmem:[#allocation5 + $0xf8] sm:$0xff]  ;;  %v3396_v30 = vadd.f32 %v9233_v45, %v9163_v33 }
 0x3be   : > { %v9318_v22 = vpop.f32.mrf.mxu2  ;;  %4563 = vmatpush.msrb.mxu2 %v4306_v49  ;;  %v4315_v13 = vld [vmem:[#allocation5 + $0x338] sm:$0xff]  ;;  %v4298_v54 = vld [vmem:[#allocation5 + $0x2b0] sm:$0xff]  ;;  %v3543_v55 = vadd.f32 %v9211_v52, %v3469_v14 }
 0x3bf   : > { %4642 = vmatpush.msra.mxu0 %v4319_v61  ;;  %v4239_v23 = vld [vmem:[#allocation5 + $0xd8] sm:$0xff]  ;;  %v3470_v45 = vadd.f32 %v9219_v6, %v3396_v30 }
 0x3c0   : > { %4460 = vmatmul.f32.gmra.mxu3 %v9357_v20  ;;  %4564 = vmatpush.msrb.mxu2 %v4302_v43  ;;  %v3617_v33 = vadd.f32 %v9227_v11, %v3543_v55  ;;  %v4303_v6 = vld [vmem:[#allocation5 + $0x2d8] sm:$0xff] }
 0x3c1   : > { %v9312_v16 = vpop.f32.mrf.mxu1  ;;  %v9314_v35 = vpop.f32.mrf.mxu0  ;;  %4643 = vmatpush.msra.mxu0 %v4315_v13  ;;  %v4223_v11 = vld [vmem:[#allocation5 + $0x58] sm:$0xff] }
 0x3c2   : > { %v9321_v9 = vpop.f32.mrf.mxu3  ;;  %4565 = vmatpush.msrb.mxu2 %v4298_v54  ;;  %v3691_v61 = vadd.f32 %v9296_v4, %v3617_v33  ;;  %v4226_v4 = vld [vmem:[#allocation5 + $0x70] sm:$0xff]  ;;  %v10966_v55 = vld [vmem:[#allocation23_spill] sm:$0xff] }
 0x3c3   : > { %v4218_v33 = vld [vmem:[#allocation5 + $0x30] sm:$0xff] }
 0x3c4   : > { %4375 = vmatmul.f32.gmra.mxu1 %v9341_v44 }
 0x3c6   : > { %v9339_v28 = vpop.f32.mrf.mxu2 }
 0x3c9   : > { %v9331_v10 = vpop.f32.mrf.mxu1  ;;  %v9333_v18 = vpop.f32.mrf.mxu0 }
 0x3ca   : > { %v9348_v37 = vpop.f32.mrf.mxu3 }
 0x3cc   : > { %4378 = vmatmul.f32.gmra.mxu1 %v9357_v20 }
 0x3ce   : > { %v9365_v53 = vpop.f32.mrf.mxu2 }
 0x3d1   : > { %v3958_v31 = vpop.f32.mrf.mxu1  ;;  %v4180_v12 = vpop.f32.mrf.mxu0 }
 0x3d2   : > { %v3982_v27 = vadd.f32 %v3958_v31, %v3908_v21  ;;  %v9371_v48 = vpop.f32.mrf.mxu3 }
 0x3d4   : > { %v4056_v50 = vadd.f32 %v9318_v22, %v3982_v27  ;;  %v4250_v22 = vld [vmem:[#allocation5 + $0x130] sm:$0xff]  ;;  %v9380_v27 = vld [vmem:[#allocation2 + $0x83] sm:$0xff] }
 0x3d5   : > { %4520 = vmatpush.msra.mxu1 %v4250_v22  ;;  %4463 = vmatmul.f32.gmra.mxu3 %v9380_v27  ;;  %v3837_v22 = vadd.f32 %v9265_v26, %v3763_v1  ;;  %v10962_v1 = vld [vmem:[#allocation26_spill] sm:$0xff] }
 0x3d6   : > { %v4130_v7 = vadd.f32 %v9321_v9, %v4056_v50  ;;  %v3468_v9 = vadd.f32 %v9199_v40, %v3394_v63  ;;  %v4247_v40 = vld [vmem:[#allocation5 + $0x118] sm:$0xff]  ;;  %v4041_v24 = vpop.f32.mrf.mxu2  ;;  %4381 = vmatmul.f32.gmra.mxu1 %v9380_v27 }
 0x3d7   : > { %4521 = vmatpush.msra.mxu1 %v4246_v59  ;;  %4603 = vmatpush.msrb.mxu3 %v4247_v40  ;;  %v4231_v59 = vld [vmem:[#allocation5 + $0x98] sm:$0xff] }
 0x3d8   : > { %v9369_v21 = vadd.f32 %v4180_v12, %v4130_v7  ;;  %v3836_v12 = vadd.f32 %v9257_v36, %v3762_v51  ;;  %v3542_v0 = vadd.f32 %v9201_v17, %v3468_v9  ;;  %v9399_v51 = vld [vmem:[#allocation2 + $0x93] sm:$0xff] }
 0x3d9   : > { %v3961_v46 = vpop.f32.mrf.mxu1  ;;  %v4183_v19 = vpop.f32.mrf.mxu0  ;;  %4522 = vmatpush.msra.mxu1 %v4242_v47  ;;  %4604 = vmatpush.msrb.mxu3 %v4243_v25  ;;  %v10960_v47 = vld [vmem:[#allocation22_spill] sm:$0xff] }
 0x3da   : > { %v3983_v31 = vadd.f32 %v3961_v46, %v3909_v56  ;;  %4407 = vmatmul.f32.vlgmr.msra.gmra.mxu2 %v9369_v21  ;;  %4489 = vmatmul.f32.vlgmr.msrb.gmra.mxu0 %v9369_v21  ;;  %v3616_v57 = vadd.f32 %v9217_v32, %v3542_v0  ;;  %v4115_v7 = vpop.f32.mrf.mxu3  ;;  %v4311_v32 = vld [vmem:[#allocation5 + $0x318] sm:$0xff]  ;;  %v4294_v46 = vld [vmem:[#allocation5 + $0x290] sm:$0xff]  ;;  %v3544_v43 = vadd.f32 %v10960_v47, %v3470_v45 }
 0x3db   : > { %4605 = vmatpush.msrb.mxu3 %v4239_v23  ;;  %4644 = vmatpush.msra.mxu0 %v4311_v32  ;;  %v10965_v23 = vld [vmem:[#allocation25_spill] sm:$0xff] }
 0x3dc   : > { %v4057_v34 = vadd.f32 %v9339_v28, %v3983_v31  ;;  %v3910_v28 = vadd.f32 %v9269_v38, %v3836_v12  ;;  %v4238_v38 = vld [vmem:[#allocation5 + $0xd0] sm:$0xff]  ;;  %v3690_v58 = vadd.f32 %v9283_v42, %v3616_v57  ;;  %4566 = vmatpush.msrb.mxu2 %v4294_v46  ;;  %v4307_v31 = vld [vmem:[#allocation5 + $0x2f8] sm:$0xff]  ;;  %v3618_v32 = vadd.f32 %v10965_v23, %v3544_v43 }
 0x3dd   : > { %4523 = vmatpush.msra.mxu1 %v4238_v38  ;;  %4466 = vmatmul.f32.gmra.mxu3 %v9399_v51  ;;  %v4234_v42 = vld [vmem:[#allocation5 + $0xb0] sm:$0xff]  ;;  %v10963_v57 = vld [vmem:[#allocation31_spill] sm:$0xff] }
 0x3de   : > { %v4131_v36 = vadd.f32 %v9348_v37, %v4057_v34  ;;  %v3764_v41 = vadd.f32 %v9271_v15, %v3690_v58  ;;  %4645 = vmatpush.msra.mxu0 %v4307_v31  ;;  %v4290_v12 = vld [vmem:[#allocation5 + $0x270] sm:$0xff]  ;;  %v4227_v15 = vld [vmem:[#allocation5 + $0x78] sm:$0xff]  ;;  %v4044_v29 = vpop.f32.mrf.mxu2  ;;  %v10959_v34 = vld [vmem:[#allocation28_spill] sm:$0xff]  ;;  %4384 = vmatmul.f32.gmra.mxu1 %v9399_v51 }
 0x3df   : > { %4524 = vmatpush.msra.mxu1 %v4234_v42  ;;  %4567 = vmatpush.msrb.mxu2 %v4290_v12  ;;  %v4295_v58 = vld [vmem:[#allocation5 + $0x298] sm:$0xff]  ;;  %v4222_v42 = vld [vmem:[#allocation5 + $0x50] sm:$0xff] }
 0x3e0   : > { %v9390_v50 = vadd.f32 %v4183_v19, %v4131_v36  ;;  %v3911_v19 = vadd.f32 %v9277_v62, %v3837_v22  ;;  %v4230_v62 = vld [vmem:[#allocation5 + $0x90] sm:$0xff]  ;;  %v3838_v40 = vadd.f32 %v10959_v34, %v3764_v41  ;;  %4646 = vmatpush.msra.mxu0 %v4303_v6  ;;  %v4215_v22 = vld [vmem:[#allocation5 + $0x18] sm:$0xff] }
 0x3e1   : > { %v3964_v63 = vpop.f32.mrf.mxu1  ;;  %v4186_v17 = vpop.f32.mrf.mxu0  ;;  %4525 = vmatpush.msra.mxu1 %v4230_v62  ;;  %v4282_v46 = vld [vmem:[#allocation5 + $0x230] sm:$0xff]  ;;  %v4279_v6 = vld [vmem:[#allocation5 + $0x218] sm:$0xff] }
 0x3e2   : > { %v3984_v37 = vadd.f32 %v3964_v63, %v3910_v28  ;;  %4410 = vmatmul.f32.gmra.mxu2 %v9390_v50  ;;  %4492 = vmatmul.f32.gmra.mxu0 %v9390_v50  ;;  %v4118_v36 = vpop.f32.mrf.mxu3  ;;  %v10961_v28 = vld [vmem:[#allocation21_spill] sm:$0xff]  ;;  %v4219_v63 = vld [vmem:[#allocation5 + $0x38] sm:$0xff]  ;;  %v3912_v14 = vadd.f32 %v10963_v57, %v3838_v40 }
 0x3e3   : > { %v3397_v25 = vadd.f32 %v10962_v1, %v10961_v28  ;;  %4526 = vmatpush.msra.mxu1 %v4226_v4  ;;  %v10967_v41 = vld [vmem:[#allocation30_spill] sm:$0xff]  ;;  %v10971_v1 = vld [vmem:[#allocation33_spill] sm:$0xff] }
 0x3e4   : > { %v4058_v56 = vadd.f32 %v9365_v53, %v3984_v37  ;;  %v4235_v53 = vld [vmem:[#allocation5 + $0xb8] sm:$0xff]  ;;  %v10964_v37 = vld [vmem:[#allocation29_spill] sm:$0xff] }
 0x3e5   : > { %4606 = vmatpush.msrb.mxu3 %v4235_v53  ;;  %v3765_v38 = vadd.f32 %v10964_v37, %v3691_v61  ;;  %v3471_v30 = vadd.f32 %v10966_v55, %v3397_v25  ;;  %v4291_v53 = vld [vmem:[#allocation5 + $0x278] sm:$0xff]  ;;  %4527 = vmatpush.msra.mxu1 %v4222_v42  ;;  %v4214_v34 = vld [vmem:[#allocation5 + $0x10] sm:$0xff] }
 0x3e6   : > { %v4132_v26 = vadd.f32 %v9371_v48, %v4058_v56  ;;  %4469 = vmatmul.f32.gmra.mxu3 %v9417_v2  ;;  %v4047_v45 = vpop.f32.mrf.mxu2  ;;  %4387 = vmatmul.f32.gmra.mxu1 %v9417_v2 }
 0x3e7   : > { %4607 = vmatpush.msrb.mxu3 %v4231_v59  ;;  %v3839_v31 = vadd.f32 %v10967_v41, %v3765_v38  ;;  %v3692_v59 = vadd.f32 %v9312_v16, %v3618_v32  ;;  %4528 = vmatpush.msra.mxu1 %v4218_v33  ;;  %v4730_v41 = vld [vmem:[#allocation11 + $0x1a0] sm:$0xff] }
 0x3e8   : > { %v9409_v9 = vadd.f32 %v4186_v17, %v4132_v26  ;;  %v4299_v17 = vld [vmem:[#allocation5 + $0x2b8] sm:$0xff]  ;;  %v4770_v33 = vld [vmem:[#allocation11 + $0x2e0] sm:$0xff] }
 0x3e9   : > { %v3967_v52 = vpop.f32.mrf.mxu1  ;;  %v4189_v49 = vpop.f32.mrf.mxu0  ;;  %4608 = vmatpush.msrb.mxu3 %v4227_v15  ;;  %4647 = vmatpush.msra.mxu0 %v4299_v17  ;;  %v4283_v15 = vld [vmem:[#allocation5 + $0x238] sm:$0xff]  ;;  %v3913_v16 = vadd.f32 %v9298_v39, %v3839_v31  ;;  %v4782_v31 = vld [vmem:[#allocation11 + $0x340] sm:$0xff] }
 0x3ea   : > { %v3985_v48 = vadd.f32 %v3967_v52, %v3911_v19  ;;  %4413 = vmatmul.f32.gmra.mxu2 %v9409_v9  ;;  %4495 = vmatmul.f32.gmra.mxu0 %v9409_v9  ;;  %v4278_v19 = vld [vmem:[#allocation5 + $0x210] sm:$0xff]  ;;  %v4121_v40 = vpop.f32.mrf.mxu3 }
 0x3eb   : > { %4609 = vmatpush.msrb.mxu3 %v4223_v11  ;;  %4648 = vmatpush.msra.mxu0 %v4295_v58 }
 0x3ec   : > { %v4059_v0 = vadd.f32 %v4041_v24, %v3985_v48  ;;  %v4286_v24 = vld [vmem:[#allocation5 + $0x250] sm:$0xff]  ;;  %v10968_v48 = vld [vmem:[#allocation24_spill] sm:$0xff]  ;;  %4529 = vmatpush.msra.mxu1 %v4214_v34 }
 0x3ed   : > { %4568 = vmatpush.msrb.mxu2 %v4286_v24  ;;  %4610 = vmatpush.msrb.mxu3 %v4219_v63  ;;  %v3545_v62 = vadd.f32 %v10968_v48, %v3471_v30  ;;  %v4766_v48 = vld [vmem:[#allocation11 + $0x2c0] sm:$0xff] }
 0x3ee   : > { %v4133_v13 = vadd.f32 %v4115_v7, %v4059_v0  ;;  %4649 = vmatpush.msra.mxu0 %v4291_v53  ;;  %4530 = vmatmul.f32.vlgmr.msra.gmra.mxu1 %v9291_v5  ;;  %v4050_v24 = vpop.f32.mrf.mxu2  ;;  %v4738_v53 = vld [vmem:[#allocation11 + $0x1e0] sm:$0xff] }
 0x3ef   : > { %4611 = vmatpush.msrb.mxu3 %v4215_v22  ;;  %4569 = vmatpush.msrb.mxu2 %v4282_v46  ;;  %v10972_v22 = vld [vmem:[#allocation34_spill] sm:$0xff]  ;;  %v4798_v46 = vld [vmem:[#allocation11 + $0x3c0] sm:$0xff] }
 0x3f0   : > { %v9426_v54 = vadd.f32 %v4189_v49, %v4133_v13  ;;  %v4287_v49 = vld [vmem:[#allocation5 + $0x258] sm:$0xff]  ;;  %4612 = vmatmul.f32.vlgmr.msrb.gmra.mxu3 %v9291_v5  ;;  %4934 = vmatpush.msrb.mxu1 %v4738_v53  ;;  %v4754_v34 = vld [vmem:[#allocation11 + $0x260] sm:$0xff] }
 0x3f1   : > { %v3970_v56 = vpop.f32.mrf.mxu1  ;;  %v4192_v7 = vpop.f32.mrf.mxu0  ;;  %4570 = vmatpush.msrb.mxu2 %v4278_v19  ;;  %4650 = vmatpush.msra.mxu0 %v4287_v49  ;;  %v4794_v19 = vld [vmem:[#allocation11 + $0x3a0] sm:$0xff] }
 0x3f2   : > { %v3986_v26 = vadd.f32 %v3970_v56, %v3912_v14  ;;  %4416 = vmatmul.f32.gmra.mxu2 %v9426_v54  ;;  %4498 = vmatmul.f32.gmra.mxu0 %v9426_v54  ;;  %v4124_v37 = vpop.f32.mrf.mxu3  ;;  %v4774_v49 = vld [vmem:[#allocation11 + $0x300] sm:$0xff] }
 0x3f3   : > { %4651 = vmatpush.msra.mxu0 %v4283_v15  ;;  %v4758_v15 = vld [vmem:[#allocation11 + $0x280] sm:$0xff] }
 0x3f4   : > { %v4060_v52 = vadd.f32 %v4044_v29, %v3986_v26  ;;  %v10969_v29 = vld [vmem:[#allocation32_spill] sm:$0xff] }
 0x3f5   : > { %v3766_v61 = vadd.f32 %v10969_v29, %v3692_v59  ;;  %4652 = vmatpush.msra.mxu0 %v4279_v6  ;;  %v4726_v59 = vld [vmem:[#allocation11 + $0x180] sm:$0xff] }
 0x3f6   : > { %v4134_v12 = vadd.f32 %v4118_v36, %v4060_v52  ;;  %v10970_v36 = vld [vmem:[#allocation27_spill] sm:$0xff]  ;;  %4533 = vmatmul.f32.gmra.mxu1 %v9305_v8  ;;  %v4053_v23 = vpop.f32.mrf.mxu2  ;;  %v4778_v52 = vld [vmem:[#allocation11 + $0x320] sm:$0xff] }
 0x3f7   : > { %v3619_v43 = vadd.f32 %v10970_v36, %v3545_v62  ;;  %v3840_v25 = vadd.f32 %v10971_v1, %v3766_v61  ;;  %v4710_v62 = vld [vmem:[#allocation11 + $0x100] sm:$0xff] }
 0x3f8   : > { %v9439_v0 = vadd.f32 %v4192_v7, %v4134_v12  ;;  %4615 = vmatmul.f32.gmra.mxu3 %v9305_v8  ;;  %v4706_v12 = vld [vmem:[#allocation11 + $0xe0] sm:$0xff] }
 0x3f9   : > { %v3973_v11 = vpop.f32.mrf.mxu1  ;;  %v4195_v47 = vpop.f32.mrf.mxu0  ;;  %v3693_v39 = vadd.f32 %v9331_v10, %v3619_v43  ;;  %v3914_v63 = vadd.f32 %v9314_v35, %v3840_v25  ;;  %v4694_v29 = vld [vmem:[#allocation11 + $0x80] sm:$0xff] }
 0x3fa   : > { %v3987_v28 = vadd.f32 %v3973_v11, %v3913_v16  ;;  %4419 = vmatmul.f32.gmra.mxu2 %v9439_v0  ;;  %4501 = vmatmul.f32.gmra.mxu0 %v9439_v0  ;;  %v4127_v55 = vpop.f32.mrf.mxu3  ;;  %v4750_v16 = vld [vmem:[#allocation11 + $0x240] sm:$0xff] }
 0x3fb   : > { %v3767_v17 = vadd.f32 %v9301_v3, %v3693_v39  ;;  %v4746_v61 = vld [vmem:[#allocation11 + $0x220] sm:$0xff] }
 0x3fc   : > { %v4061_v13 = vadd.f32 %v4047_v45, %v3987_v28  ;;  %v4714_v45 = vld [vmem:[#allocation11 + $0x120] sm:$0xff] }
 0x3fd   : > { %v3841_v58 = vadd.f32 %v10972_v22, %v3767_v17  ;;  %v4742_v11 = vld [vmem:[#allocation11 + $0x200] sm:$0xff] }
 0x3fe   : > { %v4135_v4 = vadd.f32 %v4121_v40, %v4061_v13  ;;  %4536 = vmatmul.f32.gmra.mxu1 %v9323_v60  ;;  %v4698_v40 = vld [vmem:[#allocation11 + $0xa0] sm:$0xff] }
 0x3ff   : > { %v3915_v3 = vadd.f32 %v9333_v18, %v3841_v58  ;;  %v4802_v18 = vld [vmem:[#allocation11 + $0x3e0] sm:$0xff] }
 0x400   : > { %v9450_v57 = vadd.f32 %v4195_v47, %v4135_v4  ;;  %4618 = vmatmul.f32.gmra.mxu3 %v9323_v60  ;;  %4975 = vmatpush.msra.mxu2 %v4802_v18  ;;  %v4790_v60 = vld [vmem:[#allocation11 + $0x380] sm:$0xff]  ;;  %v4799_v18 = vld [vmem:[#allocation11 + $0x3c8] sm:$0xff] }
 0x401   : > { %v3976_v14 = vpop.f32.mrf.mxu1  ;;  %v4198_v10 = vpop.f32.mrf.mxu0  ;;  %v4686_v47 = vld [vmem:[#allocation11 + $0x40] sm:$0xff] }
 0x402   : > { %v3988_v38 = vadd.f32 %v3976_v14, %v3914_v63  ;;  %4422 = vmatmul.f32.gmra.mxu2 %v9450_v57  ;;  %4504 = vmatmul.f32.gmra.mxu0 %v9450_v57  ;;  %v4682_v36 = vld [vmem:[#allocation11 + $0x20] sm:$0xff]  ;;  %v9495_v63 = vld [vmem:[#allocation7] sm:$0xf] }
 0x403   : > { %4976 = vmatpush.msra.mxu2 %v4798_v46  ;;  %v4678_v43 = vld [vmem:[#allocation11] sm:$0xff] }
 0x404   : > { %v4062_v56 = vadd.f32 %v4050_v24, %v3988_v38  ;;  %v4866_v1 = vld [vmem:[#allocation11 + $0x5e0] sm:$0xff] }
 0x405   : > { %4977 = vmatpush.msra.mxu2 %v4794_v19  ;;  %5016 = vmatpush.msra.mxu3 %v4866_v1  ;;  %v4858_v39 = vld [vmem:[#allocation11 + $0x5a0] sm:$0xff]  ;;  %v4795_v19 = vld [vmem:[#allocation11 + $0x3a8] sm:$0xff] }
 0x406   : > { %v4136_v5 = vadd.f32 %v4124_v37, %v4062_v56  ;;  %4539 = vmatmul.f32.gmra.mxu1 %v9341_v44  ;;  %v4930_v13 = vld [vmem:[#allocation11 + $0x7e0] sm:$0xff]  ;;  %v9508_v56 = vperm.slane %v9495_v63, 0 }
 0x407   : > { %4978 = vmatpush.msra.mxu2 %v4790_v60  ;;  %5057 = vmatpush.msrb.mxu0 %v4930_v13  ;;  %v4854_v4 = vld [vmem:[#allocation11 + $0x580] sm:$0xff] }
 0x408   : > { %v9458_v35 = vadd.f32 %v4198_v10, %v4136_v5  ;;  %4621 = vmatmul.f32.gmra.mxu3 %v9341_v44  ;;  %v4734_v44 = vld [vmem:[#allocation11 + $0x1c0] sm:$0xff] }
 0x409   : > { %v3979_v7 = vpop.f32.mrf.mxu1  ;;  %v4201_v26 = vpop.f32.mrf.mxu0  ;;  %4935 = vmatpush.msrb.mxu1 %v4734_v44  ;;  %v4926_v24 = vld [vmem:[#allocation11 + $0x7c0] sm:$0xff] }
 0x40a   : > { %v3989_v32 = vadd.f32 %v3979_v7, %v3915_v3  ;;  %4425 = vmatmul.f32.gmra.mxu2 %v9458_v35  ;;  %4507 = vmatmul.f32.gmra.mxu0 %v9458_v35  ;;  %v4850_v14 = vld [vmem:[#allocation11 + $0x560] sm:$0xff] }
 0x40b   : > { %4936 = vmatpush.msrb.mxu1 %v4730_v41  ;;  %5058 = vmatpush.msrb.mxu0 %v4926_v24  ;;  %v4922_v37 = vld [vmem:[#allocation11 + $0x7a0] sm:$0xff]  ;;  %v4711_v24 = vld [vmem:[#allocation11 + $0x108] sm:$0xff] }
 0x40c   : > { %v4063_v30 = vadd.f32 %v4053_v23, %v3989_v32  ;;  %v4846_v10 = vld [vmem:[#allocation11 + $0x540] sm:$0xff] }
 0x40d   : > { %4937 = vmatpush.msrb.mxu1 %v4726_v59  ;;  %5059 = vmatpush.msrb.mxu0 %v4922_v37  ;;  %v4918_v22 = vld [vmem:[#allocation11 + $0x780] sm:$0xff]  ;;  %v4763_v37 = vld [vmem:[#allocation11 + $0x2a8] sm:$0xff] }
 0x40e   : > { %v4137_v42 = vadd.f32 %v4127_v55, %v4063_v30  ;;  %4542 = vmatmul.f32.gmra.mxu1 %v9357_v20  ;;  %v4842_v7 = vld [vmem:[#allocation11 + $0x520] sm:$0xff]  ;;  %v4803_v55 = vld [vmem:[#allocation11 + $0x3e8] sm:$0xff] }
 0x40f   : > { %5060 = vmatpush.msrb.mxu0 %v4918_v22  ;;  %v4914_v23 = vld [vmem:[#allocation11 + $0x760] sm:$0xff] }
 0x410   : > { %v9464_v8 = vadd.f32 %v4201_v26, %v4137_v42  ;;  %4624 = vmatmul.f32.gmra.mxu3 %v9357_v20  ;;  %v4722_v20 = vld [vmem:[#allocation11 + $0x160] sm:$0xff] }
 0x411   : > { %4938 = vmatpush.msrb.mxu1 %v4722_v20  ;;  %5061 = vmatpush.msrb.mxu0 %v4914_v23  ;;  %v4838_v30 = vld [vmem:[#allocation11 + $0x500] sm:$0xff] }
 0x412   : > { %4428 = vmatmul.f32.gmra.mxu2 %v9464_v8  ;;  %4510 = vmatmul.f32.gmra.mxu0 %v9464_v8  ;;  %v4910_v26 = vld [vmem:[#allocation11 + $0x740] sm:$0xff] }
 0x413   : > { %5062 = vmatpush.msrb.mxu0 %v4910_v26  ;;  %v4906_v41 = vld [vmem:[#allocation11 + $0x720] sm:$0xff]  ;;  %v4755_v26 = vld [vmem:[#allocation11 + $0x268] sm:$0xff] }
 0x414   : > { %v4894_v1 = vld [vmem:[#allocation11 + $0x6c0] sm:$0xff] }
 0x415   : > { %5063 = vmatpush.msrb.mxu0 %v4906_v41  ;;  %v4886_v22 = vld [vmem:[#allocation11 + $0x680] sm:$0xff]  ;;  %v4695_v41 = vld [vmem:[#allocation11 + $0x88] sm:$0xff] }
 0x416   : > { %4545 = vmatmul.f32.gmra.mxu1 %v9380_v27  ;;  %v4882_v23 = vld [vmem:[#allocation11 + $0x660] sm:$0xff] }
 0x418   : > { %4627 = vmatmul.f32.gmra.mxu3 %v9380_v27  ;;  %v4762_v27 = vld [vmem:[#allocation11 + $0x2a0] sm:$0xff] }
 0x41a   : > { %4571 = vmatmul.f32.vlgmr.msrb.gmra.mxu2 %v9369_v21  ;;  %4653 = vmatmul.f32.vlgmr.msra.gmra.mxu0 %v9369_v21  ;;  %v4786_v21 = vld [vmem:[#allocation11 + $0x360] sm:$0xff] }
 0x41b   : > { %4979 = vmatpush.msra.mxu2 %v4786_v21  ;;  %v4834_v21 = vld [vmem:[#allocation11 + $0x4e0] sm:$0xff] }
 0x41d   : > { %4980 = vmatpush.msra.mxu2 %v4782_v31  ;;  %v4739_v31 = vld [vmem:[#allocation11 + $0x1e8] sm:$0xff] }
 0x41e   : > { %4548 = vmatmul.f32.gmra.mxu1 %v9399_v51 }
 0x41f   : > { %4981 = vmatpush.msra.mxu2 %v4778_v52  ;;  %v4791_v52 = vld [vmem:[#allocation11 + $0x388] sm:$0xff] }
 0x420   : > { %4630 = vmatmul.f32.gmra.mxu3 %v9399_v51  ;;  %v4690_v51 = vld [vmem:[#allocation11 + $0x60] sm:$0xff] }
 0x421   : > { %4982 = vmatpush.msra.mxu2 %v4774_v49  ;;  %v4735_v49 = vld [vmem:[#allocation11 + $0x1c8] sm:$0xff] }
 0x422   : > { %4574 = vmatmul.f32.gmra.mxu2 %v9390_v50  ;;  %4656 = vmatmul.f32.gmra.mxu0 %v9390_v50  ;;  %v4718_v50 = vld [vmem:[#allocation11 + $0x140] sm:$0xff] }
 0x423   : > { %4939 = vmatpush.msrb.mxu1 %v4718_v50  ;;  %4983 = vmatpush.msra.mxu2 %v4770_v33  ;;  %v4449_v6 = vpop.f32.mrf.mxu3  ;;  %v4787_v50 = vld [vmem:[#allocation11 + $0x368] sm:$0xff]  ;;  %v4830_v33 = vld [vmem:[#allocation11 + $0x4c0] sm:$0xff] }
 0x425   : > { %4940 = vmatpush.msrb.mxu1 %v4714_v45  ;;  %4984 = vmatpush.msra.mxu2 %v4766_v48  ;;  %v4902_v45 = vld [vmem:[#allocation11 + $0x700] sm:$0xff] }
 0x426   : > { %4551 = vmatmul.f32.gmra.mxu1 %v9417_v2  ;;  %5064 = vmatpush.msrb.mxu0 %v4902_v45 }
 0x427   : > { %4941 = vmatpush.msrb.mxu1 %v4710_v62  ;;  %4985 = vmatpush.msra.mxu2 %v4762_v27  ;;  %v4731_v62 = vld [vmem:[#allocation11 + $0x1a8] sm:$0xff] }
 0x428   : > { %4633 = vmatmul.f32.gmra.mxu3 %v9417_v2  ;;  %v4862_v2 = vld [vmem:[#allocation11 + $0x5c0] sm:$0xff]  ;;  %v4783_v27 = vld [vmem:[#allocation11 + $0x348] sm:$0xff] }
 0x429   : > { %4942 = vmatpush.msrb.mxu1 %v4706_v12  ;;  %4986 = vmatpush.msra.mxu2 %v4758_v15 }
 0x42a   : > { %4577 = vmatmul.f32.gmra.mxu2 %v9409_v9  ;;  %4659 = vmatmul.f32.gmra.mxu0 %v9409_v9  ;;  %v4702_v9 = vld [vmem:[#allocation11 + $0xc0] sm:$0xff] }
 0x42b   : > { %4943 = vmatpush.msrb.mxu1 %v4702_v9  ;;  %4987 = vmatpush.msra.mxu2 %v4754_v34  ;;  %v4452_v28 = vpop.f32.mrf.mxu3  ;;  %v4727_v34 = vld [vmem:[#allocation11 + $0x188] sm:$0xff] }
 0x42c   : > { %5017 = vmatpush.msra.mxu3 %v4862_v2 }
 0x42d   : > { %4944 = vmatpush.msrb.mxu1 %v4698_v40  ;;  %4988 = vmatpush.msra.mxu2 %v4750_v16  ;;  %v4779_v40 = vld [vmem:[#allocation11 + $0x328] sm:$0xff] }
 0x42e   : > { %5018 = vmatpush.msra.mxu3 %v4858_v39  ;;  %v4767_v39 = vld [vmem:[#allocation11 + $0x2c8] sm:$0xff] }
 0x42f   : > { %4945 = vmatpush.msrb.mxu1 %v4694_v29  ;;  %4989 = vmatpush.msra.mxu2 %v4746_v61  ;;  %v4826_v61 = vld [vmem:[#allocation11 + $0x4a0] sm:$0xff] }
 0x430   : > { %5019 = vmatpush.msra.mxu3 %v4854_v4  ;;  %v4890_v4 = vld [vmem:[#allocation11 + $0x6a0] sm:$0xff] }
 0x431   : > { %4946 = vmatpush.msrb.mxu1 %v4690_v51  ;;  %4990 = vmatpush.msra.mxu2 %v4742_v11  ;;  %v4723_v51 = vld [vmem:[#allocation11 + $0x168] sm:$0xff] }
 0x432   : > { %4580 = vmatmul.f32.gmra.mxu2 %v9426_v54  ;;  %4662 = vmatmul.f32.gmra.mxu0 %v9426_v54  ;;  %v4367_v54 = vpop.f32.mrf.mxu1  ;;  %v4775_v11 = vld [vmem:[#allocation11 + $0x308] sm:$0xff] }
 0x433   : > { %4947 = vmatpush.msrb.mxu1 %v4686_v47  ;;  %5020 = vmatpush.msra.mxu3 %v4850_v14  ;;  %v4368_v32 = vadd.f32 %v4367_v54, %v9508_v56  ;;  %v4719_v47 = vld [vmem:[#allocation11 + $0x148] sm:$0xff] }
 0x434   : > { %5139 = vmatpush.msrb.mxu2 %v4803_v55  ;;  %v4814_v55 = vld [vmem:[#allocation11 + $0x440] sm:$0xff] }
 0x435   : > { %4948 = vmatpush.msrb.mxu1 %v4682_v36  ;;  %5021 = vmatpush.msra.mxu3 %v4846_v10  ;;  %v4822_v36 = vld [vmem:[#allocation11 + $0x480] sm:$0xff] }
 0x436   : > { %5140 = vmatpush.msrb.mxu2 %v4799_v18  ;;  %v4699_v18 = vld [vmem:[#allocation11 + $0xa8] sm:$0xff] }
 0x437   : > { %4949 = vmatpush.msrb.mxu1 %v4678_v43  ;;  %5022 = vmatpush.msra.mxu3 %v4842_v7  ;;  %v4759_v7 = vld [vmem:[#allocation11 + $0x288] sm:$0xff] }
 0x438   : > { %5141 = vmatpush.msrb.mxu2 %v4795_v19 }
 0x439   : > { %5023 = vmatpush.msra.mxu3 %v4838_v30  ;;  %5098 = vmatpush.msra.mxu1 %v4739_v31 }
 0x43a   : > { %4583 = vmatmul.f32.gmra.mxu2 %v9439_v0  ;;  %4665 = vmatmul.f32.gmra.mxu0 %v9439_v0  ;;  %v9489_v25 = vpop.f32.mrf.mxu1  ;;  %v9491_v0 = vpop.f32.mrf.mxu3 }
 0x43b   : > { %5024 = vmatpush.msra.mxu3 %v4834_v21  ;;  %v4371_v20 = vadd.f32 %v9489_v25, %v9508_v56  ;;  %5142 = vmatpush.msrb.mxu2 %v4791_v52  ;;  %v4715_v25 = vld [vmem:[#allocation11 + $0x128] sm:$0xff]  ;;  %v4874_v21 = vld [vmem:[#allocation11 + $0x620] sm:$0xff] }
 0x43c   : > { %5099 = vmatpush.msra.mxu1 %v4735_v49  ;;  %v4747_v52 = vld [vmem:[#allocation11 + $0x228] sm:$0xff]  ;;  %v4870_v49 = vld [vmem:[#allocation11 + $0x600] sm:$0xff] }
 0x43d   : > { %5025 = vmatpush.msra.mxu3 %v4830_v33  ;;  %5143 = vmatpush.msrb.mxu2 %v4787_v50  ;;  %v4691_v33 = vld [vmem:[#allocation11 + $0x68] sm:$0xff] }
 0x43e   : > { %5100 = vmatpush.msra.mxu1 %v4731_v62  ;;  %v4806_v62 = vld [vmem:[#allocation11 + $0x400] sm:$0xff] }
 0x43f   : > { %5144 = vmatpush.msrb.mxu2 %v4783_v27  ;;  %5026 = vmatpush.msra.mxu3 %v4826_v61  ;;  %v4687_v27 = vld [vmem:[#allocation11 + $0x48] sm:$0xff] }
 0x440   : > { %5101 = vmatpush.msra.mxu1 %v4727_v34 }
 0x441   : > { %5145 = vmatpush.msrb.mxu2 %v4779_v40  ;;  %5027 = vmatpush.msra.mxu3 %v4822_v36 }
 0x442   : > { %4586 = vmatmul.f32.gmra.mxu2 %v9450_v57  ;;  %4668 = vmatmul.f32.gmra.mxu0 %v9450_v57  ;;  %v9497_v17 = vpop.f32.mrf.mxu1  ;;  %v9500_v57 = vperm.slane %v9495_v63, 1  ;;  %v9502_v38 = vpop.f32.mrf.mxu3 }
 0x443   : > { %v4374_v54 = vadd.f32 %v9497_v17, %v9508_v56  ;;  %5102 = vmatpush.msra.mxu1 %v4723_v51  ;;  %5146 = vmatpush.msrb.mxu2 %v4775_v11  ;;  %v4679_v51 = vld [vmem:[#allocation11 + $0x8] sm:$0xff] }
 0x444   : > { %v4450_v58 = vadd.f32 %v4449_v6, %v9500_v57  ;;  %v4456_v48 = vadd.f32 %v9491_v0, %v9500_v57  ;;  %v4898_v6 = vld [vmem:[#allocation11 + $0x6e0] sm:$0xff]  ;;  %v4459_v2 = vadd.f32 %v9502_v38, %v9500_v57  ;;  %v4867_v11 = vld [vmem:[#allocation11 + $0x5e8] sm:$0xff] }
 0x445   : > { %5065 = vmatpush.msrb.mxu0 %v4898_v6  ;;  %5103 = vmatpush.msra.mxu1 %v4719_v47  ;;  %v4818_v38 = vld [vmem:[#allocation11 + $0x460] sm:$0xff] }
 0x446   : > { %5028 = vmatpush.msra.mxu3 %v4818_v38 }
 0x447   : > { %5066 = vmatpush.msrb.mxu0 %v4894_v1  ;;  %5104 = vmatpush.msra.mxu1 %v4715_v25 }
 0x448   : > { %5029 = vmatpush.msra.mxu3 %v4814_v55  ;;  %v4847_v55 = vld [vmem:[#allocation11 + $0x548] sm:$0xff] }
 0x449   : > { %5067 = vmatpush.msrb.mxu0 %v4890_v4  ;;  %5105 = vmatpush.msra.mxu1 %v4711_v24  ;;  %v4855_v24 = vld [vmem:[#allocation11 + $0x588] sm:$0xff] }
 0x44a   : > { %4589 = vmatmul.f32.gmra.mxu2 %v9458_v35  ;;  %4671 = vmatmul.f32.gmra.mxu0 %v9458_v35  ;;  %v9510_v3 = vpop.f32.mrf.mxu1  ;;  %v9516_v42 = vpop.f32.mrf.mxu3 }
 0x44b   : > { %5068 = vmatpush.msrb.mxu0 %v4886_v22  ;;  %v4462_v30 = vadd.f32 %v9516_v42, %v9500_v57 }
 0x44d   : > { %5069 = vmatpush.msrb.mxu0 %v4882_v23  ;;  %v4851_v23 = vld [vmem:[#allocation11 + $0x568] sm:$0xff] }
 0x452   : > { %4592 = vmatmul.f32.gmra.mxu2 %v9464_v8  ;;  %4674 = vmatmul.f32.gmra.mxu0 %v9464_v8  ;;  %v4453_v8 = vadd.f32 %v4452_v28, %v9500_v57  ;;  %v9524_v59 = vpop.f32.mrf.mxu1  ;;  %v4771_v28 = vld [vmem:[#allocation11 + $0x2e8] sm:$0xff] }
 0x453   : > { %5147 = vmatpush.msrb.mxu2 %v4771_v28  ;;  %v4380_v45 = vadd.f32 %v9524_v59, %v9508_v56 }
 0x455   : > { %5148 = vmatpush.msrb.mxu2 %v4767_v39  ;;  %v4931_v39 = vld [vmem:[#allocation11 + $0x7e8] sm:$0xff] }
 0x457   : > { %v4490_v5 = vpop.f32.mrf.mxu0  ;;  %5149 = vmatpush.msrb.mxu2 %v4763_v37 }
 0x458   : > { %v9512_v35 = vadd.f32 %v4490_v5, %v4450_v58  ;;  %v9531_v15 = vpop.f32.mrf.mxu3  ;;  %v4707_v58 = vld [vmem:[#allocation11 + $0xe8] sm:$0xff]  ;;  %v4377_v5 = vadd.f32 %v9510_v3, %v9508_v56 }
 0x459   : > { %5106 = vmatpush.msra.mxu1 %v4707_v58  ;;  %5150 = vmatpush.msrb.mxu2 %v4759_v7  ;;  %v9594_v7 = vperm.slane %v9495_v63, 3 }
 0x45a   : > { %10973 = vst [vmem:[#allocation28_spill] sm:$0xff] %v9512_v35  ;;  %4991 = vmatmul.f32.vlgmr.msra.gmra.mxu2 %v9512_v35  ;;  %v9541_v43 = vpop.f32.mrf.mxu1 }
 0x45b   : > { %5151 = vmatpush.msrb.mxu2 %v4755_v26 }
 0x45d   : > { %v4408_v46 = vpop.f32.mrf.mxu2 }
 0x45e   : > { %v9519_v53 = vadd.f32 %v4408_v46, %v4368_v32  ;;  %v4703_v32 = vld [vmem:[#allocation11 + $0xc8] sm:$0xff] }
 0x45f   : > { %v4493_v60 = vpop.f32.mrf.mxu0  ;;  %5107 = vmatpush.msra.mxu1 %v4703_v32  ;;  %v4923_v32 = vld [vmem:[#allocation11 + $0x7a8] sm:$0xff] }
 0x460   : > { %v9521_v44 = vadd.f32 %v4493_v60, %v4453_v8  ;;  %4950 = vmatmul.f32.vlgmr.msrb.gmra.mxu1 %v9519_v53  ;;  %v9547_v14 = vpop.f32.mrf.mxu3  ;;  %v4878_v8 = vld [vmem:[#allocation11 + $0x640] sm:$0xff]  ;;  %v4751_v60 = vld [vmem:[#allocation11 + $0x248] sm:$0xff] }
 0x461   : > { %5070 = vmatpush.msrb.mxu0 %v4878_v8  ;;  %5108 = vmatpush.msra.mxu1 %v4699_v18  ;;  %v4468_v36 = vadd.f32 %v9547_v14, %v9500_v57 }
 0x462   : > { %10974 = vst [vmem:[#allocation22_spill] sm:$0xff] %v9521_v44  ;;  %4994 = vmatmul.f32.gmra.mxu2 %v9521_v44  ;;  %v9557_v19 = vpop.f32.mrf.mxu1 }
 0x463   : > { %5071 = vmatpush.msrb.mxu0 %v4874_v21  ;;  %5152 = vmatpush.msrb.mxu2 %v4751_v60 }
 0x464   : > { %5109 = vmatpush.msra.mxu1 %v4695_v41 }
 0x465   : > { %v4411_v12 = vpop.f32.mrf.mxu2  ;;  %5153 = vmatpush.msrb.mxu2 %v4747_v52  ;;  %5072 = vmatpush.msrb.mxu0 %v4870_v49  ;;  %v4839_v49 = vld [vmem:[#allocation11 + $0x508] sm:$0xff] }
 0x466   : > { %v9533_v9 = vadd.f32 %v4411_v12, %v4371_v20  ;;  %v4810_v20 = vld [vmem:[#allocation11 + $0x420] sm:$0xff]  ;;  %v4465_v12 = vadd.f32 %v9531_v15, %v9500_v57  ;;  %5110 = vmatpush.msra.mxu1 %v4691_v33  ;;  %v4383_v15 = vadd.f32 %v9541_v43, %v9508_v56  ;;  %v4386_v43 = vadd.f32 %v9557_v19, %v9508_v56  ;;  %v4800_v33 = vld [vmem:[#allocation11 + $0x3d0] sm:$0xff] }
 0x467   : > { %v4496_v16 = vpop.f32.mrf.mxu0  ;;  %5030 = vmatpush.msra.mxu3 %v4810_v20  ;;  %5221 = vmatpush.msra.mxu0 %v4931_v39  ;;  %v9602_v19 = vperm.slane %v9495_v63, 2  ;;  %v4804_v20 = vld [vmem:[#allocation11 + $0x3f0] sm:$0xff]  ;;  %v4911_v63 = vld [vmem:[#allocation11 + $0x748] sm:$0xff] }
 0x468   : > { %v9535_v29 = vadd.f32 %v4496_v16, %v4456_v48  ;;  %4953 = vmatmul.f32.gmra.mxu1 %v9533_v9  ;;  %v4743_v48 = vld [vmem:[#allocation11 + $0x208] sm:$0xff]  ;;  %v4784_v39 = vld [vmem:[#allocation11 + $0x350] sm:$0xff] }
 0x469   : > { %v4470_v50 = vpop.f32.mrf.mxu3  ;;  %5031 = vmatpush.msra.mxu3 %v4806_v62  ;;  %5154 = vmatpush.msrb.mxu2 %v4743_v48  ;;  %v4683_v16 = vld [vmem:[#allocation11 + $0x28] sm:$0xff] }
 0x46a   : > { %10975 = vst [vmem:[#allocation21_spill] sm:$0xff] %v9535_v29  ;;  %4997 = vmatmul.f32.gmra.mxu2 %v9535_v29  ;;  %5111 = vmatpush.msra.mxu1 %v4687_v27  ;;  %v4388_v6 = vpop.f32.mrf.mxu1  ;;  %v4471_v14 = vadd.f32 %v4470_v50, %v9500_v57  ;;  %v4796_v27 = vld [vmem:[#allocation11 + $0x3b0] sm:$0xff] }
 0x46b   : > { %5180 = vmatpush.msrb.mxu3 %v4867_v11  ;;  %v4389_v57 = vadd.f32 %v4388_v6, %v9508_v56  ;;  %v4843_v56 = vld [vmem:[#allocation11 + $0x528] sm:$0xff]  ;;  %5303 = vmatpush.msra.mxu2 %v4804_v20  ;;  %v4740_v6 = vld [vmem:[#allocation11 + $0x1f0] sm:$0xff] }
 0x46c   : > { %5112 = vmatpush.msra.mxu1 %v4683_v16  ;;  %v4835_v16 = vld [vmem:[#allocation11 + $0x4e8] sm:$0xff]  ;;  %v4792_v11 = vld [vmem:[#allocation11 + $0x390] sm:$0xff] }
 0x46d   : > { %v4414_v0 = vpop.f32.mrf.mxu2  ;;  %5304 = vmatpush.msra.mxu2 %v4800_v33  ;;  %v4768_v20 = vld [vmem:[#allocation11 + $0x2d0] sm:$0xff] }
 0x46e   : > { %v9545_v13 = vadd.f32 %v4414_v0, %v4374_v54  ;;  %v4863_v54 = vld [vmem:[#allocation11 + $0x5c8] sm:$0xff]  ;;  %5113 = vmatpush.msra.mxu1 %v4679_v51  ;;  %v4712_v33 = vld [vmem:[#allocation11 + $0x110] sm:$0xff] }
 0x46f   : > { %v4499_v17 = vpop.f32.mrf.mxu0  ;;  %5181 = vmatpush.msrb.mxu3 %v4863_v54  ;;  %v4859_v0 = vld [vmem:[#allocation11 + $0x5a8] sm:$0xff]  ;;  %5305 = vmatpush.msra.mxu2 %v4796_v27  ;;  %v4736_v54 = vld [vmem:[#allocation11 + $0x1d0] sm:$0xff] }
 0x470   : > { %v9549_v10 = vadd.f32 %v4499_v17, %v4459_v2  ;;  %4956 = vmatmul.f32.gmra.mxu1 %v9545_v13  ;;  %v4927_v17 = vld [vmem:[#allocation11 + $0x7c8] sm:$0xff] }
 0x471   : > { %5182 = vmatpush.msrb.mxu3 %v4859_v0  ;;  %5222 = vmatpush.msra.mxu0 %v4927_v17  ;;  %v4732_v0 = vld [vmem:[#allocation11 + $0x1b0] sm:$0xff]  ;;  %v4819_v27 = vld [vmem:[#allocation11 + $0x468] sm:$0xff] }
 0x472   : > { %10976 = vst [vmem:[#allocation26_spill] sm:$0xff] %v9549_v10  ;;  %5000 = vmatmul.f32.gmra.mxu2 %v9549_v10  ;;  %v4531_v4 = vpop.f32.mrf.mxu1  ;;  %5262 = vmatpush.msrb.mxu1 %v4740_v6  ;;  %v4780_v17 = vld [vmem:[#allocation11 + $0x330] sm:$0xff] }
 0x473   : > { %v4613_v47 = vpop.f32.mrf.mxu3  ;;  %5183 = vmatpush.msrb.mxu3 %v4855_v24  ;;  %5223 = vmatpush.msra.mxu0 %v4923_v32  ;;  %v4532_v52 = vadd.f32 %v4531_v4, %v9602_v19  ;;  %v4728_v24 = vld [vmem:[#allocation11 + $0x190] sm:$0xff] }
 0x474   : > { %v4614_v8 = vadd.f32 %v4613_v47, %v9594_v7  ;;  %v4788_v47 = vld [vmem:[#allocation11 + $0x370] sm:$0xff]  ;;  %5306 = vmatpush.msra.mxu2 %v4792_v11  ;;  %5263 = vmatpush.msrb.mxu1 %v4736_v54  ;;  %v4815_v11 = vld [vmem:[#allocation11 + $0x448] sm:$0xff] }
 0x475   : > { %v4417_v46 = vpop.f32.mrf.mxu2  ;;  %5184 = vmatpush.msrb.mxu3 %v4851_v23  ;;  %v4899_v23 = vld [vmem:[#allocation11 + $0x6e8] sm:$0xff]  ;;  %v4724_v32 = vld [vmem:[#allocation11 + $0x170] sm:$0xff] }
 0x476   : > { %v9559_v3 = vadd.f32 %v4417_v46, %v4377_v5  ;;  %5307 = vmatpush.msra.mxu2 %v4788_v47  ;;  %5264 = vmatpush.msrb.mxu1 %v4732_v0  ;;  %v4760_v6 = vld [vmem:[#allocation11 + $0x290] sm:$0xff]  ;;  %v4879_v0 = vld [vmem:[#allocation11 + $0x648] sm:$0xff] }
 0x477   : > { %v4502_v31 = vpop.f32.mrf.mxu0  ;;  %5185 = vmatpush.msrb.mxu3 %v4847_v55  ;;  %v4704_v54 = vld [vmem:[#allocation11 + $0xd0] sm:$0xff] }
 0x478   : > { %v9561_v42 = vadd.f32 %v4502_v31, %v4462_v30  ;;  %4959 = vmatmul.f32.gmra.mxu1 %v9559_v3  ;;  %v4919_v30 = vld [vmem:[#allocation11 + $0x788] sm:$0xff]  ;;  %5308 = vmatpush.msra.mxu2 %v4784_v39  ;;  %v4756_v47 = vld [vmem:[#allocation11 + $0x270] sm:$0xff] }
 0x479   : > { %5224 = vmatpush.msra.mxu0 %v4919_v30  ;;  %v4915_v31 = vld [vmem:[#allocation11 + $0x768] sm:$0xff]  ;;  %5186 = vmatpush.msrb.mxu3 %v4843_v56  ;;  %v4700_v39 = vld [vmem:[#allocation11 + $0xb0] sm:$0xff] }
 0x47a   : > { %10977 = vst [vmem:[#allocation31_spill] sm:$0xff] %v9561_v42  ;;  %5003 = vmatmul.f32.gmra.mxu2 %v9561_v42  ;;  %v4534_v26 = vpop.f32.mrf.mxu1  ;;  %5265 = vmatpush.msrb.mxu1 %v4728_v24  ;;  %v4823_v30 = vld [vmem:[#allocation11 + $0x488] sm:$0xff] }
 0x47b   : > { %v4616_v38 = vpop.f32.mrf.mxu3  ;;  %5225 = vmatpush.msra.mxu0 %v4915_v31  ;;  %5187 = vmatpush.msrb.mxu3 %v4839_v49  ;;  %v4891_v49 = vld [vmem:[#allocation11 + $0x6a8] sm:$0xff] }
 0x47c   : > { %v4617_v50 = vadd.f32 %v4616_v38, %v9594_v7  ;;  %5309 = vmatpush.msra.mxu2 %v4780_v17  ;;  %5266 = vmatpush.msrb.mxu1 %v4724_v32  ;;  %v4752_v17 = vld [vmem:[#allocation11 + $0x250] sm:$0xff] }
 0x47d   : > { %v4420_v34 = vpop.f32.mrf.mxu2  ;;  %5226 = vmatpush.msra.mxu0 %v4911_v63  ;;  %5188 = vmatpush.msrb.mxu3 %v4835_v16  ;;  %v4748_v32 = vld [vmem:[#allocation11 + $0x230] sm:$0xff] }
 0x47e   : > { %v9569_v40 = vadd.f32 %v4420_v34, %v4380_v45 }
 0x47f   : > { %v4505_v61 = vpop.f32.mrf.mxu0 }
 0x480   : > { %10978 = vst [vmem:[#allocation29_spill] sm:$0xff] %v9569_v40  ;;  %v9571_v59 = vadd.f32 %v4505_v61, %v4465_v12  ;;  %4962 = vmatmul.f32.gmra.mxu1 %v9569_v40  ;;  %v4907_v61 = vld [vmem:[#allocation11 + $0x728] sm:$0xff] }
 0x481   : > { %5227 = vmatpush.msra.mxu0 %v4907_v61  ;;  %v4708_v61 = vld [vmem:[#allocation11 + $0xf0] sm:$0xff] }
 0x482   : > { %10979 = vst [vmem:[#allocation25_spill] sm:$0xff] %v9571_v59  ;;  %5006 = vmatmul.f32.gmra.mxu2 %v9571_v59  ;;  %v4537_v48 = vpop.f32.mrf.mxu1 }
 0x483   : > { %v4619_v21 = vpop.f32.mrf.mxu3  ;;  %v4538_v55 = vadd.f32 %v4537_v48, %v9602_v19 }
 0x485   : > { %v4423_v28 = vpop.f32.mrf.mxu2 }
 0x486   : > { %v9579_v1 = vadd.f32 %v4423_v28, %v4383_v15  ;;  %v4535_v15 = vadd.f32 %v4534_v26, %v9602_v19  ;;  %v4903_v28 = vld [vmem:[#allocation11 + $0x708] sm:$0xff] }
 0x487   : > { %v4508_v2 = vpop.f32.mrf.mxu0  ;;  %5228 = vmatpush.msra.mxu0 %v4903_v28 }
 0x488   : > { %v9581_v25 = vadd.f32 %v4508_v2, %v4468_v36  ;;  %4965 = vmatmul.f32.gmra.mxu1 %v9579_v1  ;;  %v4831_v36 = vld [vmem:[#allocation11 + $0x4c8] sm:$0xff]  ;;  %v4620_v2 = vadd.f32 %v4619_v21, %v9594_v7 }
 0x489   : > { %5189 = vmatpush.msrb.mxu3 %v4831_v36  ;;  %5229 = vmatpush.msra.mxu0 %v4899_v23 }
 0x48a   : > { %10980 = vst [vmem:[#allocation23_spill] sm:$0xff] %v9581_v25  ;;  %5009 = vmatmul.f32.gmra.mxu2 %v9581_v25 }
 0x48b   : > { %v4622_v51 = vpop.f32.mrf.mxu3 }
 0x48c   : > { %v4623_v21 = vadd.f32 %v4622_v51, %v9594_v7  ;;  %v4883_v51 = vld [vmem:[#allocation11 + $0x668] sm:$0xff] }
 0x48d   : > { %v4426_v37 = vpop.f32.mrf.mxu2 }
 0x48e   : > { %v9588_v22 = vadd.f32 %v4426_v37, %v4386_v43  ;;  %v4540_v37 = vpop.f32.mrf.mxu1 }
 0x48f   : > { %v4511_v58 = vpop.f32.mrf.mxu0  ;;  %v4541_v16 = vadd.f32 %v4540_v37, %v9602_v19  ;;  %v4696_v37 = vld [vmem:[#allocation11 + $0x90] sm:$0xff] }
 0x490   : > { %v9590_v5 = vadd.f32 %v4511_v58, %v4471_v14  ;;  %4968 = vmatmul.f32.gmra.mxu1 %v9588_v22  ;;  %v4827_v58 = vld [vmem:[#allocation11 + $0x4a8] sm:$0xff] }
 0x491   : > { %5190 = vmatpush.msrb.mxu3 %v4827_v58  ;;  %v4811_v58 = vld [vmem:[#allocation11 + $0x428] sm:$0xff] }
 0x492   : > { %5012 = vmatmul.f32.gmra.mxu2 %v9590_v5 }
 0x493   : > { %v4625_v26 = vpop.f32.mrf.mxu3  ;;  %5191 = vmatpush.msrb.mxu3 %v4823_v30  ;;  %v4692_v30 = vld [vmem:[#allocation11 + $0x70] sm:$0xff] }
 0x495   : > { %v4429_v18 = vpop.f32.mrf.mxu2  ;;  %5192 = vmatpush.msrb.mxu3 %v4819_v27  ;;  %v4864_v27 = vld [vmem:[#allocation11 + $0x5d0] sm:$0xff] }
 0x496   : > { %v9599_v46 = vadd.f32 %v4429_v18, %v4389_v57  ;;  %v4776_v57 = vld [vmem:[#allocation11 + $0x310] sm:$0xff]  ;;  %v4543_v48 = vpop.f32.mrf.mxu1 }
 0x497   : > { %v4654_v60 = vpop.f32.mrf.mxu0  ;;  %v4772_v18 = vld [vmem:[#allocation11 + $0x2f0] sm:$0xff]  ;;  %5310 = vmatpush.msra.mxu2 %v4776_v57  ;;  %5193 = vmatpush.msrb.mxu3 %v4815_v11  ;;  %v4544_v23 = vadd.f32 %v4543_v48, %v9602_v19  ;;  %v4871_v57 = vld [vmem:[#allocation11 + $0x608] sm:$0xff] }
 0x498   : > { %v9604_v41 = vadd.f32 %v4654_v60, %v4614_v8  ;;  %4971 = vmatmul.f32.gmra.mxu1 %v9599_v46  ;;  %v4720_v8 = vld [vmem:[#allocation11 + $0x150] sm:$0xff]  ;;  %v4895_v60 = vld [vmem:[#allocation11 + $0x6c8] sm:$0xff] }
 0x499   : > { %5230 = vmatpush.msra.mxu0 %v4895_v60  ;;  %5267 = vmatpush.msrb.mxu1 %v4720_v8  ;;  %v4680_v48 = vld [vmem:[#allocation11 + $0x10] sm:$0xff] }
 0x49a   : > { %5073 = vmatmul.f32.vlgmr.msrb.gmra.mxu0 %v9604_v41  ;;  %5155 = vmatmul.f32.vlgmr.msrb.gmra.mxu2 %v9512_v35 }
 0x49b   : > { %5311 = vmatpush.msra.mxu2 %v4772_v18  ;;  %5231 = vmatpush.msra.mxu0 %v4891_v49  ;;  %v4628_v28 = vpop.f32.mrf.mxu3  ;;  %v4744_v18 = vld [vmem:[#allocation11 + $0x210] sm:$0xff] }
 0x49c   : > { %v4629_v8 = vadd.f32 %v4628_v28, %v9594_v7  ;;  %5194 = vmatpush.msrb.mxu3 %v4811_v58  ;;  %v4856_v28 = vld [vmem:[#allocation11 + $0x590] sm:$0xff] }
 0x49d   : > { %v4572_v45 = vpop.f32.mrf.mxu2  ;;  %5312 = vmatpush.msra.mxu2 %v4768_v20 }
 0x49e   : > { %v9611_v62 = vadd.f32 %v4572_v45, %v4532_v52  ;;  %v4716_v52 = vld [vmem:[#allocation11 + $0x130] sm:$0xff] }
 0x49f   : > { %v4657_v12 = vpop.f32.mrf.mxu0  ;;  %v4764_v45 = vld [vmem:[#allocation11 + $0x2b0] sm:$0xff]  ;;  %5268 = vmatpush.msrb.mxu1 %v4716_v52 }
 0x4a0   : > { %v9613_v34 = vadd.f32 %v4657_v12, %v4617_v50  ;;  %5032 = vmatmul.f32.vlgmr.msra.gmra.mxu3 %v9611_v62  ;;  %5114 = vmatmul.f32.vlgmr.msra.gmra.mxu1 %v9519_v53  ;;  %v4887_v12 = vld [vmem:[#allocation11 + $0x688] sm:$0xff] }
 0x4a1   : > { %5269 = vmatpush.msrb.mxu1 %v4712_v33  ;;  %5313 = vmatpush.msra.mxu2 %v4764_v45  ;;  %v4868_v33 = vld [vmem:[#allocation11 + $0x5f0] sm:$0xff] }
 0x4a2   : > { %5076 = vmatmul.f32.gmra.mxu0 %v9613_v34  ;;  %5158 = vmatmul.f32.gmra.mxu2 %v9521_v44 }
 0x4a3   : > { %5232 = vmatpush.msra.mxu0 %v4887_v12  ;;  %5270 = vmatpush.msrb.mxu1 %v4708_v61  ;;  %v4631_v20 = vpop.f32.mrf.mxu3 }
 0x4a4   : > { %5314 = vmatpush.msra.mxu2 %v4760_v6  ;;  %v4632_v12 = vadd.f32 %v4631_v20, %v9594_v7 }
 0x4a5   : > { %v4575_v4 = vpop.f32.mrf.mxu2  ;;  %5233 = vmatpush.msra.mxu0 %v4883_v51  ;;  %5271 = vmatpush.msrb.mxu1 %v4704_v54  ;;  %v4932_v54 = vld [vmem:[#allocation11 + $0x7f0] sm:$0xff] }
 0x4a6   : > { %v9621_v43 = vadd.f32 %v4575_v4, %v4535_v15  ;;  %v4626_v15 = vadd.f32 %v4625_v26, %v9594_v7  ;;  %5315 = vmatpush.msra.mxu2 %v4756_v47  ;;  %v4807_v26 = vld [vmem:[#allocation11 + $0x408] sm:$0xff] }
 0x4a7   : > { %v4660_v14 = vpop.f32.mrf.mxu0  ;;  %5234 = vmatpush.msra.mxu0 %v4879_v0  ;;  %5272 = vmatpush.msrb.mxu1 %v4700_v39  ;;  %v4928_v0 = vld [vmem:[#allocation11 + $0x7d0] sm:$0xff] }
 0x4a8   : > { %v9623_v38 = vadd.f32 %v4660_v14, %v4620_v2  ;;  %5035 = vmatmul.f32.gmra.mxu3 %v9621_v43  ;;  %5117 = vmatmul.f32.gmra.mxu1 %v9533_v9  ;;  %v4875_v14 = vld [vmem:[#allocation11 + $0x628] sm:$0xff] }
 0x4a9   : > { %5316 = vmatpush.msra.mxu2 %v4752_v17  ;;  %5235 = vmatpush.msra.mxu0 %v4875_v14 }
 0x4aa   : > { %5079 = vmatmul.f32.gmra.mxu0 %v9623_v38  ;;  %5161 = vmatmul.f32.gmra.mxu2 %v9535_v29 }
 0x4ab   : > { %5273 = vmatpush.msrb.mxu1 %v4696_v37  ;;  %5317 = vmatpush.msra.mxu2 %v4748_v32  ;;  %v4634_v47 = vpop.f32.mrf.mxu3  ;;  %v4924_v32 = vld [vmem:[#allocation11 + $0x7b0] sm:$0xff] }
 0x4ac   : > { %5236 = vmatpush.msra.mxu0 %v4871_v57  ;;  %5195 = vmatpush.msrb.mxu3 %v4807_v26  ;;  %v4635_v39 = vadd.f32 %v4634_v47, %v9594_v7  ;;  %v4848_v57 = vld [vmem:[#allocation11 + $0x550] sm:$0xff]  ;;  %v4785_v47 = vld [vmem:[#allocation11 + $0x358] sm:$0xff] }
 0x4ad   : > { %v4578_v56 = vpop.f32.mrf.mxu2  ;;  %5274 = vmatpush.msrb.mxu1 %v4692_v30  ;;  %5318 = vmatpush.msra.mxu2 %v4744_v18  ;;  %v4916_v18 = vld [vmem:[#allocation11 + $0x770] sm:$0xff] }
 0x4ae   : > { %v9631_v31 = vadd.f32 %v4578_v56, %v4538_v55  ;;  %v4546_v55 = vpop.f32.mrf.mxu1  ;;  %v4688_v56 = vld [vmem:[#allocation11 + $0x50] sm:$0xff]  ;;  %5344 = vmatpush.msra.mxu3 %v4868_v33  ;;  %5385 = vmatpush.msrb.mxu0 %v4932_v54  ;;  %v4733_v54 = vld [vmem:[#allocation11 + $0x1b8] sm:$0xff] }
 0x4af   : > { %v4663_v63 = vpop.f32.mrf.mxu0  ;;  %5275 = vmatpush.msrb.mxu1 %v4688_v56  ;;  %v4547_v45 = vadd.f32 %v4546_v55, %v9602_v19  ;;  %v4920_v55 = vld [vmem:[#allocation11 + $0x790] sm:$0xff] }
 0x4b0   : > { %v9633_v50 = vadd.f32 %v4663_v63, %v4623_v21  ;;  %5038 = vmatmul.f32.gmra.mxu3 %v9631_v31  ;;  %5120 = vmatmul.f32.gmra.mxu1 %v9545_v13  ;;  %v4684_v63 = vld [vmem:[#allocation11 + $0x30] sm:$0xff] }
 0x4b1   : > { %5276 = vmatpush.msrb.mxu1 %v4684_v63  ;;  %5345 = vmatpush.msra.mxu3 %v4864_v27  ;;  %v4912_v56 = vld [vmem:[#allocation11 + $0x750] sm:$0xff]  ;;  %v4797_v63 = vld [vmem:[#allocation11 + $0x3b8] sm:$0xff] }
 0x4b2   : > { %10981 = vst [vmem:[#allocation30_spill] sm:$0xff] %v9633_v50  ;;  %5082 = vmatmul.f32.gmra.mxu0 %v9633_v50  ;;  %5164 = vmatmul.f32.gmra.mxu2 %v9549_v10  ;;  %v4836_v33 = vld [vmem:[#allocation11 + $0x4f0] sm:$0xff] }
 0x4b3   : > { %5277 = vmatpush.msrb.mxu1 %v4680_v48  ;;  %5386 = vmatpush.msrb.mxu0 %v4928_v0  ;;  %v4741_v48 = vld [vmem:[#allocation11 + $0x1f8] sm:$0xff] }
 0x4b4   : > { %v4781_v0 = vld [vmem:[#allocation11 + $0x338] sm:$0xff] }
 0x4b5   : > { %v4581_v36 = vpop.f32.mrf.mxu2  ;;  %5387 = vmatpush.msrb.mxu0 %v4924_v32  ;;  %5426 = vmatpush.msra.mxu1 %v4741_v48  ;;  %v4884_v48 = vld [vmem:[#allocation11 + $0x670] sm:$0xff] }
 0x4b6   : > { %v9641_v2 = vadd.f32 %v4581_v36, %v4541_v16  ;;  %v4549_v61 = vpop.f32.mrf.mxu1 }
 0x4b7   : > { %v4666_v4 = vpop.f32.mrf.mxu0  ;;  %v4550_v36 = vadd.f32 %v4549_v61, %v9602_v19  ;;  %5388 = vmatpush.msrb.mxu0 %v4920_v55  ;;  %v4789_v61 = vld [vmem:[#allocation11 + $0x378] sm:$0xff]  ;;  %v4896_v55 = vld [vmem:[#allocation11 + $0x6d0] sm:$0xff] }
 0x4b8   : > { %v9643_v24 = vadd.f32 %v4666_v4, %v4626_v15  ;;  %5041 = vmatmul.f32.gmra.mxu3 %v9641_v2  ;;  %5123 = vmatmul.f32.gmra.mxu1 %v9559_v3  ;;  %v4860_v15 = vld [vmem:[#allocation11 + $0x5b0] sm:$0xff] }
 0x4b9   : > { %5346 = vmatpush.msra.mxu3 %v4860_v15  ;;  %5389 = vmatpush.msrb.mxu0 %v4916_v18  ;;  %v4904_v15 = vld [vmem:[#allocation11 + $0x710] sm:$0xff]  ;;  %v4769_v18 = vld [vmem:[#allocation11 + $0x2d8] sm:$0xff] }
 0x4ba   : > { %10982 = vst [vmem:[#allocation24_spill] sm:$0xff] %v9643_v24  ;;  %5085 = vmatmul.f32.gmra.mxu0 %v9643_v24  ;;  %5167 = vmatmul.f32.gmra.mxu2 %v9561_v42 }
 0x4bb   : > { %5347 = vmatpush.msra.mxu3 %v4856_v28  ;;  %5390 = vmatpush.msrb.mxu0 %v4912_v56  ;;  %v4729_v28 = vld [vmem:[#allocation11 + $0x198] sm:$0xff] }
 0x4bc   : > { %v4765_v56 = vld [vmem:[#allocation11 + $0x2b8] sm:$0xff] }
 0x4bd   : > { %v4584_v60 = vpop.f32.mrf.mxu2 }
 0x4be   : > { %v9651_v21 = vadd.f32 %v4584_v60, %v4544_v23  ;;  %v4552_v37 = vpop.f32.mrf.mxu1  ;;  %v4852_v23 = vld [vmem:[#allocation11 + $0x570] sm:$0xff] }
 0x4bf   : > { %v4669_v52 = vpop.f32.mrf.mxu0  ;;  %5348 = vmatpush.msra.mxu3 %v4852_v23  ;;  %v4553_v7 = vadd.f32 %v4552_v37, %v9602_v19  ;;  %v4805_v19 = vld [vmem:[#allocation11 + $0x3f8] sm:$0xff]  ;;  %v4840_v60 = vld [vmem:[#allocation11 + $0x510] sm:$0xff] }
 0x4c0   : > { %v9653_v49 = vadd.f32 %v4669_v52, %v4629_v8  ;;  %5044 = vmatmul.f32.gmra.mxu3 %v9651_v21  ;;  %5126 = vmatmul.f32.gmra.mxu1 %v9569_v40  ;;  %v4844_v8 = vld [vmem:[#allocation11 + $0x530] sm:$0xff]  ;;  %v4801_v52 = vld [vmem:[#allocation11 + $0x3d8] sm:$0xff] }
 0x4c1   : > { %5349 = vmatpush.msra.mxu3 %v4848_v57  ;;  %5467 = vmatpush.msrb.mxu2 %v4805_v19  ;;  %v4777_v37 = vld [vmem:[#allocation11 + $0x318] sm:$0xff]  ;;  %v4824_v23 = vld [vmem:[#allocation11 + $0x490] sm:$0xff] }
 0x4c2   : > { %10983 = vst [vmem:[#allocation32_spill] sm:$0xff] %v9653_v49  ;;  %5088 = vmatmul.f32.gmra.mxu0 %v9653_v49  ;;  %5170 = vmatmul.f32.gmra.mxu2 %v9571_v59  ;;  %v4773_v57 = vld [vmem:[#allocation11 + $0x2f8] sm:$0xff]  ;;  %v4892_v19 = vld [vmem:[#allocation11 + $0x6b0] sm:$0xff] }
 0x4c3   : > { %5350 = vmatpush.msra.mxu3 %v4844_v8  ;;  %5468 = vmatpush.msrb.mxu2 %v4801_v52  ;;  %v4717_v8 = vld [vmem:[#allocation11 + $0x138] sm:$0xff]  ;;  %v4820_v52 = vld [vmem:[#allocation11 + $0x470] sm:$0xff] }
 0x4c5   : > { %v4587_v16 = vpop.f32.mrf.mxu2  ;;  %5351 = vmatpush.msra.mxu3 %v4840_v60  ;;  %5469 = vmatpush.msrb.mxu2 %v4797_v63  ;;  %v4713_v60 = vld [vmem:[#allocation11 + $0x118] sm:$0xff]  ;;  %v4888_v63 = vld [vmem:[#allocation11 + $0x690] sm:$0xff] }
 0x4c6   : > { %v9661_v6 = vadd.f32 %v4587_v16, %v4547_v45  ;;  %v4908_v45 = vld [vmem:[#allocation11 + $0x730] sm:$0xff]  ;;  %v4737_v16 = vld [vmem:[#allocation11 + $0x1d8] sm:$0xff] }
 0x4c7   : > { %v4672_v51 = vpop.f32.mrf.mxu0  ;;  %5352 = vmatpush.msra.mxu3 %v4836_v33  ;;  %5391 = vmatpush.msrb.mxu0 %v4908_v45  ;;  %v4709_v33 = vld [vmem:[#allocation11 + $0xf8] sm:$0xff] }
 0x4c8   : > { %v9663_v11 = vadd.f32 %v4672_v51, %v4632_v12  ;;  %5047 = vmatmul.f32.gmra.mxu3 %v9661_v6  ;;  %5129 = vmatmul.f32.gmra.mxu1 %v9579_v1  ;;  %v4793_v12 = vld [vmem:[#allocation11 + $0x398] sm:$0xff]  ;;  %v4832_v51 = vld [vmem:[#allocation11 + $0x4d0] sm:$0xff] }
 0x4c9   : > { %5470 = vmatpush.msrb.mxu2 %v4793_v12  ;;  %5353 = vmatpush.msra.mxu3 %v4832_v51  ;;  %v4761_v45 = vld [vmem:[#allocation11 + $0x298] sm:$0xff]  ;;  %v4816_v12 = vld [vmem:[#allocation11 + $0x450] sm:$0xff] }
 0x4ca   : > { %10984 = vst [vmem:[#allocation27_spill] sm:$0xff] %v9663_v11  ;;  %5091 = vmatmul.f32.gmra.mxu0 %v9663_v11  ;;  %5173 = vmatmul.f32.gmra.mxu2 %v9581_v25 }
 0x4cb   : > { %5392 = vmatpush.msrb.mxu0 %v4904_v15  ;;  %5427 = vmatpush.msra.mxu1 %v4737_v16  ;;  %v4705_v16 = vld [vmem:[#allocation11 + $0xd8] sm:$0xff] }
 0x4cc   : > { %5471 = vmatpush.msrb.mxu2 %v4789_v61  ;;  %v4757_v61 = vld [vmem:[#allocation11 + $0x278] sm:$0xff] }
 0x4cd   : > { %v4590_v4 = vpop.f32.mrf.mxu2  ;;  %5428 = vmatpush.msra.mxu1 %v4733_v54  ;;  %v4880_v54 = vld [vmem:[#allocation11 + $0x650] sm:$0xff] }
 0x4ce   : > { %v9671_v17 = vadd.f32 %v4590_v4, %v4550_v36  ;;  %5472 = vmatpush.msrb.mxu2 %v4785_v47  ;;  %v4900_v4 = vld [vmem:[#allocation11 + $0x6f0] sm:$0xff]  ;;  %v4701_v47 = vld [vmem:[#allocation11 + $0xb8] sm:$0xff] }
 0x4cf   : > { %v4675_v14 = vpop.f32.mrf.mxu0  ;;  %5429 = vmatpush.msra.mxu1 %v4729_v28  ;;  %5393 = vmatpush.msrb.mxu0 %v4900_v4  ;;  %v4753_v28 = vld [vmem:[#allocation11 + $0x258] sm:$0xff]  ;;  %v4812_v4 = vld [vmem:[#allocation11 + $0x430] sm:$0xff] }
 0x4d0   : > { %v9673_v58 = vadd.f32 %v4675_v14, %v4635_v39  ;;  %5050 = vmatmul.f32.gmra.mxu3 %v9671_v17  ;;  %5132 = vmatmul.f32.gmra.mxu1 %v9588_v22  ;;  %v4828_v39 = vld [vmem:[#allocation11 + $0x4b0] sm:$0xff]  ;;  %v4725_v14 = vld [vmem:[#allocation11 + $0x178] sm:$0xff] }
 0x4d1   : > { %5473 = vmatpush.msrb.mxu2 %v4781_v0  ;;  %5354 = vmatpush.msra.mxu3 %v4828_v39  ;;  %v4876_v0 = vld [vmem:[#allocation11 + $0x630] sm:$0xff]  ;;  %v4697_v39 = vld [vmem:[#allocation11 + $0x98] sm:$0xff] }
 0x4d2   : > { %10985 = vst [vmem:[#allocation33_spill] sm:$0xff] %v9673_v58  ;;  %5094 = vmatmul.f32.gmra.mxu0 %v9673_v58  ;;  %5176 = vmatmul.f32.gmra.mxu2 %v9590_v5 }
 0x4d3   : > { %5430 = vmatpush.msra.mxu1 %v4725_v14  ;;  %5474 = vmatpush.msrb.mxu2 %v4777_v37  ;;  %v4749_v14 = vld [vmem:[#allocation11 + $0x238] sm:$0xff]  ;;  %v4872_v37 = vld [vmem:[#allocation11 + $0x610] sm:$0xff] }
 0x4d4   : > { %5355 = vmatpush.msra.mxu3 %v4824_v23  ;;  %5394 = vmatpush.msrb.mxu0 %v4896_v55  ;;  %v4693_v23 = vld [vmem:[#allocation11 + $0x78] sm:$0xff] }
 0x4d5   : > { %v4593_v30 = vpop.f32.mrf.mxu2  ;;  %5475 = vmatpush.msrb.mxu2 %v4773_v57  ;;  %v4745_v57 = vld [vmem:[#allocation11 + $0x218] sm:$0xff] }
 0x4d6   : > { %v9680_v26 = vadd.f32 %v4593_v30, %v4553_v7  ;;  %v4721_v7 = vld [vmem:[#allocation11 + $0x158] sm:$0xff]  ;;  %5395 = vmatpush.msrb.mxu0 %v4892_v19  ;;  %5356 = vmatpush.msra.mxu3 %v4820_v52  ;;  %v7198_v52 = vld [vmem:[#allocation11 + $0x3e0] sm:$0xff] }
 0x4d7   : > { %5431 = vmatpush.msra.mxu1 %v4721_v7  ;;  %5476 = vmatpush.msrb.mxu2 %v4769_v18  ;;  %v4808_v7 = vld [vmem:[#allocation11 + $0x410] sm:$0xff]  ;;  %v4685_v19 = vld [vmem:[#allocation11 + $0x38] sm:$0xff] }
 0x4d8   : > { %5053 = vmatmul.f32.gmra.mxu3 %v9680_v26  ;;  %5135 = vmatmul.f32.gmra.mxu1 %v9599_v46 }
 0x4d9   : > { %5432 = vmatpush.msra.mxu1 %v4717_v8  ;;  %5477 = vmatpush.msrb.mxu2 %v4765_v56  ;;  %v4689_v8 = vld [vmem:[#allocation11 + $0x58] sm:$0xff] }
 0x4da   : > { %5237 = vmatmul.f32.vlgmr.msra.gmra.mxu0 %v9604_v41  ;;  %5319 = vmatmul.f32.vlgmr.msra.gmra.mxu2 %v9512_v35  ;;  %v4681_v56 = vld [vmem:[#allocation11 + $0x18] sm:$0xff] }
 0x4db   : > { %5433 = vmatpush.msra.mxu1 %v4713_v60  ;;  %5396 = vmatpush.msrb.mxu0 %v4888_v63  ;;  %v4869_v60 = vld [vmem:[#allocation11 + $0x5f8] sm:$0xff] }
 0x4dc   : > { %5478 = vmatpush.msrb.mxu2 %v4761_v45  ;;  %5357 = vmatpush.msra.mxu3 %v4816_v12  ;;  %v4865_v45 = vld [vmem:[#allocation11 + $0x5d8] sm:$0xff]  ;;  %v7201_v12 = vld [vmem:[#allocation11 + $0x3a0] sm:$0xff] }
 0x4dd   : > { %v9686_v20 = vpop.f32.mrf.mxu1  ;;  %v9690_v27 = vpop.f32.mrf.mxu2  ;;  %5434 = vmatpush.msra.mxu1 %v4709_v33  ;;  %5397 = vmatpush.msrb.mxu0 %v4884_v48  ;;  %v7199_v33 = vld [vmem:[#allocation11 + $0x3c0] sm:$0xff] }
 0x4de   : > { %5479 = vmatpush.msrb.mxu2 %v4757_v61  ;;  %5358 = vmatpush.msra.mxu3 %v4812_v4  ;;  %v7200_v48 = vld [vmem:[#allocation11 + $0x1e0] sm:$0xff]  ;;  %v4933_v61 = vld [vmem:[#allocation11 + $0x7f8] sm:$0xff] }
 0x4df   : > { %5435 = vmatpush.msra.mxu1 %v4705_v16  ;;  %5398 = vmatpush.msrb.mxu0 %v4880_v54  ;;  %v4861_v16 = vld [vmem:[#allocation11 + $0x5b8] sm:$0xff]  ;;  %v7205_v4 = vld [vmem:[#allocation11 + $0x360] sm:$0xff] }
 0x4e0   : > { %5196 = vmatmul.f32.vlgmr.msrb.gmra.mxu3 %v9611_v62  ;;  %5278 = vmatmul.f32.vlgmr.msrb.gmra.mxu1 %v9519_v53 }
 0x4e1   : > { %5436 = vmatpush.msra.mxu1 %v4701_v47  ;;  %5480 = vmatpush.msrb.mxu2 %v4753_v28  ;;  %v7202_v47 = vld [vmem:[#allocation11 + $0x1c0] sm:$0xff] }
 0x4e2   : > { %5240 = vmatmul.f32.gmra.mxu0 %v9613_v34  ;;  %5322 = vmatmul.f32.gmra.mxu2 %v9521_v44  ;;  %v7203_v28 = vld [vmem:[#allocation11 + $0x380] sm:$0xff] }
 0x4e3   : > { %5399 = vmatpush.msrb.mxu0 %v4876_v0  ;;  %5437 = vmatpush.msra.mxu1 %v4697_v39  ;;  %v7204_v39 = vld [vmem:[#allocation11 + $0x1a0] sm:$0xff] }
 0x4e4   : > { %5481 = vmatpush.msrb.mxu2 %v4749_v14  ;;  %5359 = vmatpush.msra.mxu3 %v4808_v7  ;;  %v7206_v14 = vld [vmem:[#allocation11 + $0x180] sm:$0xff]  ;;  %v4929_v7 = vld [vmem:[#allocation11 + $0x7d8] sm:$0xff] }
 0x4e5   : > { %v9694_v36 = vpop.f32.mrf.mxu1  ;;  %v9700_v32 = vpop.f32.mrf.mxu2  ;;  %5400 = vmatpush.msrb.mxu0 %v4872_v37  ;;  %5438 = vmatpush.msra.mxu1 %v4693_v23  ;;  %v7207_v37 = vld [vmem:[#allocation11 + $0x340] sm:$0xff]  ;;  %v4857_v23 = vld [vmem:[#allocation11 + $0x598] sm:$0xff] }
 0x4e6   : > { %5482 = vmatpush.msrb.mxu2 %v4745_v57  ;;  %5508 = vmatpush.msrb.mxu3 %v4869_v60  ;;  %v4853_v57 = vld [vmem:[#allocation11 + $0x578] sm:$0xff]  ;;  %v7208_v60 = vld [vmem:[#allocation11 + $0x160] sm:$0xff] }
 0x4e7   : > { %5439 = vmatpush.msra.mxu1 %v4689_v8  ;;  %5549 = vmatpush.msra.mxu0 %v4933_v61  ;;  %v4925_v8 = vld [vmem:[#allocation11 + $0x7b8] sm:$0xff] }
 0x4e8   : > { %5199 = vmatmul.f32.gmra.mxu3 %v9621_v43  ;;  %5281 = vmatmul.f32.gmra.mxu1 %v9533_v9  ;;  %v4845_v61 = vld [vmem:[#allocation11 + $0x538] sm:$0xff] }
 0x4e9   : > { %5440 = vmatpush.msra.mxu1 %v4685_v19  ;;  %5751 = vmatpush.msra.mxu2 %v7198_v52 }
 0x4ea   : > { %5243 = vmatmul.f32.gmra.mxu0 %v9623_v38  ;;  %5325 = vmatmul.f32.gmra.mxu2 %v9535_v29 }
 0x4eb   : > { %5441 = vmatpush.msra.mxu1 %v4681_v56  ;;  %5752 = vmatpush.msra.mxu2 %v7199_v33  ;;  %v7209_v56 = vld [vmem:[#allocation11 + $0x320] sm:$0xff] }
 0x4ec   : > { %5509 = vmatpush.msrb.mxu3 %v4865_v45  ;;  %5550 = vmatpush.msra.mxu0 %v4929_v7  ;;  %v7210_v33 = vld [vmem:[#allocation11 + $0x140] sm:$0xff] }
 0x4ed   : > { %v9702_v30 = vpop.f32.mrf.mxu1  ;;  %v9708_v51 = vpop.f32.mrf.mxu2  ;;  %5710 = vmatpush.msrb.mxu1 %v7200_v48  ;;  %5753 = vmatpush.msra.mxu2 %v7201_v12  ;;  %v7211_v45 = vld [vmem:[#allocation11 + $0x300] sm:$0xff]  ;;  %v4849_v12 = vld [vmem:[#allocation11 + $0x558] sm:$0xff] }
 0x4ee   : > { %5510 = vmatpush.msrb.mxu3 %v4861_v16  ;;  %5551 = vmatpush.msra.mxu0 %v4925_v8  ;;  %v4921_v16 = vld [vmem:[#allocation11 + $0x798] sm:$0xff] }
 0x4ef   : > { %5711 = vmatpush.msrb.mxu1 %v7202_v47  ;;  %5754 = vmatpush.msra.mxu2 %v7203_v28  ;;  %v4917_v47 = vld [vmem:[#allocation11 + $0x778] sm:$0xff]  ;;  %v7212_v28 = vld [vmem:[#allocation11 + $0x120] sm:$0xff] }
 0x4f0   : > { %5202 = vmatmul.f32.gmra.mxu3 %v9631_v31  ;;  %5284 = vmatmul.f32.gmra.mxu1 %v9545_v13  ;;  %v4913_v8 = vld [vmem:[#allocation11 + $0x758] sm:$0xff] }
 0x4f1   : > { %5712 = vmatpush.msrb.mxu1 %v7204_v39  ;;  %5755 = vmatpush.msra.mxu2 %v7205_v4  ;;  %v7213_v39 = vld [vmem:[#allocation11 + $0x2e0] sm:$0xff] }
 0x4f2   : > { %5246 = vmatmul.f32.gmra.mxu0 %v9633_v50  ;;  %5328 = vmatmul.f32.gmra.mxu2 %v9549_v10 }
 0x4f3   : > { %5713 = vmatpush.msrb.mxu1 %v7206_v14  ;;  %5756 = vmatpush.msra.mxu2 %v7207_v37  ;;  %v7214_v37 = vld [vmem:[#allocation11 + $0x100] sm:$0xff] }
 0x4f4   : > { %5511 = vmatpush.msrb.mxu3 %v4857_v23  ;;  %5552 = vmatpush.msra.mxu0 %v4921_v16  ;;  %v7215_v23 = vld [vmem:[#allocation11 + $0x2c0] sm:$0xff] }
 0x4f5   : > { %v9710_v15 = vpop.f32.mrf.mxu1  ;;  %v9718_v18 = vpop.f32.mrf.mxu2  ;;  %5714 = vmatpush.msrb.mxu1 %v7208_v60  ;;  %5757 = vmatpush.msra.mxu2 %v7209_v56  ;;  %v4837_v60 = vld [vmem:[#allocation11 + $0x4f8] sm:$0xff] }
 0x4f6   : > { %5512 = vmatpush.msrb.mxu3 %v4853_v57  ;;  %5553 = vmatpush.msra.mxu0 %v4917_v47  ;;  %v4841_v57 = vld [vmem:[#allocation11 + $0x518] sm:$0xff]  ;;  %v7219_v47 = vld [vmem:[#allocation11 + $0x280] sm:$0xff] }
 0x4f7   : > { %5715 = vmatpush.msrb.mxu1 %v7210_v33  ;;  %5758 = vmatpush.msra.mxu2 %v7211_v45  ;;  %v4909_v56 = vld [vmem:[#allocation11 + $0x738] sm:$0xff]  ;;  %v7216_v45 = vld [vmem:[#allocation11 + $0xe0] sm:$0xff] }
 0x4f8   : > { %5205 = vmatmul.f32.gmra.mxu3 %v9641_v2  ;;  %5287 = vmatmul.f32.gmra.mxu1 %v9559_v3 }
 0x4f9   : > { %5513 = vmatpush.msrb.mxu3 %v4849_v12  ;;  %5716 = vmatpush.msrb.mxu1 %v7212_v28  ;;  %v7217_v12 = vld [vmem:[#allocation11 + $0x2a0] sm:$0xff] }
 0x4fa   : > { %5249 = vmatmul.f32.gmra.mxu0 %v9643_v24  ;;  %5331 = vmatmul.f32.gmra.mxu2 %v9561_v42 }
 0x4fb   : > { %5514 = vmatpush.msrb.mxu3 %v4845_v61  ;;  %5759 = vmatpush.msra.mxu2 %v7213_v39  ;;  %v7218_v61 = vld [vmem:[#allocation11 + $0xc0] sm:$0xff] }
 0x4fc   : > { %5717 = vmatpush.msrb.mxu1 %v7214_v37  ;;  %5554 = vmatpush.msra.mxu0 %v4913_v8  ;;  %v4833_v37 = vld [vmem:[#allocation11 + $0x4d8] sm:$0xff] }
 0x4fd   : > { %v9716_v55 = vpop.f32.mrf.mxu1  ;;  %v9728_v54 = vpop.f32.mrf.mxu2  ;;  %5760 = vmatpush.msra.mxu2 %v7215_v23  ;;  %5515 = vmatpush.msrb.mxu3 %v4841_v57  ;;  %v4905_v23 = vld [vmem:[#allocation11 + $0x718] sm:$0xff] }
 0x4fe   : > { %5555 = vmatpush.msra.mxu0 %v4909_v56  ;;  %5718 = vmatpush.msrb.mxu1 %v7216_v45  ;;  %v4829_v57 = vld [vmem:[#allocation11 + $0x4b8] sm:$0xff]  ;;  %v7220_v45 = vld [vmem:[#allocation11 + $0xa0] sm:$0xff] }
 0x4ff   : > { %5516 = vmatpush.msrb.mxu3 %v4837_v60  ;;  %5761 = vmatpush.msra.mxu2 %v7217_v12  ;;  %v4901_v8 = vld [vmem:[#allocation11 + $0x6f8] sm:$0xff]  ;;  %v7221_v12 = vld [vmem:[#allocation11 + $0x260] sm:$0xff] }
 0x500   : > { %5208 = vmatmul.f32.gmra.mxu3 %v9651_v21  ;;  %5290 = vmatmul.f32.gmra.mxu1 %v9569_v40  ;;  %v4897_v56 = vld [vmem:[#allocation11 + $0x6d8] sm:$0xff] }
 0x501   : > { %5719 = vmatpush.msrb.mxu1 %v7218_v61  ;;  %5762 = vmatpush.msra.mxu2 %v7219_v47  ;;  %v4893_v61 = vld [vmem:[#allocation11 + $0x6b8] sm:$0xff]  ;;  %v7222_v47 = vld [vmem:[#allocation11 + $0x80] sm:$0xff] }
 0x502   : > { %5252 = vmatmul.f32.gmra.mxu0 %v9653_v49  ;;  %5334 = vmatmul.f32.gmra.mxu2 %v9571_v59 }
 0x503   : > { %5517 = vmatpush.msrb.mxu3 %v4833_v37  ;;  %5556 = vmatpush.msra.mxu0 %v4905_v23  ;;  %v7223_v37 = vld [vmem:[#allocation11 + $0x240] sm:$0xff] }
 0x504   : > { %5720 = vmatpush.msrb.mxu1 %v7220_v45  ;;  %5763 = vmatpush.msra.mxu2 %v7221_v12  ;;  %v4889_v45 = vld [vmem:[#allocation11 + $0x698] sm:$0xff] }
 0x505   : > { %v9724_v63 = vpop.f32.mrf.mxu1  ;;  %v9738_v19 = vpop.f32.mrf.mxu2  ;;  %5518 = vmatpush.msrb.mxu3 %v4829_v57  ;;  %5557 = vmatpush.msra.mxu0 %v4901_v8  ;;  %v4825_v57 = vld [vmem:[#allocation11 + $0x498] sm:$0xff] }
 0x506   : > { %5721 = vmatpush.msrb.mxu1 %v7222_v47  ;;  %5764 = vmatpush.msra.mxu2 %v7223_v37  ;;  %v4821_v8 = vld [vmem:[#allocation11 + $0x478] sm:$0xff]  ;;  %v7224_v47 = vld [vmem:[#allocation11 + $0x60] sm:$0xff] }
 0x507   : > { %5558 = vmatpush.msra.mxu0 %v4897_v56  ;;  %5519 = vmatpush.msrb.mxu3 %v4825_v57  ;;  %v4885_v56 = vld [vmem:[#allocation11 + $0x678] sm:$0xff]  ;;  %v7225_v37 = vld [vmem:[#allocation11 + $0x220] sm:$0xff] }
 0x508   : > { %5211 = vmatmul.f32.gmra.mxu3 %v9661_v6  ;;  %5293 = vmatmul.f32.gmra.mxu1 %v9579_v1  ;;  %v7227_v57 = vld [vmem:[#allocation11 + $0x200] sm:$0xff] }
 0x509   : > { %5559 = vmatpush.msra.mxu0 %v4893_v61  ;;  %5520 = vmatpush.msrb.mxu3 %v4821_v8  ;;  %v4881_v61 = vld [vmem:[#allocation11 + $0x658] sm:$0xff] }
 0x50a   : > { %5255 = vmatmul.f32.gmra.mxu0 %v9663_v11  ;;  %5337 = vmatmul.f32.gmra.mxu2 %v9581_v25  ;;  %v4817_v8 = vld [vmem:[#allocation11 + $0x458] sm:$0xff] }
 0x50b   : > { %5560 = vmatpush.msra.mxu0 %v4889_v45  ;;  %5722 = vmatpush.msrb.mxu1 %v7224_v47  ;;  %v4873_v47 = vld [vmem:[#allocation11 + $0x618] sm:$0xff] }
 0x50c   : > { %5765 = vmatpush.msra.mxu2 %v7225_v37  ;;  %5521 = vmatpush.msrb.mxu3 %v4817_v8  ;;  %v7230_v37 = vld [vmem:[#allocation11 + $0x3c8] sm:$0xff]  ;;  %v4809_v8 = vld [vmem:[#allocation11 + $0x418] sm:$0xff] }
 0x50d   : > { %v9732_v0 = vpop.f32.mrf.mxu1  ;;  %v9748_v4 = vpop.f32.mrf.mxu2  ;;  %5561 = vmatpush.msra.mxu0 %v4885_v56  ;;  %v4813_v56 = vld [vmem:[#allocation11 + $0x438] sm:$0xff] }
 0x50e   : > { %5766 = vmatpush.msra.mxu2 %v7227_v57  ;;  %5522 = vmatpush.msrb.mxu3 %v4813_v56  ;;  %v7231_v57 = vld [vmem:[#allocation11 + $0x7e0] sm:$0xff]  ;;  %v7236_v56 = vld [vmem:[#allocation11 + $0x1c8] sm:$0xff] }
 0x50f   : > { %5562 = vmatpush.msra.mxu0 %v4881_v61 }
 0x510   : > { %5214 = vmatmul.f32.gmra.mxu3 %v9671_v17  ;;  %5296 = vmatmul.f32.gmra.mxu1 %v9588_v22 }
 0x511   : > { %5523 = vmatpush.msrb.mxu3 %v4809_v8  ;;  %v7241_v8 = vld [vmem:[#allocation11 + $0x7a0] sm:$0xff] }
 0x512   : > { %5258 = vmatmul.f32.gmra.mxu0 %v9673_v58  ;;  %5340 = vmatmul.f32.gmra.mxu2 %v9590_v5 }
 0x515   : > { %v9740_v52 = vpop.f32.mrf.mxu1  ;;  %v9762_v28 = vpop.f32.mrf.mxu2 }
 0x517   : > { %v9742_v48 = vpop.f32.mrf.mxu0 }
 0x518   : > { %5217 = vmatmul.f32.gmra.mxu3 %v9680_v26  ;;  %5299 = vmatmul.f32.gmra.mxu1 %v9599_v46 }
 0x51a   : > { %5401 = vmatmul.f32.vlgmr.msrb.gmra.mxu0 %v9604_v41  ;;  %5483 = vmatmul.f32.vlgmr.msrb.gmra.mxu2 %v9512_v35  ;;  %v4877_v35 = vld [vmem:[#allocation11 + $0x638] sm:$0xff] }
 0x51b   : > { %5563 = vmatpush.msra.mxu0 %v4877_v35 }
 0x51d   : > { %v9750_v14 = vpop.f32.mrf.mxu1  ;;  %5564 = vmatpush.msra.mxu0 %v4873_v47  ;;  %v7233_v47 = vld [vmem:[#allocation11 + $0x1e8] sm:$0xff] }
 0x51e   : > { %10986 = vst [vmem:[#allocation34_spill] sm:$0xff] %v9750_v14 }
 0x51f   : > { %v9752_v7 = vpop.f32.mrf.mxu0  ;;  %5833 = vmatpush.msrb.mxu0 %v7231_v57 }
 0x520   : > { %5360 = vmatmul.f32.vlgmr.msra.gmra.mxu3 %v9611_v62  ;;  %5442 = vmatmul.f32.vlgmr.msra.gmra.mxu1 %v9519_v53 }
 0x522   : > { %5404 = vmatmul.f32.gmra.mxu0 %v9613_v34  ;;  %5486 = vmatmul.f32.gmra.mxu2 %v9521_v44 }
 0x523   : > { %v9758_v33 = vpop.f32.mrf.mxu3 }
 0x525   : > { %v9760_v16 = vpop.f32.mrf.mxu1 }
 0x527   : > { %v9764_v39 = vpop.f32.mrf.mxu0 }
 0x528   : > { %5363 = vmatmul.f32.gmra.mxu3 %v9621_v43  ;;  %5445 = vmatmul.f32.gmra.mxu1 %v9533_v9 }
 0x52a   : > { %5407 = vmatmul.f32.gmra.mxu0 %v9623_v38  ;;  %5489 = vmatmul.f32.gmra.mxu2 %v9535_v29  ;;  %v9778_v29 = vpop.f32.mrf.mxu2 }
 0x52b   : > { %v9770_v60 = vpop.f32.mrf.mxu3  ;;  %10988 = vst [vmem:[#allocation36_spill] sm:$0xff] %v9778_v29  ;;  %v7232_v29 = vld [vmem:[#allocation11] sm:$0xff] }
 0x52d   : > { %v9774_v44 = vpop.f32.mrf.mxu1 }
 0x52e   : > { %10987 = vst [vmem:[#allocation35_spill] sm:$0xff] %v9774_v44  ;;  %v7226_v44 = vld [vmem:[#allocation11 + $0x40] sm:$0xff] }
 0x52f   : > { %v9772_v23 = vpop.f32.mrf.mxu0  ;;  %5723 = vmatpush.msrb.mxu1 %v7226_v44 }
 0x530   : > { %5366 = vmatmul.f32.gmra.mxu3 %v9631_v31  ;;  %5448 = vmatmul.f32.gmra.mxu1 %v9545_v13 }
 0x532   : > { %5410 = vmatmul.f32.gmra.mxu0 %v9633_v50  ;;  %5492 = vmatmul.f32.gmra.mxu2 %v9549_v10  ;;  %v7228_v10 = vld [vmem:[#allocation11 + $0x3e8] sm:$0xff]  ;;  %v9792_v44 = vpop.f32.mrf.mxu2 }
 0x533   : > { %v9782_v12 = vpop.f32.mrf.mxu3  ;;  %5915 = vmatpush.msrb.mxu2 %v7228_v10  ;;  %10990 = vst [vmem:[#allocation38_spill] sm:$0xff] %v9792_v44  ;;  %v7229_v10 = vld [vmem:[#allocation11 + $0x20] sm:$0xff] }
 0x534   : > { %5724 = vmatpush.msrb.mxu1 %v7229_v10  ;;  %v7237_v10 = vld [vmem:[#allocation11 + $0x5e0] sm:$0xff] }
 0x535   : > { %v9788_v61 = vpop.f32.mrf.mxu1  ;;  %5916 = vmatpush.msrb.mxu2 %v7230_v37  ;;  %5792 = vmatpush.msra.mxu3 %v7237_v10  ;;  %v7239_v37 = vld [vmem:[#allocation11 + $0x5c0] sm:$0xff] }
 0x536   : > { %10989 = vst [vmem:[#allocation37_spill] sm:$0xff] %v9788_v61  ;;  %5725 = vmatpush.msrb.mxu1 %v7232_v29  ;;  %v7234_v61 = vld [vmem:[#allocation11 + $0x3a8] sm:$0xff]  ;;  %v7243_v10 = vld [vmem:[#allocation11 + $0x5a0] sm:$0xff] }
 0x537   : > { %v9784_v45 = vpop.f32.mrf.mxu0  ;;  %5917 = vmatpush.msrb.mxu2 %v7234_v61  ;;  %v7238_v61 = vld [vmem:[#allocation11 + $0x1a8] sm:$0xff]  ;;  %5793 = vmatpush.msra.mxu3 %v7239_v37  ;;  %v7247_v37 = vld [vmem:[#allocation11 + $0x580] sm:$0xff] }
 0x538   : > { %5369 = vmatmul.f32.gmra.mxu3 %v9641_v2  ;;  %5451 = vmatmul.f32.gmra.mxu1 %v9559_v3 }
 0x539   : > { %5874 = vmatpush.msra.mxu1 %v7233_v47  ;;  %5794 = vmatpush.msra.mxu3 %v7243_v10  ;;  %v7251_v10 = vld [vmem:[#allocation11 + $0x540] sm:$0xff] }
 0x53a   : > { %5413 = vmatmul.f32.gmra.mxu0 %v9643_v24  ;;  %5495 = vmatmul.f32.gmra.mxu2 %v9561_v42  ;;  %v7235_v42 = vld [vmem:[#allocation11 + $0x7c0] sm:$0xff]  ;;  %v9806_v47 = vpop.f32.mrf.mxu2 }
 0x53b   : > { %v9794_v35 = vpop.f32.mrf.mxu3  ;;  %5834 = vmatpush.msrb.mxu0 %v7235_v42  ;;  %5875 = vmatpush.msra.mxu1 %v7236_v56  ;;  %v7240_v42 = vld [vmem:[#allocation11 + $0x388] sm:$0xff] }
 0x53c   : > { %5918 = vmatpush.msrb.mxu2 %v7240_v42  ;;  %v7242_v56 = vld [vmem:[#allocation11 + $0x188] sm:$0xff]  ;;  %5795 = vmatpush.msra.mxu3 %v7247_v37  ;;  %v4999_v37 = vadd.f32 %v9708_v51, %v9702_v30  ;;  %v7257_v51 = vld [vmem:[#allocation11 + $0x740] sm:$0xff] }
 0x53d   : > { %5876 = vmatpush.msra.mxu1 %v7238_v61  ;;  %v9804_v57 = vpop.f32.mrf.mxu1  ;;  %5835 = vmatpush.msrb.mxu0 %v7241_v8  ;;  %v7246_v61 = vld [vmem:[#allocation11 + $0x168] sm:$0xff]  ;;  %v7249_v8 = vld [vmem:[#allocation11 + $0x560] sm:$0xff] }
 0x53e   : > { %v7248_v42 = vld [vmem:[#allocation11 + $0x148] sm:$0xff]  ;;  %5796 = vmatpush.msra.mxu3 %v7249_v8 }
 0x53f   : > { %v9796_v14 = vpop.f32.mrf.mxu0  ;;  %5877 = vmatpush.msra.mxu1 %v7242_v56  ;;  %v4996_v56 = vadd.f32 %v9700_v32, %v9694_v36  ;;  %v7252_v8 = vld [vmem:[#allocation11 + $0x348] sm:$0xff]  ;;  %v7253_v36 = vld [vmem:[#allocation11 + $0x760] sm:$0xff] }
 0x540   : > { %5372 = vmatmul.f32.gmra.mxu3 %v9651_v21  ;;  %5454 = vmatmul.f32.gmra.mxu1 %v9569_v40  ;;  %v7244_v40 = vld [vmem:[#allocation11 + $0x368] sm:$0xff] }
 0x541   : > { %5919 = vmatpush.msrb.mxu2 %v7244_v40  ;;  %5878 = vmatpush.msra.mxu1 %v7246_v61  ;;  %v4993_v61 = vadd.f32 %v9690_v27, %v9686_v20  ;;  %v7254_v32 = vld [vmem:[#allocation11 + $0x108] sm:$0xff]  ;;  %v5040_v20 = vadd.f32 %v9782_v12, %v4999_v37  ;;  %v5008_v12 = vadd.f32 %v9738_v19, %v9724_v63  ;;  %v7263_v63 = vld [vmem:[#allocation11 + $0x4e0] sm:$0xff] }
 0x542   : > { %5416 = vmatmul.f32.gmra.mxu0 %v9653_v49  ;;  %5498 = vmatmul.f32.gmra.mxu2 %v9571_v59  ;;  %v7245_v59 = vld [vmem:[#allocation11 + $0x780] sm:$0xff]  ;;  %v7256_v30 = vld [vmem:[#allocation11 + $0x328] sm:$0xff] }
 0x543   : > { %v9802_v29 = vpop.f32.mrf.mxu3  ;;  %5836 = vmatpush.msrb.mxu0 %v7245_v59  ;;  %5879 = vmatpush.msra.mxu1 %v7248_v42  ;;  %v7250_v59 = vld [vmem:[#allocation11 + $0x128] sm:$0xff]  ;;  %v5037_v42 = vadd.f32 %v9770_v60, %v4996_v56  ;;  %v9827_v60 = vpop.f32.mrf.mxu2 }
 0x544   : > { %5797 = vmatpush.msra.mxu3 %v7251_v10  ;;  %5920 = vmatpush.msrb.mxu2 %v7252_v8  ;;  %v5034_v10 = vadd.f32 %v9758_v33, %v4993_v61  ;;  %v7258_v8 = vld [vmem:[#allocation11 + $0xe8] sm:$0xff] }
 0x545   : > { %5880 = vmatpush.msra.mxu1 %v7250_v59  ;;  %5837 = vmatpush.msrb.mxu0 %v7253_v36  ;;  %v5002_v59 = vadd.f32 %v9718_v18, %v9710_v15  ;;  %v9825_v27 = vpop.f32.mrf.mxu1  ;;  %v5005_v15 = vadd.f32 %v9728_v54, %v9716_v55  ;;  %v5078_v18 = vadd.f32 %v9752_v7, %v5037_v42  ;;  %v7260_v61 = vld [vmem:[#allocation11 + $0xc8] sm:$0xff] }
 0x546   : > { %5921 = vmatpush.msrb.mxu2 %v7256_v30  ;;  %v7261_v37 = vld [vmem:[#allocation11 + $0x308] sm:$0xff]  ;;  %v5075_v36 = vadd.f32 %v9742_v48, %v5034_v10  ;;  %v5011_v54 = vadd.f32 %v9748_v4, %v9732_v0  ;;  %v7267_v10 = vld [vmem:[#allocation11 + $0x4c0] sm:$0xff] }
 0x547   : > { %v9808_v44 = vpop.f32.mrf.mxu0  ;;  %5881 = vmatpush.msra.mxu1 %v7254_v32  ;;  %5838 = vmatpush.msrb.mxu0 %v7257_v51  ;;  %v5043_v33 = vadd.f32 %v9794_v35, %v5002_v59  ;;  %v5081_v32 = vadd.f32 %v9764_v39, %v5040_v20  ;;  %v5046_v55 = vadd.f32 %v9802_v29, %v5005_v15  ;;  %v7262_v35 = vld [vmem:[#allocation11 + $0xa8] sm:$0xff]  ;;  %v7265_v39 = vld [vmem:[#allocation11 + $0x720] sm:$0xff] }
 0x548   : > { %5375 = vmatmul.f32.gmra.mxu3 %v9661_v6  ;;  %5457 = vmatmul.f32.gmra.mxu1 %v9579_v1  ;;  %v5590_v19 = vadd.f32 %v5078_v18, %v5075_v36  ;;  %v7264_v59 = vld [vmem:[#allocation11 + $0x2e8] sm:$0xff]  ;;  %v7269_v51 = vld [vmem:[#allocation11 + $0x700] sm:$0xff] }
 0x549   : > { %5882 = vmatpush.msra.mxu1 %v7258_v8  ;;  %5922 = vmatpush.msrb.mxu2 %v7261_v37  ;;  %v5084_v42 = vadd.f32 %v9772_v23, %v5043_v33  ;;  %v7266_v29 = vld [vmem:[#allocation11 + $0x88] sm:$0xff]  ;;  %v5087_v0 = vadd.f32 %v9784_v45, %v5046_v55 }
 0x54a   : > { %5419 = vmatmul.f32.gmra.mxu0 %v9663_v11  ;;  %5501 = vmatmul.f32.gmra.mxu2 %v9581_v25  ;;  %v7255_v25 = vld [vmem:[#allocation11 + $0x520] sm:$0xff]  ;;  %v5591_v20 = vadd.f32 %v5590_v19, %v5081_v32  ;;  %v7268_v30 = vld [vmem:[#allocation11 + $0x2c8] sm:$0xff] }
 0x54b   : > { %v5048_v40 = vpop.f32.mrf.mxu3  ;;  %5798 = vmatpush.msra.mxu3 %v7255_v25  ;;  %v7259_v25 = vld [vmem:[#allocation11 + $0x500] sm:$0xff]  ;;  %5883 = vmatpush.msra.mxu1 %v7260_v61  ;;  %v7270_v23 = vld [vmem:[#allocation11 + $0x68] sm:$0xff]  ;;  %v9855_v45 = vpop.f32.mrf.mxu2  ;;  %v5014_v61 = vadd.f32 %v9762_v28, %v9740_v52 }
 0x54c   : > { %v5049_v48 = vadd.f32 %v5048_v40, %v5008_v12  ;;  %5923 = vmatpush.msrb.mxu2 %v7264_v59  ;;  %5839 = vmatpush.msrb.mxu0 %v7265_v39  ;;  %v7271_v40 = vld [vmem:[#allocation11 + $0x4a0] sm:$0xff]  ;;  %v7272_v33 = vld [vmem:[#allocation11 + $0x48] sm:$0xff] }
 0x54d   : > { %5799 = vmatpush.msra.mxu3 %v7259_v25  ;;  %5884 = vmatpush.msra.mxu1 %v7262_v35  ;;  %v5592_v25 = vadd.f32 %v5591_v20, %v5084_v42  ;;  %v9851_v18 = vpop.f32.mrf.mxu1  ;;  %v7273_v12 = vld [vmem:[#allocation11 + $0x2a8] sm:$0xff]  ;;  %v7278_v19 = vld [vmem:[#allocation11 + $0x6e0] sm:$0xff] }
 0x54e   : > { %5924 = vmatpush.msrb.mxu2 %v7268_v30  ;;  %5840 = vmatpush.msrb.mxu0 %v7269_v51  ;;  %v5090_v15 = vadd.f32 %v9796_v14, %v5049_v48  ;;  %v7274_v14 = vld [vmem:[#allocation11 + $0x480] sm:$0xff]  ;;  %v7275_v55 = vld [vmem:[#allocation11 + $0x28] sm:$0xff] }
 0x54f   : > { %v9829_v56 = vpop.f32.mrf.mxu0  ;;  %5800 = vmatpush.msra.mxu3 %v7263_v63  ;;  %5885 = vmatpush.msra.mxu1 %v7266_v29  ;;  %v5593_v37 = vadd.f32 %v5592_v25, %v5087_v0  ;;  %v7277_v63 = vld [vmem:[#allocation11 + $0x460] sm:$0xff]  ;;  %v7279_v42 = vld [vmem:[#allocation11 + $0x8] sm:$0xff] }
 0x550   : > { %5378 = vmatmul.f32.gmra.mxu3 %v9671_v17  ;;  %5460 = vmatmul.f32.gmra.mxu1 %v9588_v22  ;;  %v7280_v52 = vld [vmem:[#allocation11 + $0x268] sm:$0xff]  ;;  %v7281_v48 = vld [vmem:[#allocation11 + $0x440] sm:$0xff] }
 0x551   : > { %5801 = vmatpush.msra.mxu3 %v7267_v10  ;;  %5886 = vmatpush.msra.mxu1 %v7270_v23  ;;  %v7282_v59 = vld [vmem:[#allocation11 + $0x6c0] sm:$0xff]  ;;  %v7283_v29 = vld [vmem:[#allocation11 + $0x248] sm:$0xff] }
 0x552   : > { %5422 = vmatmul.f32.gmra.mxu0 %v9673_v58  ;;  %5504 = vmatmul.f32.gmra.mxu2 %v9590_v5  ;;  %v7284_v20 = vld [vmem:[#allocation11 + $0x6a0] sm:$0xff]  ;;  %v7288_v25 = vld [vmem:[#allocation11 + $0x208] sm:$0xff] }
 0x553   : > { %v5051_v7 = vpop.f32.mrf.mxu3  ;;  %5802 = vmatpush.msra.mxu3 %v7271_v40  ;;  %5887 = vmatpush.msra.mxu1 %v7272_v33  ;;  %v7285_v0 = vld [vmem:[#allocation11 + $0x420] sm:$0xff]  ;;  %v9868_v51 = vpop.f32.mrf.mxu2  ;;  %v7289_v33 = vld [vmem:[#allocation11 + $0x5e8] sm:$0xff] }
 0x554   : > { %v5052_v4 = vadd.f32 %v5051_v7, %v5011_v54  ;;  %5925 = vmatpush.msrb.mxu2 %v7273_v12  ;;  %v7276_v54 = vld [vmem:[#allocation11 + $0x288] sm:$0xff]  ;;  %v5594_v7 = vadd.f32 %v5593_v37, %v5090_v15  ;;  %5841 = vmatpush.msrb.mxu0 %v7278_v19  ;;  %v7287_v40 = vld [vmem:[#allocation11 + $0x400] sm:$0xff] }
 0x555   : > { %5803 = vmatpush.msra.mxu3 %v7274_v14  ;;  %5888 = vmatpush.msra.mxu1 %v7275_v55  ;;  %v9865_v30 = vpop.f32.mrf.mxu1  ;;  %v7290_v12 = vld [vmem:[#allocation11 + $0x680] sm:$0xff]  ;;  %v7291_v37 = vld [vmem:[#allocation11 + $0x5c8] sm:$0xff] }
 0x556   : > { %v5093_v36 = vadd.f32 %v9808_v44, %v5052_v4  ;;  %5926 = vmatpush.msrb.mxu2 %v7276_v54  ;;  %5842 = vmatpush.msrb.mxu0 %v7282_v59  ;;  %v7286_v4 = vld [vmem:[#allocation11 + $0x228] sm:$0xff]  ;;  %v7293_v55 = vld [vmem:[#allocation11 + $0x640] sm:$0xff] }
 0x557   : > { %v9848_v8 = vpop.f32.mrf.mxu0  ;;  %5804 = vmatpush.msra.mxu3 %v7277_v63  ;;  %5889 = vmatpush.msra.mxu1 %v7279_v42  ;;  %v7294_v54 = vld [vmem:[#allocation11 + $0x5a8] sm:$0xff]  ;;  %v7296_v19 = vld [vmem:[#allocation11 + $0x620] sm:$0xff] }
 0x558   : > { %5381 = vmatmul.f32.gmra.mxu3 %v9680_v26  ;;  %5463 = vmatmul.f32.gmra.mxu1 %v9599_v46  ;;  %v5595_v28 = vadd.f32 %v5594_v7, %v5093_v36  ;;  %v7292_v36 = vld [vmem:[#allocation11 + $0x660] sm:$0xff]  ;;  %v7295_v63 = vld [vmem:[#allocation11 + $0x588] sm:$0xff] }
 0x559   : > { %5927 = vmatpush.msrb.mxu2 %v7280_v52  ;;  %5805 = vmatpush.msra.mxu3 %v7281_v48  ;;  %v7298_v48 = vld [vmem:[#allocation11 + $0x600] sm:$0xff] }
 0x55a   : > { %5565 = vmatmul.f32.vlgmr.msra.gmra.mxu0 %v9604_v41 }
 0x55b   : > { %v5054_v32 = vpop.f32.mrf.mxu3  ;;  %5928 = vmatpush.msrb.mxu2 %v7283_v29  ;;  %5843 = vmatpush.msrb.mxu0 %v7284_v20  ;;  %v7299_v29 = vld [vmem:[#allocation11 + $0x7e8] sm:$0xff] }
 0x55c   : > { %v5055_v35 = vadd.f32 %v5054_v32, %v5014_v61  ;;  %5806 = vmatpush.msra.mxu3 %v7285_v0  ;;  %v7300_v20 = vld [vmem:[#allocation11 + $0x548] sm:$0xff] }
 0x55d   : > { %5929 = vmatpush.msrb.mxu2 %v7286_v4  ;;  %5844 = vmatpush.msrb.mxu0 %v7290_v12  ;;  %v9878_v52 = vpop.f32.mrf.mxu1  ;;  %v7301_v4 = vld [vmem:[#allocation11 + $0x528] sm:$0xff] }
 0x55e   : > { %v5096_v44 = vadd.f32 %v9829_v56, %v5055_v35  ;;  %5807 = vmatpush.msra.mxu3 %v7287_v40 }
 0x55f   : > { %v9862_v39 = vpop.f32.mrf.mxu0  ;;  %5930 = vmatpush.msrb.mxu2 %v7288_v25  ;;  %5845 = vmatpush.msrb.mxu0 %v7292_v36  ;;  %v7302_v25 = vld [vmem:[#allocation11 + $0x508] sm:$0xff] }
 0x560   : > { %v5596_v10 = vadd.f32 %v5595_v28, %v5096_v44  ;;  %5524 = vmatmul.f32.vlgmr.msrb.gmra.mxu3 %v9611_v62  ;;  %v9880_v28 = vpop.f32.mrf.mxu2  ;;  %v7297_v44 = vld [vmem:[#allocation11 + $0x568] sm:$0xff] }
 0x561   : > { %5956 = vmatpush.msrb.mxu3 %v7289_v33  ;;  %5846 = vmatpush.msrb.mxu0 %v7293_v55  ;;  %v7304_v33 = vld [vmem:[#allocation11 + $0x1f0] sm:$0xff] }
 0x562   : > { %v5597_v56 = vrot.slane %v5596_v10, 4  ;;  %5568 = vmatmul.f32.gmra.mxu0 %v9613_v34  ;;  %v7307_v55 = vld [vmem:[#allocation11 + $0x1d0] sm:$0xff] }
 0x563   : > { %v9870_v23 = vpop.f32.mrf.mxu3  ;;  %5957 = vmatpush.msrb.mxu3 %v7291_v37  ;;  %5847 = vmatpush.msrb.mxu0 %v7296_v19  ;;  %v7306_v37 = vld [vmem:[#allocation11 + $0x7a8] sm:$0xff] }
 0x564   : > { %v5598_v15 = vadd.f32 %v5597_v56, %v5596_v10  ;;  %v7311_v19 = vld [vmem:[#allocation11 + $0x4a8] sm:$0xff] }
 0x565   : > { %5958 = vmatpush.msrb.mxu3 %v7294_v54  ;;  %5848 = vmatpush.msrb.mxu0 %v7298_v48  ;;  %v9899_v12 = vpop.f32.mrf.mxu1  ;;  %v7308_v54 = vld [vmem:[#allocation11 + $0x4c8] sm:$0xff] }
 0x566   : > { %v5599_v61 = vrot.slane %v5598_v15, 2  ;;  %v7313_v48 = vld [vmem:[#allocation11 + $0x488] sm:$0xff] }
 0x567   : > { %v9872_v14 = vpop.f32.mrf.mxu0  ;;  %5959 = vmatpush.msrb.mxu3 %v7295_v63  ;;  %5997 = vmatpush.msra.mxu0 %v7299_v29  ;;  %v7310_v63 = vld [vmem:[#allocation11 + $0x1b0] sm:$0xff]  ;;  %v7314_v29 = vld [vmem:[#allocation11 + $0x768] sm:$0xff] }
 0x568   : > { %v5600_v32 = vadd.f32 %v5599_v61, %v5598_v15  ;;  %5527 = vmatmul.f32.gmra.mxu3 %v9621_v43  ;;  %v7303_v15 = vld [vmem:[#allocation11 + $0x7c8] sm:$0xff]  ;;  %v9905_v36 = vpop.f32.mrf.mxu2 }
 0x569   : > { %5960 = vmatpush.msrb.mxu3 %v7297_v44  ;;  %5998 = vmatpush.msra.mxu0 %v7303_v15  ;;  %v7312_v44 = vld [vmem:[#allocation11 + $0x190] sm:$0xff]  ;;  %v7317_v15 = vld [vmem:[#allocation11 + $0x748] sm:$0xff] }
 0x56a   : > { %v5601_v7 = vrot.slane %v5600_v32, 1  ;;  %5571 = vmatmul.f32.gmra.mxu0 %v9623_v38 }
 0x56b   : > { %v9876_v35 = vpop.f32.mrf.mxu3  ;;  %5961 = vmatpush.msrb.mxu3 %v7300_v20  ;;  %5999 = vmatpush.msra.mxu0 %v7306_v37  ;;  %v7315_v20 = vld [vmem:[#allocation11 + $0x170] sm:$0xff]  ;;  %v7319_v37 = vld [vmem:[#allocation11 + $0x448] sm:$0xff] }
 0x56c   : > { %v5602_v42 = vadd.f32 %v5601_v7, %v5600_v32  ;;  %v7309_v7 = vld [vmem:[#allocation11 + $0x788] sm:$0xff] }
 0x56d   : > { %5962 = vmatpush.msrb.mxu3 %v7301_v4  ;;  %6000 = vmatpush.msra.mxu0 %v7309_v7  ;;  %v7316_v4 = vld [vmem:[#allocation11 + $0x468] sm:$0xff] }
 0x56e   : > { %v9882_v59 = vmul.f32 0.0009765625, %v5602_v42 }
 0x56f   : > { %v9884_v10 = vpop.f32.mrf.mxu0  ;;  %5963 = vmatpush.msrb.mxu3 %v7302_v25  ;;  %6001 = vmatpush.msra.mxu0 %v7314_v29  ;;  %v7324_v29 = vld [vmem:[#allocation11 + $0x408] sm:$0xff] }
 0x570   : > { %5530 = vmatmul.f32.gmra.mxu3 %v9631_v31  ;;  %v9889_v0 = vsub.f32 %v9519_v53, %v9882_v59  ;;  %v7305_v53 = vld [vmem:[#allocation11 + $0x4e8] sm:$0xff]  ;;  %v9903_v61 = vsub.f32 %v9533_v9, %v9882_v59  ;;  %v9920_v25 = vsub.f32 %v9545_v13, %v9882_v59  ;;  %v9927_v7 = vpop.f32.mrf.mxu2 }
 0x571   : > { %5964 = vmatpush.msrb.mxu3 %v7305_v53  ;;  %6002 = vmatpush.msra.mxu0 %v7317_v15  ;;  %v7318_v53 = vld [vmem:[#allocation11 + $0x150] sm:$0xff]  ;;  %v7322_v13 = vld [vmem:[#allocation11 + $0x428] sm:$0xff]  ;;  %v9937_v15 = vsub.f32 %v9559_v3, %v9882_v59 }
 0x572   : > { %10991 = vst [vmem:[#allocation39_spill] sm:$0xff] %v9889_v0  ;;  %5574 = vmatmul.f32.gmra.mxu0 %v9633_v50  ;;  %v9894_v56 = vmul.f32 %v9889_v0, %v9889_v0  ;;  %v9913_v9 = vmul.f32 %v9903_v61, %v9903_v61  ;;  %v10998_v0 = vld [vmem:[#allocation35_spill] sm:$0xff]  ;;  %v7365_v50 = vld [vmem:[#allocation11 + $0x98] sm:$0xff] }
 0x573   : > { %v9896_v40 = vpop.f32.mrf.mxu3  ;;  %10992 = vst [vmem:[#allocation40_spill] sm:$0xff] %v9903_v61  ;;  %5965 = vmatpush.msrb.mxu3 %v7308_v54  ;;  %v7320_v54 = vld [vmem:[#allocation11 + $0x728] sm:$0xff]  ;;  %v9949_v3 = vmul.f32 %v9937_v15, %v9937_v15 }
 0x574   : > { %5726 = vmatmul.f32.vlgmr.msrb.gmra.mxu1 %v9894_v56  ;;  %10993 = vst [vmem:[#allocation41_spill] sm:$0xff] %v9920_v25  ;;  %6003 = vmatpush.msra.mxu0 %v7320_v54  ;;  %v7328_v54 = vld [vmem:[#allocation11 + $0xd0] sm:$0xff] }
 0x575   : > { %6038 = vmatpush.msrb.mxu1 %v7304_v33  ;;  %5966 = vmatpush.msrb.mxu3 %v7311_v19  ;;  %v9932_v19 = vmul.f32 %v9920_v25, %v9920_v25  ;;  %10994 = vst [vmem:[#allocation42_spill] sm:$0xff] %v9937_v15  ;;  %v7332_v25 = vld [vmem:[#allocation11 + $0x6a8] sm:$0xff] }
 0x576   : > { %v7334_v15 = vld [vmem:[#allocation11 + $0x688] sm:$0xff] }
 0x577   : > { %v9907_v32 = vpop.f32.mrf.mxu0  ;;  %6039 = vmatpush.msrb.mxu1 %v7307_v55  ;;  %5967 = vmatpush.msrb.mxu3 %v7313_v48  ;;  %v9924_v55 = vpop.f32.mrf.mxu1  ;;  %v7323_v48 = vld [vmem:[#allocation11 + $0x110] sm:$0xff] }
 0x578   : > { %5533 = vmatmul.f32.gmra.mxu3 %v9641_v2 }
 0x579   : > { %6040 = vmatpush.msrb.mxu1 %v7310_v63  ;;  %5968 = vmatpush.msrb.mxu3 %v7316_v4  ;;  %v7321_v63 = vld [vmem:[#allocation11 + $0x130] sm:$0xff] }
 0x57a   : > { %5577 = vmatmul.f32.gmra.mxu0 %v9643_v24  ;;  %v7326_v4 = vld [vmem:[#allocation11 + $0xf0] sm:$0xff] }
 0x57b   : > { %v9915_v42 = vpop.f32.mrf.mxu3  ;;  %6041 = vmatpush.msrb.mxu1 %v7312_v44  ;;  %5969 = vmatpush.msrb.mxu3 %v7319_v37 }
 0x57c   : > { %5729 = vmatmul.f32.gmra.mxu1 %v9913_v9 }
 0x57d   : > { %6042 = vmatpush.msrb.mxu1 %v7315_v20  ;;  %5970 = vmatpush.msrb.mxu3 %v7322_v13  ;;  %v7325_v20 = vld [vmem:[#allocation11 + $0x708] sm:$0xff]  ;;  %v7330_v13 = vld [vmem:[#allocation11 + $0xb0] sm:$0xff] }
 0x57e   : > { %6004 = vmatpush.msra.mxu0 %v7325_v20 }
 0x57f   : > { %v9922_v33 = vpop.f32.mrf.mxu0  ;;  %6043 = vmatpush.msrb.mxu1 %v7318_v53  ;;  %5971 = vmatpush.msrb.mxu3 %v7324_v29  ;;  %v7327_v53 = vld [vmem:[#allocation11 + $0x6e8] sm:$0xff]  ;;  %v9944_v20 = vpop.f32.mrf.mxu1 }
 0x580   : > { %5536 = vmatmul.f32.gmra.mxu3 %v9651_v21  ;;  %6005 = vmatpush.msra.mxu0 %v7327_v53 }
 0x581   : > { %6044 = vmatpush.msrb.mxu1 %v7321_v63  ;;  %v7329_v63 = vld [vmem:[#allocation11 + $0x6c8] sm:$0xff] }
 0x582   : > { %5580 = vmatmul.f32.gmra.mxu0 %v9653_v49  ;;  %v10999_v49 = vld [vmem:[#allocation37_spill] sm:$0xff] }
 0x583   : > { %v5209_v44 = vpop.f32.mrf.mxu3  ;;  %6045 = vmatpush.msrb.mxu1 %v7323_v48  ;;  %6006 = vmatpush.msra.mxu0 %v7329_v63  ;;  %v10995_v48 = vld [vmem:[#allocation38_spill] sm:$0xff]  ;;  %v5166_v24 = vadd.f32 %v9827_v60, %v10999_v49  ;;  %v5172_v60 = vadd.f32 %v9868_v51, %v9825_v27  ;;  %v5175_v27 = vadd.f32 %v9880_v28, %v9851_v18 }
 0x584   : > { %5732 = vmatmul.f32.gmra.mxu1 %v9932_v19  ;;  %v5160_v29 = vadd.f32 %v10995_v48, %v9760_v16  ;;  %v10996_v63 = vld [vmem:[#allocation34_spill] sm:$0xff]  ;;  %v5163_v16 = vadd.f32 %v9806_v47, %v10998_v0  ;;  %v7335_v0 = vld [vmem:[#allocation11 + $0x50] sm:$0xff] }
 0x585   : > { %6046 = vmatpush.msrb.mxu1 %v7326_v4  ;;  %v9951_v4 = vpop.f32.mrf.mxu2  ;;  %6007 = vmatpush.msra.mxu0 %v7332_v25  ;;  %v5207_v49 = vadd.f32 %v9915_v42, %v5166_v24 }
 0x586   : > { %v5201_v48 = vadd.f32 %v9876_v35, %v5160_v29  ;;  %v5204_v25 = vadd.f32 %v9896_v40, %v5163_v16  ;;  %v7336_v35 = vld [vmem:[#allocation11 + $0x668] sm:$0xff] }
 0x587   : > { %v9939_v37 = vpop.f32.mrf.mxu0  ;;  %6047 = vmatpush.msrb.mxu1 %v7328_v54  ;;  %v7331_v54 = vld [vmem:[#allocation11 + $0x90] sm:$0xff]  ;;  %6008 = vmatpush.msra.mxu0 %v7334_v15  ;;  %v7338_v40 = vld [vmem:[#allocation11 + $0x648] sm:$0xff]  ;;  %v9984_v42 = vpop.f32.mrf.mxu1 }
 0x588   : > { %5539 = vmatmul.f32.gmra.mxu3 %v9661_v6  ;;  %v5242_v15 = vadd.f32 %v9862_v39, %v5201_v48  ;;  %v5245_v29 = vadd.f32 %v9872_v14, %v5204_v25  ;;  %v7340_v39 = vld [vmem:[#allocation11 + $0x628] sm:$0xff] }
 0x589   : > { %6048 = vmatpush.msrb.mxu1 %v7330_v13  ;;  %v10997_v13 = vld [vmem:[#allocation36_spill] sm:$0xff]  ;;  %6009 = vmatpush.msra.mxu0 %v7336_v35  ;;  %v7341_v48 = vld [vmem:[#allocation11 + $0x608] sm:$0xff] }
 0x58a   : > { %5583 = vmatmul.f32.gmra.mxu0 %v9663_v11  ;;  %v5157_v61 = vadd.f32 %v10997_v13, %v10996_v63  ;;  %v7333_v11 = vld [vmem:[#allocation11 + $0x70] sm:$0xff]  ;;  %v11000_v63 = vld [vmem:[#allocation29_spill] sm:$0xff] }
 0x58b   : > { %v5212_v53 = vpop.f32.mrf.mxu3  ;;  %6049 = vmatpush.msrb.mxu1 %v7331_v54  ;;  %v9965_v13 = vsub.f32 %v11000_v63, %v9882_v59  ;;  %6010 = vmatpush.msra.mxu0 %v7338_v40  ;;  %v10010_v40 = vsub.f32 %v9588_v22, %v9882_v59  ;;  %v10025_v22 = vsub.f32 %v9599_v46, %v9882_v59 }
 0x58c   : > { %5735 = vmatmul.f32.gmra.mxu1 %v9949_v3  ;;  %v5198_v54 = vadd.f32 %v9870_v23, %v5157_v61  ;;  %v7337_v23 = vld [vmem:[#allocation11 + $0x30] sm:$0xff]  ;;  %v5213_v14 = vadd.f32 %v5212_v53, %v5172_v60  ;;  %v5178_v53 = vadd.f32 %v9905_v36, %v9865_v30 }
 0x58d   : > { %6050 = vmatpush.msrb.mxu1 %v7333_v11  ;;  %11001 = vst [vmem:[#allocation38_spill] sm:$0xff] %v9965_v13  ;;  %v5169_v11 = vadd.f32 %v9855_v45, %v9804_v57  ;;  %v9979_v57 = vmul.f32 %v9965_v13, %v9965_v13  ;;  %v7339_v45 = vld [vmem:[#allocation11 + $0x10] sm:$0xff]  ;;  %6011 = vmatpush.msra.mxu0 %v7340_v39 }
 0x58e   : > { %v5239_v61 = vadd.f32 %v9848_v8, %v5198_v54  ;;  %v5248_v8 = vadd.f32 %v9884_v10, %v5207_v49  ;;  %v5254_v10 = vadd.f32 %v9922_v33, %v5213_v14  ;;  %11003 = vst [vmem:[#allocation36_spill] sm:$0xff] %v10010_v40  ;;  %v10035_v14 = vmul.f32 %v10025_v22, %v10025_v22 }
 0x58f   : > { %v5259_v47 = vpop.f32.mrf.mxu0  ;;  %6051 = vmatpush.msrb.mxu1 %v7335_v0  ;;  %v5210_v16 = vadd.f32 %v5209_v44, %v5169_v11  ;;  %v9987_v44 = vpop.f32.mrf.mxu2  ;;  %6012 = vmatpush.msra.mxu0 %v7341_v48  ;;  %v9992_v0 = vsub.f32 %v9579_v1, %v9882_v59  ;;  %11004 = vst [vmem:[#allocation35_spill] sm:$0xff] %v10025_v22  ;;  %v11005_v59 = vld [vmem:[#allocation28_spill] sm:$0xff] }
 0x590   : > { %5542 = vmatmul.f32.gmra.mxu3 %v9671_v17  ;;  %v5603_v51 = vadd.f32 %v5242_v15, %v5239_v61  ;;  %v10006_v60 = vpop.f32.mrf.mxu1  ;;  %v7355_v22 = vld [vmem:[#allocation11 + $0x138] sm:$0xff] }
 0x591   : > { %6052 = vmatpush.msrb.mxu1 %v7337_v23  ;;  %v5251_v25 = vadd.f32 %v9907_v32, %v5210_v16  ;;  %11002 = vst [vmem:[#allocation34_spill] sm:$0xff] %v9992_v0  ;;  %v10003_v32 = vmul.f32 %v9992_v0, %v9992_v0  ;;  %v7357_v0 = vld [vmem:[#allocation11 + $0x118] sm:$0xff] }
 0x592   : > { %5586 = vmatmul.f32.gmra.mxu0 %v9673_v58  ;;  %v5604_v54 = vadd.f32 %v5603_v51, %v5245_v29  ;;  %v10018_v29 = vmul.f32 %v10010_v40, %v10010_v40  ;;  %v7364_v58 = vld [vmem:[#allocation11 + $0x290] sm:$0xff] }
 0x593   : > { %v5215_v24 = vpop.f32.mrf.mxu3  ;;  %6053 = vmatpush.msrb.mxu1 %v7339_v45 }
 0x594   : > { %5738 = vmatmul.f32.gmra.mxu1 %v9979_v57  ;;  %v5216_v63 = vadd.f32 %v5215_v24, %v5175_v27  ;;  %v5605_v28 = vadd.f32 %v5604_v54, %v5248_v8 }
 0x596   : > { %v5606_v35 = vadd.f32 %v5605_v28, %v5251_v25  ;;  %v5257_v11 = vadd.f32 %v9939_v37, %v5216_v63 }
 0x597   : > { %v9994_v18 = vpop.f32.mrf.mxu0  ;;  %v10012_v30 = vpop.f32.mrf.mxu2 }
 0x598   : > { %5545 = vmatmul.f32.gmra.mxu3 %v9680_v26  ;;  %v5607_v1 = vadd.f32 %v5606_v35, %v5254_v10  ;;  %v10029_v39 = vpop.f32.mrf.mxu1 }
 0x59a   : > { %v5608_v33 = vadd.f32 %v5607_v1, %v5257_v11  ;;  %v7342_v11 = vld [vmem:[#allocation11 + $0x3f0] sm:$0xff]  ;;  %v11007_v1 = vld [vmem:[#allocation22_spill] sm:$0xff] }
 0x59b   : > { %v5218_v15 = vpop.f32.mrf.mxu3 }
 0x59c   : > { %v5219_v49 = vadd.f32 %v5218_v15, %v5178_v53  ;;  %5741 = vmatmul.f32.gmra.mxu1 %v10003_v32  ;;  %v7343_v15 = vld [vmem:[#allocation11 + $0x1f8] sm:$0xff] }
 0x59e   : > { %v5260_v23 = vadd.f32 %v5259_v47, %v5219_v49 }
 0x59f   : > { %v10014_v36 = vpop.f32.mrf.mxu0  ;;  %v10031_v51 = vpop.f32.mrf.mxu2 }
 0x5a0   : > { %v5609_v37 = vadd.f32 %v5608_v33, %v5260_v23  ;;  %v10048_v28 = vpop.f32.mrf.mxu1  ;;  %v7344_v23 = vld [vmem:[#allocation11 + $0x3d0] sm:$0xff] }
 0x5a2   : > { %v5610_v61 = vrot.slane %v5609_v37, 4 }
 0x5a3   : > { %v10020_v16 = vpop.f32.mrf.mxu3 }
 0x5a4   : > { %v5611_v24 = vadd.f32 %v5610_v61, %v5609_v37  ;;  %5744 = vmatmul.f32.gmra.mxu1 %v10018_v29  ;;  %v7345_v37 = vld [vmem:[#allocation11 + $0x1d8] sm:$0xff]  ;;  %v7346_v61 = vld [vmem:[#allocation11 + $0x3b0] sm:$0xff] }
 0x5a6   : > { %v5612_v47 = vrot.slane %v5611_v24, 2 }
 0x5a7   : > { %v10027_v45 = vpop.f32.mrf.mxu0  ;;  %v10054_v53 = vpop.f32.mrf.mxu2 }
 0x5a8   : > { %v5613_v27 = vadd.f32 %v5612_v47, %v5611_v24  ;;  %v7347_v24 = vld [vmem:[#allocation11 + $0x1b8] sm:$0xff] }
 0x5aa   : > { %v5614_v8 = vrot.slane %v5613_v27, 1 }
 0x5ab   : > { %v10037_v48 = vpop.f32.mrf.mxu3 }
 0x5ac   : > { %v5615_v54 = vadd.f32 %v5614_v8, %v5613_v27  ;;  %5747 = vmatmul.f32.gmra.mxu1 %v10035_v14  ;;  %v7348_v8 = vld [vmem:[#allocation11 + $0x390] sm:$0xff] }
 0x5ae   : > { %v10040_v25 = vmul.f32 0.0009765625, %v5615_v54  ;;  %v7349_v54 = vld [vmem:[#allocation11 + $0x198] sm:$0xff] }
 0x5af   : > { %v10042_v46 = vpop.f32.mrf.mxu0 }
 0x5b0   : > { %v10046_v63 = vsub.f32 %v11005_v59, %v10040_v25  ;;  %v10062_v49 = vsub.f32 %v11007_v1, %v10040_v25  ;;  %v10072_v59 = vpop.f32.mrf.mxu1  ;;  %v7351_v1 = vld [vmem:[#allocation11 + $0x178] sm:$0xff] }
 0x5b2   : > { %11006 = vst [vmem:[#allocation37_spill] sm:$0xff] %v10046_v63  ;;  %v10052_v10 = vmul.f32 %v10046_v63, %v10046_v63  ;;  %v10068_v47 = vmul.f32 %v10062_v49, %v10062_v49  ;;  %v7363_v63 = vld [vmem:[#allocation11 + $0xb8] sm:$0xff] }
 0x5b3   : > { %v10056_v35 = vpop.f32.mrf.mxu3  ;;  %11008 = vst [vmem:[#allocation29_spill] sm:$0xff] %v10062_v49  ;;  %v7362_v49 = vld [vmem:[#allocation11 + $0x2b0] sm:$0xff] }
 0x5b4   : > { %5767 = vmatmul.f32.vlgmr.msra.gmra.mxu2 %v10052_v10  ;;  %5890 = vmatmul.f32.vlgmr.msra.gmra.mxu1 %v9894_v56 }
 0x5b5   : > { %6079 = vmatpush.msra.mxu2 %v7342_v11  ;;  %6202 = vmatpush.msra.mxu1 %v7343_v15  ;;  %v10076_v11 = vpop.f32.mrf.mxu2  ;;  %v7350_v15 = vld [vmem:[#allocation11 + $0x370] sm:$0xff] }
 0x5b7   : > { %v10064_v33 = vpop.f32.mrf.mxu0  ;;  %6080 = vmatpush.msra.mxu2 %v7344_v23  ;;  %6203 = vmatpush.msra.mxu1 %v7345_v37  ;;  %v11009_v23 = vld [vmem:[#allocation21_spill] sm:$0xff] }
 0x5b8   : > { %v10080_v37 = vsub.f32 %v11009_v23, %v10040_v25  ;;  %v7358_v23 = vld [vmem:[#allocation11 + $0x2f0] sm:$0xff] }
 0x5b9   : > { %6081 = vmatpush.msra.mxu2 %v7346_v61  ;;  %6204 = vmatpush.msra.mxu1 %v7347_v24  ;;  %v7352_v24 = vld [vmem:[#allocation11 + $0x350] sm:$0xff] }
 0x5ba   : > { %11010 = vst [vmem:[#allocation28_spill] sm:$0xff] %v10080_v37  ;;  %v10086_v40 = vmul.f32 %v10080_v37, %v10080_v37 }
 0x5bb   : > { %v10070_v27 = vpop.f32.mrf.mxu3  ;;  %6082 = vmatpush.msra.mxu2 %v7348_v8  ;;  %6205 = vmatpush.msra.mxu1 %v7349_v54  ;;  %v7353_v8 = vld [vmem:[#allocation11 + $0x158] sm:$0xff]  ;;  %v7354_v54 = vld [vmem:[#allocation11 + $0x330] sm:$0xff] }
 0x5bc   : > { %5770 = vmatmul.f32.gmra.mxu2 %v10068_v47  ;;  %5893 = vmatmul.f32.gmra.mxu1 %v9913_v9 }
 0x5bd   : > { %6083 = vmatpush.msra.mxu2 %v7350_v15  ;;  %6206 = vmatpush.msra.mxu1 %v7351_v1  ;;  %v7356_v1 = vld [vmem:[#allocation11 + $0x310] sm:$0xff]  ;;  %v10096_v13 = vpop.f32.mrf.mxu2 }
 0x5bf   : > { %v10082_v61 = vpop.f32.mrf.mxu0  ;;  %6084 = vmatpush.msra.mxu2 %v7352_v24  ;;  %6207 = vmatpush.msra.mxu1 %v7353_v8  ;;  %v7359_v24 = vld [vmem:[#allocation11 + $0xf8] sm:$0xff]  ;;  %v10090_v8 = vpop.f32.mrf.mxu1 }
 0x5c1   : > { %6085 = vmatpush.msra.mxu2 %v7354_v54  ;;  %6208 = vmatpush.msra.mxu1 %v7355_v22  ;;  %v11011_v22 = vld [vmem:[#allocation26_spill] sm:$0xff] }
 0x5c2   : > { %v10094_v54 = vsub.f32 %v11011_v22, %v10040_v25 }
 0x5c3   : > { %v5373_v15 = vpop.f32.mrf.mxu3  ;;  %6086 = vmatpush.msra.mxu2 %v7356_v1  ;;  %6209 = vmatpush.msra.mxu1 %v7357_v0  ;;  %v7360_v1 = vld [vmem:[#allocation11 + $0x2d0] sm:$0xff]  ;;  %v7361_v0 = vld [vmem:[#allocation11 + $0xd8] sm:$0xff] }
 0x5c4   : > { %5773 = vmatmul.f32.gmra.mxu2 %v10086_v40  ;;  %5896 = vmatmul.f32.gmra.mxu1 %v9932_v19  ;;  %11012 = vst [vmem:[#allocation22_spill] sm:$0xff] %v10094_v54 }
 0x5c5   : > { %6087 = vmatpush.msra.mxu2 %v7358_v23  ;;  %6210 = vmatpush.msra.mxu1 %v7359_v24  ;;  %v5324_v23 = vadd.f32 %v9951_v4, %v9899_v12  ;;  %v10104_v24 = vmul.f32 %v10094_v54, %v10094_v54  ;;  %v7366_v12 = vld [vmem:[#allocation11 + $0x270] sm:$0xff]  ;;  %v7367_v4 = vld [vmem:[#allocation11 + $0x78] sm:$0xff] }
 0x5c7   : > { %v10098_v37 = vpop.f32.mrf.mxu0  ;;  %6088 = vmatpush.msra.mxu2 %v7360_v1  ;;  %6211 = vmatpush.msra.mxu1 %v7361_v0  ;;  %v5321_v1 = vadd.f32 %v9927_v7, %v9878_v52  ;;  %v11013_v7 = vld [vmem:[#allocation31_spill] sm:$0xff]  ;;  %v7369_v0 = vld [vmem:[#allocation11 + $0x58] sm:$0xff] }
 0x5c9   : > { %6089 = vmatpush.msra.mxu2 %v7362_v49  ;;  %6212 = vmatpush.msra.mxu1 %v7363_v63  ;;  %v5327_v49 = vadd.f32 %v9987_v44, %v9924_v55  ;;  %v5365_v63 = vadd.f32 %v10037_v48, %v5324_v23  ;;  %v10119_v55 = vsub.f32 %v11013_v7, %v10040_v25  ;;  %v7368_v48 = vld [vmem:[#allocation11 + $0x250] sm:$0xff] }
 0x5ca   : > { %v5333_v23 = vadd.f32 %v10031_v51, %v9984_v42  ;;  %v5339_v51 = vadd.f32 %v10076_v11, %v10029_v39 }
 0x5cb   : > { %v5376_v22 = vpop.f32.mrf.mxu3  ;;  %6090 = vmatpush.msra.mxu2 %v7364_v58  ;;  %6213 = vmatpush.msra.mxu1 %v7365_v50  ;;  %v5330_v58 = vadd.f32 %v10012_v30, %v9944_v20  ;;  %v5362_v50 = vadd.f32 %v10020_v16, %v5321_v1  ;;  %v5368_v52 = vadd.f32 %v10056_v35, %v5327_v49  ;;  %v10129_v16 = vpop.f32.mrf.mxu2  ;;  %v7370_v35 = vld [vmem:[#allocation11 + $0x230] sm:$0xff]  ;;  %v7371_v1 = vld [vmem:[#allocation11 + $0x38] sm:$0xff] }
 0x5cc   : > { %5776 = vmatmul.f32.gmra.mxu2 %v10104_v24  ;;  %5899 = vmatmul.f32.gmra.mxu1 %v9949_v3  ;;  %11014 = vst [vmem:[#allocation21_spill] sm:$0xff] %v10119_v55  ;;  %v5336_v30 = vadd.f32 %v10054_v53, %v10006_v60  ;;  %v5374_v42 = vadd.f32 %v5373_v15, %v5333_v23  ;;  %v7372_v60 = vld [vmem:[#allocation11 + $0x210] sm:$0xff]  ;;  %v7373_v53 = vld [vmem:[#allocation11 + $0x18] sm:$0xff] }
 0x5cd   : > { %6091 = vmatpush.msra.mxu2 %v7366_v12  ;;  %6214 = vmatpush.msra.mxu1 %v7367_v4  ;;  %v5406_v12 = vadd.f32 %v10014_v36, %v5365_v63  ;;  %v10124_v4 = vpop.f32.mrf.mxu1  ;;  %v5371_v20 = vadd.f32 %v10070_v27, %v5330_v58  ;;  %v5403_v49 = vadd.f32 %v9994_v18, %v5362_v50  ;;  %v11015_v50 = vld [vmem:[#allocation25_spill] sm:$0xff] }
 0x5ce   : > { %v5409_v7 = vadd.f32 %v10027_v45, %v5368_v52  ;;  %v10135_v36 = vmul.f32 %v10119_v55, %v10119_v55  ;;  %v5415_v45 = vadd.f32 %v10064_v33, %v5374_v42  ;;  %v10145_v39 = vsub.f32 %v11015_v50, %v10040_v25 }
 0x5cf   : > { %v5423_v44 = vpop.f32.mrf.mxu0  ;;  %6092 = vmatpush.msra.mxu2 %v7368_v48  ;;  %6215 = vmatpush.msra.mxu1 %v7369_v0  ;;  %v5616_v63 = vadd.f32 %v5406_v12, %v5403_v49  ;;  %v5412_v58 = vadd.f32 %v10042_v46, %v5371_v20  ;;  %v5377_v48 = vadd.f32 %v5376_v22, %v5336_v30 }
 0x5d0   : > { %11016 = vst [vmem:[#allocation26_spill] sm:$0xff] %v10145_v39  ;;  %v5342_v46 = vadd.f32 %v10096_v13, %v10048_v28  ;;  %v10157_v33 = vmul.f32 %v10145_v39, %v10145_v39  ;;  %v11017_v28 = vld [vmem:[#allocation23_spill] sm:$0xff] }
 0x5d1   : > { %6093 = vmatpush.msra.mxu2 %v7370_v35  ;;  %6216 = vmatpush.msra.mxu1 %v7371_v1  ;;  %v5617_v18 = vadd.f32 %v5616_v63, %v5409_v7  ;;  %v5418_v0 = vadd.f32 %v10082_v61, %v5377_v48  ;;  %v10165_v49 = vsub.f32 %v11017_v28, %v10040_v25  ;;  %v7377_v28 = vld [vmem:[#allocation11 + $0x3d8] sm:$0xff] }
 0x5d3   : > { %v5379_v27 = vpop.f32.mrf.mxu3  ;;  %6094 = vmatpush.msra.mxu2 %v7372_v60  ;;  %6217 = vmatpush.msra.mxu1 %v7373_v53  ;;  %v5618_v52 = vadd.f32 %v5617_v18, %v5412_v58  ;;  %v10159_v20 = vpop.f32.mrf.mxu2  ;;  %11018 = vst [vmem:[#allocation31_spill] sm:$0xff] %v10165_v49  ;;  %v10183_v58 = vsub.f32 %v9590_v5, %v10040_v25 }
 0x5d4   : > { %5779 = vmatmul.f32.gmra.mxu2 %v10135_v36  ;;  %5902 = vmatmul.f32.gmra.mxu1 %v9979_v57  ;;  %v5380_v15 = vadd.f32 %v5379_v27, %v5339_v51  ;;  %v10171_v51 = vmul.f32 %v10165_v49, %v10165_v49  ;;  %v7387_v49 = vld [vmem:[#allocation11 + $0x338] sm:$0xff]  ;;  %v5488_v55 = vadd.f32 %v10159_v20, %v10090_v8 }
 0x5d5   : > { %v10152_v22 = vpop.f32.mrf.mxu1  ;;  %v5619_v23 = vadd.f32 %v5618_v52, %v5415_v45  ;;  %11019 = vst [vmem:[#allocation25_spill] sm:$0xff] %v10183_v58  ;;  %v10187_v45 = vmul.f32 %v10183_v58, %v10183_v58  ;;  %v7395_v20 = vld [vmem:[#allocation11 + $0x2b8] sm:$0xff] }
 0x5d6   : > { %v5421_v12 = vadd.f32 %v10098_v37, %v5380_v15 }
 0x5d7   : > { %v10147_v11 = vpop.f32.mrf.mxu0  ;;  %v5620_v35 = vadd.f32 %v5619_v23, %v5418_v0 }
 0x5d9   : > { %v5621_v61 = vadd.f32 %v5620_v35, %v5421_v12  ;;  %v7374_v35 = vld [vmem:[#allocation11 + $0x5f0] sm:$0xff] }
 0x5db   : > { %v5382_v30 = vpop.f32.mrf.mxu3 }
 0x5dc   : > { %v5383_v1 = vadd.f32 %v5382_v30, %v5342_v46  ;;  %5782 = vmatmul.f32.gmra.mxu2 %v10157_v33  ;;  %5905 = vmatmul.f32.gmra.mxu1 %v10003_v32 }
 0x5dd   : > { %v10175_v60 = vpop.f32.mrf.mxu1 }
 0x5de   : > { %v5424_v13 = vadd.f32 %v5423_v44, %v5383_v1  ;;  %v10179_v44 = vpop.f32.mrf.mxu2  ;;  %v7375_v1 = vld [vmem:[#allocation11 + $0x3f8] sm:$0xff] }
 0x5df   : > { %v10167_v7 = vpop.f32.mrf.mxu0 }
 0x5e0   : > { %v5622_v37 = vadd.f32 %v5621_v61, %v5424_v13  ;;  %v7376_v61 = vld [vmem:[#allocation11 + $0x5d0] sm:$0xff] }
 0x5e2   : > { %v5623_v42 = vrot.slane %v5622_v37, 4 }
 0x5e3   : > { %v10173_v27 = vpop.f32.mrf.mxu3 }
 0x5e4   : > { %v5624_v53 = vadd.f32 %v5623_v42, %v5622_v37  ;;  %5785 = vmatmul.f32.gmra.mxu2 %v10171_v51  ;;  %5908 = vmatmul.f32.gmra.mxu1 %v10018_v29  ;;  %v7378_v42 = vld [vmem:[#allocation11 + $0x5b0] sm:$0xff] }
 0x5e5   : > { %v10195_v0 = vpop.f32.mrf.mxu1 }
 0x5e6   : > { %v5625_v63 = vrot.slane %v5624_v53, 2  ;;  %v10199_v5 = vpop.f32.mrf.mxu2 }
 0x5e7   : > { %v10189_v15 = vpop.f32.mrf.mxu0 }
 0x5e8   : > { %v5626_v48 = vadd.f32 %v5625_v63, %v5624_v53  ;;  %v7379_v63 = vld [vmem:[#allocation11 + $0x3b8] sm:$0xff] }
 0x5ea   : > { %v5627_v18 = vrot.slane %v5626_v48, 1 }
 0x5eb   : > { %v10191_v50 = vpop.f32.mrf.mxu3 }
 0x5ec   : > { %v5628_v52 = vadd.f32 %v5627_v18, %v5626_v48  ;;  %5788 = vmatmul.f32.gmra.mxu2 %v10187_v45  ;;  %5911 = vmatmul.f32.gmra.mxu1 %v10035_v14  ;;  %v7380_v48 = vld [vmem:[#allocation11 + $0x590] sm:$0xff]  ;;  %v7381_v18 = vld [vmem:[#allocation11 + $0x398] sm:$0xff] }
 0x5ed   : > { %v10220_v13 = vpop.f32.mrf.mxu1 }
 0x5ee   : > { %v10197_v46 = vmul.f32 0.0009765625, %v5628_v52  ;;  %v10222_v37 = vpop.f32.mrf.mxu2 }
 0x5ef   : > { %v10213_v30 = vpop.f32.mrf.mxu0 }
 0x5f0   : > { %v10203_v25 = vsub.f32 %v9611_v62, %v10197_v46  ;;  %v10218_v62 = vsub.f32 %v9621_v43, %v10197_v46  ;;  %v10235_v52 = vsub.f32 %v9631_v31, %v10197_v46 }
 0x5f2   : > { %v10207_v23 = vmul.f32 %v10203_v25, %v10203_v25  ;;  %v10226_v53 = vmul.f32 %v10218_v62, %v10218_v62  ;;  %11020 = vst [vmem:[#allocation23_spill] sm:$0xff] %v10235_v52 }
 0x5f3   : > { %v10209_v12 = vpop.f32.mrf.mxu3 }
 0x5f4   : > { %5808 = vmatmul.f32.vlgmr.msra.gmra.mxu3 %v10207_v23  ;;  %5931 = vmatmul.f32.vlgmr.msrb.gmra.mxu2 %v10052_v10 }
 0x5f5   : > { %6054 = vmatmul.f32.vlgmr.msrb.gmra.mxu1 %v9894_v56  ;;  %6120 = vmatpush.msra.mxu3 %v7374_v35  ;;  %v7382_v35 = vld [vmem:[#allocation11 + $0x570] sm:$0xff] }
 0x5f6   : > { %6243 = vmatpush.msrb.mxu2 %v7375_v1  ;;  %v5499_v31 = vpop.f32.mrf.mxu2 }
 0x5f7   : > { %6121 = vmatpush.msra.mxu3 %v7376_v61  ;;  %v10237_v1 = vpop.f32.mrf.mxu0  ;;  %v7383_v61 = vld [vmem:[#allocation11 + $0x378] sm:$0xff] }
 0x5f8   : > { %6244 = vmatpush.msrb.mxu2 %v7377_v28  ;;  %v7384_v28 = vld [vmem:[#allocation11 + $0x550] sm:$0xff] }
 0x5f9   : > { %6122 = vmatpush.msra.mxu3 %v7378_v42  ;;  %v7385_v42 = vld [vmem:[#allocation11 + $0x358] sm:$0xff] }
 0x5fa   : > { %6245 = vmatpush.msrb.mxu2 %v7379_v63  ;;  %v10239_v63 = vpop.f32.mrf.mxu1 }
 0x5fb   : > { %v10228_v43 = vpop.f32.mrf.mxu3  ;;  %6123 = vmatpush.msra.mxu3 %v7380_v48  ;;  %v10243_v48 = vmul.f32 %v10235_v52, %v10235_v52  ;;  %v7394_v52 = vld [vmem:[#allocation11 + $0x4b0] sm:$0xff] }
 0x5fc   : > { %5811 = vmatmul.f32.gmra.mxu3 %v10226_v53  ;;  %5934 = vmatmul.f32.gmra.mxu2 %v10068_v47 }
 0x5fd   : > { %6057 = vmatmul.f32.gmra.mxu1 %v9913_v9  ;;  %6246 = vmatpush.msrb.mxu2 %v7381_v18  ;;  %v7386_v18 = vld [vmem:[#allocation11 + $0x530] sm:$0xff] }
 0x5fe   : > { %6124 = vmatpush.msra.mxu3 %v7382_v35  ;;  %v7388_v35 = vld [vmem:[#allocation11 + $0x510] sm:$0xff]  ;;  %v5502_v8 = vpop.f32.mrf.mxu2 }
 0x5ff   : > { %6247 = vmatpush.msrb.mxu2 %v7383_v61  ;;  %v10250_v61 = vsub.f32 %v9641_v2, %v10197_v46  ;;  %v10252_v39 = vpop.f32.mrf.mxu0  ;;  %v7393_v2 = vld [vmem:[#allocation11 + $0x2d8] sm:$0xff] }
 0x600   : > { %6125 = vmatpush.msra.mxu3 %v7384_v28  ;;  %v7389_v28 = vld [vmem:[#allocation11 + $0x318] sm:$0xff] }
 0x601   : > { %6248 = vmatpush.msrb.mxu2 %v7385_v42  ;;  %v7390_v42 = vld [vmem:[#allocation11 + $0x4f0] sm:$0xff] }
 0x602   : > { %6126 = vmatpush.msra.mxu3 %v7386_v18  ;;  %v7391_v18 = vld [vmem:[#allocation11 + $0x2f8] sm:$0xff]  ;;  %v10256_v54 = vpop.f32.mrf.mxu1 }
 0x603   : > { %v5537_v58 = vpop.f32.mrf.mxu3  ;;  %6249 = vmatpush.msrb.mxu2 %v7387_v49  ;;  %v7392_v49 = vld [vmem:[#allocation11 + $0x4d0] sm:$0xff] }
 0x604   : > { %5814 = vmatmul.f32.gmra.mxu3 %v10243_v48  ;;  %5937 = vmatmul.f32.gmra.mxu2 %v10086_v40 }
 0x605   : > { %6060 = vmatmul.f32.gmra.mxu1 %v9932_v19  ;;  %6127 = vmatpush.msra.mxu3 %v7388_v35  ;;  %v10260_v35 = vmul.f32 %v10250_v61, %v10250_v61 }
 0x606   : > { %6250 = vmatpush.msrb.mxu2 %v7389_v28 }
 0x607   : > { %6128 = vmatpush.msra.mxu3 %v7390_v42  ;;  %v5485_v42 = vadd.f32 %v10129_v16, %v10072_v59  ;;  %v7397_v16 = vld [vmem:[#allocation11 + $0x298] sm:$0xff] }
 0x608   : > { %6251 = vmatpush.msrb.mxu2 %v7391_v18  ;;  %v5491_v18 = vadd.f32 %v10179_v44, %v10124_v4  ;;  %v10276_v4 = vsub.f32 %v9651_v21, %v10197_v46  ;;  %v5497_v44 = vadd.f32 %v10222_v37, %v10175_v60  ;;  %v7400_v60 = vld [vmem:[#allocation11 + $0x450] sm:$0xff]  ;;  %v5584_v37 = vpop.f32.mrf.mxu0 }
 0x609   : > { %6129 = vmatpush.msra.mxu3 %v7392_v49  ;;  %v5529_v49 = vadd.f32 %v10191_v50, %v5488_v55  ;;  %v7396_v55 = vld [vmem:[#allocation11 + $0x490] sm:$0xff] }
 0x60a   : > { %6252 = vmatpush.msrb.mxu2 %v7393_v2  ;;  %v5526_v2 = vadd.f32 %v10173_v27, %v5485_v42  ;;  %v5532_v59 = vadd.f32 %v10209_v12, %v5491_v18  ;;  %11021 = vst [vmem:[#allocation43_spill] sm:$0xff] %v10276_v4  ;;  %v5500_v27 = vadd.f32 %v5499_v31, %v10195_v0  ;;  %v10290_v31 = vpop.f32.mrf.mxu1 }
 0x60b   : > { %v5540_v28 = vpop.f32.mrf.mxu3  ;;  %6130 = vmatpush.msra.mxu3 %v7394_v52  ;;  %v5494_v52 = vadd.f32 %v10199_v5, %v10152_v22  ;;  %v5570_v50 = vadd.f32 %v10167_v7, %v5529_v49  ;;  %v7398_v22 = vld [vmem:[#allocation11 + $0x470] sm:$0xff]  ;;  %v7399_v5 = vld [vmem:[#allocation11 + $0x278] sm:$0xff]  ;;  %v5538_v42 = vadd.f32 %v5537_v58, %v5497_v44  ;;  %v10287_v18 = vmul.f32 %v10276_v4, %v10276_v4 }
 0x60c   : > { %5817 = vmatmul.f32.gmra.mxu3 %v10260_v35  ;;  %5940 = vmatmul.f32.gmra.mxu2 %v10104_v24  ;;  %v5567_v21 = vadd.f32 %v10147_v11, %v5526_v2  ;;  %v5573_v12 = vadd.f32 %v10189_v15, %v5532_v59  ;;  %v5503_v7 = vadd.f32 %v5502_v8, %v10220_v13  ;;  %v7401_v49 = vld [vmem:[#allocation11 + $0x258] sm:$0xff]  ;;  %v7402_v58 = vld [vmem:[#allocation11 + $0x430] sm:$0xff] }
 0x60d   : > { %6063 = vmatmul.f32.gmra.mxu1 %v9949_v3  ;;  %6253 = vmatpush.msrb.mxu2 %v7395_v20  ;;  %v5535_v20 = vadd.f32 %v10228_v43, %v5494_v52  ;;  %v5541_v52 = vadd.f32 %v5540_v28, %v5500_v27  ;;  %v5579_v13 = vadd.f32 %v10237_v1, %v5538_v42  ;;  %v7403_v59 = vld [vmem:[#allocation11 + $0x238] sm:$0xff]  ;;  %v7404_v28 = vld [vmem:[#allocation11 + $0x410] sm:$0xff] }
 0x60e   : > { %6131 = vmatpush.msra.mxu3 %v7396_v55  ;;  %v5629_v0 = vadd.f32 %v5570_v50, %v5567_v21  ;;  %v10299_v2 = vsub.f32 %v9661_v6, %v10197_v46  ;;  %v7405_v44 = vld [vmem:[#allocation11 + $0x218] sm:$0xff]  ;;  %v10314_v42 = vsub.f32 %v9671_v17, %v10197_v46 }
 0x60f   : > { %6254 = vmatpush.msrb.mxu2 %v7397_v16  ;;  %v5576_v11 = vadd.f32 %v10213_v30, %v5535_v20  ;;  %v5505_v30 = vpop.f32.mrf.mxu2  ;;  %v5582_v16 = vadd.f32 %v10252_v39, %v5541_v52 }
 0x610   : > { %6132 = vmatpush.msra.mxu3 %v7398_v22  ;;  %v5630_v15 = vadd.f32 %v5629_v0, %v5573_v12  ;;  %11022 = vst [vmem:[#allocation44_spill] sm:$0xff] %v10299_v2  ;;  %v5506_v50 = vadd.f32 %v5505_v30, %v10239_v63  ;;  %v10305_v1 = vmul.f32 %v10299_v2, %v10299_v2  ;;  %v5587_v21 = vpop.f32.mrf.mxu0  ;;  %v7407_v30 = vld [vmem:[#allocation11 + $0x5f8] sm:$0xff] }
 0x611   : > { %6255 = vmatpush.msrb.mxu2 %v7399_v5  ;;  %11023 = vst [vmem:[#allocation45_spill] sm:$0xff] %v10314_v42  ;;  %v10325_v0 = vsub.f32 %v9680_v26, %v10197_v46 }
 0x612   : > { %6133 = vmatpush.msra.mxu3 %v7400_v60  ;;  %v5631_v55 = vadd.f32 %v5630_v15, %v5576_v11  ;;  %v10310_v39 = vpop.f32.mrf.mxu1 }
 0x613   : > { %v5543_v43 = vpop.f32.mrf.mxu3  ;;  %6256 = vmatpush.msrb.mxu2 %v7401_v49  ;;  %11024 = vst [vmem:[#allocation46_spill] sm:$0xff] %v10325_v0 }
 0x614   : > { %5820 = vmatmul.f32.gmra.mxu3 %v10287_v18  ;;  %5943 = vmatmul.f32.gmra.mxu2 %v10135_v36  ;;  %v5544_v8 = vadd.f32 %v5543_v43, %v5503_v7  ;;  %v5632_v20 = vadd.f32 %v5631_v55, %v5579_v13 }
 0x615   : > { %6066 = vmatmul.f32.gmra.mxu1 %v9979_v57  ;;  %6134 = vmatpush.msra.mxu3 %v7402_v58  ;;  %v10331_v58 = vmul.f32 %v10325_v0, %v10325_v0 }
 0x616   : > { %6257 = vmatpush.msrb.mxu2 %v7403_v59  ;;  %v5585_v22 = vadd.f32 %v5584_v37, %v5544_v8  ;;  %v5633_v27 = vadd.f32 %v5632_v20, %v5582_v16  ;;  %v10318_v37 = vmul.f32 %v10314_v42, %v10314_v42  ;;  %v7408_v16 = vld [vmem:[#allocation11 + $0x7d0] sm:$0xff] }
 0x617   : > { %6135 = vmatpush.msra.mxu3 %v7404_v28 }
 0x618   : > { %6258 = vmatpush.msrb.mxu2 %v7405_v44  ;;  %v5634_v12 = vadd.f32 %v5633_v27, %v5585_v22  ;;  %v7409_v44 = vld [vmem:[#allocation11 + $0x5d8] sm:$0xff]  ;;  %v7412_v22 = vld [vmem:[#allocation11 + $0x790] sm:$0xff] }
 0x61a   : > { %v10327_v17 = vpop.f32.mrf.mxu1 }
 0x61b   : > { %v5546_v6 = vpop.f32.mrf.mxu3 }
 0x61c   : > { %v5547_v5 = vadd.f32 %v5546_v6, %v5506_v50  ;;  %5823 = vmatmul.f32.gmra.mxu3 %v10305_v1  ;;  %5946 = vmatmul.f32.gmra.mxu2 %v10157_v33  ;;  %v7413_v6 = vld [vmem:[#allocation11 + $0x598] sm:$0xff] }
 0x61d   : > { %6069 = vmatmul.f32.gmra.mxu1 %v10003_v32 }
 0x61e   : > { %v5588_v63 = vadd.f32 %v5587_v21, %v5547_v5  ;;  %v7414_v21 = vld [vmem:[#allocation11 + $0x770] sm:$0xff] }
 0x620   : > { %v5635_v60 = vadd.f32 %v5634_v12, %v5588_v63  ;;  %v7415_v12 = vld [vmem:[#allocation11 + $0x578] sm:$0xff] }
 0x622   : > { %v5636_v7 = vrot.slane %v5635_v60, 4  ;;  %v10342_v46 = vpop.f32.mrf.mxu1 }
 0x624   : > { %v5637_v43 = vadd.f32 %v5636_v7, %v5635_v60  ;;  %5826 = vmatmul.f32.gmra.mxu3 %v10318_v37  ;;  %5949 = vmatmul.f32.gmra.mxu2 %v10171_v51  ;;  %v11025_v60 = vld [vmem:[#allocation30_spill] sm:$0xff] }
 0x625   : > { %6072 = vmatmul.f32.gmra.mxu1 %v10018_v29 }
 0x626   : > { %v5638_v49 = vrot.slane %v5637_v43, 2 }
 0x628   : > { %v5639_v11 = vadd.f32 %v5638_v49, %v5637_v43  ;;  %v7418_v43 = vld [vmem:[#allocation11 + $0x730] sm:$0xff]  ;;  %v7419_v49 = vld [vmem:[#allocation11 + $0x538] sm:$0xff] }
 0x62a   : > { %v5640_v52 = vrot.slane %v5639_v11, 1  ;;  %v10363_v20 = vpop.f32.mrf.mxu1 }
 0x62c   : > { %v5641_v15 = vadd.f32 %v5640_v52, %v5639_v11  ;;  %5829 = vmatmul.f32.gmra.mxu3 %v10331_v58  ;;  %5952 = vmatmul.f32.gmra.mxu2 %v10187_v45 }
 0x62d   : > { %6075 = vmatmul.f32.gmra.mxu1 %v10035_v14 }
 0x62e   : > { %v10336_v13 = vmul.f32 0.0009765625, %v5641_v15  ;;  %v7420_v15 = vld [vmem:[#allocation11 + $0x710] sm:$0xff] }
 0x630   : > { %v10340_v26 = vsub.f32 %v9604_v41, %v10336_v13  ;;  %v10354_v59 = vsub.f32 %v9613_v34, %v10336_v13  ;;  %v7406_v41 = vld [vmem:[#allocation11 + $0x7f0] sm:$0xff]  ;;  %v7411_v34 = vld [vmem:[#allocation11 + $0x5b8] sm:$0xff]  ;;  %v10388_v7 = vsub.f32 %v11025_v60, %v10336_v13 }
 0x631   : > { %v7430_v60 = vld [vmem:[#allocation11 + $0x670] sm:$0xff] }
 0x632   : > { %v10346_v8 = vmul.f32 %v10340_v26, %v10340_v26  ;;  %v10361_v50 = vmul.f32 %v10354_v59, %v10354_v59 }
 0x634   : > { %5849 = vmatmul.f32.vlgmr.msrb.gmra.mxu0 %v10346_v8  ;;  %5972 = vmatmul.f32.vlgmr.msrb.gmra.mxu3 %v10207_v23 }
 0x635   : > { %6095 = vmatmul.f32.vlgmr.msra.gmra.mxu2 %v10052_v10  ;;  %6218 = vmatmul.f32.vlgmr.msra.gmra.mxu1 %v9894_v56  ;;  %v7410_v56 = vld [vmem:[#allocation11 + $0x7b0] sm:$0xff] }
 0x636   : > { %6161 = vmatpush.msrb.mxu0 %v7406_v41  ;;  %6284 = vmatpush.msrb.mxu3 %v7407_v30  ;;  %v7421_v41 = vld [vmem:[#allocation11 + $0x518] sm:$0xff]  ;;  %v7422_v30 = vld [vmem:[#allocation11 + $0x6f0] sm:$0xff] }
 0x637   : > { %v5768_v28 = vpop.f32.mrf.mxu2 }
 0x638   : > { %v10357_v55 = vadd.f32 %v5768_v28, %v10256_v54  ;;  %6162 = vmatpush.msrb.mxu0 %v7408_v16  ;;  %6285 = vmatpush.msrb.mxu3 %v7409_v44  ;;  %v10371_v54 = vsub.f32 %v9623_v38, %v10336_v13  ;;  %v7417_v38 = vld [vmem:[#allocation11 + $0x558] sm:$0xff]  ;;  %v7424_v44 = vld [vmem:[#allocation11 + $0x6d0] sm:$0xff] }
 0x639   : > { %v7423_v28 = vld [vmem:[#allocation11 + $0x4f8] sm:$0xff] }
 0x63a   : > { %6163 = vmatpush.msrb.mxu0 %v7410_v56  ;;  %6286 = vmatpush.msrb.mxu3 %v7411_v34  ;;  %v10378_v63 = vmul.f32 %v10371_v54, %v10371_v54  ;;  %v7425_v56 = vld [vmem:[#allocation11 + $0x4d8] sm:$0xff] }
 0x63c   : > { %5852 = vmatmul.f32.gmra.mxu0 %v10361_v50  ;;  %5975 = vmatmul.f32.gmra.mxu3 %v10226_v53 }
 0x63d   : > { %6098 = vmatmul.f32.gmra.mxu2 %v10068_v47  ;;  %6221 = vmatmul.f32.gmra.mxu1 %v9913_v9  ;;  %v7416_v9 = vld [vmem:[#allocation11 + $0x750] sm:$0xff] }
 0x63e   : > { %6164 = vmatpush.msrb.mxu0 %v7412_v22  ;;  %6287 = vmatpush.msrb.mxu3 %v7413_v6 }
 0x63f   : > { %v5771_v27 = vpop.f32.mrf.mxu2 }
 0x640   : > { %v10374_v5 = vadd.f32 %v5771_v27, %v10290_v31  ;;  %6165 = vmatpush.msrb.mxu0 %v7414_v21  ;;  %6288 = vmatpush.msrb.mxu3 %v7415_v12  ;;  %v10384_v31 = vpop.f32.mrf.mxu1  ;;  %v7426_v27 = vld [vmem:[#allocation11 + $0x6b0] sm:$0xff]  ;;  %v7427_v21 = vld [vmem:[#allocation11 + $0x4b8] sm:$0xff] }
 0x641   : > { %v7428_v12 = vld [vmem:[#allocation11 + $0x690] sm:$0xff] }
 0x642   : > { %6166 = vmatpush.msrb.mxu0 %v7416_v9  ;;  %6289 = vmatpush.msrb.mxu3 %v7417_v38  ;;  %v7429_v9 = vld [vmem:[#allocation11 + $0x498] sm:$0xff] }
 0x644   : > { %5855 = vmatmul.f32.gmra.mxu0 %v10378_v63  ;;  %5978 = vmatmul.f32.gmra.mxu3 %v10243_v48 }
 0x645   : > { %6101 = vmatmul.f32.gmra.mxu2 %v10086_v40  ;;  %6224 = vmatmul.f32.gmra.mxu1 %v9932_v19  ;;  %v10395_v19 = vmul.f32 %v10388_v7, %v10388_v7 }
 0x646   : > { %6167 = vmatpush.msrb.mxu0 %v7418_v43  ;;  %6290 = vmatpush.msrb.mxu3 %v7419_v49  ;;  %v7431_v43 = vld [vmem:[#allocation11 + $0x478] sm:$0xff] }
 0x647   : > { %v5774_v11 = vpop.f32.mrf.mxu2 }
 0x648   : > { %v10391_v52 = vadd.f32 %v5774_v11, %v10310_v39  ;;  %6168 = vmatpush.msrb.mxu0 %v7420_v15  ;;  %6291 = vmatpush.msrb.mxu3 %v7421_v41  ;;  %v11026_v39 = vld [vmem:[#allocation24_spill] sm:$0xff]  ;;  %v5748_v22 = vpop.f32.mrf.mxu1  ;;  %v7432_v15 = vld [vmem:[#allocation11 + $0x650] sm:$0xff] }
 0x649   : > { %v10403_v16 = vsub.f32 %v11026_v39, %v10336_v13  ;;  %v7433_v41 = vld [vmem:[#allocation11 + $0x458] sm:$0xff] }
 0x64a   : > { %6169 = vmatpush.msrb.mxu0 %v7422_v30  ;;  %6292 = vmatpush.msrb.mxu3 %v7423_v28  ;;  %v7434_v28 = vld [vmem:[#allocation11 + $0x630] sm:$0xff]  ;;  %v7435_v39 = vld [vmem:[#allocation11 + $0x438] sm:$0xff] }
 0x64b   : > { %11027 = vst [vmem:[#allocation30_spill] sm:$0xff] %v10403_v16 }
 0x64c   : > { %5858 = vmatmul.f32.gmra.mxu0 %v10395_v19  ;;  %5981 = vmatmul.f32.gmra.mxu3 %v10260_v35 }
 0x64d   : > { %6104 = vmatmul.f32.gmra.mxu2 %v10104_v24  ;;  %6227 = vmatmul.f32.gmra.mxu1 %v9949_v3  ;;  %v10410_v3 = vmul.f32 %v10403_v16, %v10403_v16 }
 0x64e   : > { %6170 = vmatpush.msrb.mxu0 %v7424_v44  ;;  %6293 = vmatpush.msrb.mxu3 %v7425_v56  ;;  %v7436_v56 = vld [vmem:[#allocation11 + $0x610] sm:$0xff] }
 0x64f   : > { %v5777_v34 = vpop.f32.mrf.mxu2 }
 0x650   : > { %v10406_v6 = vadd.f32 %v5777_v34, %v10327_v17  ;;  %6171 = vmatpush.msrb.mxu0 %v7426_v27  ;;  %6294 = vmatpush.msrb.mxu3 %v7427_v21  ;;  %v11028_v17 = vld [vmem:[#allocation32_spill] sm:$0xff]  ;;  %v10423_v30 = vpop.f32.mrf.mxu1 }
 0x651   : > { %v10418_v38 = vsub.f32 %v11028_v17, %v10336_v13  ;;  %v7437_v34 = vld [vmem:[#allocation11 + $0x418] sm:$0xff] }
 0x652   : > { %6172 = vmatpush.msrb.mxu0 %v7428_v12  ;;  %6295 = vmatpush.msrb.mxu3 %v7429_v9 }
 0x653   : > { %11029 = vst [vmem:[#allocation24_spill] sm:$0xff] %v10418_v38 }
 0x654   : > { %5861 = vmatmul.f32.gmra.mxu0 %v10410_v3  ;;  %5984 = vmatmul.f32.gmra.mxu3 %v10287_v18 }
 0x655   : > { %6107 = vmatmul.f32.gmra.mxu2 %v10135_v36  ;;  %6230 = vmatmul.f32.gmra.mxu1 %v9979_v57  ;;  %v10427_v57 = vmul.f32 %v10418_v38, %v10418_v38 }
 0x656   : > { %6173 = vmatpush.msrb.mxu0 %v7430_v60  ;;  %6296 = vmatpush.msrb.mxu3 %v7431_v43 }
 0x657   : > { %v5780_v49 = vpop.f32.mrf.mxu2 }
 0x658   : > { %v10421_v11 = vadd.f32 %v5780_v49, %v10342_v46  ;;  %6174 = vmatpush.msrb.mxu0 %v7432_v15  ;;  %6297 = vmatpush.msrb.mxu3 %v7433_v41  ;;  %v11030_v46 = vld [vmem:[#allocation27_spill] sm:$0xff]  ;;  %v10444_v9 = vpop.f32.mrf.mxu1 }
 0x659   : > { %v10435_v44 = vsub.f32 %v11030_v46, %v10336_v13  ;;  %v7441_v46 = vld [vmem:[#allocation11 + $0x798] sm:$0xff] }
 0x65a   : > { %6175 = vmatpush.msrb.mxu0 %v7434_v28  ;;  %6298 = vmatpush.msrb.mxu3 %v7435_v39  ;;  %v7439_v28 = vld [vmem:[#allocation11 + $0x7d8] sm:$0xff] }
 0x65b   : > { %v10442_v12 = vmul.f32 %v10435_v44, %v10435_v44 }
 0x65c   : > { %5864 = vmatmul.f32.gmra.mxu0 %v10427_v57  ;;  %5987 = vmatmul.f32.gmra.mxu3 %v10305_v1 }
 0x65d   : > { %6110 = vmatmul.f32.gmra.mxu2 %v10157_v33  ;;  %6233 = vmatmul.f32.gmra.mxu1 %v10003_v32  ;;  %v11031_v32 = vld [vmem:[#allocation33_spill] sm:$0xff] }
 0x65e   : > { %6176 = vmatpush.msrb.mxu0 %v7436_v56  ;;  %6299 = vmatpush.msrb.mxu3 %v7437_v34  ;;  %v10452_v17 = vsub.f32 %v11031_v32, %v10336_v13  ;;  %v7444_v32 = vld [vmem:[#allocation11 + $0x738] sm:$0xff] }
 0x65f   : > { %v5783_v27 = vpop.f32.mrf.mxu2 }
 0x660   : > { %v10438_v21 = vadd.f32 %v5783_v27, %v10363_v20  ;;  %11032 = vst [vmem:[#allocation32_spill] sm:$0xff] %v10452_v17  ;;  %v10459_v43 = vmul.f32 %v10452_v17, %v10452_v17  ;;  %v7443_v27 = vld [vmem:[#allocation11 + $0x758] sm:$0xff] }
 0x664   : > { %5867 = vmatmul.f32.gmra.mxu0 %v10442_v12  ;;  %5990 = vmatmul.f32.gmra.mxu3 %v10318_v37 }
 0x665   : > { %6113 = vmatmul.f32.gmra.mxu2 %v10171_v51  ;;  %6236 = vmatmul.f32.gmra.mxu1 %v10018_v29  ;;  %v10465_v29 = vpop.f32.mrf.mxu1 }
 0x667   : > { %v5786_v20 = vpop.f32.mrf.mxu2 }
 0x668   : > { %v10455_v60 = vadd.f32 %v5786_v20, %v10384_v31  ;;  %v7438_v31 = vld [vmem:[#allocation11 + $0x7f8] sm:$0xff] }
 0x66c   : > { %5870 = vmatmul.f32.gmra.mxu0 %v10459_v43  ;;  %5993 = vmatmul.f32.gmra.mxu3 %v10331_v58 }
 0x66d   : > { %6116 = vmatmul.f32.gmra.mxu2 %v10187_v45  ;;  %6239 = vmatmul.f32.gmra.mxu1 %v10035_v14  ;;  %v10474_v39 = vpop.f32.mrf.mxu1 }
 0x66f   : > { %v5789_v13 = vpop.f32.mrf.mxu2 }
 0x670   : > { %v10467_v49 = vadd.f32 %v5789_v13, %v5748_v22  ;;  %v7440_v22 = vld [vmem:[#allocation11 + $0x7b8] sm:$0xff] }
 0x671   : > { %v7445_v13 = vld [vmem:[#allocation11 + $0x718] sm:$0xff] }
 0x674   : > { %6013 = vmatmul.f32.vlgmr.msra.gmra.mxu0 %v10346_v8  ;;  %6136 = vmatmul.f32.vlgmr.msra.gmra.mxu3 %v10207_v23 }
 0x675   : > { %6259 = vmatmul.f32.vlgmr.msrb.gmra.mxu2 %v10052_v10  ;;  %6325 = vmatpush.msra.mxu0 %v7438_v31  ;;  %v7442_v10 = vld [vmem:[#allocation11 + $0x778] sm:$0xff]  ;;  %v10487_v20 = vpop.f32.mrf.mxu1 }
 0x677   : > { %v5809_v15 = vpop.f32.mrf.mxu3  ;;  %v10472_v41 = vpop.f32.mrf.mxu2  ;;  %6326 = vmatpush.msra.mxu0 %v7439_v28  ;;  %v7447_v28 = vld [vmem:[#allocation11 + $0x6d8] sm:$0xff] }
 0x678   : > { %v10477_v14 = vadd.f32 %v5809_v15, %v10357_v55 }
 0x679   : > { %6327 = vmatpush.msra.mxu0 %v7440_v22  ;;  %v7448_v22 = vld [vmem:[#allocation11 + $0x6b8] sm:$0xff] }
 0x67b   : > { %6328 = vmatpush.msra.mxu0 %v7441_v46  ;;  %v7449_v46 = vld [vmem:[#allocation11 + $0x698] sm:$0xff] }
 0x67c   : > { %6016 = vmatmul.f32.gmra.mxu0 %v10361_v50  ;;  %6139 = vmatmul.f32.gmra.mxu3 %v10226_v53 }
 0x67d   : > { %6262 = vmatmul.f32.gmra.mxu2 %v10068_v47  ;;  %6329 = vmatpush.msra.mxu0 %v7442_v10  ;;  %v7446_v47 = vld [vmem:[#allocation11 + $0x6f8] sm:$0xff]  ;;  %v10497_v10 = vpop.f32.mrf.mxu1 }
 0x67f   : > { %v5812_v56 = vpop.f32.mrf.mxu3  ;;  %v10482_v34 = vpop.f32.mrf.mxu2  ;;  %6330 = vmatpush.msra.mxu0 %v7443_v27 }
 0x680   : > { %v10485_v55 = vadd.f32 %v5812_v56, %v10374_v5 }
 0x681   : > { %6331 = vmatpush.msra.mxu0 %v7444_v32  ;;  %v7451_v32 = vld [vmem:[#allocation11 + $0x658] sm:$0xff] }
 0x683   : > { %6332 = vmatpush.msra.mxu0 %v7445_v13  ;;  %v7452_v13 = vld [vmem:[#allocation11 + $0x638] sm:$0xff] }
 0x684   : > { %6019 = vmatmul.f32.gmra.mxu0 %v10378_v63  ;;  %6142 = vmatmul.f32.gmra.mxu3 %v10243_v48 }
 0x685   : > { %6265 = vmatmul.f32.gmra.mxu2 %v10086_v40  ;;  %6333 = vmatpush.msra.mxu0 %v7446_v47  ;;  %v7450_v40 = vld [vmem:[#allocation11 + $0x678] sm:$0xff] }
 0x686   : > { %v7453_v47 = vld [vmem:[#allocation11 + $0x618] sm:$0xff] }
 0x687   : > { %v5815_v31 = vpop.f32.mrf.mxu3  ;;  %v10492_v15 = vpop.f32.mrf.mxu2  ;;  %6334 = vmatpush.msra.mxu0 %v7447_v28 }
 0x688   : > { %v10495_v5 = vadd.f32 %v5815_v31, %v10391_v52 }
 0x689   : > { %6335 = vmatpush.msra.mxu0 %v7448_v22 }
 0x68b   : > { %6336 = vmatpush.msra.mxu0 %v7449_v46 }
 0x68c   : > { %6022 = vmatmul.f32.gmra.mxu0 %v10395_v19  ;;  %6145 = vmatmul.f32.gmra.mxu3 %v10260_v35 }
 0x68d   : > { %6268 = vmatmul.f32.gmra.mxu2 %v10104_v24  ;;  %6337 = vmatpush.msra.mxu0 %v7450_v40  ;;  %v10508_v24 = vpop.f32.mrf.mxu1 }
 0x68f   : > { %v5818_v56 = vpop.f32.mrf.mxu3  ;;  %v10502_v27 = vpop.f32.mrf.mxu2  ;;  %6338 = vmatpush.msra.mxu0 %v7451_v32 }
 0x690   : > { %v5819_v52 = vadd.f32 %v5818_v56, %v10406_v6 }
 0x691   : > { %6339 = vmatpush.msra.mxu0 %v7452_v13 }
 0x693   : > { %6340 = vmatpush.msra.mxu0 %v7453_v47 }
 0x694   : > { %6025 = vmatmul.f32.gmra.mxu0 %v10410_v3  ;;  %6148 = vmatmul.f32.gmra.mxu3 %v10287_v18 }
 0x695   : > { %6271 = vmatmul.f32.gmra.mxu2 %v10135_v36  ;;  %v10518_v40 = vpop.f32.mrf.mxu1 }
 0x697   : > { %v5821_v31 = vpop.f32.mrf.mxu3  ;;  %v10510_v28 = vpop.f32.mrf.mxu2 }
 0x698   : > { %v5822_v22 = vadd.f32 %v5821_v31, %v10421_v11 }
 0x69c   : > { %6028 = vmatmul.f32.gmra.mxu0 %v10427_v57  ;;  %6151 = vmatmul.f32.gmra.mxu3 %v10305_v1 }
 0x69d   : > { %6274 = vmatmul.f32.gmra.mxu2 %v10157_v33  ;;  %v10527_v13 = vpop.f32.mrf.mxu1 }
 0x69f   : > { %v5824_v6 = vpop.f32.mrf.mxu3  ;;  %v10516_v46 = vpop.f32.mrf.mxu2 }
 0x6a0   : > { %v5825_v36 = vadd.f32 %v5824_v6, %v10438_v21 }
 0x6a4   : > { %6031 = vmatmul.f32.gmra.mxu0 %v10442_v12  ;;  %6154 = vmatmul.f32.gmra.mxu3 %v10318_v37 }
 0x6a5   : > { %6277 = vmatmul.f32.gmra.mxu2 %v10171_v51  ;;  %v10535_v51 = vpop.f32.mrf.mxu1 }
 0x6a7   : > { %v5827_v11 = vpop.f32.mrf.mxu3  ;;  %v10524_v56 = vpop.f32.mrf.mxu2 }
 0x6a8   : > { %v5828_v32 = vadd.f32 %v5827_v11, %v10455_v60 }
 0x6ac   : > { %6034 = vmatmul.f32.gmra.mxu0 %v10459_v43  ;;  %6157 = vmatmul.f32.gmra.mxu3 %v10331_v58 }
 0x6ad   : > { %6280 = vmatmul.f32.gmra.mxu2 %v10187_v45 }
 0x6af   : > { %v5830_v33 = vpop.f32.mrf.mxu3  ;;  %v10532_v21 = vpop.f32.mrf.mxu2 }
 0x6b0   : > { %v5831_v47 = vadd.f32 %v5830_v33, %v10467_v49  ;;  %v6061_v49 = vpop.f32.mrf.mxu1 }
 0x6b1   : > { %v5850_v31 = vpop.f32.mrf.mxu0 }
 0x6b2   : > { %v5851_v0 = vadd.f32 %v5850_v31, %v10477_v14 }
 0x6b4   : > { %6177 = vmatmul.f32.vlgmr.msrb.gmra.mxu0 %v10346_v8  ;;  %6300 = vmatmul.f32.vlgmr.msrb.gmra.mxu3 %v10207_v23 }
 0x6b7   : > { %v10539_v60 = vpop.f32.mrf.mxu3 }
 0x6b8   : > { %v10541_v6 = vpop.f32.mrf.mxu2 }
 0x6b9   : > { %v5853_v11 = vpop.f32.mrf.mxu0 }
 0x6ba   : > { %v5854_v45 = vadd.f32 %v5853_v11, %v10485_v55  ;;  %v6064_v55 = vpop.f32.mrf.mxu1 }
 0x6bc   : > { %v6366_v42 = vadd.f32 %v5854_v45, %v5851_v0  ;;  %6180 = vmatmul.f32.gmra.mxu0 %v10361_v50  ;;  %6303 = vmatmul.f32.gmra.mxu3 %v10226_v53 }
 0x6bf   : > { %v10547_v33 = vpop.f32.mrf.mxu3 }
 0x6c0   : > { %v6099_v38 = vpop.f32.mrf.mxu2 }
 0x6c1   : > { %v5856_v2 = vpop.f32.mrf.mxu0 }
 0x6c2   : > { %v5857_v23 = vadd.f32 %v5856_v2, %v10495_v5 }
 0x6c4   : > { %v6367_v16 = vadd.f32 %v6366_v42, %v5857_v23  ;;  %6183 = vmatmul.f32.gmra.mxu0 %v10378_v63  ;;  %6306 = vmatmul.f32.gmra.mxu3 %v10243_v48  ;;  %v6067_v23 = vpop.f32.mrf.mxu1 }
 0x6c7   : > { %v10552_v14 = vpop.f32.mrf.mxu3 }
 0x6c8   : > { %v6102_v0 = vpop.f32.mrf.mxu2 }
 0x6c9   : > { %v6103_v31 = vadd.f32 %v6102_v0, %v6061_v49  ;;  %v5859_v11 = vpop.f32.mrf.mxu0 }
 0x6ca   : > { %v5860_v45 = vadd.f32 %v5859_v11, %v5819_v52 }
 0x6cc   : > { %v6368_v53 = vadd.f32 %v6367_v16, %v5860_v45  ;;  %6186 = vmatmul.f32.gmra.mxu0 %v10395_v19  ;;  %6309 = vmatmul.f32.gmra.mxu3 %v10260_v35  ;;  %v6070_v45 = vpop.f32.mrf.mxu1 }
 0x6cf   : > { %v10556_v4 = vpop.f32.mrf.mxu3 }
 0x6d0   : > { %v6105_v2 = vpop.f32.mrf.mxu2 }
 0x6d1   : > { %v6106_v42 = vadd.f32 %v6105_v2, %v6064_v55  ;;  %v5862_v5 = vpop.f32.mrf.mxu0 }
 0x6d2   : > { %v5863_v17 = vadd.f32 %v5862_v5, %v5822_v22 }
 0x6d4   : > { %v6369_v48 = vadd.f32 %v6368_v53, %v5863_v17  ;;  %6189 = vmatmul.f32.gmra.mxu0 %v10410_v3  ;;  %6312 = vmatmul.f32.gmra.mxu3 %v10287_v18  ;;  %v6073_v5 = vpop.f32.mrf.mxu1 }
 0x6d7   : > { %v10560_v49 = vpop.f32.mrf.mxu3 }
 0x6d8   : > { %v6108_v52 = vpop.f32.mrf.mxu2 }
 0x6d9   : > { %v6109_v16 = vadd.f32 %v6108_v52, %v6067_v23  ;;  %v5865_v0 = vpop.f32.mrf.mxu0 }
 0x6da   : > { %v5866_v11 = vadd.f32 %v5865_v0, %v5825_v36 }
 0x6dc   : > { %v6370_v35 = vadd.f32 %v6369_v48, %v5866_v11  ;;  %6192 = vmatmul.f32.gmra.mxu0 %v10427_v57  ;;  %6315 = vmatmul.f32.gmra.mxu3 %v10305_v1 }
 0x6df   : > { %v10564_v55 = vpop.f32.mrf.mxu3 }
 0x6e0   : > { %v6111_v22 = vpop.f32.mrf.mxu2 }
 0x6e1   : > { %v10566_v17 = vadd.f32 %v6111_v22, %v6070_v45  ;;  %v5868_v53 = vpop.f32.mrf.mxu0  ;;  %v6097_v22 = vadd.f32 %v10541_v6, %v10527_v13 }
 0x6e2   : > { %v5869_v2 = vadd.f32 %v5868_v53, %v5828_v32  ;;  %v6076_v32 = vpop.f32.mrf.mxu1 }
 0x6e4   : > { %v6371_v18 = vadd.f32 %v6370_v35, %v5869_v2  ;;  %6195 = vmatmul.f32.gmra.mxu0 %v10442_v12  ;;  %6318 = vmatmul.f32.gmra.mxu3 %v10318_v37 }
 0x6e7   : > { %v10570_v36 = vpop.f32.mrf.mxu3 }
 0x6e8   : > { %v6114_v23 = vpop.f32.mrf.mxu2 }
 0x6e9   : > { %v10572_v48 = vadd.f32 %v6114_v23, %v6073_v5  ;;  %v5871_v52 = vpop.f32.mrf.mxu0 }
 0x6ea   : > { %v5872_v1 = vadd.f32 %v5871_v52, %v5831_v47 }
 0x6ec   : > { %v6372_v0 = vadd.f32 %v6371_v18, %v5872_v1  ;;  %6198 = vmatmul.f32.gmra.mxu0 %v10459_v43  ;;  %6321 = vmatmul.f32.gmra.mxu3 %v10331_v58  ;;  %v6100_v58 = vadd.f32 %v6099_v38, %v10535_v51  ;;  %v5936_v38 = vadd.f32 %v10482_v34, %v10444_v9 }
 0x6ef   : > { %v10576_v11 = vpop.f32.mrf.mxu3 }
 0x6f0   : > { %v6117_v45 = vpop.f32.mrf.mxu2 }
 0x6f1   : > { %v10578_v35 = vadd.f32 %v6117_v45, %v6076_v32  ;;  %v6014_v37 = vpop.f32.mrf.mxu0  ;;  %v6373_v45 = vrot.slane %v6372_v0, 4 }
 0x6f3   : > { %v6374_v51 = vadd.f32 %v6373_v45, %v6372_v0 }
 0x6f4   : > { %6341 = vmatmul.f32.vlgmr.msra.gmra.mxu0 %v10346_v8 }
 0x6f5   : > { %v6375_v9 = vrot.slane %v6374_v51, 2 }
 0x6f7   : > { %v6137_v53 = vpop.f32.mrf.mxu3 }
 0x6f8   : > { %v10583_v2 = vadd.f32 %v6137_v53, %v6097_v22  ;;  %v5942_v53 = vadd.f32 %v10502_v27, %v10474_v39 }
 0x6f9   : > { %v6017_v47 = vpop.f32.mrf.mxu0 }
 0x6fc   : > { %6344 = vmatmul.f32.gmra.mxu0 %v10361_v50 }
 0x6ff   : > { %v6140_v18 = vpop.f32.mrf.mxu3 }
 0x700   : > { %v10587_v5 = vadd.f32 %v6140_v18, %v6100_v58  ;;  %v5954_v18 = vadd.f32 %v10532_v21, %v10518_v40 }
 0x701   : > { %v6020_v23 = vpop.f32.mrf.mxu0 }
 0x704   : > { %6347 = vmatmul.f32.gmra.mxu0 %v10378_v63 }
 0x707   : > { %v6143_v52 = vpop.f32.mrf.mxu3 }
 0x708   : > { %v10590_v1 = vadd.f32 %v6143_v52, %v6103_v31  ;;  %v5933_v31 = vadd.f32 %v10472_v41, %v10423_v30  ;;  %v5983_v30 = vadd.f32 %v10556_v4, %v5942_v53 }
 0x709   : > { %v6023_v8 = vpop.f32.mrf.mxu0 }
 0x70c   : > { %6350 = vmatmul.f32.gmra.mxu0 %v10395_v19  ;;  %v5939_v19 = vadd.f32 %v10492_v15, %v10465_v29  ;;  %v5948_v15 = vadd.f32 %v10516_v46, %v10497_v10 }
 0x70e   : > { %v5980_v58 = vadd.f32 %v10552_v14, %v5939_v19  ;;  %v6024_v14 = vadd.f32 %v6023_v8, %v5983_v30  ;;  %v5989_v4 = vadd.f32 %v10564_v55, %v5948_v15 }
 0x70f   : > { %v6146_v13 = vpop.f32.mrf.mxu3 }
 0x710   : > { %v10593_v6 = vadd.f32 %v6146_v13, %v6106_v42  ;;  %v5977_v42 = vadd.f32 %v10547_v33, %v5936_v38  ;;  %v6021_v29 = vadd.f32 %v6020_v23, %v5980_v58 }
 0x711   : > { %v6026_v32 = vpop.f32.mrf.mxu0 }
 0x712   : > { %v6018_v34 = vadd.f32 %v6017_v47, %v5977_v42 }
 0x714   : > { %6353 = vmatmul.f32.gmra.mxu0 %v10410_v3  ;;  %v5974_v3 = vadd.f32 %v10539_v60, %v5933_v31  ;;  %v6376_v60 = vadd.f32 %v6375_v9, %v6374_v51 }
 0x716   : > { %v6015_v41 = vadd.f32 %v6014_v37, %v5974_v3  ;;  %v6377_v10 = vrot.slane %v6376_v60, 1 }
 0x717   : > { %v6149_v50 = vpop.f32.mrf.mxu3 }
 0x718   : > { %v10598_v22 = vadd.f32 %v6149_v50, %v6109_v16  ;;  %v5945_v16 = vadd.f32 %v10510_v28, %v10487_v20  ;;  %v6379_v33 = vadd.f32 %v6018_v34, %v6015_v41  ;;  %v5951_v20 = vadd.f32 %v10524_v56, %v10508_v24 }
 0x719   : > { %v6029_v63 = vpop.f32.mrf.mxu0  ;;  %v6378_v8 = vadd.f32 %v6377_v10, %v6376_v60  ;;  %v5995_v24 = vadd.f32 %v10576_v11, %v5954_v18 }
 0x71a   : > { %v5986_v39 = vadd.f32 %v10560_v49, %v5945_v16  ;;  %v6380_v28 = vadd.f32 %v6379_v33, %v6021_v29  ;;  %v5992_v47 = vadd.f32 %v10570_v36, %v5951_v20  ;;  %v6030_v49 = vadd.f32 %v6029_v63, %v5989_v4 }
 0x71b   : > { %v6418_v45 = vmul.f32 0.0009765625, %v6378_v8  ;;  %v6219_v8 = vpop.f32.mrf.mxu1 }
 0x71c   : > { %6356 = vmatmul.f32.gmra.mxu0 %v10427_v57  ;;  %v6027_v37 = vadd.f32 %v6026_v32, %v5986_v39  ;;  %v6381_v46 = vadd.f32 %v6380_v28, %v6024_v14 }
 0x71d   : > { %v6423_v40 = vadd.f32 1e-05, %v6418_v45 }
 0x71f   : > { %v6152_v27 = vpop.f32.mrf.mxu3  ;;  %7150 = vrsqrt.f32 %v6423_v40  ;;  %vm6433_vm4 = vweird.f32 %v6423_v40 }
 0x720   : > { %v10617_v0 = vadd.f32 %v6152_v27, %v10566_v17  ;;  %v6382_v17 = vadd.f32 %v6381_v46, %v6027_v37 }
 0x721   : > { %v6032_v57 = vpop.f32.mrf.mxu0 }
 0x722   : > { %v6033_v23 = vadd.f32 %v6032_v57, %v5992_v47  ;;  %v6383_v56 = vadd.f32 %v6382_v17, %v6030_v49 }
 0x723   : > { %v6222_v45 = vpop.f32.mrf.mxu1 }
 0x724   : > { %6359 = vmatmul.f32.gmra.mxu0 %v10442_v12  ;;  %v6384_v36 = vadd.f32 %v6383_v56, %v6033_v23 }
 0x725   : > { %v7151_v3 = vpop.eup %7150 }
 0x726   : > { %v6428_v16 = vmul.f32 %v7151_v3, %v6423_v40  ;;  %vm6434_vm1 = vweird.f32 %v7151_v3 }
 0x727   : > { %v6155_v52 = vpop.f32.mrf.mxu3  ;;  %vm6435_vm6 = vmor %vm6433_vm4, %vm6434_vm1 }
 0x728   : > { %v10628_v55 = vadd.f32 %v6155_v52, %v10572_v48  ;;  %v6429_v30 = vmul.f32 %v7151_v3, %v6428_v16  ;;  %v6260_v52 = vpop.f32.mrf.mxu2 }
 0x729   : > { %v6035_v13 = vpop.f32.mrf.mxu0 }
 0x72a   : > { %v6036_v32 = vadd.f32 %v6035_v13, %v5995_v24 }
 0x72c   : > { %v6385_v50 = vadd.f32 %v6384_v36, %v6036_v32  ;;  %6362 = vmatmul.f32.gmra.mxu0 %v10459_v43 }
 0x72e   : > { %v6386_v12 = vrot.slane %v6385_v50, 4 }
 0x72f   : > { %v6158_v38 = vpop.f32.mrf.mxu3 }
 0x730   : > { %v6387_v21 = vadd.f32 %v6386_v12, %v6385_v50  ;;  %v6159_v51 = vadd.f32 %v6158_v38, %v10578_v35  ;;  %v6263_v32 = vpop.f32.mrf.mxu2 }
 0x731   : > { %v6178_v63 = vpop.f32.mrf.mxu0 }
 0x732   : > { %v6388_v31 = vrot.slane %v6387_v21, 2  ;;  %v6179_v11 = vadd.f32 %v6178_v63, %v10583_v2  ;;  %v6430_v2 = vmul.f32 0.5, %v6429_v30  ;;  %v6225_v63 = vpop.f32.mrf.mxu1 }
 0x734   : > { %v6389_v48 = vadd.f32 %v6388_v31, %v6387_v21  ;;  %v6431_v60 = vsub.f32 1.5, %v6430_v2 }
 0x736   : > { %v6390_v19 = vrot.slane %v6389_v48, 1  ;;  %v6432_v4 = vmul.f32 %v7151_v3, %v6431_v60  ;;  %v6261_v60 = vadd.f32 %v6260_v52, %v6219_v8  ;;  %v6612_v52 = vld [vmem:[#allocation13 + $0x78] sm:$0xff] }
 0x737   : > { %v6301_v24 = vpop.f32.mrf.mxu3  ;;  %v10641_v8 = vld [vmem:[#allocation13 + $0x1f8] sm:$0xff]  ;;  %6661 = vmatpush.msrb.mxu1 %v6612_v52 }
 0x738   : > { %v6391_v42 = vadd.f32 %v6390_v19, %v6389_v48  ;;  %v6436_v47 = vsel %vm6435_vm6, %v7151_v3, %v6432_v4  ;;  %v6266_v21 = vpop.f32.mrf.mxu2  ;;  %v6628_v19 = vld [vmem:[#allocation13 + $0xf8] sm:$0xff]  ;;  %v6627_v3 = vld [vmem:[#allocation13 + $0xf0] sm:$0xff]  ;;  %v6302_v4 = vadd.f32 %v6301_v24, %v6261_v60  ;;  %6784 = vmatpush.msrb.mxu0 %v10641_v8 }
 0x739   : > { %v6181_v53 = vpop.f32.mrf.mxu0  ;;  %6702 = vmatpush.msra.mxu2 %v6628_v19  ;;  %v6610_v19 = vld [vmem:[#allocation13 + $0x68] sm:$0xff]  ;;  %v6604_v52 = vld [vmem:[#allocation13 + $0x38] sm:$0xff] }
 0x73a   : > { %v6419_v58 = vmul.f32 0.0009765625, %v6391_v42  ;;  %v6182_v9 = vadd.f32 %v6181_v53, %v10587_v5  ;;  %v6228_v48 = vpop.f32.mrf.mxu1 }
 0x73b   : > { %6703 = vmatpush.msra.mxu2 %v6627_v3 }
 0x73c   : > { %v6424_v43 = vadd.f32 1e-05, %v6419_v58  ;;  %v6392_v34 = vadd.f32 %v6182_v9, %v6179_v11 }
 0x73e   : > { %7152 = vrsqrt.f32 %v6424_v43  ;;  %vm6443_vm2 = vweird.f32 %v6424_v43 }
 0x73f   : > { %v6304_v50 = vpop.f32.mrf.mxu3 }
 0x741   : > { %v6184_v41 = vpop.f32.mrf.mxu0 }
 0x742   : > { %v6185_v35 = vadd.f32 %v6184_v41, %v10590_v1  ;;  %v6231_v9 = vpop.f32.mrf.mxu1 }
 0x744   : > { %v7153_v29 = vpop.eup %7152  ;;  %v6393_v15 = vadd.f32 %v6392_v34, %v6185_v35 }
 0x745   : > { %v6438_v39 = vmul.f32 %v7153_v29, %v6424_v43  ;;  %vm6444_vm0 = vweird.f32 %v7153_v29 }
 0x746   : > { %vm6445_vm3 = vmor %vm6443_vm2, %vm6444_vm0 }
 0x747   : > { %v6439_v27 = vmul.f32 %v7153_v29, %v6438_v39  ;;  %v6307_v31 = vpop.f32.mrf.mxu3 }
 0x749   : > { %v6440_v33 = vmul.f32 0.5, %v6439_v27  ;;  %v6187_v14 = vpop.f32.mrf.mxu0 }
 0x74a   : > { %v6188_v57 = vadd.f32 %v6187_v14, %v10593_v6  ;;  %v6234_v16 = vpop.f32.mrf.mxu1 }
 0x74b   : > { %v6441_v20 = vsub.f32 1.5, %v6440_v33  ;;  %v6267_v33 = vadd.f32 %v6266_v21, %v6225_v63  ;;  %v10644_v21 = vld [vmem:[#allocation13 + $0x1f0] sm:$0xff] }
 0x74c   : > { %v6394_v5 = vadd.f32 %v6393_v15, %v6188_v57  ;;  %v6264_v15 = vadd.f32 %v6263_v32, %v6222_v45  ;;  %6785 = vmatpush.msrb.mxu0 %v10644_v21 }
 0x74d   : > { %v6442_v28 = vmul.f32 %v7153_v29, %v6441_v20 }
 0x74e   : > { %v6305_v14 = vadd.f32 %v6304_v50, %v6264_v15  ;;  %v6640_v15 = vld [vmem:[#allocation13 + $0x158] sm:$0xff] }
 0x74f   : > { %v6446_v1 = vsel %vm6445_vm3, %v7153_v29, %v6442_v28  ;;  %v6310_v42 = vpop.f32.mrf.mxu3  ;;  %v6308_v28 = vadd.f32 %v6307_v31, %v6267_v33 }
 0x750   : > { %v6471_v37 = vrot.slane %v6446_v1, 7 }
 0x751   : > { %v6190_v10 = vpop.f32.mrf.mxu0 }
 0x752   : > { %v10636_v46 = vsel %vm6474_vm5, %v6436_v47, %v6471_v37  ;;  %v6191_v49 = vadd.f32 %v6190_v10, %v10598_v22  ;;  %v6237_v57 = vpop.f32.mrf.mxu1 }
 0x754   : > { %v6395_v6 = vadd.f32 %v6394_v5, %v6191_v49 }
 0x757   : > { %v6313_v43 = vpop.f32.mrf.mxu3 }
 0x759   : > { %v6193_v18 = vpop.f32.mrf.mxu0 }
 0x75a   : > { %v6194_v17 = vadd.f32 %v6193_v18, %v10617_v0  ;;  %v6269_v0 = vpop.f32.mrf.mxu2 }
 0x75b   : > { %v6270_v20 = vadd.f32 %v6269_v0, %v6228_v48  ;;  %v6642_v48 = vld [vmem:[#allocation13 + $0x168] sm:$0xff] }
 0x75c   : > { %v6396_v23 = vadd.f32 %v6395_v6, %v6194_v17 }
 0x75d   : > { %v6311_v10 = vadd.f32 %v6310_v42, %v6270_v20  ;;  %v10647_v42 = vld [vmem:[#allocation13 + $0x1e8] sm:$0xff]  ;;  %v6607_v20 = vld [vmem:[#allocation13 + $0x50] sm:$0xff] }
 0x75e   : > { %6786 = vmatpush.msrb.mxu0 %v10647_v42 }
 0x75f   : > { %v6316_v41 = vpop.f32.mrf.mxu3 }
 0x761   : > { %v6196_v56 = vpop.f32.mrf.mxu0 }
 0x762   : > { %v6197_v13 = vadd.f32 %v6196_v56, %v10628_v55  ;;  %v6626_v55 = vld [vmem:[#allocation13 + $0xe8] sm:$0xff]  ;;  %v6272_v58 = vpop.f32.mrf.mxu2 }
 0x763   : > { %6704 = vmatpush.msra.mxu2 %v6626_v55  ;;  %v6273_v47 = vadd.f32 %v6272_v58, %v6231_v9 }
 0x764   : > { %v6397_v36 = vadd.f32 %v6396_v23, %v6197_v13 }
 0x765   : > { %v6314_v17 = vadd.f32 %v6313_v43, %v6273_v47  ;;  %v6625_v43 = vld [vmem:[#allocation13 + $0xe0] sm:$0xff]  ;;  %v6606_v47 = vld [vmem:[#allocation13 + $0x48] sm:$0xff] }
 0x766   : > { %6705 = vmatpush.msra.mxu2 %v6625_v43  ;;  %v6615_v43 = vld [vmem:[#allocation13 + $0x90] sm:$0xff] }
 0x767   : > { %v6319_v5 = vpop.f32.mrf.mxu3 }
 0x769   : > { %v6199_v12 = vpop.f32.mrf.mxu0 }
 0x76a   : > { %v6200_v38 = vadd.f32 %v6199_v12, %v6159_v51  ;;  %v6275_v34 = vpop.f32.mrf.mxu2 }
 0x76b   : > { %v6276_v18 = vadd.f32 %v6275_v34, %v6234_v16  ;;  %v6609_v34 = vld [vmem:[#allocation13 + $0x60] sm:$0xff] }
 0x76c   : > { %v6398_v40 = vadd.f32 %v6397_v36, %v6200_v38  ;;  %v6644_v36 = vld [vmem:[#allocation13 + $0x178] sm:$0xff]  ;;  %v6643_v38 = vld [vmem:[#allocation13 + $0x170] sm:$0xff]  ;;  %v10650_v16 = vld [vmem:[#allocation13 + $0x1e0] sm:$0xff] }
 0x76d   : > { %6743 = vmatpush.msra.mxu3 %v6644_v36  ;;  %v6317_v45 = vadd.f32 %v6316_v41, %v6276_v18  ;;  %6787 = vmatpush.msrb.mxu0 %v10650_v16  ;;  %v6637_v18 = vld [vmem:[#allocation13 + $0x140] sm:$0xff]  ;;  %v6636_v36 = vld [vmem:[#allocation13 + $0x138] sm:$0xff] }
 0x76e   : > { %v6399_v30 = vrot.slane %v6398_v40, 4 }
 0x76f   : > { %6744 = vmatpush.msra.mxu3 %v6643_v38  ;;  %v6322_v3 = vpop.f32.mrf.mxu3  ;;  %v10671_v38 = vld [vmem:[#allocation13 + $0x1b0] sm:$0xff] }
 0x770   : > { %v6400_v29 = vadd.f32 %v6399_v30, %v6398_v40  ;;  %v6611_v40 = vld [vmem:[#allocation13 + $0x70] sm:$0xff] }
 0x771   : > { %v6342_v22 = vpop.f32.mrf.mxu0  ;;  %6662 = vmatpush.msrb.mxu1 %v6611_v40  ;;  %6745 = vmatpush.msra.mxu3 %v6642_v48 }
 0x772   : > { %v6401_v2 = vrot.slane %v6400_v29, 2  ;;  %v6278_v39 = vpop.f32.mrf.mxu2  ;;  %v6343_v49 = vadd.f32 %v6342_v22, %v6302_v4 }
 0x773   : > { %v6279_v24 = vadd.f32 %v6278_v39, %v6237_v57  ;;  %6663 = vmatpush.msrb.mxu1 %v6610_v19  ;;  %v6639_v57 = vld [vmem:[#allocation13 + $0x150] sm:$0xff]  ;;  %v6617_v19 = vld [vmem:[#allocation13 + $0xa0] sm:$0xff] }
 0x774   : > { %v6402_v1 = vadd.f32 %v6401_v2, %v6400_v29  ;;  %v6624_v29 = vld [vmem:[#allocation13 + $0xd8] sm:$0xff] }
 0x775   : > { %v6320_v63 = vadd.f32 %v6319_v5, %v6279_v24  ;;  %6664 = vmatpush.msrb.mxu1 %v6609_v34  ;;  %v6608_v2 = vld [vmem:[#allocation13 + $0x58] sm:$0xff]  ;;  %6706 = vmatpush.msra.mxu2 %v6624_v29  ;;  %v10656_v5 = vld [vmem:[#allocation13 + $0x1d0] sm:$0xff] }
 0x776   : > { %v6403_v23 = vrot.slane %v6402_v1, 1  ;;  %v6632_v34 = vld [vmem:[#allocation13 + $0x118] sm:$0xff]  ;;  %v6631_v29 = vld [vmem:[#allocation13 + $0x110] sm:$0xff] }
 0x777   : > { %6665 = vmatpush.msrb.mxu1 %v6608_v2  ;;  %v6614_v2 = vld [vmem:[#allocation13 + $0x88] sm:$0xff] }
 0x778   : > { %v6404_v31 = vadd.f32 %v6403_v23, %v6402_v1  ;;  %v6622_v1 = vld [vmem:[#allocation13 + $0xc8] sm:$0xff]  ;;  %v10664_v23 = vld [vmem:[#allocation13 + $0x1c0] sm:$0xff] }
 0x779   : > { %v6345_v11 = vpop.f32.mrf.mxu0  ;;  %6666 = vmatpush.msrb.mxu1 %v6607_v20  ;;  %v10689_v20 = vld [vmem:[#allocation13 + $0x188] sm:$0xff] }
 0x77a   : > { %v6346_v37 = vadd.f32 %v6345_v11, %v6305_v14  ;;  %v6281_v22 = vpop.f32.mrf.mxu2  ;;  %v6420_v30 = vmul.f32 0.0009765625, %v6404_v31  ;;  %v6623_v14 = vld [vmem:[#allocation13 + $0xd0] sm:$0xff]  ;;  %v6634_v31 = vld [vmem:[#allocation13 + $0x128] sm:$0xff] }
 0x77b   : > { %6707 = vmatpush.msra.mxu2 %v6623_v14  ;;  %6667 = vmatpush.msrb.mxu1 %v6606_v47  ;;  %v10693_v47 = vld [vmem:[#allocation13 + $0x180] sm:$0xff] }
 0x77c   : > { %v6405_v56 = vadd.f32 %v6346_v37, %v6343_v49  ;;  %v10658_v4 = vadd.f32 1e-05, %v6420_v30  ;;  %v6638_v37 = vld [vmem:[#allocation13 + $0x148] sm:$0xff] }
 0x77d   : > { %6708 = vmatpush.msra.mxu2 %v6622_v1  ;;  %v6597_v1 = vld [vmem:[#allocation13] sm:$0xff] }
 0x77e   : > { %7154 = vrsqrt.f32 %v10658_v4  ;;  %vm6453_vm8 = vweird.f32 %v10658_v4 }
 0x781   : > { %v6348_v53 = vpop.f32.mrf.mxu0 }
 0x782   : > { %v6349_v6 = vadd.f32 %v6348_v53, %v6308_v28  ;;  %v6240_v53 = vpop.f32.mrf.mxu1 }
 0x783   : > { %v6282_v55 = vadd.f32 %v6281_v22, %v6240_v53  ;;  %v6618_v22 = vld [vmem:[#allocation13 + $0xa8] sm:$0xff]  ;;  %v6616_v53 = vld [vmem:[#allocation13 + $0x98] sm:$0xff] }
 0x784   : > { %v6406_v50 = vadd.f32 %v6405_v56, %v6349_v6  ;;  %v6621_v6 = vld [vmem:[#allocation13 + $0xc0] sm:$0xff] }
 0x785   : > { %v6323_v41 = vadd.f32 %v6322_v3, %v6282_v55  ;;  %6709 = vmatpush.msra.mxu2 %v6621_v6  ;;  %v6601_v3 = vld [vmem:[#allocation13 + $0x20] sm:$0xff] }
 0x786   : > { %v6633_v55 = vld [vmem:[#allocation13 + $0x120] sm:$0xff] }
 0x789   : > { %v6351_v51 = vpop.f32.mrf.mxu0 }
 0x78a   : > { %v6352_v13 = vadd.f32 %v6351_v51, %v6311_v10  ;;  %v6641_v51 = vld [vmem:[#allocation13 + $0x160] sm:$0xff]  ;;  %v10661_v10 = vld [vmem:[#allocation13 + $0x1c8] sm:$0xff] }
 0x78b   : > { %6746 = vmatpush.msra.mxu3 %v6641_v51  ;;  %v6600_v51 = vld [vmem:[#allocation13 + $0x18] sm:$0xff] }
 0x78c   : > { %v6407_v11 = vadd.f32 %v6406_v50, %v6352_v13  ;;  %v6620_v13 = vld [vmem:[#allocation13 + $0xb8] sm:$0xff]  ;;  %v6635_v50 = vld [vmem:[#allocation13 + $0x130] sm:$0xff] }
 0x78d   : > { %6747 = vmatpush.msra.mxu3 %v6640_v15  ;;  %6710 = vmatpush.msra.mxu2 %v6620_v13 }
 0x78f   : > { %6748 = vmatpush.msra.mxu3 %v6639_v57  ;;  %v6613_v57 = vld [vmem:[#allocation13 + $0x80] sm:$0xff] }
 0x791   : > { %v6354_v35 = vpop.f32.mrf.mxu0  ;;  %6749 = vmatpush.msra.mxu3 %v6638_v37  ;;  %v6629_v37 = vld [vmem:[#allocation13 + $0x100] sm:$0xff] }
 0x792   : > { %v6355_v12 = vadd.f32 %v6354_v35, %v6314_v17  ;;  %v6605_v17 = vld [vmem:[#allocation13 + $0x40] sm:$0xff] }
 0x793   : > { %6750 = vmatpush.msra.mxu3 %v6637_v18  ;;  %6668 = vmatpush.msrb.mxu1 %v6605_v17 }
 0x794   : > { %v6408_v58 = vadd.f32 %v6407_v11, %v6355_v12  ;;  %v6603_v12 = vld [vmem:[#allocation13 + $0x30] sm:$0xff]  ;;  %v10674_v11 = vld [vmem:[#allocation13 + $0x1a8] sm:$0xff] }
 0x795   : > { %6751 = vmatpush.msra.mxu3 %v6636_v36  ;;  %6669 = vmatpush.msrb.mxu1 %v6604_v52 }
 0x797   : > { %6752 = vmatpush.msra.mxu3 %v6635_v50  ;;  %6670 = vmatpush.msrb.mxu1 %v6603_v12 }
 0x799   : > { %v6357_v27 = vpop.f32.mrf.mxu0  ;;  %6753 = vmatpush.msra.mxu3 %v6634_v31 }
 0x79a   : > { %v6358_v0 = vadd.f32 %v6357_v27, %v6317_v45  ;;  %v10653_v27 = vld [vmem:[#allocation13 + $0x1d8] sm:$0xff]  ;;  %v6619_v45 = vld [vmem:[#allocation13 + $0xb0] sm:$0xff] }
 0x79b   : > { %6788 = vmatpush.msrb.mxu0 %v10653_v27  ;;  %6711 = vmatpush.msra.mxu2 %v6619_v45 }
 0x79c   : > { %v6409_v35 = vadd.f32 %v6408_v58, %v6358_v0  ;;  %v10676_v0 = vpop.eup %7154  ;;  %v10679_v58 = vld [vmem:[#allocation13 + $0x1a0] sm:$0xff]  ;;  %6754 = vmatpush.msra.mxu3 %v6633_v55 }
 0x79d   : > { %6789 = vmatpush.msrb.mxu0 %v10656_v5  ;;  %6712 = vmatpush.msra.mxu2 %v6618_v22  ;;  %v6448_v30 = vmul.f32 %v10676_v0, %v10658_v4  ;;  %vm6454_vm7 = vweird.f32 %v10676_v0  ;;  %v6422_v4 = vld [vmem:[#allocation8] sm:$0xf] }
 0x79e   : > { %6755 = vmatpush.msra.mxu3 %v6632_v34  ;;  %vm6455_vm10 = vmor %vm6453_vm8, %vm6454_vm7 }
 0x79f   : > { %6790 = vmatpush.msrb.mxu0 %v10661_v10  ;;  %6713 = vmatpush.msra.mxu2 %v6617_v19 }
 0x7a0   : > { %6756 = vmatpush.msra.mxu3 %v6631_v29 }
 0x7a1   : > { %v6360_v32 = vpop.f32.mrf.mxu0  ;;  %6791 = vmatpush.msrb.mxu0 %v10664_v23  ;;  %6714 = vmatpush.msra.mxu2 %v6616_v53 }
 0x7a2   : > { %v6361_v9 = vadd.f32 %v6360_v32, %v6320_v63  ;;  %v10668_v32 = vld [vmem:[#allocation13 + $0x1b8] sm:$0xff]  ;;  %v6602_v63 = vld [vmem:[#allocation13 + $0x28] sm:$0xff] }
 0x7a3   : > { %6792 = vmatpush.msrb.mxu0 %v10668_v32  ;;  %6671 = vmatpush.msrb.mxu1 %v6602_v63 }
 0x7a4   : > { %v6410_v60 = vadd.f32 %v6409_v35, %v6361_v9  ;;  %v6599_v35 = vld [vmem:[#allocation13 + $0x10] sm:$0xff]  ;;  %6715 = vmatpush.msra.mxu2 %v6615_v43 }
 0x7a5   : > { %6793 = vmatpush.msrb.mxu0 %v10671_v38  ;;  %6672 = vmatpush.msrb.mxu1 %v6601_v3 }
 0x7a6   : > { %6716 = vmatpush.msra.mxu2 %v6614_v2 }
 0x7a7   : > { %6794 = vmatpush.msrb.mxu0 %v10674_v11  ;;  %6673 = vmatpush.msrb.mxu1 %v6600_v51  ;;  %v11036_v51 = vld [vmem:[#allocation29_spill] sm:$0xff] }
 0x7a8   : > { %6717 = vmatpush.msra.mxu2 %v6613_v57  ;;  %v11038_v57 = vld [vmem:[#allocation28_spill] sm:$0xff] }
 0x7a9   : > { %v6363_v39 = vpop.f32.mrf.mxu0  ;;  %6795 = vmatpush.msrb.mxu0 %v10679_v58  ;;  %6674 = vmatpush.msrb.mxu1 %v6599_v35 }
 0x7aa   : > { %v6364_v33 = vadd.f32 %v6363_v39, %v6323_v41  ;;  %v10684_v41 = vld [vmem:[#allocation13 + $0x198] sm:$0xff]  ;;  %v10686_v39 = vld [vmem:[#allocation13 + $0x190] sm:$0xff]  ;;  %7020 = vmatpush.msrb.mxu2 %v10641_v8 }
 0x7ab   : > { %6796 = vmatpush.msrb.mxu0 %v10684_v41 }
 0x7ac   : > { %v6411_v28 = vadd.f32 %v6410_v60, %v6364_v33  ;;  %v6598_v60 = vld [vmem:[#allocation13 + $0x8] sm:$0xff]  ;;  %7021 = vmatpush.msrb.mxu2 %v10644_v21 }
 0x7ad   : > { %v6630_v33 = vld [vmem:[#allocation13 + $0x108] sm:$0xff]  ;;  %6797 = vmatpush.msrb.mxu0 %v10686_v39  ;;  %6675 = vmatpush.msrb.mxu1 %v6598_v60 }
 0x7ae   : > { %v6412_v49 = vrot.slane %v6411_v28, 4  ;;  %6757 = vmatpush.msra.mxu3 %v6630_v33  ;;  %7022 = vmatpush.msrb.mxu2 %v10647_v42 }
 0x7af   : > { %6798 = vmatpush.msrb.mxu0 %v10689_v20  ;;  %6676 = vmatpush.msrb.mxu1 %v6597_v1 }
 0x7b0   : > { %v6413_v56 = vadd.f32 %v6412_v49, %v6411_v28  ;;  %v6449_v28 = vmul.f32 %v10676_v0, %v6448_v30  ;;  %6758 = vmatpush.msra.mxu3 %v6629_v37  ;;  %7023 = vmatpush.msrb.mxu2 %v10650_v16  ;;  %v11039_v37 = vld [vmem:[#allocation23_spill] sm:$0xff] }
 0x7b1   : > { %6799 = vmatpush.msrb.mxu0 %v10693_v47 }
 0x7b2   : > { %v6414_v24 = vrot.slane %v6413_v56, 2  ;;  %v6450_v49 = vmul.f32 0.5, %v6449_v28  ;;  %7024 = vmatpush.msrb.mxu2 %v10653_v27 }
 0x7b4   : > { %v6415_v40 = vadd.f32 %v6414_v24, %v6413_v56  ;;  %v6451_v18 = vsub.f32 1.5, %v6450_v49  ;;  %7025 = vmatpush.msrb.mxu2 %v10656_v5  ;;  %v6523_v5 = vld [vmem:[#allocation10] sm:$0xf] }
 0x7b5   : > { %v10712_v12 = vperm.slane %v6523_v5, 0 }
 0x7b6   : > { %v6416_v48 = vrot.slane %v6415_v40, 1  ;;  %v6452_v13 = vmul.f32 %v10676_v0, %v6451_v18  ;;  %7026 = vmatpush.msrb.mxu2 %v10661_v10  ;;  %v10714_v10 = vperm.slane %v6523_v5, 1 }
 0x7b8   : > { %v6417_v9 = vadd.f32 %v6416_v48, %v6415_v40  ;;  %v6456_v21 = vsel %vm6455_vm10, %v10676_v0, %v6452_v13  ;;  %7027 = vmatpush.msrb.mxu2 %v10664_v23  ;;  %v10716_v40 = vperm.slane %v6523_v5, 2  ;;  %v10718_v23 = vperm.slane %v6523_v5, 3  ;;  %v11034_v0 = vld [vmem:[#allocation37_spill] sm:$0xff]  ;;  %v11042_v5 = vld [vmem:[#allocation32_spill] sm:$0xff] }
 0x7b9   : > { %v6472_v52 = vrot.slane %v6456_v21, 6 }
 0x7ba   : > { %v6421_v15 = vmul.f32 0.0009765625, %v6417_v9  ;;  %7028 = vmatpush.msrb.mxu2 %v10668_v32  ;;  %v11035_v9 = vld [vmem:[#allocation40_spill] sm:$0xff] }
 0x7bc   : > { %v6426_v14 = vadd.f32 1e-05, %v6421_v15  ;;  %7029 = vmatpush.msrb.mxu2 %v10671_v38  ;;  %v11033_v38 = vld [vmem:[#allocation39_spill] sm:$0xff] }
 0x7be   : > { %7156 = vrsqrt.f32 %v6426_v14  ;;  %vm6463_vm11 = vweird.f32 %v6426_v14  ;;  %7030 = vmatpush.msrb.mxu2 %v10674_v11 }
 0x7c0   : > { %7031 = vmatpush.msrb.mxu2 %v10679_v58 }
 0x7c2   : > { %7032 = vmatpush.msrb.mxu2 %v10684_v41 }
 0x7c4   : > { %v7157_v6 = vpop.eup %7156  ;;  %7033 = vmatpush.msrb.mxu2 %v10686_v39 }
 0x7c5   : > { %v6458_v17 = vmul.f32 %v7157_v6, %v6426_v14  ;;  %vm6464_vm9 = vweird.f32 %v7157_v6  ;;  %v11037_v14 = vld [vmem:[#allocation41_spill] sm:$0xff] }
 0x7c6   : > { %vm6465_vm12 = vmor %vm6463_vm11, %vm6464_vm9  ;;  %7034 = vmatpush.msrb.mxu2 %v10689_v20 }
 0x7c7   : > { %v6459_v56 = vmul.f32 %v7157_v6, %v6458_v17 }
 0x7c8   : > { %7035 = vmatpush.msrb.mxu2 %v10693_v47 }
 0x7c9   : > { %v6460_v36 = vmul.f32 0.5, %v6459_v56 }
 0x7cb   : > { %v6461_v8 = vsub.f32 1.5, %v6460_v36 }
 0x7cd   : > { %v6462_v42 = vmul.f32 %v7157_v6, %v6461_v8  ;;  %v11040_v8 = vld [vmem:[#allocation42_spill] sm:$0xff] }
 0x7cf   : > { %v6466_v16 = vsel %vm6465_vm12, %v7157_v6, %v6462_v42  ;;  %v11041_v42 = vld [vmem:[#allocation22_spill] sm:$0xff] }
 0x7d0   : > { %v6473_v27 = vrot.slane %v6466_v16, 5 }
 0x7d2   : > { %v6477_v24 = vsel %vm6476_vm13, %v6472_v52, %v6473_v27 }
 0x7d3   : > { %v6479_v45 = vsel %vm6478_vm14, %v10636_v46, %v6477_v24 }
 0x7d4   : > { %v6481_v50 = vmul.f32 %v6479_v45, %v6422_v4 }
 0x7d6   : > { %v10721_v22 = vperm.slane %v6481_v50, 0  ;;  %v10723_v32 = vperm.slane %v6481_v50, 1  ;;  %v10725_v63 = vperm.slane %v6481_v50, 2  ;;  %v10727_v46 = vperm.slane %v6481_v50, 3 }
 0x7d8   : > { %v6491_v31 = vmul.f32 %v10721_v22, %v11033_v38  ;;  %v6492_v48 = vmul.f32 %v10723_v32, %v11034_v0  ;;  %v6493_v19 = vmul.f32 %v10725_v63, %v10203_v25  ;;  %v6494_v11 = vmul.f32 %v10727_v46, %v10340_v26 }
 0x7d9   : > { %v6495_v43 = vmul.f32 %v10721_v22, %v11035_v9  ;;  %v6496_v34 = vmul.f32 %v10723_v32, %v11036_v51  ;;  %v6497_v35 = vmul.f32 %v10725_v63, %v10218_v62  ;;  %v6498_v29 = vmul.f32 %v10727_v46, %v10354_v59  ;;  %v11045_v9 = vld [vmem:[#allocation43_spill] sm:$0xff]  ;;  %v11046_v51 = vld [vmem:[#allocation30_spill] sm:$0xff] }
 0x7da   : > { %v6533_v53 = vadd.f32 %v10712_v12, %v6491_v31  ;;  %v6534_v3 = vadd.f32 %v10714_v10, %v6492_v48  ;;  %v6535_v55 = vadd.f32 %v10716_v40, %v6493_v19  ;;  %v6536_v58 = vadd.f32 %v10718_v23, %v6494_v11  ;;  %v11043_v19 = vld [vmem:[#allocation38_spill] sm:$0xff] }
 0x7db   : > { %v6537_v15 = vadd.f32 %v10712_v12, %v6495_v43  ;;  %v6538_v2 = vadd.f32 %v10714_v10, %v6496_v34  ;;  %v6539_v39 = vadd.f32 %v10716_v40, %v6497_v35  ;;  %v6540_v60 = vadd.f32 %v10718_v23, %v6498_v29 }
 0x7dc   : > { %v6565_v25 = vmax.f32 %v6533_v53, 0.0  ;;  %v6566_v26 = vmax.f32 %v6534_v3, 0.0  ;;  %v6567_v30 = vmax.f32 %v6535_v55, 0.0  ;;  %v6568_v41 = vmax.f32 %v6536_v58, 0.0  ;;  %v11044_v53 = vld [vmem:[#allocation21_spill] sm:$0xff] }
 0x7dd   : > { %v6569_v62 = vmax.f32 %v6537_v15, 0.0  ;;  %v6570_v33 = vmax.f32 %v6538_v2, 0.0  ;;  %v6499_v59 = vmul.f32 %v10721_v22, %v11037_v14  ;;  %v6500_v20 = vmul.f32 %v10723_v32, %v11038_v57  ;;  %v11047_v15 = vld [vmem:[#allocation34_spill] sm:$0xff]  ;;  %v11049_v14 = vld [vmem:[#allocation44_spill] sm:$0xff] }
 0x7de   : > { %6677 = vmatmul.f32.vlgmr.msrb.gmra.mxu1 %v6565_v25  ;;  %6718 = vmatmul.f32.vlgmr.msra.gmra.mxu2 %v6566_v26  ;;  %v6571_v28 = vmax.f32 %v6539_v39, 0.0  ;;  %v6572_v1 = vmax.f32 %v6540_v60, 0.0  ;;  %v6501_v49 = vmul.f32 %v10725_v63, %v11039_v37  ;;  %v6502_v47 = vmul.f32 %v10727_v46, %v10371_v54  ;;  %v11048_v39 = vld [vmem:[#allocation26_spill] sm:$0xff]  ;;  %v11050_v57 = vld [vmem:[#allocation24_spill] sm:$0xff] }
 0x7df   : > { %6759 = vmatmul.f32.vlgmr.msra.gmra.mxu3 %v6567_v30  ;;  %6800 = vmatmul.f32.vlgmr.msrb.gmra.mxu0 %v6568_v41  ;;  %v6541_v6 = vadd.f32 %v10712_v12, %v6499_v59  ;;  %v6542_v18 = vadd.f32 %v10714_v10, %v6500_v20  ;;  %v6503_v21 = vmul.f32 %v10721_v22, %v11040_v8  ;;  %v11053_v8 = vld [vmem:[#allocation45_spill] sm:$0xff] }
 0x7e0   : > { %v6543_v17 = vadd.f32 %v10716_v40, %v6501_v49  ;;  %v6544_v56 = vadd.f32 %v10718_v23, %v6502_v47  ;;  %v6504_v54 = vmul.f32 %v10723_v32, %v11041_v42  ;;  %v6505_v27 = vmul.f32 %v10725_v63, %v10250_v61 }
 0x7e1   : > { %v6573_v13 = vmax.f32 %v6541_v6, 0.0  ;;  %v6574_v36 = vmax.f32 %v6542_v18, 0.0  ;;  %v6506_v4 = vmul.f32 %v10727_v46, %v10388_v7  ;;  %v6518_v24 = vmul.f32 %v10727_v46, %v10435_v44  ;;  %v11051_v18 = vld [vmem:[#allocation36_spill] sm:$0xff] }
 0x7e2   : > { %v6575_v16 = vmax.f32 %v6543_v17, 0.0  ;;  %v6576_v52 = vmax.f32 %v6544_v56, 0.0  ;;  %v6522_v45 = vmul.f32 %v10727_v46, %v11042_v5  ;;  %v6545_v50 = vadd.f32 %v10712_v12, %v6503_v21  ;;  %v11052_v56 = vld [vmem:[#allocation31_spill] sm:$0xff] }
 0x7e3   : > { %v6546_v38 = vadd.f32 %v10714_v10, %v6504_v54  ;;  %v10785_v31 = vadd.f32 %v10718_v23, %v6518_v24  ;;  %v6547_v61 = vadd.f32 %v10716_v40, %v6505_v27  ;;  %v6548_v7 = vadd.f32 %v10718_v23, %v6506_v4  ;;  %v11054_v27 = vld [vmem:[#allocation35_spill] sm:$0xff]  ;;  %v11055_v24 = vld [vmem:[#allocation25_spill] sm:$0xff] }
 0x7e4   : > { %v10790_v0 = vadd.f32 %v10718_v23, %v6522_v45  ;;  %v6577_v44 = vmax.f32 %v6545_v50, 0.0  ;;  %v6507_v11 = vmul.f32 %v10721_v22, %v11043_v19  ;;  %v6508_v3 = vmul.f32 %v10723_v32, %v11044_v53  ;;  %v11056_v50 = vld [vmem:[#allocation46_spill] sm:$0xff] }
 0x7e5   : > { %v6578_v48 = vmax.f32 %v6546_v38, 0.0  ;;  %v6579_v55 = vmax.f32 %v6547_v61, 0.0  ;;  %v6580_v58 = vmax.f32 %v6548_v7, 0.0  ;;  %v6509_v43 = vmul.f32 %v10725_v63, %v11045_v9 }
 0x7e6   : > { %6680 = vmatmul.f32.gmra.mxu1 %v6569_v62  ;;  %6721 = vmatmul.f32.gmra.mxu2 %v6570_v33  ;;  %v6510_v34 = vmul.f32 %v10727_v46, %v11046_v51  ;;  %v6549_v25 = vadd.f32 %v10712_v12, %v6507_v11  ;;  %v6550_v26 = vadd.f32 %v10714_v10, %v6508_v3 }
 0x7e7   : > { %6762 = vmatmul.f32.gmra.mxu3 %v6571_v28  ;;  %6803 = vmatmul.f32.gmra.mxu0 %v6572_v1  ;;  %v6551_v30 = vadd.f32 %v10716_v40, %v6509_v43  ;;  %v6511_v2 = vmul.f32 %v10721_v22, %v11047_v15  ;;  %v6512_v60 = vmul.f32 %v10723_v32, %v11048_v39 }
 0x7e8   : > { %v6552_v41 = vadd.f32 %v10718_v23, %v6510_v34  ;;  %v6581_v35 = vmax.f32 %v6549_v25, 0.0  ;;  %v6582_v29 = vmax.f32 %v6550_v26, 0.0  ;;  %v6513_v59 = vmul.f32 %v10725_v63, %v11049_v14  ;;  %v7454_v25 = vld [vmem:[#allocation2 + $0x33] sm:$0xff] }
 0x7e9   : > { %v6583_v62 = vmax.f32 %v6551_v30, 0.0  ;;  %v6514_v20 = vmul.f32 %v10727_v46, %v11050_v57  ;;  %v6553_v28 = vadd.f32 %v10712_v12, %v6511_v2  ;;  %v6554_v1 = vadd.f32 %v10714_v10, %v6512_v60  ;;  %v7455_v60 = vld [vmem:[#allocation2 + $0x43] sm:$0xff] }
 0x7ea   : > { %v6584_v33 = vmax.f32 %v6552_v41, 0.0  ;;  %v6555_v37 = vadd.f32 %v10716_v40, %v6513_v59  ;;  %v6515_v17 = vmul.f32 %v10721_v22, %v11051_v18  ;;  %v6516_v46 = vmul.f32 %v10723_v32, %v11052_v56  ;;  %v6827_v57 = vld [vmem:[%s7957_s24 + $0x10] sm:$0xff] }
 0x7eb   : > { %v6556_v49 = vadd.f32 %v10718_v23, %v6514_v20  ;;  %v6585_v47 = vmax.f32 %v6553_v28, 0.0  ;;  %v6586_v6 = vmax.f32 %v6554_v1, 0.0  ;;  %v6517_v21 = vmul.f32 %v10725_v63, %v11053_v8 }
 0x7ec   : > { %v6557_v42 = vadd.f32 %v10712_v12, %v6515_v17  ;;  %v6558_v23 = vadd.f32 %v10714_v10, %v6516_v46  ;;  %v6519_v4 = vmul.f32 %v10721_v22, %v11054_v27  ;;  %v6520_v5 = vmul.f32 %v10723_v32, %v11055_v24  ;;  %v6828_v46 = vld [vmem:[%s7957_s24 + $0x18] sm:$0xff] }
 0x7ed   : > { %v6559_v54 = vadd.f32 %v10716_v40, %v6517_v21  ;;  %v6521_v38 = vmul.f32 %v10725_v63, %v11056_v50  ;;  %v6592_v32 = vmax.f32 %v10785_v31, 0.0  ;;  %v6596_v63 = vmax.f32 %v10790_v0, 0.0 }
 0x7ee   : > { %6683 = vmatmul.f32.gmra.mxu1 %v6573_v13  ;;  %6724 = vmatmul.f32.gmra.mxu2 %v6574_v36  ;;  %v6587_v13 = vmax.f32 %v6555_v37, 0.0  ;;  %v6588_v36 = vmax.f32 %v6556_v49, 0.0  ;;  %v6561_v61 = vadd.f32 %v10712_v12, %v6519_v4  ;;  %v6562_v7 = vadd.f32 %v10714_v10, %v6520_v5  ;;  %v6829_v4 = vld [vmem:[%s7957_s24 + $0x20] sm:$0xff] }
 0x7ef   : > { %6765 = vmatmul.f32.gmra.mxu3 %v6575_v16  ;;  %6806 = vmatmul.f32.gmra.mxu0 %v6576_v52  ;;  %v6589_v16 = vmax.f32 %v6557_v42, 0.0  ;;  %v6590_v52 = vmax.f32 %v6558_v23, 0.0  ;;  %v6591_v45 = vmax.f32 %v6559_v54, 0.0  ;;  %v7457_v42 = vld [vmem:[#allocation2 + $0x63] sm:$0xff] }
 0x7f0   : > { %v6594_v19 = vmax.f32 %v6562_v7, 0.0 }
 0x7f6   : > { %6686 = vmatmul.f32.gmra.mxu1 %v6577_v44  ;;  %6727 = vmatmul.f32.gmra.mxu2 %v6578_v48  ;;  %v6563_v44 = vadd.f32 %v10716_v40, %v6521_v38  ;;  %v6593_v48 = vmax.f32 %v6561_v61, 0.0  ;;  %v7458_v38 = vld [vmem:[#allocation2 + $0x73] sm:$0xff] }
 0x7f7   : > { %6768 = vmatmul.f32.gmra.mxu3 %v6579_v55  ;;  %6809 = vmatmul.f32.gmra.mxu0 %v6580_v58  ;;  %v6825_v58 = vld [vmem:[%s7957_s24] sm:$0xff] }
 0x7f8   : > { %v6595_v22 = vmax.f32 %v6563_v44, 0.0 }
 0x7fe   : > { %6689 = vmatmul.f32.gmra.mxu1 %v6581_v35  ;;  %6730 = vmatmul.f32.gmra.mxu2 %v6582_v29  ;;  %v6826_v35 = vld [vmem:[%s7957_s24 + $0x8] sm:$0xff] }
 0x7ff   : > { %6771 = vmatmul.f32.gmra.mxu3 %v6583_v62  ;;  %6812 = vmatmul.f32.gmra.mxu0 %v6584_v33 }
 0x806   : > { %6692 = vmatmul.f32.gmra.mxu1 %v6585_v47  ;;  %6733 = vmatmul.f32.gmra.mxu2 %v6586_v6  ;;  %v7456_v47 = vld [vmem:[#allocation2 + $0x53] sm:$0xff] }
 0x807   : > { %6774 = vmatmul.f32.gmra.mxu3 %v6587_v13  ;;  %6815 = vmatmul.f32.gmra.mxu0 %v6588_v36 }
 0x80e   : > { %6695 = vmatmul.f32.gmra.mxu1 %v6589_v16  ;;  %6736 = vmatmul.f32.gmra.mxu2 %v6590_v52 }
 0x80f   : > { %6777 = vmatmul.f32.gmra.mxu3 %v6591_v45 }
 0x816   : > { %6698 = vmatmul.f32.gmra.mxu1 %v6593_v48  ;;  %6739 = vmatmul.f32.gmra.mxu2 %v6594_v19 }
 0x817   : > { %6780 = vmatmul.f32.gmra.mxu3 %v6595_v22  ;;  %v6830_v22 = vld [vmem:[%s7957_s24 + $0x28] sm:$0xff] }
 0x81e   : > { %6818 = vmatmul.f32.vlgmr.msrb.gmra.mxu2 %v6592_v32 }
 0x826   : > { %6821 = vmatmul.f32.gmra.mxu2 %v6596_v63 }
 0x85b   : > { %v6678_v11 = vpop.f32.mrf.mxu1 }
 0x85c   : > { %v6801_v53 = vpop.f32.mrf.mxu0 }
 0x861   : > { %v6719_v12 = vpop.f32.mrf.mxu2 }
 0x862   : > { %v6720_v3 = vadd.f32 %v6719_v12, %v6678_v11  ;;  %v6760_v10 = vpop.f32.mrf.mxu3 }
 0x863   : > { %v6681_v40 = vpop.f32.mrf.mxu1 }
 0x864   : > { %v6761_v55 = vadd.f32 %v6760_v10, %v6720_v3  ;;  %v6804_v9 = vpop.f32.mrf.mxu0 }
 0x866   : > { %v6802_v43 = vadd.f32 %v6801_v53, %v6761_v55  ;;  %v7459_v53 = vld [vmem:[#allocation2 + $0x83] sm:$0xff] }
 0x868   : > { %v6833_v51 = vmul.f32 %v6825_v58, %v6802_v43  ;;  %v6831_v43 = vld [vmem:[%s7957_s24 + $0x30] sm:$0xff] }
 0x869   : > { %v6722_v34 = vpop.f32.mrf.mxu2 }
 0x86a   : > { %v10837_v26 = vadd.f32 %v7454_v25, %v6833_v51  ;;  %v6723_v31 = vadd.f32 %v6722_v34, %v6681_v40  ;;  %v6763_v0 = vpop.f32.mrf.mxu3 }
 0x86b   : > { %v6684_v30 = vpop.f32.mrf.mxu1 }
 0x86c   : > { %6849 = vst [vmem:[#allocation2 + $0x33] sm:$0xff] %v10837_v26  ;;  %v6764_v41 = vadd.f32 %v6763_v0, %v6723_v31  ;;  %v6807_v15 = vpop.f32.mrf.mxu0  ;;  %v7460_v0 = vld [vmem:[#allocation2 + $0x93] sm:$0xff] }
 0x86e   : > { %v6805_v29 = vadd.f32 %v6804_v9, %v6764_v41 }
 0x870   : > { %v6834_v2 = vmul.f32 %v6826_v35, %v6805_v29 }
 0x871   : > { %v6725_v39 = vpop.f32.mrf.mxu2 }
 0x872   : > { %v10841_v62 = vadd.f32 %v7455_v60, %v6834_v2  ;;  %v6726_v33 = vadd.f32 %v6725_v39, %v6684_v30  ;;  %v6766_v14 = vpop.f32.mrf.mxu3  ;;  %v7461_v60 = vld [vmem:[#allocation2 + $0xa3] sm:$0xff] }
 0x873   : > { %v6687_v20 = vpop.f32.mrf.mxu1 }
 0x874   : > { %6850 = vst [vmem:[#allocation2 + $0x43] sm:$0xff] %v10841_v62  ;;  %v6767_v59 = vadd.f32 %v6766_v14, %v6726_v33  ;;  %v6810_v37 = vpop.f32.mrf.mxu0 }
 0x876   : > { %v6808_v28 = vadd.f32 %v6807_v15, %v6767_v59  ;;  %v6832_v15 = vld [vmem:[%s7957_s24 + $0x38] sm:$0xff] }
 0x878   : > { %v6835_v1 = vmul.f32 %v6827_v57, %v6808_v28 }
 0x879   : > { %v6728_v49 = vpop.f32.mrf.mxu2 }
 0x87a   : > { %v6843_v6 = vadd.f32 %v7456_v47, %v6835_v1  ;;  %v6729_v18 = vadd.f32 %v6728_v49, %v6687_v20  ;;  %v6769_v17 = vpop.f32.mrf.mxu3 }
 0x87b   : > { %v6690_v36 = vpop.f32.mrf.mxu1 }
 0x87c   : > { %6851 = vst [vmem:[#allocation2 + $0x53] sm:$0xff] %v6843_v6  ;;  %v6770_v56 = vadd.f32 %v6769_v17, %v6729_v18  ;;  %v6813_v52 = vpop.f32.mrf.mxu0 }
 0x87e   : > { %v6811_v13 = vadd.f32 %v6810_v37, %v6770_v56 }
 0x880   : > { %v6836_v8 = vmul.f32 %v6828_v46, %v6811_v13 }
 0x881   : > { %v6731_v21 = vpop.f32.mrf.mxu2 }
 0x882   : > { %v6844_v23 = vadd.f32 %v7457_v42, %v6836_v8  ;;  %v6732_v54 = vadd.f32 %v6731_v21, %v6690_v36  ;;  %v6772_v16 = vpop.f32.mrf.mxu3 }
 0x883   : > { %v6693_v45 = vpop.f32.mrf.mxu1 }
 0x884   : > { %6852 = vst [vmem:[#allocation2 + $0x63] sm:$0xff] %v6844_v23  ;;  %v6773_v27 = vadd.f32 %v6772_v16, %v6732_v54  ;;  %v6816_v19 = vpop.f32.mrf.mxu0 }
 0x886   : > { %v6814_v24 = vadd.f32 %v6813_v52, %v6773_v27 }
 0x888   : > { %v6837_v5 = vmul.f32 %v6829_v4, %v6814_v24 }
 0x889   : > { %v6734_v50 = vpop.f32.mrf.mxu2 }
 0x88a   : > { %v6845_v61 = vadd.f32 %v7458_v38, %v6837_v5  ;;  %v6735_v7 = vadd.f32 %v6734_v50, %v6693_v45  ;;  %v6775_v44 = vpop.f32.mrf.mxu3 }
 0x88b   : > { %v6696_v3 = vpop.f32.mrf.mxu1 }
 0x88c   : > { %6853 = vst [vmem:[#allocation2 + $0x73] sm:$0xff] %v6845_v61  ;;  %v6776_v48 = vadd.f32 %v6775_v44, %v6735_v7 }
 0x88e   : > { %v6817_v32 = vadd.f32 %v6816_v19, %v6776_v48 }
 0x890   : > { %v6838_v63 = vmul.f32 %v6830_v22, %v6817_v32 }
 0x891   : > { %v6737_v11 = vpop.f32.mrf.mxu2 }
 0x892   : > { %v6846_v12 = vadd.f32 %v7459_v53, %v6838_v63  ;;  %v6738_v40 = vadd.f32 %v6737_v11, %v6696_v3  ;;  %v6778_v55 = vpop.f32.mrf.mxu3 }
 0x893   : > { %v6699_v34 = vpop.f32.mrf.mxu1 }
 0x894   : > { %6854 = vst [vmem:[#allocation2 + $0x83] sm:$0xff] %v6846_v12  ;;  %v6779_v58 = vadd.f32 %v6778_v55, %v6738_v40 }
 0x899   : > { %v6740_v10 = vpop.f32.mrf.mxu2 }
 0x89a   : > { %v6741_v25 = vadd.f32 %v6740_v10, %v6699_v34  ;;  %v6781_v41 = vpop.f32.mrf.mxu3 }
 0x89c   : > { %v6782_v35 = vadd.f32 %v6781_v41, %v6741_v25 }
 0x8a1   : > { %v6819_v9 = vpop.f32.mrf.mxu2 }
 0x8a2   : > { %v6820_v51 = vadd.f32 %v6819_v9, %v6779_v58 }
 0x8a4   : > { %v6839_v31 = vmul.f32 %v6831_v43, %v6820_v51 }
 0x8a6   : > { %v6847_v30 = vadd.f32 %v7460_v0, %v6839_v31 }
 0x8a8   : > { %6855 = vst [vmem:[#allocation2 + $0x93] sm:$0xff] %v6847_v30 }
 0x8a9   : > { %v6822_v29 = vpop.f32.mrf.mxu2 }
 0x8aa   : > { %v6823_v2 = vadd.f32 %v6822_v29, %v6782_v35 }
 0x8ac   : > { %v6840_v39 = vmul.f32 %v6832_v15, %v6823_v2  ;;  %6860 = sbr.rel (%p7000_p1) target bundleno = 2233 (0x8b9), region = 96 }
 0x8ae   : > { %v6848_v33 = vadd.f32 %v7461_v60, %v6840_v39 }
 0x8b0   : > { %6856 = vst [vmem:[#allocation2 + $0xa3] sm:$0xff] %v6848_v33 }
 0x8b1   : > { %6861 = vst [vmem:[%s10899_s9] sm:$0xff] %v10837_v26 }
 0x8b2   : > { %6862 = vst [vmem:[%s10899_s9 + $0x8] sm:$0xff] %v10841_v62 }
 0x8b3   : > { %6863 = vst [vmem:[%s10899_s9 + $0x10] sm:$0xff] %v6843_v6 }
 0x8b4   : > { %6864 = vst [vmem:[%s10899_s9 + $0x18] sm:$0xff] %v6844_v23 }
 0x8b5   : > { %6865 = vst [vmem:[%s10899_s9 + $0x20] sm:$0xff] %v6845_v61 }
 0x8b6   : > { %6866 = vst [vmem:[%s10899_s9 + $0x28] sm:$0xff] %v6846_v12 }
 0x8b7   : > { %6867 = vst [vmem:[%s10899_s9 + $0x30] sm:$0xff] %v6847_v30 }
 0x8b8   : > { %6868 = vst [vmem:[%s10899_s9 + $0x38] sm:$0xff] %v6848_v33 }
 0x8b9 PF: > { %p23_p3 = scmp.ge.s32.totalorder %s7896_s28, 4   ;;  %s11057_s30 = smov %s7744_s10 }
 0x8ba   : > { %s11058_s10 = smov %s7748_s11  ;;  %s11059_s11 = smov %s7907_s26 }
 0x8bb   : > { %s11060_s12 = smov %s7896_s28  ;;  %25 = sbr.rel (!%p23_p3) target bundleno = 9 (0x9), region = 190 }
 0x8c0   :  { %6880 = vsyncpa [#allocation4], 1 }
 0x8c1   :  { %6882 = vsyncpa [#allocation4 + $0x1], 1 }
 0x8c2   :  { %6883 = vsyncpa [#allocation6], 1 }
 0x8c3   :  { %6884 = vsyncpa [#allocation9], 1 }
 0x8c4   :  { %6885 = vsyncpa [#allocation12], 1 }
 0x8c5   :  { %6886 = vsyncpa [#allocation15], 1 }
 0x8c6   :  { %6888 = vsyncpa [#allocation15 + $0x1], 1 }

</bundles_post_ra>
